<compile_context>
chip_gen: v7x
topology: tpu7x:2x2x1
jax: 0.10.0
libtpu: 0.0.40
codegen_flags: <defaults>
</compile_context>

<pallas_src>
import functools
import math

import jax
import jax.numpy as jnp
from jax.experimental import pallas as pl
from jax.experimental.pallas import tpu as pltpu


_VMEM_LIMIT_BYTES = 48 * 1024 * 1024   # leaves headroom on v7x's 64 MiB VMEM
_TILE_M = 512                          # M tile for the stride-2 conv matmuls


def _round_up(x, m):
    return ((x + m - 1) // m) * m


# ---------------------------------------------------------------------------
# Kernel 1: tiled  out = relu(x @ w + b)      (the two 2x2 / stride-2 convs)
# ---------------------------------------------------------------------------
def _mm_bias_kernel(x_ref, w_ref, b_ref, o_ref, *, relu):
    acc = jnp.dot(x_ref[...], w_ref[...], preferred_element_type=jnp.float32)
    acc = acc + b_ref[...]
    if relu:
        acc = jnp.maximum(acc, 0.0)
    o_ref[...] = acc.astype(o_ref.dtype)


def _mm_bias(x, w, b, *, relu, out_dtype=jnp.float32):
    """x: (M, K) (already in matmul dtype), w: (K, N), b: (1, N) f32."""
    M, K = x.shape
    N = w.shape[1]
    tm = min(_TILE_M, _round_up(M, 8))
    Mp = _round_up(M, tm)
    if Mp != M:
        x = jnp.pad(x, ((0, Mp - M), (0, 0)))
    grid = (Mp // tm,)
    flops = 2 * Mp * K * N
    bytes_accessed = int(Mp * K * x.dtype.itemsize
                         + K * N * w.dtype.itemsize
                         + N * b.dtype.itemsize
                         + Mp * N * jnp.dtype(out_dtype).itemsize)
    out = pl.pallas_call(
        functools.partial(_mm_bias_kernel, relu=relu),
        out_shape=jax.ShapeDtypeStruct((Mp, N), out_dtype),
        grid=grid,
        in_specs=[
            pl.BlockSpec((tm, K), lambda i: (i, 0)),   # activations: tiled over M
            pl.BlockSpec((K, N), lambda i: (0, 0)),    # weights: resident in VMEM
            pl.BlockSpec((1, N), lambda i: (0, 0)),    # bias: resident in VMEM
        ],
        out_specs=pl.BlockSpec((tm, N), lambda i: (i, 0)),
        compiler_params=pltpu.CompilerParams(
            dimension_semantics=("parallel",),
            vmem_limit_bytes=_VMEM_LIMIT_BYTES),
        cost_estimate=pl.CostEstimate(flops=flops, transcendentals=0,
                                      bytes_accessed=bytes_accessed),
    )(x, w, b)
    if Mp != M:
        out = out[:M]
    return out


# ---------------------------------------------------------------------------
# Kernel 2: 3x3 conv (padding=1, stride=1) on a flattened, zero-padded NHWC
# "frame".  The 9 taps are gathered in-kernel by shifted row slices of the
# frame (no im2col in HBM); the 1x1 residual skip is pre-folded into tap 4.
#
# Frame layout for spatial size (H, W):  Wf = W + 2, F = (H + 3) * Wf,
# flat index r * Wf + c holds x[r - 1, c - 1] for 1 <= r <= H, 1 <= c <= W and
# zero elsewhere.  The kernel's output is written in the SAME frame layout, so
# consecutive 3x3 convs chain with no glue copies.
# ---------------------------------------------------------------------------
def _conv3x3_kernel(x_ref, w_ref, b_ref, m_ref, o_ref, acc_ref, *, relu, Wf, L):
    # x_ref : (F, C)   f32 padded input frame for one batch element
    # w_ref : (9, C, O) bf16 per-tap weights
    # b_ref : (1, O)   f32 bias ;  m_ref: (L, 1) f32 valid-column mask
    # o_ref : (F, O)   output frame ;  acc_ref: (L, O) f32 VMEM accumulator
    for t in range(9):
        kh, kw = divmod(t, 3)
        d = kh * Wf + kw                                # static shift per tap
        w_t = w_ref[t]                                  # (C, O)
        xs = x_ref[d:d + L, :].astype(w_t.dtype)        # shifted tap window
        contrib = jnp.dot(xs, w_t, preferred_element_type=jnp.float32)
        if t == 0:
            acc_ref[...] = contrib
        else:
            acc_ref[...] += contrib
    res = acc_ref[...] + b_ref[...]
    if relu:
        res = jnp.maximum(res, 0.0)
    res = res * m_ref[...]                              # zero wrap/pad columns
    o_ref[...] = jnp.zeros_like(o_ref)                  # frame padding = zeros
    o_ref[Wf + 1:Wf + 1 + L, :] = res.astype(o_ref.dtype)


def conv3x3_frame(x_frame, w9, b, mask, *, H, W, relu=True,
                  out_dtype=jnp.float32):
    """x_frame: (B, F, C) flattened padded frame.  Returns (B, F, O) frame."""
    B, F, C = x_frame.shape
    O = w9.shape[-1]
    Wf = W + 2
    L = H * Wf
    assert F == (H + 3) * Wf, (F, H, W)
    flops = 2 * B * L * 9 * C * O
    bytes_accessed = int(B * F * C * x_frame.dtype.itemsize
                         + 9 * C * O * w9.dtype.itemsize
                         + O * b.dtype.itemsize + L * mask.dtype.itemsize
                         + B * F * O * jnp.dtype(out_dtype).itemsize)
    return pl.pallas_call(
        functools.partial(_conv3x3_kernel, relu=relu, Wf=Wf, L=L),
        out_shape=jax.ShapeDtypeStruct((B, F, O), out_dtype),
        grid=(B,),
        in_specs=[
            pl.BlockSpec((None, F, C), lambda i: (i, 0, 0)),  # one batch elem
            pl.BlockSpec((9, C, O), lambda i: (0, 0, 0)),     # weights resident
            pl.BlockSpec((1, O), lambda i: (0, 0)),           # bias resident
            pl.BlockSpec((L, 1), lambda i: (0, 0)),           # mask resident
        ],
        out_specs=pl.BlockSpec((None, F, O), lambda i: (i, 0, 0)),
        scratch_shapes=[pltpu.VMEM((L, O), jnp.float32)],
        compiler_params=pltpu.CompilerParams(
            dimension_semantics=("parallel",),                # megacore on v7x
            vmem_limit_bytes=_VMEM_LIMIT_BYTES),
        cost_estimate=pl.CostEstimate(flops=flops, transcendentals=0,
                                      bytes_accessed=bytes_accessed),
    )(x_frame, w9, b, mask)


# ---------------------------------------------------------------------------
# Frame / NHWC glue (plain JAX; one copy in, slices fuse into consumer copies)
# ---------------------------------------------------------------------------
def nhwc_to_frame(x):
    """(B, H, W, C) -> (B, (H+3)*(W+2), C) zero-padded flattened frame."""
    B, H, W, C = x.shape
    xp = jnp.pad(x, ((0, 0), (1, 2), (1, 1), (0, 0)))
    return xp.reshape(B, (H + 3) * (W + 2), C)


def frame_to_nhwc(y, H, W):
    """(B, (H+3)*(W+2), O) frame -> dense (B, H, W, O)."""
    B, F, O = y.shape
    Wf = W + 2
    return y.reshape(B, H + 3, Wf, O)[:, 1:H + 1, 1:W + 1, :]


def _col_mask(H, W):
    Wf = W + 2
    cols = jnp.arange(H * Wf, dtype=jnp.int32) % Wf
    return (cols < W).astype(jnp.float32).reshape(H * Wf, 1)


def camera_encode(camera):
    """(B, 5) -> (B, 8): [pos(3), cos/sin(yaw), cos/sin(pitch), 0-pad]."""
    pos = camera[:, :3]
    yaw = camera[:, 3:4]
    pitch = camera[:, 4:5]
    enc = jnp.concatenate(
        [pos, jnp.cos(yaw), jnp.sin(yaw), jnp.cos(pitch), jnp.sin(pitch)],
        axis=1)
    return jnp.pad(enc, ((0, 0), (0, 1)))   # pad 7 -> 8 channels (zero)


# ---------------------------------------------------------------------------
# Parameters: raw PyTorch-style init, then a one-time prep into kernel layout
# ---------------------------------------------------------------------------
def _conv_init(key, out_c, in_c, kh, kw):
    fan_in = in_c * kh * kw
    bound = 1.0 / math.sqrt(fan_in)
    kw_key, kb_key = jax.random.split(key)
    w = jax.random.uniform(kw_key, (out_c, in_c, kh, kw),
                           minval=-bound, maxval=bound, dtype=jnp.float32)
    b = jax.random.uniform(kb_key, (out_c,),
                           minval=-bound, maxval=bound, dtype=jnp.float32)
    return w, b


def init_params(key, nc=3):
    ks = jax.random.split(key, 8)
    p = {}
    p["c1_w"], p["c1_b"] = _conv_init(ks[0], 256, nc, 2, 2)        # Conv2d(nc,256,2,2)
    p["r1m_w"], p["r1m_b"] = _conv_init(ks[1], 128, 256, 3, 3)     # Residual main
    p["r1s_w"], p["r1s_b"] = _conv_init(ks[2], 128, 256, 1, 1)     # Residual skip
    p["c2_w"], p["c2_b"] = _conv_init(ks[3], 256, 128, 2, 2)       # Conv2d(128,256,2,2)
    p["r2m_w"], p["r2m_b"] = _conv_init(ks[4], 128, 256 + 7, 3, 3)
    p["r2s_w"], p["r2s_b"] = _conv_init(ks[5], 128, 256 + 7, 1, 1)
    p["c3_w"], p["c3_b"] = _conv_init(ks[6], 256, 128, 3, 3)
    p["c4_w"], p["c4_b"] = _conv_init(ks[7], 256, 256, 3, 3)
    return p


def prepare_params(raw, compute_dtype=jnp.bfloat16):
    """One-time: transpose/fuse/pad weights into kernel-ready layouts."""
    def conv2x2(w, b):
        O, C = w.shape[0], w.shape[1]
        wm = jnp.transpose(w, (2, 3, 1, 0)).reshape(4 * C, O)   # (kh,kw,c) major
        return wm.astype(compute_dtype), b.reshape(1, O).astype(jnp.float32)

    def conv3x3(w, b, skip_w=None, skip_b=None, pad_in=0):
        O, C = w.shape[0], w.shape[1]
        w9 = jnp.transpose(w, (2, 3, 1, 0)).reshape(9, C, O)    # (tap, C, O)
        bias = b
        if skip_w is not None:                                  # fold 1x1 skip
            w9 = w9.at[4].add(skip_w[:, :, 0, 0].T)             # centre tap
            bias = bias + skip_b
        if pad_in:                                              # 263 -> 264 ch
            w9 = jnp.pad(w9, ((0, 0), (0, pad_in), (0, 0)))
        return w9.astype(compute_dtype), bias.reshape(1, O).astype(jnp.float32)

    p = {}
    p["c1_w"], p["c1_b"] = conv2x2(raw["c1_w"], raw["c1_b"])
    p["r1_w"], p["r1_b"] = conv3x3(raw["r1m_w"], raw["r1m_b"],
                                   raw["r1s_w"], raw["r1s_b"])
    p["c2_w"], p["c2_b"] = conv2x2(raw["c2_w"], raw["c2_b"])
    p["r2_w"], p["r2_b"] = conv3x3(raw["r2m_w"], raw["r2m_b"],
                                   raw["r2s_w"], raw["r2s_b"], pad_in=1)
    p["c3_w"], p["c3_b"] = conv3x3(raw["c3_w"], raw["c3_b"])
    p["c4_w"], p["c4_b"] = conv3x3(raw["c4_w"], raw["c4_b"])
    return p


# ---------------------------------------------------------------------------
# Forward pass (== TowerRepresentationNetwork.forward, use_instance_norm=False)
# ---------------------------------------------------------------------------
@jax.jit
def tower_forward(params, image, camera):
    B, C, H, W = image.shape
    assert H % 4 == 0 and W % 4 == 0, "spatial dims must be multiples of 4"
    Ho, Wo = H // 2, W // 2
    mm_dtype = params["c1_w"].dtype

    # conv1: 2x2/s2, nc->256  (patches built straight from NCHW, cast to bf16)
    p1 = (image.reshape(B, C, Ho, 2, Wo, 2)
          .transpose(0, 2, 4, 3, 5, 1)
          .reshape(B * Ho * Wo, 4 * C).astype(mm_dtype))
    x = _mm_bias(p1, params["c1_w"], params["c1_b"], relu=True)
    x = x.reshape(B, Ho, Wo, 256)

    # r1: ResidualConv3x3(256->128) + ReLU (skip folded into centre tap)
    xf = nhwc_to_frame(x)
    y = conv3x3_frame(xf, params["r1_w"], params["r1_b"], _col_mask(Ho, Wo),
                      H=Ho, W=Wo, relu=True)

    # conv2: 2x2/s2, 128->256 (frame slice fuses into the patch-build copy)
    H2, W2 = Ho // 2, Wo // 2
    y_nhwc = frame_to_nhwc(y, Ho, Wo)                       # (B, Ho, Wo, 128)
    Cr = y_nhwc.shape[-1]
    p2 = (y_nhwc.reshape(B, H2, 2, W2, 2, Cr)
          .transpose(0, 1, 3, 2, 4, 5)
          .reshape(B * H2 * W2, 4 * Cr).astype(mm_dtype))
    x = _mm_bias(p2, params["c2_w"], params["c2_b"], relu=True)
    x = x.reshape(B, H2, W2, 256)

    # camera encode (padded to 8 ch), broadcast, channel concat -> 264 channels
    cam = camera_encode(camera)                              # (B, 8)
    cam_map = jnp.broadcast_to(cam[:, None, None, :], (B, H2, W2, 8))
    x = jnp.concatenate([x, cam_map], axis=-1)               # (B, H2, W2, 264)

    # enc: r2 (residual 264->128) -> c3 (128->256) -> c4 (256->256),
    # chained frame->frame with no re-layout copies in between.
    mask2 = _col_mask(H2, W2)
    xf = nhwc_to_frame(x)
    y = conv3x3_frame(xf, params["r2_w"], params["r2_b"], mask2,
                      H=H2, W=W2, relu=True)
    y = conv3x3_frame(y, params["c3_w"], params["c3_b"], mask2,
                      H=H2, W=W2, relu=True)
    y = conv3x3_frame(y, params["c4_w"], params["c4_b"], mask2,
                      H=H2, W=W2, relu=True)

    out = frame_to_nhwc(y, H2, W2)                           # (B, H2, W2, 256)
    return jnp.transpose(out, (0, 3, 1, 2))                  # NCHW at boundary


if __name__ == "__main__":
    key = jax.random.PRNGKey(0)
    pkey, ikey, ckey = jax.random.split(key, 3)

    nheight = nwidth = 16   # small, multiple of 4; module default is 64
    nc = 3
    batch = 2

    raw = init_params(pkey, nc=nc)
    params = prepare_params(raw)
    image = jax.random.normal(ikey, (batch, nc, nheight, nwidth),
                              dtype=jnp.float32)
    camera = jax.random.normal(ckey, (batch, 5), dtype=jnp.float32)

    out = tower_forward(params, image, camera)
    out = jax.block_until_ready(out)
    assert out.shape == (batch, 256, nheight // 4, nwidth // 4), out.shape
    assert out.dtype == jnp.float32
    print("KERNEL_OK")
</pallas_src>

<mosaic_0001>
module attributes {stable_mosaic.version = 11 : i64} {
  func.func @_mm_bias_kernel(%arg0: i32, %arg1: memref<128x12xbf16, #tpu.memory_space<vmem>>, %arg2: memref<12x256xbf16, #tpu.memory_space<vmem>>, %arg3: memref<1x256xf32, #tpu.memory_space<vmem>>, %arg4: memref<128x256xf32, #tpu.memory_space<vmem>>) attributes {dimension_semantics = [#tpu.dimension_semantics<parallel>], iteration_bounds = array<i64: 1>, scalar_prefetch = 0 : i64, scratch_operands = 0 : i64, tpu.core_type = #tpu.core_type<tc>, window_params = [{transform_indices = @transform_0, window_bounds = array<i64: 128, 12>}, {pipeline_mode = #tpu.pipeline_mode<synchronous>, transform_indices = @transform_1, window_bounds = array<i64: 12, 256>}, {pipeline_mode = #tpu.pipeline_mode<synchronous>, transform_indices = @transform_2, window_bounds = array<i64: 1, 256>}, {transform_indices = @transform_3, window_bounds = array<i64: 128, 256>}]} {
    %c0 = arith.constant 0 : index
    %c0_0 = arith.constant 0 : index
    %0 = vector.load %arg1[%c0, %c0_0] : memref<128x12xbf16, #tpu.memory_space<vmem>>, vector<128x12xbf16>
    %c0_1 = arith.constant 0 : index
    %c0_2 = arith.constant 0 : index
    %1 = vector.load %arg2[%c0_1, %c0_2] : memref<12x256xbf16, #tpu.memory_space<vmem>>, vector<12x256xbf16>
    %cst = arith.constant dense<0.000000e+00> : vector<128x256xf32>
    %2 = tpu.matmul %0, %1, %cst {dimension_numbers = #tpu.dot_dimension_numbers<[1], [0], [0], [1], [0, 0, 1, 1], [], []>} : vector<128x12xbf16>, vector<12x256xbf16>, vector<128x256xf32> -> vector<128x256xf32>
    %c0_3 = arith.constant 0 : index
    %c0_4 = arith.constant 0 : index
    %3 = vector.load %arg3[%c0_3, %c0_4] : memref<1x256xf32, #tpu.memory_space<vmem>>, vector<1x256xf32>
    %4 = vector.broadcast %3 : vector<1x256xf32> to vector<128x256xf32>
    %5 = arith.addf %2, %4 : vector<128x256xf32>
    %cst_5 = arith.constant 0.000000e+00 : f32
    %6 = vector.broadcast %cst_5 : f32 to vector<128x256xf32>
    %7 = arith.maximumf %5, %6 : vector<128x256xf32>
    %c0_6 = arith.constant 0 : index
    %c0_7 = arith.constant 0 : index
    %8 = vector.load %arg4[%c0_6, %c0_7] : memref<128x256xf32, #tpu.memory_space<vmem>>, vector<128x256xf32>
    tpu.vector_store %arg4[%c0_6, %c0_7], %7 {strides = array<i32>} : memref<128x256xf32, #tpu.memory_space<vmem>>, vector<128x256xf32>,
    return
  }
  func.func @transform_0(%arg0: i32) -> (i32, i32) {
    %c0_i32 = arith.constant 0 : i32
    %c0_i32_0 = arith.constant 0 : i32
    return %arg0, %c0_i32 : i32, i32
  }
  func.func @transform_1(%arg0: i32) -> (i32, i32) {
    %c0_i32 = arith.constant 0 : i32
    %c0_i32_0 = arith.constant 0 : i32
    %c0_i32_1 = arith.constant 0 : i32
    return %c0_i32, %c0_i32_0 : i32, i32
  }
  func.func @transform_2(%arg0: i32) -> (i32, i32) {
    %c0_i32 = arith.constant 0 : i32
    %c0_i32_0 = arith.constant 0 : i32
    %c0_i32_1 = arith.constant 0 : i32
    return %c0_i32, %c0_i32_0 : i32, i32
  }
  func.func @transform_3(%arg0: i32) -> (i32, i32) {
    %c0_i32 = arith.constant 0 : i32
    %c0_i32_0 = arith.constant 0 : i32
    return %arg0, %c0_i32 : i32, i32
  }
}

module attributes {stable_mosaic.version = 11 : i64} {
  func.func @_conv3x3_kernel(%arg0: i32, %arg1: memref<1x110x256xf32, #tpu.memory_space<vmem>>, %arg2: memref<9x256x128xbf16, #tpu.memory_space<vmem>>, %arg3: memref<1x128xf32, #tpu.memory_space<vmem>>, %arg4: memref<80x1xf32, #tpu.memory_space<vmem>>, %arg5: memref<1x110x128xf32, #tpu.memory_space<vmem>>, %arg6: memref<80x128xf32, #tpu.memory_space<vmem>>) attributes {dimension_semantics = [#tpu.dimension_semantics<parallel>], iteration_bounds = array<i64: 2>, scalar_prefetch = 0 : i64, scratch_operands = 1 : i64, tpu.core_type = #tpu.core_type<tc>, window_params = [{transform_indices = @transform_0, window_bounds = array<i64: 1, 110, 256>}, {pipeline_mode = #tpu.pipeline_mode<synchronous>, transform_indices = @transform_1, window_bounds = array<i64: 9, 256, 128>}, {pipeline_mode = #tpu.pipeline_mode<synchronous>, transform_indices = @transform_2, window_bounds = array<i64: 1, 128>}, {pipeline_mode = #tpu.pipeline_mode<synchronous>, transform_indices = @transform_3, window_bounds = array<i64: 80, 1>}, {transform_indices = @transform_4, window_bounds = array<i64: 1, 110, 128>}]} {
    %c0 = arith.constant 0 : index
    %c0_0 = arith.constant 0 : index
    %c0_1 = arith.constant 0 : index
    %0 = vector.load %arg2[%c0, %c0_0, %c0_1] : memref<9x256x128xbf16, #tpu.memory_space<vmem>>, vector<1x256x128xbf16>
    %1 = vector.shape_cast %0 : vector<1x256x128xbf16> to vector<256x128xbf16>
    %c0_2 = arith.constant 0 : index
    %c0_3 = arith.constant 0 : index
    %c0_4 = arith.constant 0 : index
    %2 = vector.load %arg1[%c0_2, %c0_3, %c0_4] : memref<1x110x256xf32, #tpu.memory_space<vmem>>, vector<1x80x256xf32>
    %3 = vector.shape_cast %2 : vector<1x80x256xf32> to vector<80x256xf32>
    %4 = arith.truncf %3 : vector<80x256xf32> to vector<80x256xbf16>
    %cst = arith.constant dense<0.000000e+00> : vector<80x128xf32>
    %5 = tpu.matmul %4, %1, %cst {dimension_numbers = #tpu.dot_dimension_numbers<[1], [0], [0], [1], [0, 0, 1, 1], [], []>} : vector<80x256xbf16>, vector<256x128xbf16>, vector<80x128xf32> -> vector<80x128xf32>
    %c0_5 = arith.constant 0 : index
    %c0_6 = arith.constant 0 : index
    %6 = vector.load %arg6[%c0_5, %c0_6] : memref<80x128xf32, #tpu.memory_space<vmem>>, vector<80x128xf32>
    tpu.vector_store %arg6[%c0_5, %c0_6], %5 {strides = array<i32>} : memref<80x128xf32, #tpu.memory_space<vmem>>, vector<80x128xf32>,
    %c1 = arith.constant 1 : index
    %c0_7 = arith.constant 0 : index
    %c0_8 = arith.constant 0 : index
    %7 = vector.load %arg2[%c1, %c0_7, %c0_8] : memref<9x256x128xbf16, #tpu.memory_space<vmem>>, vector<1x256x128xbf16>
    %8 = vector.shape_cast %7 : vector<1x256x128xbf16> to vector<256x128xbf16>
    %c0_9 = arith.constant 0 : index
    %c1_10 = arith.constant 1 : index
    %c0_11 = arith.constant 0 : index
    %9 = vector.load %arg1[%c0_9, %c1_10, %c0_11] : memref<1x110x256xf32, #tpu.memory_space<vmem>>, vector<1x80x256xf32>
    %10 = vector.shape_cast %9 : vector<1x80x256xf32> to vector<80x256xf32>
    %11 = arith.truncf %10 : vector<80x256xf32> to vector<80x256xbf16>
    %cst_12 = arith.constant dense<0.000000e+00> : vector<80x128xf32>
    %12 = tpu.matmul %11, %8, %cst_12 {dimension_numbers = #tpu.dot_dimension_numbers<[1], [0], [0], [1], [0, 0, 1, 1], [], []>} : vector<80x256xbf16>, vector<256x128xbf16>, vector<80x128xf32> -> vector<80x128xf32>
    %c0_13 = arith.constant 0 : index
    %c0_14 = arith.constant 0 : index
    %13 = vector.load %arg6[%c0_13, %c0_14] : memref<80x128xf32, #tpu.memory_space<vmem>>, vector<80x128xf32>
    %14 = arith.addf %13, %12 : vector<80x128xf32>
    %c0_15 = arith.constant 0 : index
    %c0_16 = arith.constant 0 : index
    %15 = vector.load %arg6[%c0_15, %c0_16] : memref<80x128xf32, #tpu.memory_space<vmem>>, vector<80x128xf32>
    tpu.vector_store %arg6[%c0_15, %c0_16], %14 {strides = array<i32>} : memref<80x128xf32, #tpu.memory_space<vmem>>, vector<80x128xf32>,
    %c2 = arith.constant 2 : index
    %c0_17 = arith.constant 0 : index
    %c0_18 = arith.constant 0 : index
    %16 = vector.load %arg2[%c2, %c0_17, %c0_18] : memref<9x256x128xbf16, #tpu.memory_space<vmem>>, vector<1x256x128xbf16>
    %17 = vector.shape_cast %16 : vector<1x256x128xbf16> to vector<256x128xbf16>
    %c0_19 = arith.constant 0 : index
    %c2_20 = arith.constant 2 : index
    %c0_21 = arith.constant 0 : index
    %18 = vector.load %arg1[%c0_19, %c2_20, %c0_21] : memref<1x110x256xf32, #tpu.memory_space<vmem>>, vector<1x80x256xf32>
    %19 = vector.shape_cast %18 : vector<1x80x256xf32> to vector<80x256xf32>
    %20 = arith.truncf %19 : vector<80x256xf32> to vector<80x256xbf16>
    %cst_22 = arith.constant dense<0.000000e+00> : vector<80x128xf32>
    %21 = tpu.matmul %20, %17, %cst_22 {dimension_numbers = #tpu.dot_dimension_numbers<[1], [0], [0], [1], [0, 0, 1, 1], [], []>} : vector<80x256xbf16>, vector<256x128xbf16>, vector<80x128xf32> -> vector<80x128xf32>
    %c0_23 = arith.constant 0 : index
    %c0_24 = arith.constant 0 : index
    %22 = vector.load %arg6[%c0_23, %c0_24] : memref<80x128xf32, #tpu.memory_space<vmem>>, vector<80x128xf32>
    %23 = arith.addf %22, %21 : vector<80x128xf32>
    %c0_25 = arith.constant 0 : index
    %c0_26 = arith.constant 0 : index
    %24 = vector.load %arg6[%c0_25, %c0_26] : memref<80x128xf32, #tpu.memory_space<vmem>>, vector<80x128xf32>
    tpu.vector_store %arg6[%c0_25, %c0_26], %23 {strides = array<i32>} : memref<80x128xf32, #tpu.memory_space<vmem>>, vector<80x128xf32>,
    %c3 = arith.constant 3 : index
    %c0_27 = arith.constant 0 : index
    %c0_28 = arith.constant 0 : index
    %25 = vector.load %arg2[%c3, %c0_27, %c0_28] : memref<9x256x128xbf16, #tpu.memory_space<vmem>>, vector<1x256x128xbf16>
    %26 = vector.shape_cast %25 : vector<1x256x128xbf16> to vector<256x128xbf16>
    %c0_29 = arith.constant 0 : index
    %c10 = arith.constant 10 : index
    %c0_30 = arith.constant 0 : index
    %27 = vector.load %arg1[%c0_29, %c10, %c0_30] : memref<1x110x256xf32, #tpu.memory_space<vmem>>, vector<1x80x256xf32>
    %28 = vector.shape_cast %27 : vector<1x80x256xf32> to vector<80x256xf32>
    %29 = arith.truncf %28 : vector<80x256xf32> to vector<80x256xbf16>
    %cst_31 = arith.constant dense<0.000000e+00> : vector<80x128xf32>
    %30 = tpu.matmul %29, %26, %cst_31 {dimension_numbers = #tpu.dot_dimension_numbers<[1], [0], [0], [1], [0, 0, 1, 1], [], []>} : vector<80x256xbf16>, vector<256x128xbf16>, vector<80x128xf32> -> vector<80x128xf32>
    %c0_32 = arith.constant 0 : index
    %c0_33 = arith.constant 0 : index
    %31 = vector.load %arg6[%c0_32, %c0_33] : memref<80x128xf32, #tpu.memory_space<vmem>>, vector<80x128xf32>
    %32 = arith.addf %31, %30 : vector<80x128xf32>
    %c0_34 = arith.constant 0 : index
    %c0_35 = arith.constant 0 : index
    %33 = vector.load %arg6[%c0_34, %c0_35] : memref<80x128xf32, #tpu.memory_space<vmem>>, vector<80x128xf32>
    tpu.vector_store %arg6[%c0_34, %c0_35], %32 {strides = array<i32>} : memref<80x128xf32, #tpu.memory_space<vmem>>, vector<80x128xf32>,
    %c4 = arith.constant 4 : index
    %c0_36 = arith.constant 0 : index
    %c0_37 = arith.constant 0 : index
    %34 = vector.load %arg2[%c4, %c0_36, %c0_37] : memref<9x256x128xbf16, #tpu.memory_space<vmem>>, vector<1x256x128xbf16>
    %35 = vector.shape_cast %34 : vector<1x256x128xbf16> to vector<256x128xbf16>
    %c0_38 = arith.constant 0 : index
    %c11 = arith.constant 11 : index
    %c0_39 = arith.constant 0 : index
    %36 = vector.load %arg1[%c0_38, %c11, %c0_39] : memref<1x110x256xf32, #tpu.memory_space<vmem>>, vector<1x80x256xf32>
    %37 = vector.shape_cast %36 : vector<1x80x256xf32> to vector<80x256xf32>
    %38 = arith.truncf %37 : vector<80x256xf32> to vector<80x256xbf16>
    %cst_40 = arith.constant dense<0.000000e+00> : vector<80x128xf32>
    %39 = tpu.matmul %38, %35, %cst_40 {dimension_numbers = #tpu.dot_dimension_numbers<[1], [0], [0], [1], [0, 0, 1, 1], [], []>} : vector<80x256xbf16>, vector<256x128xbf16>, vector<80x128xf32> -> vector<80x128xf32>
    %c0_41 = arith.constant 0 : index
    %c0_42 = arith.constant 0 : index
    %40 = vector.load %arg6[%c0_41, %c0_42] : memref<80x128xf32, #tpu.memory_space<vmem>>, vector<80x128xf32>
    %41 = arith.addf %40, %39 : vector<80x128xf32>
    %c0_43 = arith.constant 0 : index
    %c0_44 = arith.constant 0 : index
    %42 = vector.load %arg6[%c0_43, %c0_44] : memref<80x128xf32, #tpu.memory_space<vmem>>, vector<80x128xf32>
    tpu.vector_store %arg6[%c0_43, %c0_44], %41 {strides = array<i32>} : memref<80x128xf32, #tpu.memory_space<vmem>>, vector<80x128xf32>,
    %c5 = arith.constant 5 : index
    %c0_45 = arith.constant 0 : index
    %c0_46 = arith.constant 0 : index
    %43 = vector.load %arg2[%c5, %c0_45, %c0_46] : memref<9x256x128xbf16, #tpu.memory_space<vmem>>, vector<1x256x128xbf16>
    %44 = vector.shape_cast %43 : vector<1x256x128xbf16> to vector<256x128xbf16>
    %c0_47 = arith.constant 0 : index
    %c12 = arith.constant 12 : index
    %c0_48 = arith.constant 0 : index
    %45 = vector.load %arg1[%c0_47, %c12, %c0_48] : memref<1x110x256xf32, #tpu.memory_space<vmem>>, vector<1x80x256xf32>
    %46 = vector.shape_cast %45 : vector<1x80x256xf32> to vector<80x256xf32>
    %47 = arith.truncf %46 : vector<80x256xf32> to vector<80x256xbf16>
    %cst_49 = arith.constant dense<0.000000e+00> : vector<80x128xf32>
    %48 = tpu.matmul %47, %44, %cst_49 {dimension_numbers = #tpu.dot_dimension_numbers<[1], [0], [0], [1], [0, 0, 1, 1], [], []>} : vector<80x256xbf16>, vector<256x128xbf16>, vector<80x128xf32> -> vector<80x128xf32>
    %c0_50 = arith.constant 0 : index
    %c0_51 = arith.constant 0 : index
    %49 = vector.load %arg6[%c0_50, %c0_51] : memref<80x128xf32, #tpu.memory_space<vmem>>, vector<80x128xf32>
    %50 = arith.addf %49, %48 : vector<80x128xf32>
    %c0_52 = arith.constant 0 : index
    %c0_53 = arith.constant 0 : index
    %51 = vector.load %arg6[%c0_52, %c0_53] : memref<80x128xf32, #tpu.memory_space<vmem>>, vector<80x128xf32>
    tpu.vector_store %arg6[%c0_52, %c0_53], %50 {strides = array<i32>} : memref<80x128xf32, #tpu.memory_space<vmem>>, vector<80x128xf32>,
    %c6 = arith.constant 6 : index
    %c0_54 = arith.constant 0 : index
    %c0_55 = arith.constant 0 : index
    %52 = vector.load %arg2[%c6, %c0_54, %c0_55] : memref<9x256x128xbf16, #tpu.memory_space<vmem>>, vector<1x256x128xbf16>
    %53 = vector.shape_cast %52 : vector<1x256x128xbf16> to vector<256x128xbf16>
    %c0_56 = arith.constant 0 : index
    %c20 = arith.constant 20 : index
    %c0_57 = arith.constant 0 : index
    %54 = vector.load %arg1[%c0_56, %c20, %c0_57] : memref<1x110x256xf32, #tpu.memory_space<vmem>>, vector<1x80x256xf32>
    %55 = vector.shape_cast %54 : vector<1x80x256xf32> to vector<80x256xf32>
    %56 = arith.truncf %55 : vector<80x256xf32> to vector<80x256xbf16>
    %cst_58 = arith.constant dense<0.000000e+00> : vector<80x128xf32>
    %57 = tpu.matmul %56, %53, %cst_58 {dimension_numbers = #tpu.dot_dimension_numbers<[1], [0], [0], [1], [0, 0, 1, 1], [], []>} : vector<80x256xbf16>, vector<256x128xbf16>, vector<80x128xf32> -> vector<80x128xf32>
    %c0_59 = arith.constant 0 : index
    %c0_60 = arith.constant 0 : index
    %58 = vector.load %arg6[%c0_59, %c0_60] : memref<80x128xf32, #tpu.memory_space<vmem>>, vector<80x128xf32>
    %59 = arith.addf %58, %57 : vector<80x128xf32>
    %c0_61 = arith.constant 0 : index
    %c0_62 = arith.constant 0 : index
    %60 = vector.load %arg6[%c0_61, %c0_62] : memref<80x128xf32, #tpu.memory_space<vmem>>, vector<80x128xf32>
    tpu.vector_store %arg6[%c0_61, %c0_62], %59 {strides = array<i32>} : memref<80x128xf32, #tpu.memory_space<vmem>>, vector<80x128xf32>,
    %c7 = arith.constant 7 : index
    %c0_63 = arith.constant 0 : index
    %c0_64 = arith.constant 0 : index
    %61 = vector.load %arg2[%c7, %c0_63, %c0_64] : memref<9x256x128xbf16, #tpu.memory_space<vmem>>, vector<1x256x128xbf16>
    %62 = vector.shape_cast %61 : vector<1x256x128xbf16> to vector<256x128xbf16>
    %c0_65 = arith.constant 0 : index
    %c21 = arith.constant 21 : index
    %c0_66 = arith.constant 0 : index
    %63 = vector.load %arg1[%c0_65, %c21, %c0_66] : memref<1x110x256xf32, #tpu.memory_space<vmem>>, vector<1x80x256xf32>
    %64 = vector.shape_cast %63 : vector<1x80x256xf32> to vector<80x256xf32>
    %65 = arith.truncf %64 : vector<80x256xf32> to vector<80x256xbf16>
    %cst_67 = arith.constant dense<0.000000e+00> : vector<80x128xf32>
    %66 = tpu.matmul %65, %62, %cst_67 {dimension_numbers = #tpu.dot_dimension_numbers<[1], [0], [0], [1], [0, 0, 1, 1], [], []>} : vector<80x256xbf16>, vector<256x128xbf16>, vector<80x128xf32> -> vector<80x128xf32>
    %c0_68 = arith.constant 0 : index
    %c0_69 = arith.constant 0 : index
    %67 = vector.load %arg6[%c0_68, %c0_69] : memref<80x128xf32, #tpu.memory_space<vmem>>, vector<80x128xf32>
    %68 = arith.addf %67, %66 : vector<80x128xf32>
    %c0_70 = arith.constant 0 : index
    %c0_71 = arith.constant 0 : index
    %69 = vector.load %arg6[%c0_70, %c0_71] : memref<80x128xf32, #tpu.memory_space<vmem>>, vector<80x128xf32>
    tpu.vector_store %arg6[%c0_70, %c0_71], %68 {strides = array<i32>} : memref<80x128xf32, #tpu.memory_space<vmem>>, vector<80x128xf32>,
    %c8 = arith.constant 8 : index
    %c0_72 = arith.constant 0 : index
    %c0_73 = arith.constant 0 : index
    %70 = vector.load %arg2[%c8, %c0_72, %c0_73] : memref<9x256x128xbf16, #tpu.memory_space<vmem>>, vector<1x256x128xbf16>
    %71 = vector.shape_cast %70 : vector<1x256x128xbf16> to vector<256x128xbf16>
    %c0_74 = arith.constant 0 : index
    %c22 = arith.constant 22 : index
    %c0_75 = arith.constant 0 : index
    %72 = vector.load %arg1[%c0_74, %c22, %c0_75] : memref<1x110x256xf32, #tpu.memory_space<vmem>>, vector<1x80x256xf32>
    %73 = vector.shape_cast %72 : vector<1x80x256xf32> to vector<80x256xf32>
    %74 = arith.truncf %73 : vector<80x256xf32> to vector<80x256xbf16>
    %cst_76 = arith.constant dense<0.000000e+00> : vector<80x128xf32>
    %75 = tpu.matmul %74, %71, %cst_76 {dimension_numbers = #tpu.dot_dimension_numbers<[1], [0], [0], [1], [0, 0, 1, 1], [], []>} : vector<80x256xbf16>, vector<256x128xbf16>, vector<80x128xf32> -> vector<80x128xf32>
    %c0_77 = arith.constant 0 : index
    %c0_78 = arith.constant 0 : index
    %76 = vector.load %arg6[%c0_77, %c0_78] : memref<80x128xf32, #tpu.memory_space<vmem>>, vector<80x128xf32>
    %77 = arith.addf %76, %75 : vector<80x128xf32>
    %c0_79 = arith.constant 0 : index
    %c0_80 = arith.constant 0 : index
    %78 = vector.load %arg6[%c0_79, %c0_80] : memref<80x128xf32, #tpu.memory_space<vmem>>, vector<80x128xf32>
    tpu.vector_store %arg6[%c0_79, %c0_80], %77 {strides = array<i32>} : memref<80x128xf32, #tpu.memory_space<vmem>>, vector<80x128xf32>,
    %c0_81 = arith.constant 0 : index
    %c0_82 = arith.constant 0 : index
    %79 = vector.load %arg6[%c0_81, %c0_82] : memref<80x128xf32, #tpu.memory_space<vmem>>, vector<80x128xf32>
    %c0_83 = arith.constant 0 : index
    %c0_84 = arith.constant 0 : index
    %80 = vector.load %arg3[%c0_83, %c0_84] : memref<1x128xf32, #tpu.memory_space<vmem>>, vector<1x128xf32>
    %81 = vector.broadcast %80 : vector<1x128xf32> to vector<80x128xf32>
    %82 = arith.addf %79, %81 : vector<80x128xf32>
    %cst_85 = arith.constant 0.000000e+00 : f32
    %83 = vector.broadcast %cst_85 : f32 to vector<80x128xf32>
    %84 = arith.maximumf %82, %83 : vector<80x128xf32>
    %c0_86 = arith.constant 0 : index
    %c0_87 = arith.constant 0 : index
    %85 = vector.load %arg4[%c0_86, %c0_87] : memref<80x1xf32, #tpu.memory_space<vmem>>, vector<80x1xf32>
    %86 = vector.broadcast %85 : vector<80x1xf32> to vector<80x128xf32>
    %87 = arith.mulf %84, %86 : vector<80x128xf32>
    %cst_88 = arith.constant 0.000000e+00 : f32
    %88 = vector.broadcast %cst_88 : f32 to vector<110x128xf32>
    %c0_89 = arith.constant 0 : index
    %c0_90 = arith.constant 0 : index
    %c0_91 = arith.constant 0 : index
    %89 = vector.load %arg5[%c0_89, %c0_90, %c0_91] : memref<1x110x128xf32, #tpu.memory_space<vmem>>, vector<1x110x128xf32>
    %90 = vector.shape_cast %89 : vector<1x110x128xf32> to vector<110x128xf32>
    %91 = vector.shape_cast %88 : vector<110x128xf32> to vector<1x110x128xf32>
    tpu.vector_store %arg5[%c0_89, %c0_90, %c0_91], %91 {strides = array<i32>} : memref<1x110x128xf32, #tpu.memory_space<vmem>>, vector<1x110x128xf32>,
    %c0_92 = arith.constant 0 : index
    %c11_93 = arith.constant 11 : index
    %c0_94 = arith.constant 0 : index
    %92 = vector.load %arg5[%c0_92, %c11_93, %c0_94] : memref<1x110x128xf32, #tpu.memory_space<vmem>>, vector<1x80x128xf32>
    %93 = vector.shape_cast %92 : vector<1x80x128xf32> to vector<80x128xf32>
    %94 = vector.shape_cast %87 : vector<80x128xf32> to vector<1x80x128xf32>
    tpu.vector_store %arg5[%c0_92, %c11_93, %c0_94], %94 {strides = array<i32>} : memref<1x110x128xf32, #tpu.memory_space<vmem>>, vector<1x80x128xf32>,
    return
  }
  func.func @transform_0(%arg0: i32) -> (i32, i32, i32) {
    %c0_i32 = arith.constant 0 : i32
    %c0_i32_0 = arith.constant 0 : i32
    %c0_i32_1 = arith.constant 0 : i32
    return %arg0, %c0_i32, %c0_i32_0 : i32, i32, i32
  }
  func.func @transform_1(%arg0: i32) -> (i32, i32, i32) {
    %c0_i32 = arith.constant 0 : i32
    %c0_i32_0 = arith.constant 0 : i32
    %c0_i32_1 = arith.constant 0 : i32
    %c0_i32_2 = arith.constant 0 : i32
    return %c0_i32, %c0_i32_0, %c0_i32_1 : i32, i32, i32
  }
  func.func @transform_2(%arg0: i32) -> (i32, i32) {
    %c0_i32 = arith.constant 0 : i32
    %c0_i32_0 = arith.constant 0 : i32
    %c0_i32_1 = arith.constant 0 : i32
    return %c0_i32, %c0_i32_0 : i32, i32
  }
  func.func @transform_3(%arg0: i32) -> (i32, i32) {
    %c0_i32 = arith.constant 0 : i32
    %c0_i32_0 = arith.constant 0 : i32
    %c0_i32_1 = arith.constant 0 : i32
    return %c0_i32, %c0_i32_0 : i32, i32
  }
  func.func @transform_4(%arg0: i32) -> (i32, i32, i32) {
    %c0_i32 = arith.constant 0 : i32
    %c0_i32_0 = arith.constant 0 : i32
    %c0_i32_1 = arith.constant 0 : i32
    return %arg0, %c0_i32, %c0_i32_0 : i32, i32, i32
  }
}

module attributes {stable_mosaic.version = 11 : i64} {
  func.func @_mm_bias_kernel(%arg0: i32, %arg1: memref<32x512xbf16, #tpu.memory_space<vmem>>, %arg2: memref<512x256xbf16, #tpu.memory_space<vmem>>, %arg3: memref<1x256xf32, #tpu.memory_space<vmem>>, %arg4: memref<32x256xf32, #tpu.memory_space<vmem>>) attributes {dimension_semantics = [#tpu.dimension_semantics<parallel>], iteration_bounds = array<i64: 1>, scalar_prefetch = 0 : i64, scratch_operands = 0 : i64, tpu.core_type = #tpu.core_type<tc>, window_params = [{transform_indices = @transform_0, window_bounds = array<i64: 32, 512>}, {pipeline_mode = #tpu.pipeline_mode<synchronous>, transform_indices = @transform_1, window_bounds = array<i64: 512, 256>}, {pipeline_mode = #tpu.pipeline_mode<synchronous>, transform_indices = @transform_2, window_bounds = array<i64: 1, 256>}, {transform_indices = @transform_3, window_bounds = array<i64: 32, 256>}]} {
    %c0 = arith.constant 0 : index
    %c0_0 = arith.constant 0 : index
    %0 = vector.load %arg1[%c0, %c0_0] : memref<32x512xbf16, #tpu.memory_space<vmem>>, vector<32x512xbf16>
    %c0_1 = arith.constant 0 : index
    %c0_2 = arith.constant 0 : index
    %1 = vector.load %arg2[%c0_1, %c0_2] : memref<512x256xbf16, #tpu.memory_space<vmem>>, vector<512x256xbf16>
    %cst = arith.constant dense<0.000000e+00> : vector<32x256xf32>
    %2 = tpu.matmul %0, %1, %cst {dimension_numbers = #tpu.dot_dimension_numbers<[1], [0], [0], [1], [0, 0, 1, 1], [], []>} : vector<32x512xbf16>, vector<512x256xbf16>, vector<32x256xf32> -> vector<32x256xf32>
    %c0_3 = arith.constant 0 : index
    %c0_4 = arith.constant 0 : index
    %3 = vector.load %arg3[%c0_3, %c0_4] : memref<1x256xf32, #tpu.memory_space<vmem>>, vector<1x256xf32>
    %4 = vector.broadcast %3 : vector<1x256xf32> to vector<32x256xf32>
    %5 = arith.addf %2, %4 : vector<32x256xf32>
    %cst_5 = arith.constant 0.000000e+00 : f32
    %6 = vector.broadcast %cst_5 : f32 to vector<32x256xf32>
    %7 = arith.maximumf %5, %6 : vector<32x256xf32>
    %c0_6 = arith.constant 0 : index
    %c0_7 = arith.constant 0 : index
    %8 = vector.load %arg4[%c0_6, %c0_7] : memref<32x256xf32, #tpu.memory_space<vmem>>, vector<32x256xf32>
    tpu.vector_store %arg4[%c0_6, %c0_7], %7 {strides = array<i32>} : memref<32x256xf32, #tpu.memory_space<vmem>>, vector<32x256xf32>,
    return
  }
  func.func @transform_0(%arg0: i32) -> (i32, i32) {
    %c0_i32 = arith.constant 0 : i32
    %c0_i32_0 = arith.constant 0 : i32
    return %arg0, %c0_i32 : i32, i32
  }
  func.func @transform_1(%arg0: i32) -> (i32, i32) {
    %c0_i32 = arith.constant 0 : i32
    %c0_i32_0 = arith.constant 0 : i32
    %c0_i32_1 = arith.constant 0 : i32
    return %c0_i32, %c0_i32_0 : i32, i32
  }
  func.func @transform_2(%arg0: i32) -> (i32, i32) {
    %c0_i32 = arith.constant 0 : i32
    %c0_i32_0 = arith.constant 0 : i32
    %c0_i32_1 = arith.constant 0 : i32
    return %c0_i32, %c0_i32_0 : i32, i32
  }
  func.func @transform_3(%arg0: i32) -> (i32, i32) {
    %c0_i32 = arith.constant 0 : i32
    %c0_i32_0 = arith.constant 0 : i32
    return %arg0, %c0_i32 : i32, i32
  }
}

module attributes {stable_mosaic.version = 11 : i64} {
  func.func @_conv3x3_kernel(%arg0: i32, %arg1: memref<1x42x264xf32, #tpu.memory_space<vmem>>, %arg2: memref<9x264x128xbf16, #tpu.memory_space<vmem>>, %arg3: memref<1x128xf32, #tpu.memory_space<vmem>>, %arg4: memref<24x1xf32, #tpu.memory_space<vmem>>, %arg5: memref<1x42x128xf32, #tpu.memory_space<vmem>>, %arg6: memref<24x128xf32, #tpu.memory_space<vmem>>) attributes {dimension_semantics = [#tpu.dimension_semantics<parallel>], iteration_bounds = array<i64: 2>, scalar_prefetch = 0 : i64, scratch_operands = 1 : i64, tpu.core_type = #tpu.core_type<tc>, window_params = [{transform_indices = @transform_0, window_bounds = array<i64: 1, 42, 264>}, {pipeline_mode = #tpu.pipeline_mode<synchronous>, transform_indices = @transform_1, window_bounds = array<i64: 9, 264, 128>}, {pipeline_mode = #tpu.pipeline_mode<synchronous>, transform_indices = @transform_2, window_bounds = array<i64: 1, 128>}, {pipeline_mode = #tpu.pipeline_mode<synchronous>, transform_indices = @transform_3, window_bounds = array<i64: 24, 1>}, {transform_indices = @transform_4, window_bounds = array<i64: 1, 42, 128>}]} {
    %c0 = arith.constant 0 : index
    %c0_0 = arith.constant 0 : index
    %c0_1 = arith.constant 0 : index
    %0 = vector.load %arg2[%c0, %c0_0, %c0_1] : memref<9x264x128xbf16, #tpu.memory_space<vmem>>, vector<1x264x128xbf16>
    %1 = vector.shape_cast %0 : vector<1x264x128xbf16> to vector<264x128xbf16>
    %c0_2 = arith.constant 0 : index
    %c0_3 = arith.constant 0 : index
    %c0_4 = arith.constant 0 : index
    %2 = vector.load %arg1[%c0_2, %c0_3, %c0_4] : memref<1x42x264xf32, #tpu.memory_space<vmem>>, vector<1x24x264xf32>
    %3 = vector.shape_cast %2 : vector<1x24x264xf32> to vector<24x264xf32>
    %4 = arith.truncf %3 : vector<24x264xf32> to vector<24x264xbf16>
    %cst = arith.constant dense<0.000000e+00> : vector<24x128xf32>
    %5 = tpu.matmul %4, %1, %cst {dimension_numbers = #tpu.dot_dimension_numbers<[1], [0], [0], [1], [0, 0, 1, 1], [], []>} : vector<24x264xbf16>, vector<264x128xbf16>, vector<24x128xf32> -> vector<24x128xf32>
    %c0_5 = arith.constant 0 : index
    %c0_6 = arith.constant 0 : index
    %6 = vector.load %arg6[%c0_5, %c0_6] : memref<24x128xf32, #tpu.memory_space<vmem>>, vector<24x128xf32>
    tpu.vector_store %arg6[%c0_5, %c0_6], %5 {strides = array<i32>} : memref<24x128xf32, #tpu.memory_space<vmem>>, vector<24x128xf32>,
    %c1 = arith.constant 1 : index
    %c0_7 = arith.constant 0 : index
    %c0_8 = arith.constant 0 : index
    %7 = vector.load %arg2[%c1, %c0_7, %c0_8] : memref<9x264x128xbf16, #tpu.memory_space<vmem>>, vector<1x264x128xbf16>
    %8 = vector.shape_cast %7 : vector<1x264x128xbf16> to vector<264x128xbf16>
    %c0_9 = arith.constant 0 : index
    %c1_10 = arith.constant 1 : index
    %c0_11 = arith.constant 0 : index
    %9 = vector.load %arg1[%c0_9, %c1_10, %c0_11] : memref<1x42x264xf32, #tpu.memory_space<vmem>>, vector<1x24x264xf32>
    %10 = vector.shape_cast %9 : vector<1x24x264xf32> to vector<24x264xf32>
    %11 = arith.truncf %10 : vector<24x264xf32> to vector<24x264xbf16>
    %cst_12 = arith.constant dense<0.000000e+00> : vector<24x128xf32>
    %12 = tpu.matmul %11, %8, %cst_12 {dimension_numbers = #tpu.dot_dimension_numbers<[1], [0], [0], [1], [0, 0, 1, 1], [], []>} : vector<24x264xbf16>, vector<264x128xbf16>, vector<24x128xf32> -> vector<24x128xf32>
    %c0_13 = arith.constant 0 : index
    %c0_14 = arith.constant 0 : index
    %13 = vector.load %arg6[%c0_13, %c0_14] : memref<24x128xf32, #tpu.memory_space<vmem>>, vector<24x128xf32>
    %14 = arith.addf %13, %12 : vector<24x128xf32>
    %c0_15 = arith.constant 0 : index
    %c0_16 = arith.constant 0 : index
    %15 = vector.load %arg6[%c0_15, %c0_16] : memref<24x128xf32, #tpu.memory_space<vmem>>, vector<24x128xf32>
    tpu.vector_store %arg6[%c0_15, %c0_16], %14 {strides = array<i32>} : memref<24x128xf32, #tpu.memory_space<vmem>>, vector<24x128xf32>,
    %c2 = arith.constant 2 : index
    %c0_17 = arith.constant 0 : index
    %c0_18 = arith.constant 0 : index
    %16 = vector.load %arg2[%c2, %c0_17, %c0_18] : memref<9x264x128xbf16, #tpu.memory_space<vmem>>, vector<1x264x128xbf16>
    %17 = vector.shape_cast %16 : vector<1x264x128xbf16> to vector<264x128xbf16>
    %c0_19 = arith.constant 0 : index
    %c2_20 = arith.constant 2 : index
    %c0_21 = arith.constant 0 : index
    %18 = vector.load %arg1[%c0_19, %c2_20, %c0_21] : memref<1x42x264xf32, #tpu.memory_space<vmem>>, vector<1x24x264xf32>
    %19 = vector.shape_cast %18 : vector<1x24x264xf32> to vector<24x264xf32>
    %20 = arith.truncf %19 : vector<24x264xf32> to vector<24x264xbf16>
    %cst_22 = arith.constant dense<0.000000e+00> : vector<24x128xf32>
    %21 = tpu.matmul %20, %17, %cst_22 {dimension_numbers = #tpu.dot_dimension_numbers<[1], [0], [0], [1], [0, 0, 1, 1], [], []>} : vector<24x264xbf16>, vector<264x128xbf16>, vector<24x128xf32> -> vector<24x128xf32>
    %c0_23 = arith.constant 0 : index
    %c0_24 = arith.constant 0 : index
    %22 = vector.load %arg6[%c0_23, %c0_24] : memref<24x128xf32, #tpu.memory_space<vmem>>, vector<24x128xf32>
    %23 = arith.addf %22, %21 : vector<24x128xf32>
    %c0_25 = arith.constant 0 : index
    %c0_26 = arith.constant 0 : index
    %24 = vector.load %arg6[%c0_25, %c0_26] : memref<24x128xf32, #tpu.memory_space<vmem>>, vector<24x128xf32>
    tpu.vector_store %arg6[%c0_25, %c0_26], %23 {strides = array<i32>} : memref<24x128xf32, #tpu.memory_space<vmem>>, vector<24x128xf32>,
    %c3 = arith.constant 3 : index
    %c0_27 = arith.constant 0 : index
    %c0_28 = arith.constant 0 : index
    %25 = vector.load %arg2[%c3, %c0_27, %c0_28] : memref<9x264x128xbf16, #tpu.memory_space<vmem>>, vector<1x264x128xbf16>
    %26 = vector.shape_cast %25 : vector<1x264x128xbf16> to vector<264x128xbf16>
    %c0_29 = arith.constant 0 : index
    %c6 = arith.constant 6 : index
    %c0_30 = arith.constant 0 : index
    %27 = vector.load %arg1[%c0_29, %c6, %c0_30] : memref<1x42x264xf32, #tpu.memory_space<vmem>>, vector<1x24x264xf32>
    %28 = vector.shape_cast %27 : vector<1x24x264xf32> to vector<24x264xf32>
    %29 = arith.truncf %28 : vector<24x264xf32> to vector<24x264xbf16>
    %cst_31 = arith.constant dense<0.000000e+00> : vector<24x128xf32>
    %30 = tpu.matmul %29, %26, %cst_31 {dimension_numbers = #tpu.dot_dimension_numbers<[1], [0], [0], [1], [0, 0, 1, 1], [], []>} : vector<24x264xbf16>, vector<264x128xbf16>, vector<24x128xf32> -> vector<24x128xf32>
    %c0_32 = arith.constant 0 : index
    %c0_33 = arith.constant 0 : index
    %31 = vector.load %arg6[%c0_32, %c0_33] : memref<24x128xf32, #tpu.memory_space<vmem>>, vector<24x128xf32>
    %32 = arith.addf %31, %30 : vector<24x128xf32>
    %c0_34 = arith.constant 0 : index
    %c0_35 = arith.constant 0 : index
    %33 = vector.load %arg6[%c0_34, %c0_35] : memref<24x128xf32, #tpu.memory_space<vmem>>, vector<24x128xf32>
    tpu.vector_store %arg6[%c0_34, %c0_35], %32 {strides = array<i32>} : memref<24x128xf32, #tpu.memory_space<vmem>>, vector<24x128xf32>,
    %c4 = arith.constant 4 : index
    %c0_36 = arith.constant 0 : index
    %c0_37 = arith.constant 0 : index
    %34 = vector.load %arg2[%c4, %c0_36, %c0_37] : memref<9x264x128xbf16, #tpu.memory_space<vmem>>, vector<1x264x128xbf16>
    %35 = vector.shape_cast %34 : vector<1x264x128xbf16> to vector<264x128xbf16>
    %c0_38 = arith.constant 0 : index
    %c7 = arith.constant 7 : index
    %c0_39 = arith.constant 0 : index
    %36 = vector.load %arg1[%c0_38, %c7, %c0_39] : memref<1x42x264xf32, #tpu.memory_space<vmem>>, vector<1x24x264xf32>
    %37 = vector.shape_cast %36 : vector<1x24x264xf32> to vector<24x264xf32>
    %38 = arith.truncf %37 : vector<24x264xf32> to vector<24x264xbf16>
    %cst_40 = arith.constant dense<0.000000e+00> : vector<24x128xf32>
    %39 = tpu.matmul %38, %35, %cst_40 {dimension_numbers = #tpu.dot_dimension_numbers<[1], [0], [0], [1], [0, 0, 1, 1], [], []>} : vector<24x264xbf16>, vector<264x128xbf16>, vector<24x128xf32> -> vector<24x128xf32>
    %c0_41 = arith.constant 0 : index
    %c0_42 = arith.constant 0 : index
    %40 = vector.load %arg6[%c0_41, %c0_42] : memref<24x128xf32, #tpu.memory_space<vmem>>, vector<24x128xf32>
    %41 = arith.addf %40, %39 : vector<24x128xf32>
    %c0_43 = arith.constant 0 : index
    %c0_44 = arith.constant 0 : index
    %42 = vector.load %arg6[%c0_43, %c0_44] : memref<24x128xf32, #tpu.memory_space<vmem>>, vector<24x128xf32>
    tpu.vector_store %arg6[%c0_43, %c0_44], %41 {strides = array<i32>} : memref<24x128xf32, #tpu.memory_space<vmem>>, vector<24x128xf32>,
    %c5 = arith.constant 5 : index
    %c0_45 = arith.constant 0 : index
    %c0_46 = arith.constant 0 : index
    %43 = vector.load %arg2[%c5, %c0_45, %c0_46] : memref<9x264x128xbf16, #tpu.memory_space<vmem>>, vector<1x264x128xbf16>
    %44 = vector.shape_cast %43 : vector<1x264x128xbf16> to vector<264x128xbf16>
    %c0_47 = arith.constant 0 : index
    %c8 = arith.constant 8 : index
    %c0_48 = arith.constant 0 : index
    %45 = vector.load %arg1[%c0_47, %c8, %c0_48] : memref<1x42x264xf32, #tpu.memory_space<vmem>>, vector<1x24x264xf32>
    %46 = vector.shape_cast %45 : vector<1x24x264xf32> to vector<24x264xf32>
    %47 = arith.truncf %46 : vector<24x264xf32> to vector<24x264xbf16>
    %cst_49 = arith.constant dense<0.000000e+00> : vector<24x128xf32>
    %48 = tpu.matmul %47, %44, %cst_49 {dimension_numbers = #tpu.dot_dimension_numbers<[1], [0], [0], [1], [0, 0, 1, 1], [], []>} : vector<24x264xbf16>, vector<264x128xbf16>, vector<24x128xf32> -> vector<24x128xf32>
    %c0_50 = arith.constant 0 : index
    %c0_51 = arith.constant 0 : index
    %49 = vector.load %arg6[%c0_50, %c0_51] : memref<24x128xf32, #tpu.memory_space<vmem>>, vector<24x128xf32>
    %50 = arith.addf %49, %48 : vector<24x128xf32>
    %c0_52 = arith.constant 0 : index
    %c0_53 = arith.constant 0 : index
    %51 = vector.load %arg6[%c0_52, %c0_53] : memref<24x128xf32, #tpu.memory_space<vmem>>, vector<24x128xf32>
    tpu.vector_store %arg6[%c0_52, %c0_53], %50 {strides = array<i32>} : memref<24x128xf32, #tpu.memory_space<vmem>>, vector<24x128xf32>,
    %c6_54 = arith.constant 6 : index
    %c0_55 = arith.constant 0 : index
    %c0_56 = arith.constant 0 : index
    %52 = vector.load %arg2[%c6_54, %c0_55, %c0_56] : memref<9x264x128xbf16, #tpu.memory_space<vmem>>, vector<1x264x128xbf16>
    %53 = vector.shape_cast %52 : vector<1x264x128xbf16> to vector<264x128xbf16>
    %c0_57 = arith.constant 0 : index
    %c12 = arith.constant 12 : index
    %c0_58 = arith.constant 0 : index
    %54 = vector.load %arg1[%c0_57, %c12, %c0_58] : memref<1x42x264xf32, #tpu.memory_space<vmem>>, vector<1x24x264xf32>
    %55 = vector.shape_cast %54 : vector<1x24x264xf32> to vector<24x264xf32>
    %56 = arith.truncf %55 : vector<24x264xf32> to vector<24x264xbf16>
    %cst_59 = arith.constant dense<0.000000e+00> : vector<24x128xf32>
    %57 = tpu.matmul %56, %53, %cst_59 {dimension_numbers = #tpu.dot_dimension_numbers<[1], [0], [0], [1], [0, 0, 1, 1], [], []>} : vector<24x264xbf16>, vector<264x128xbf16>, vector<24x128xf32> -> vector<24x128xf32>
    %c0_60 = arith.constant 0 : index
    %c0_61 = arith.constant 0 : index
    %58 = vector.load %arg6[%c0_60, %c0_61] : memref<24x128xf32, #tpu.memory_space<vmem>>, vector<24x128xf32>
    %59 = arith.addf %58, %57 : vector<24x128xf32>
    %c0_62 = arith.constant 0 : index
    %c0_63 = arith.constant 0 : index
    %60 = vector.load %arg6[%c0_62, %c0_63] : memref<24x128xf32, #tpu.memory_space<vmem>>, vector<24x128xf32>
    tpu.vector_store %arg6[%c0_62, %c0_63], %59 {strides = array<i32>} : memref<24x128xf32, #tpu.memory_space<vmem>>, vector<24x128xf32>,
    %c7_64 = arith.constant 7 : index
    %c0_65 = arith.constant 0 : index
    %c0_66 = arith.constant 0 : index
    %61 = vector.load %arg2[%c7_64, %c0_65, %c0_66] : memref<9x264x128xbf16, #tpu.memory_space<vmem>>, vector<1x264x128xbf16>
    %62 = vector.shape_cast %61 : vector<1x264x128xbf16> to vector<264x128xbf16>
    %c0_67 = arith.constant 0 : index
    %c13 = arith.constant 13 : index
    %c0_68 = arith.constant 0 : index
    %63 = vector.load %arg1[%c0_67, %c13, %c0_68] : memref<1x42x264xf32, #tpu.memory_space<vmem>>, vector<1x24x264xf32>
    %64 = vector.shape_cast %63 : vector<1x24x264xf32> to vector<24x264xf32>
    %65 = arith.truncf %64 : vector<24x264xf32> to vector<24x264xbf16>
    %cst_69 = arith.constant dense<0.000000e+00> : vector<24x128xf32>
    %66 = tpu.matmul %65, %62, %cst_69 {dimension_numbers = #tpu.dot_dimension_numbers<[1], [0], [0], [1], [0, 0, 1, 1], [], []>} : vector<24x264xbf16>, vector<264x128xbf16>, vector<24x128xf32> -> vector<24x128xf32>
    %c0_70 = arith.constant 0 : index
    %c0_71 = arith.constant 0 : index
    %67 = vector.load %arg6[%c0_70, %c0_71] : memref<24x128xf32, #tpu.memory_space<vmem>>, vector<24x128xf32>
    %68 = arith.addf %67, %66 : vector<24x128xf32>
    %c0_72 = arith.constant 0 : index
    %c0_73 = arith.constant 0 : index
    %69 = vector.load %arg6[%c0_72, %c0_73] : memref<24x128xf32, #tpu.memory_space<vmem>>, vector<24x128xf32>
    tpu.vector_store %arg6[%c0_72, %c0_73], %68 {strides = array<i32>} : memref<24x128xf32, #tpu.memory_space<vmem>>, vector<24x128xf32>,
    %c8_74 = arith.constant 8 : index
    %c0_75 = arith.constant 0 : index
    %c0_76 = arith.constant 0 : index
    %70 = vector.load %arg2[%c8_74, %c0_75, %c0_76] : memref<9x264x128xbf16, #tpu.memory_space<vmem>>, vector<1x264x128xbf16>
    %71 = vector.shape_cast %70 : vector<1x264x128xbf16> to vector<264x128xbf16>
    %c0_77 = arith.constant 0 : index
    %c14 = arith.constant 14 : index
    %c0_78 = arith.constant 0 : index
    %72 = vector.load %arg1[%c0_77, %c14, %c0_78] : memref<1x42x264xf32, #tpu.memory_space<vmem>>, vector<1x24x264xf32>
    %73 = vector.shape_cast %72 : vector<1x24x264xf32> to vector<24x264xf32>
    %74 = arith.truncf %73 : vector<24x264xf32> to vector<24x264xbf16>
    %cst_79 = arith.constant dense<0.000000e+00> : vector<24x128xf32>
    %75 = tpu.matmul %74, %71, %cst_79 {dimension_numbers = #tpu.dot_dimension_numbers<[1], [0], [0], [1], [0, 0, 1, 1], [], []>} : vector<24x264xbf16>, vector<264x128xbf16>, vector<24x128xf32> -> vector<24x128xf32>
    %c0_80 = arith.constant 0 : index
    %c0_81 = arith.constant 0 : index
    %76 = vector.load %arg6[%c0_80, %c0_81] : memref<24x128xf32, #tpu.memory_space<vmem>>, vector<24x128xf32>
    %77 = arith.addf %76, %75 : vector<24x128xf32>
    %c0_82 = arith.constant 0 : index
    %c0_83 = arith.constant 0 : index
    %78 = vector.load %arg6[%c0_82, %c0_83] : memref<24x128xf32, #tpu.memory_space<vmem>>, vector<24x128xf32>
    tpu.vector_store %arg6[%c0_82, %c0_83], %77 {strides = array<i32>} : memref<24x128xf32, #tpu.memory_space<vmem>>, vector<24x128xf32>,
    %c0_84 = arith.constant 0 : index
    %c0_85 = arith.constant 0 : index
    %79 = vector.load %arg6[%c0_84, %c0_85] : memref<24x128xf32, #tpu.memory_space<vmem>>, vector<24x128xf32>
    %c0_86 = arith.constant 0 : index
    %c0_87 = arith.constant 0 : index
    %80 = vector.load %arg3[%c0_86, %c0_87] : memref<1x128xf32, #tpu.memory_space<vmem>>, vector<1x128xf32>
    %81 = vector.broadcast %80 : vector<1x128xf32> to vector<24x128xf32>
    %82 = arith.addf %79, %81 : vector<24x128xf32>
    %cst_88 = arith.constant 0.000000e+00 : f32
    %83 = vector.broadcast %cst_88 : f32 to vector<24x128xf32>
    %84 = arith.maximumf %82, %83 : vector<24x128xf32>
    %c0_89 = arith.constant 0 : index
    %c0_90 = arith.constant 0 : index
    %85 = vector.load %arg4[%c0_89, %c0_90] : memref<24x1xf32, #tpu.memory_space<vmem>>, vector<24x1xf32>
    %86 = vector.broadcast %85 : vector<24x1xf32> to vector<24x128xf32>
    %87 = arith.mulf %84, %86 : vector<24x128xf32>
    %cst_91 = arith.constant 0.000000e+00 : f32
    %88 = vector.broadcast %cst_91 : f32 to vector<42x128xf32>
    %c0_92 = arith.constant 0 : index
    %c0_93 = arith.constant 0 : index
    %c0_94 = arith.constant 0 : index
    %89 = vector.load %arg5[%c0_92, %c0_93, %c0_94] : memref<1x42x128xf32, #tpu.memory_space<vmem>>, vector<1x42x128xf32>
    %90 = vector.shape_cast %89 : vector<1x42x128xf32> to vector<42x128xf32>
    %91 = vector.shape_cast %88 : vector<42x128xf32> to vector<1x42x128xf32>
    tpu.vector_store %arg5[%c0_92, %c0_93, %c0_94], %91 {strides = array<i32>} : memref<1x42x128xf32, #tpu.memory_space<vmem>>, vector<1x42x128xf32>,
    %c0_95 = arith.constant 0 : index
    %c7_96 = arith.constant 7 : index
    %c0_97 = arith.constant 0 : index
    %92 = vector.load %arg5[%c0_95, %c7_96, %c0_97] : memref<1x42x128xf32, #tpu.memory_space<vmem>>, vector<1x24x128xf32>
    %93 = vector.shape_cast %92 : vector<1x24x128xf32> to vector<24x128xf32>
    %94 = vector.shape_cast %87 : vector<24x128xf32> to vector<1x24x128xf32>
    tpu.vector_store %arg5[%c0_95, %c7_96, %c0_97], %94 {strides = array<i32>} : memref<1x42x128xf32, #tpu.memory_space<vmem>>, vector<1x24x128xf32>,
    return
  }
  func.func @transform_0(%arg0: i32) -> (i32, i32, i32) {
    %c0_i32 = arith.constant 0 : i32
    %c0_i32_0 = arith.constant 0 : i32
    %c0_i32_1 = arith.constant 0 : i32
    return %arg0, %c0_i32, %c0_i32_0 : i32, i32, i32
  }
  func.func @transform_1(%arg0: i32) -> (i32, i32, i32) {
    %c0_i32 = arith.constant 0 : i32
    %c0_i32_0 = arith.constant 0 : i32
    %c0_i32_1 = arith.constant 0 : i32
    %c0_i32_2 = arith.constant 0 : i32
    return %c0_i32, %c0_i32_0, %c0_i32_1 : i32, i32, i32
  }
  func.func @transform_2(%arg0: i32) -> (i32, i32) {
    %c0_i32 = arith.constant 0 : i32
    %c0_i32_0 = arith.constant 0 : i32
    %c0_i32_1 = arith.constant 0 : i32
    return %c0_i32, %c0_i32_0 : i32, i32
  }
  func.func @transform_3(%arg0: i32) -> (i32, i32) {
    %c0_i32 = arith.constant 0 : i32
    %c0_i32_0 = arith.constant 0 : i32
    %c0_i32_1 = arith.constant 0 : i32
    return %c0_i32, %c0_i32_0 : i32, i32
  }
  func.func @transform_4(%arg0: i32) -> (i32, i32, i32) {
    %c0_i32 = arith.constant 0 : i32
    %c0_i32_0 = arith.constant 0 : i32
    %c0_i32_1 = arith.constant 0 : i32
    return %arg0, %c0_i32, %c0_i32_0 : i32, i32, i32
  }
}

module attributes {stable_mosaic.version = 11 : i64} {
  func.func @_conv3x3_kernel(%arg0: i32, %arg1: memref<1x42x128xf32, #tpu.memory_space<vmem>>, %arg2: memref<9x128x256xbf16, #tpu.memory_space<vmem>>, %arg3: memref<1x256xf32, #tpu.memory_space<vmem>>, %arg4: memref<24x1xf32, #tpu.memory_space<vmem>>, %arg5: memref<1x42x256xf32, #tpu.memory_space<vmem>>, %arg6: memref<24x256xf32, #tpu.memory_space<vmem>>) attributes {dimension_semantics = [#tpu.dimension_semantics<parallel>], iteration_bounds = array<i64: 2>, scalar_prefetch = 0 : i64, scratch_operands = 1 : i64, tpu.core_type = #tpu.core_type<tc>, window_params = [{transform_indices = @transform_0, window_bounds = array<i64: 1, 42, 128>}, {pipeline_mode = #tpu.pipeline_mode<synchronous>, transform_indices = @transform_1, window_bounds = array<i64: 9, 128, 256>}, {pipeline_mode = #tpu.pipeline_mode<synchronous>, transform_indices = @transform_2, window_bounds = array<i64: 1, 256>}, {pipeline_mode = #tpu.pipeline_mode<synchronous>, transform_indices = @transform_3, window_bounds = array<i64: 24, 1>}, {transform_indices = @transform_4, window_bounds = array<i64: 1, 42, 256>}]} {
    %c0 = arith.constant 0 : index
    %c0_0 = arith.constant 0 : index
    %c0_1 = arith.constant 0 : index
    %0 = vector.load %arg2[%c0, %c0_0, %c0_1] : memref<9x128x256xbf16, #tpu.memory_space<vmem>>, vector<1x128x256xbf16>
    %1 = vector.shape_cast %0 : vector<1x128x256xbf16> to vector<128x256xbf16>
    %c0_2 = arith.constant 0 : index
    %c0_3 = arith.constant 0 : index
    %c0_4 = arith.constant 0 : index
    %2 = vector.load %arg1[%c0_2, %c0_3, %c0_4] : memref<1x42x128xf32, #tpu.memory_space<vmem>>, vector<1x24x128xf32>
    %3 = vector.shape_cast %2 : vector<1x24x128xf32> to vector<24x128xf32>
    %4 = arith.truncf %3 : vector<24x128xf32> to vector<24x128xbf16>
    %cst = arith.constant dense<0.000000e+00> : vector<24x256xf32>
    %5 = tpu.matmul %4, %1, %cst {dimension_numbers = #tpu.dot_dimension_numbers<[1], [0], [0], [1], [0, 0, 1, 1], [], []>} : vector<24x128xbf16>, vector<128x256xbf16>, vector<24x256xf32> -> vector<24x256xf32>
    %c0_5 = arith.constant 0 : index
    %c0_6 = arith.constant 0 : index
    %6 = vector.load %arg6[%c0_5, %c0_6] : memref<24x256xf32, #tpu.memory_space<vmem>>, vector<24x256xf32>
    tpu.vector_store %arg6[%c0_5, %c0_6], %5 {strides = array<i32>} : memref<24x256xf32, #tpu.memory_space<vmem>>, vector<24x256xf32>,
    %c1 = arith.constant 1 : index
    %c0_7 = arith.constant 0 : index
    %c0_8 = arith.constant 0 : index
    %7 = vector.load %arg2[%c1, %c0_7, %c0_8] : memref<9x128x256xbf16, #tpu.memory_space<vmem>>, vector<1x128x256xbf16>
    %8 = vector.shape_cast %7 : vector<1x128x256xbf16> to vector<128x256xbf16>
    %c0_9 = arith.constant 0 : index
    %c1_10 = arith.constant 1 : index
    %c0_11 = arith.constant 0 : index
    %9 = vector.load %arg1[%c0_9, %c1_10, %c0_11] : memref<1x42x128xf32, #tpu.memory_space<vmem>>, vector<1x24x128xf32>
    %10 = vector.shape_cast %9 : vector<1x24x128xf32> to vector<24x128xf32>
    %11 = arith.truncf %10 : vector<24x128xf32> to vector<24x128xbf16>
    %cst_12 = arith.constant dense<0.000000e+00> : vector<24x256xf32>
    %12 = tpu.matmul %11, %8, %cst_12 {dimension_numbers = #tpu.dot_dimension_numbers<[1], [0], [0], [1], [0, 0, 1, 1], [], []>} : vector<24x128xbf16>, vector<128x256xbf16>, vector<24x256xf32> -> vector<24x256xf32>
    %c0_13 = arith.constant 0 : index
    %c0_14 = arith.constant 0 : index
    %13 = vector.load %arg6[%c0_13, %c0_14] : memref<24x256xf32, #tpu.memory_space<vmem>>, vector<24x256xf32>
    %14 = arith.addf %13, %12 : vector<24x256xf32>
    %c0_15 = arith.constant 0 : index
    %c0_16 = arith.constant 0 : index
    %15 = vector.load %arg6[%c0_15, %c0_16] : memref<24x256xf32, #tpu.memory_space<vmem>>, vector<24x256xf32>
    tpu.vector_store %arg6[%c0_15, %c0_16], %14 {strides = array<i32>} : memref<24x256xf32, #tpu.memory_space<vmem>>, vector<24x256xf32>,
    %c2 = arith.constant 2 : index
    %c0_17 = arith.constant 0 : index
    %c0_18 = arith.constant 0 : index
    %16 = vector.load %arg2[%c2, %c0_17, %c0_18] : memref<9x128x256xbf16, #tpu.memory_space<vmem>>, vector<1x128x256xbf16>
    %17 = vector.shape_cast %16 : vector<1x128x256xbf16> to vector<128x256xbf16>
    %c0_19 = arith.constant 0 : index
    %c2_20 = arith.constant 2 : index
    %c0_21 = arith.constant 0 : index
    %18 = vector.load %arg1[%c0_19, %c2_20, %c0_21] : memref<1x42x128xf32, #tpu.memory_space<vmem>>, vector<1x24x128xf32>
    %19 = vector.shape_cast %18 : vector<1x24x128xf32> to vector<24x128xf32>
    %20 = arith.truncf %19 : vector<24x128xf32> to vector<24x128xbf16>
    %cst_22 = arith.constant dense<0.000000e+00> : vector<24x256xf32>
    %21 = tpu.matmul %20, %17, %cst_22 {dimension_numbers = #tpu.dot_dimension_numbers<[1], [0], [0], [1], [0, 0, 1, 1], [], []>} : vector<24x128xbf16>, vector<128x256xbf16>, vector<24x256xf32> -> vector<24x256xf32>
    %c0_23 = arith.constant 0 : index
    %c0_24 = arith.constant 0 : index
    %22 = vector.load %arg6[%c0_23, %c0_24] : memref<24x256xf32, #tpu.memory_space<vmem>>, vector<24x256xf32>
    %23 = arith.addf %22, %21 : vector<24x256xf32>
    %c0_25 = arith.constant 0 : index
    %c0_26 = arith.constant 0 : index
    %24 = vector.load %arg6[%c0_25, %c0_26] : memref<24x256xf32, #tpu.memory_space<vmem>>, vector<24x256xf32>
    tpu.vector_store %arg6[%c0_25, %c0_26], %23 {strides = array<i32>} : memref<24x256xf32, #tpu.memory_space<vmem>>, vector<24x256xf32>,
    %c3 = arith.constant 3 : index
    %c0_27 = arith.constant 0 : index
    %c0_28 = arith.constant 0 : index
    %25 = vector.load %arg2[%c3, %c0_27, %c0_28] : memref<9x128x256xbf16, #tpu.memory_space<vmem>>, vector<1x128x256xbf16>
    %26 = vector.shape_cast %25 : vector<1x128x256xbf16> to vector<128x256xbf16>
    %c0_29 = arith.constant 0 : index
    %c6 = arith.constant 6 : index
    %c0_30 = arith.constant 0 : index
    %27 = vector.load %arg1[%c0_29, %c6, %c0_30] : memref<1x42x128xf32, #tpu.memory_space<vmem>>, vector<1x24x128xf32>
    %28 = vector.shape_cast %27 : vector<1x24x128xf32> to vector<24x128xf32>
    %29 = arith.truncf %28 : vector<24x128xf32> to vector<24x128xbf16>
    %cst_31 = arith.constant dense<0.000000e+00> : vector<24x256xf32>
    %30 = tpu.matmul %29, %26, %cst_31 {dimension_numbers = #tpu.dot_dimension_numbers<[1], [0], [0], [1], [0, 0, 1, 1], [], []>} : vector<24x128xbf16>, vector<128x256xbf16>, vector<24x256xf32> -> vector<24x256xf32>
    %c0_32 = arith.constant 0 : index
    %c0_33 = arith.constant 0 : index
    %31 = vector.load %arg6[%c0_32, %c0_33] : memref<24x256xf32, #tpu.memory_space<vmem>>, vector<24x256xf32>
    %32 = arith.addf %31, %30 : vector<24x256xf32>
    %c0_34 = arith.constant 0 : index
    %c0_35 = arith.constant 0 : index
    %33 = vector.load %arg6[%c0_34, %c0_35] : memref<24x256xf32, #tpu.memory_space<vmem>>, vector<24x256xf32>
    tpu.vector_store %arg6[%c0_34, %c0_35], %32 {strides = array<i32>} : memref<24x256xf32, #tpu.memory_space<vmem>>, vector<24x256xf32>,
    %c4 = arith.constant 4 : index
    %c0_36 = arith.constant 0 : index
    %c0_37 = arith.constant 0 : index
    %34 = vector.load %arg2[%c4, %c0_36, %c0_37] : memref<9x128x256xbf16, #tpu.memory_space<vmem>>, vector<1x128x256xbf16>
    %35 = vector.shape_cast %34 : vector<1x128x256xbf16> to vector<128x256xbf16>
    %c0_38 = arith.constant 0 : index
    %c7 = arith.constant 7 : index
    %c0_39 = arith.constant 0 : index
    %36 = vector.load %arg1[%c0_38, %c7, %c0_39] : memref<1x42x128xf32, #tpu.memory_space<vmem>>, vector<1x24x128xf32>
    %37 = vector.shape_cast %36 : vector<1x24x128xf32> to vector<24x128xf32>
    %38 = arith.truncf %37 : vector<24x128xf32> to vector<24x128xbf16>
    %cst_40 = arith.constant dense<0.000000e+00> : vector<24x256xf32>
    %39 = tpu.matmul %38, %35, %cst_40 {dimension_numbers = #tpu.dot_dimension_numbers<[1], [0], [0], [1], [0, 0, 1, 1], [], []>} : vector<24x128xbf16>, vector<128x256xbf16>, vector<24x256xf32> -> vector<24x256xf32>
    %c0_41 = arith.constant 0 : index
    %c0_42 = arith.constant 0 : index
    %40 = vector.load %arg6[%c0_41, %c0_42] : memref<24x256xf32, #tpu.memory_space<vmem>>, vector<24x256xf32>
    %41 = arith.addf %40, %39 : vector<24x256xf32>
    %c0_43 = arith.constant 0 : index
    %c0_44 = arith.constant 0 : index
    %42 = vector.load %arg6[%c0_43, %c0_44] : memref<24x256xf32, #tpu.memory_space<vmem>>, vector<24x256xf32>
    tpu.vector_store %arg6[%c0_43, %c0_44], %41 {strides = array<i32>} : memref<24x256xf32, #tpu.memory_space<vmem>>, vector<24x256xf32>,
    %c5 = arith.constant 5 : index
    %c0_45 = arith.constant 0 : index
    %c0_46 = arith.constant 0 : index
    %43 = vector.load %arg2[%c5, %c0_45, %c0_46] : memref<9x128x256xbf16, #tpu.memory_space<vmem>>, vector<1x128x256xbf16>
    %44 = vector.shape_cast %43 : vector<1x128x256xbf16> to vector<128x256xbf16>
    %c0_47 = arith.constant 0 : index
    %c8 = arith.constant 8 : index
    %c0_48 = arith.constant 0 : index
    %45 = vector.load %arg1[%c0_47, %c8, %c0_48] : memref<1x42x128xf32, #tpu.memory_space<vmem>>, vector<1x24x128xf32>
    %46 = vector.shape_cast %45 : vector<1x24x128xf32> to vector<24x128xf32>
    %47 = arith.truncf %46 : vector<24x128xf32> to vector<24x128xbf16>
    %cst_49 = arith.constant dense<0.000000e+00> : vector<24x256xf32>
    %48 = tpu.matmul %47, %44, %cst_49 {dimension_numbers = #tpu.dot_dimension_numbers<[1], [0], [0], [1], [0, 0, 1, 1], [], []>} : vector<24x128xbf16>, vector<128x256xbf16>, vector<24x256xf32> -> vector<24x256xf32>
    %c0_50 = arith.constant 0 : index
    %c0_51 = arith.constant 0 : index
    %49 = vector.load %arg6[%c0_50, %c0_51] : memref<24x256xf32, #tpu.memory_space<vmem>>, vector<24x256xf32>
    %50 = arith.addf %49, %48 : vector<24x256xf32>
    %c0_52 = arith.constant 0 : index
    %c0_53 = arith.constant 0 : index
    %51 = vector.load %arg6[%c0_52, %c0_53] : memref<24x256xf32, #tpu.memory_space<vmem>>, vector<24x256xf32>
    tpu.vector_store %arg6[%c0_52, %c0_53], %50 {strides = array<i32>} : memref<24x256xf32, #tpu.memory_space<vmem>>, vector<24x256xf32>,
    %c6_54 = arith.constant 6 : index
    %c0_55 = arith.constant 0 : index
    %c0_56 = arith.constant 0 : index
    %52 = vector.load %arg2[%c6_54, %c0_55, %c0_56] : memref<9x128x256xbf16, #tpu.memory_space<vmem>>, vector<1x128x256xbf16>
    %53 = vector.shape_cast %52 : vector<1x128x256xbf16> to vector<128x256xbf16>
    %c0_57 = arith.constant 0 : index
    %c12 = arith.constant 12 : index
    %c0_58 = arith.constant 0 : index
    %54 = vector.load %arg1[%c0_57, %c12, %c0_58] : memref<1x42x128xf32, #tpu.memory_space<vmem>>, vector<1x24x128xf32>
    %55 = vector.shape_cast %54 : vector<1x24x128xf32> to vector<24x128xf32>
    %56 = arith.truncf %55 : vector<24x128xf32> to vector<24x128xbf16>
    %cst_59 = arith.constant dense<0.000000e+00> : vector<24x256xf32>
    %57 = tpu.matmul %56, %53, %cst_59 {dimension_numbers = #tpu.dot_dimension_numbers<[1], [0], [0], [1], [0, 0, 1, 1], [], []>} : vector<24x128xbf16>, vector<128x256xbf16>, vector<24x256xf32> -> vector<24x256xf32>
    %c0_60 = arith.constant 0 : index
    %c0_61 = arith.constant 0 : index
    %58 = vector.load %arg6[%c0_60, %c0_61] : memref<24x256xf32, #tpu.memory_space<vmem>>, vector<24x256xf32>
    %59 = arith.addf %58, %57 : vector<24x256xf32>
    %c0_62 = arith.constant 0 : index
    %c0_63 = arith.constant 0 : index
    %60 = vector.load %arg6[%c0_62, %c0_63] : memref<24x256xf32, #tpu.memory_space<vmem>>, vector<24x256xf32>
    tpu.vector_store %arg6[%c0_62, %c0_63], %59 {strides = array<i32>} : memref<24x256xf32, #tpu.memory_space<vmem>>, vector<24x256xf32>,
    %c7_64 = arith.constant 7 : index
    %c0_65 = arith.constant 0 : index
    %c0_66 = arith.constant 0 : index
    %61 = vector.load %arg2[%c7_64, %c0_65, %c0_66] : memref<9x128x256xbf16, #tpu.memory_space<vmem>>, vector<1x128x256xbf16>
    %62 = vector.shape_cast %61 : vector<1x128x256xbf16> to vector<128x256xbf16>
    %c0_67 = arith.constant 0 : index
    %c13 = arith.constant 13 : index
    %c0_68 = arith.constant 0 : index
    %63 = vector.load %arg1[%c0_67, %c13, %c0_68] : memref<1x42x128xf32, #tpu.memory_space<vmem>>, vector<1x24x128xf32>
    %64 = vector.shape_cast %63 : vector<1x24x128xf32> to vector<24x128xf32>
    %65 = arith.truncf %64 : vector<24x128xf32> to vector<24x128xbf16>
    %cst_69 = arith.constant dense<0.000000e+00> : vector<24x256xf32>
    %66 = tpu.matmul %65, %62, %cst_69 {dimension_numbers = #tpu.dot_dimension_numbers<[1], [0], [0], [1], [0, 0, 1, 1], [], []>} : vector<24x128xbf16>, vector<128x256xbf16>, vector<24x256xf32> -> vector<24x256xf32>
    %c0_70 = arith.constant 0 : index
    %c0_71 = arith.constant 0 : index
    %67 = vector.load %arg6[%c0_70, %c0_71] : memref<24x256xf32, #tpu.memory_space<vmem>>, vector<24x256xf32>
    %68 = arith.addf %67, %66 : vector<24x256xf32>
    %c0_72 = arith.constant 0 : index
    %c0_73 = arith.constant 0 : index
    %69 = vector.load %arg6[%c0_72, %c0_73] : memref<24x256xf32, #tpu.memory_space<vmem>>, vector<24x256xf32>
    tpu.vector_store %arg6[%c0_72, %c0_73], %68 {strides = array<i32>} : memref<24x256xf32, #tpu.memory_space<vmem>>, vector<24x256xf32>,
    %c8_74 = arith.constant 8 : index
    %c0_75 = arith.constant 0 : index
    %c0_76 = arith.constant 0 : index
    %70 = vector.load %arg2[%c8_74, %c0_75, %c0_76] : memref<9x128x256xbf16, #tpu.memory_space<vmem>>, vector<1x128x256xbf16>
    %71 = vector.shape_cast %70 : vector<1x128x256xbf16> to vector<128x256xbf16>
    %c0_77 = arith.constant 0 : index
    %c14 = arith.constant 14 : index
    %c0_78 = arith.constant 0 : index
    %72 = vector.load %arg1[%c0_77, %c14, %c0_78] : memref<1x42x128xf32, #tpu.memory_space<vmem>>, vector<1x24x128xf32>
    %73 = vector.shape_cast %72 : vector<1x24x128xf32> to vector<24x128xf32>
    %74 = arith.truncf %73 : vector<24x128xf32> to vector<24x128xbf16>
    %cst_79 = arith.constant dense<0.000000e+00> : vector<24x256xf32>
    %75 = tpu.matmul %74, %71, %cst_79 {dimension_numbers = #tpu.dot_dimension_numbers<[1], [0], [0], [1], [0, 0, 1, 1], [], []>} : vector<24x128xbf16>, vector<128x256xbf16>, vector<24x256xf32> -> vector<24x256xf32>
    %c0_80 = arith.constant 0 : index
    %c0_81 = arith.constant 0 : index
    %76 = vector.load %arg6[%c0_80, %c0_81] : memref<24x256xf32, #tpu.memory_space<vmem>>, vector<24x256xf32>
    %77 = arith.addf %76, %75 : vector<24x256xf32>
    %c0_82 = arith.constant 0 : index
    %c0_83 = arith.constant 0 : index
    %78 = vector.load %arg6[%c0_82, %c0_83] : memref<24x256xf32, #tpu.memory_space<vmem>>, vector<24x256xf32>
    tpu.vector_store %arg6[%c0_82, %c0_83], %77 {strides = array<i32>} : memref<24x256xf32, #tpu.memory_space<vmem>>, vector<24x256xf32>,
    %c0_84 = arith.constant 0 : index
    %c0_85 = arith.constant 0 : index
    %79 = vector.load %arg6[%c0_84, %c0_85] : memref<24x256xf32, #tpu.memory_space<vmem>>, vector<24x256xf32>
    %c0_86 = arith.constant 0 : index
    %c0_87 = arith.constant 0 : index
    %80 = vector.load %arg3[%c0_86, %c0_87] : memref<1x256xf32, #tpu.memory_space<vmem>>, vector<1x256xf32>
    %81 = vector.broadcast %80 : vector<1x256xf32> to vector<24x256xf32>
    %82 = arith.addf %79, %81 : vector<24x256xf32>
    %cst_88 = arith.constant 0.000000e+00 : f32
    %83 = vector.broadcast %cst_88 : f32 to vector<24x256xf32>
    %84 = arith.maximumf %82, %83 : vector<24x256xf32>
    %c0_89 = arith.constant 0 : index
    %c0_90 = arith.constant 0 : index
    %85 = vector.load %arg4[%c0_89, %c0_90] : memref<24x1xf32, #tpu.memory_space<vmem>>, vector<24x1xf32>
    %86 = vector.broadcast %85 : vector<24x1xf32> to vector<24x256xf32>
    %87 = arith.mulf %84, %86 : vector<24x256xf32>
    %cst_91 = arith.constant 0.000000e+00 : f32
    %88 = vector.broadcast %cst_91 : f32 to vector<42x256xf32>
    %c0_92 = arith.constant 0 : index
    %c0_93 = arith.constant 0 : index
    %c0_94 = arith.constant 0 : index
    %89 = vector.load %arg5[%c0_92, %c0_93, %c0_94] : memref<1x42x256xf32, #tpu.memory_space<vmem>>, vector<1x42x256xf32>
    %90 = vector.shape_cast %89 : vector<1x42x256xf32> to vector<42x256xf32>
    %91 = vector.shape_cast %88 : vector<42x256xf32> to vector<1x42x256xf32>
    tpu.vector_store %arg5[%c0_92, %c0_93, %c0_94], %91 {strides = array<i32>} : memref<1x42x256xf32, #tpu.memory_space<vmem>>, vector<1x42x256xf32>,
    %c0_95 = arith.constant 0 : index
    %c7_96 = arith.constant 7 : index
    %c0_97 = arith.constant 0 : index
    %92 = vector.load %arg5[%c0_95, %c7_96, %c0_97] : memref<1x42x256xf32, #tpu.memory_space<vmem>>, vector<1x24x256xf32>
    %93 = vector.shape_cast %92 : vector<1x24x256xf32> to vector<24x256xf32>
    %94 = vector.shape_cast %87 : vector<24x256xf32> to vector<1x24x256xf32>
    tpu.vector_store %arg5[%c0_95, %c7_96, %c0_97], %94 {strides = array<i32>} : memref<1x42x256xf32, #tpu.memory_space<vmem>>, vector<1x24x256xf32>,
    return
  }
  func.func @transform_0(%arg0: i32) -> (i32, i32, i32) {
    %c0_i32 = arith.constant 0 : i32
    %c0_i32_0 = arith.constant 0 : i32
    %c0_i32_1 = arith.constant 0 : i32
    return %arg0, %c0_i32, %c0_i32_0 : i32, i32, i32
  }
  func.func @transform_1(%arg0: i32) -> (i32, i32, i32) {
    %c0_i32 = arith.constant 0 : i32
    %c0_i32_0 = arith.constant 0 : i32
    %c0_i32_1 = arith.constant 0 : i32
    %c0_i32_2 = arith.constant 0 : i32
    return %c0_i32, %c0_i32_0, %c0_i32_1 : i32, i32, i32
  }
  func.func @transform_2(%arg0: i32) -> (i32, i32) {
    %c0_i32 = arith.constant 0 : i32
    %c0_i32_0 = arith.constant 0 : i32
    %c0_i32_1 = arith.constant 0 : i32
    return %c0_i32, %c0_i32_0 : i32, i32
  }
  func.func @transform_3(%arg0: i32) -> (i32, i32) {
    %c0_i32 = arith.constant 0 : i32
    %c0_i32_0 = arith.constant 0 : i32
    %c0_i32_1 = arith.constant 0 : i32
    return %c0_i32, %c0_i32_0 : i32, i32
  }
  func.func @transform_4(%arg0: i32) -> (i32, i32, i32) {
    %c0_i32 = arith.constant 0 : i32
    %c0_i32_0 = arith.constant 0 : i32
    %c0_i32_1 = arith.constant 0 : i32
    return %arg0, %c0_i32, %c0_i32_0 : i32, i32, i32
  }
}

module attributes {stable_mosaic.version = 11 : i64} {
  func.func @_conv3x3_kernel(%arg0: i32, %arg1: memref<1x42x256xf32, #tpu.memory_space<vmem>>, %arg2: memref<9x256x256xbf16, #tpu.memory_space<vmem>>, %arg3: memref<1x256xf32, #tpu.memory_space<vmem>>, %arg4: memref<24x1xf32, #tpu.memory_space<vmem>>, %arg5: memref<1x42x256xf32, #tpu.memory_space<vmem>>, %arg6: memref<24x256xf32, #tpu.memory_space<vmem>>) attributes {dimension_semantics = [#tpu.dimension_semantics<parallel>], iteration_bounds = array<i64: 2>, scalar_prefetch = 0 : i64, scratch_operands = 1 : i64, tpu.core_type = #tpu.core_type<tc>, window_params = [{transform_indices = @transform_0, window_bounds = array<i64: 1, 42, 256>}, {pipeline_mode = #tpu.pipeline_mode<synchronous>, transform_indices = @transform_1, window_bounds = array<i64: 9, 256, 256>}, {pipeline_mode = #tpu.pipeline_mode<synchronous>, transform_indices = @transform_2, window_bounds = array<i64: 1, 256>}, {pipeline_mode = #tpu.pipeline_mode<synchronous>, transform_indices = @transform_3, window_bounds = array<i64: 24, 1>}, {transform_indices = @transform_4, window_bounds = array<i64: 1, 42, 256>}]} {
    %c0 = arith.constant 0 : index
    %c0_0 = arith.constant 0 : index
    %c0_1 = arith.constant 0 : index
    %0 = vector.load %arg2[%c0, %c0_0, %c0_1] : memref<9x256x256xbf16, #tpu.memory_space<vmem>>, vector<1x256x256xbf16>
    %1 = vector.shape_cast %0 : vector<1x256x256xbf16> to vector<256x256xbf16>
    %c0_2 = arith.constant 0 : index
    %c0_3 = arith.constant 0 : index
    %c0_4 = arith.constant 0 : index
    %2 = vector.load %arg1[%c0_2, %c0_3, %c0_4] : memref<1x42x256xf32, #tpu.memory_space<vmem>>, vector<1x24x256xf32>
    %3 = vector.shape_cast %2 : vector<1x24x256xf32> to vector<24x256xf32>
    %4 = arith.truncf %3 : vector<24x256xf32> to vector<24x256xbf16>
    %cst = arith.constant dense<0.000000e+00> : vector<24x256xf32>
    %5 = tpu.matmul %4, %1, %cst {dimension_numbers = #tpu.dot_dimension_numbers<[1], [0], [0], [1], [0, 0, 1, 1], [], []>} : vector<24x256xbf16>, vector<256x256xbf16>, vector<24x256xf32> -> vector<24x256xf32>
    %c0_5 = arith.constant 0 : index
    %c0_6 = arith.constant 0 : index
    %6 = vector.load %arg6[%c0_5, %c0_6] : memref<24x256xf32, #tpu.memory_space<vmem>>, vector<24x256xf32>
    tpu.vector_store %arg6[%c0_5, %c0_6], %5 {strides = array<i32>} : memref<24x256xf32, #tpu.memory_space<vmem>>, vector<24x256xf32>,
    %c1 = arith.constant 1 : index
    %c0_7 = arith.constant 0 : index
    %c0_8 = arith.constant 0 : index
    %7 = vector.load %arg2[%c1, %c0_7, %c0_8] : memref<9x256x256xbf16, #tpu.memory_space<vmem>>, vector<1x256x256xbf16>
    %8 = vector.shape_cast %7 : vector<1x256x256xbf16> to vector<256x256xbf16>
    %c0_9 = arith.constant 0 : index
    %c1_10 = arith.constant 1 : index
    %c0_11 = arith.constant 0 : index
    %9 = vector.load %arg1[%c0_9, %c1_10, %c0_11] : memref<1x42x256xf32, #tpu.memory_space<vmem>>, vector<1x24x256xf32>
    %10 = vector.shape_cast %9 : vector<1x24x256xf32> to vector<24x256xf32>
    %11 = arith.truncf %10 : vector<24x256xf32> to vector<24x256xbf16>
    %cst_12 = arith.constant dense<0.000000e+00> : vector<24x256xf32>
    %12 = tpu.matmul %11, %8, %cst_12 {dimension_numbers = #tpu.dot_dimension_numbers<[1], [0], [0], [1], [0, 0, 1, 1], [], []>} : vector<24x256xbf16>, vector<256x256xbf16>, vector<24x256xf32> -> vector<24x256xf32>
    %c0_13 = arith.constant 0 : index
    %c0_14 = arith.constant 0 : index
    %13 = vector.load %arg6[%c0_13, %c0_14] : memref<24x256xf32, #tpu.memory_space<vmem>>, vector<24x256xf32>
    %14 = arith.addf %13, %12 : vector<24x256xf32>
    %c0_15 = arith.constant 0 : index
    %c0_16 = arith.constant 0 : index
    %15 = vector.load %arg6[%c0_15, %c0_16] : memref<24x256xf32, #tpu.memory_space<vmem>>, vector<24x256xf32>
    tpu.vector_store %arg6[%c0_15, %c0_16], %14 {strides = array<i32>} : memref<24x256xf32, #tpu.memory_space<vmem>>, vector<24x256xf32>,
    %c2 = arith.constant 2 : index
    %c0_17 = arith.constant 0 : index
    %c0_18 = arith.constant 0 : index
    %16 = vector.load %arg2[%c2, %c0_17, %c0_18] : memref<9x256x256xbf16, #tpu.memory_space<vmem>>, vector<1x256x256xbf16>
    %17 = vector.shape_cast %16 : vector<1x256x256xbf16> to vector<256x256xbf16>
    %c0_19 = arith.constant 0 : index
    %c2_20 = arith.constant 2 : index
    %c0_21 = arith.constant 0 : index
    %18 = vector.load %arg1[%c0_19, %c2_20, %c0_21] : memref<1x42x256xf32, #tpu.memory_space<vmem>>, vector<1x24x256xf32>
    %19 = vector.shape_cast %18 : vector<1x24x256xf32> to vector<24x256xf32>
    %20 = arith.truncf %19 : vector<24x256xf32> to vector<24x256xbf16>
    %cst_22 = arith.constant dense<0.000000e+00> : vector<24x256xf32>
    %21 = tpu.matmul %20, %17, %cst_22 {dimension_numbers = #tpu.dot_dimension_numbers<[1], [0], [0], [1], [0, 0, 1, 1], [], []>} : vector<24x256xbf16>, vector<256x256xbf16>, vector<24x256xf32> -> vector<24x256xf32>
    %c0_23 = arith.constant 0 : index
    %c0_24 = arith.constant 0 : index
    %22 = vector.load %arg6[%c0_23, %c0_24] : memref<24x256xf32, #tpu.memory_space<vmem>>, vector<24x256xf32>
    %23 = arith.addf %22, %21 : vector<24x256xf32>
    %c0_25 = arith.constant 0 : index
    %c0_26 = arith.constant 0 : index
    %24 = vector.load %arg6[%c0_25, %c0_26] : memref<24x256xf32, #tpu.memory_space<vmem>>, vector<24x256xf32>
    tpu.vector_store %arg6[%c0_25, %c0_26], %23 {strides = array<i32>} : memref<24x256xf32, #tpu.memory_space<vmem>>, vector<24x256xf32>,
    %c3 = arith.constant 3 : index
    %c0_27 = arith.constant 0 : index
    %c0_28 = arith.constant 0 : index
    %25 = vector.load %arg2[%c3, %c0_27, %c0_28] : memref<9x256x256xbf16, #tpu.memory_space<vmem>>, vector<1x256x256xbf16>
    %26 = vector.shape_cast %25 : vector<1x256x256xbf16> to vector<256x256xbf16>
    %c0_29 = arith.constant 0 : index
    %c6 = arith.constant 6 : index
    %c0_30 = arith.constant 0 : index
    %27 = vector.load %arg1[%c0_29, %c6, %c0_30] : memref<1x42x256xf32, #tpu.memory_space<vmem>>, vector<1x24x256xf32>
    %28 = vector.shape_cast %27 : vector<1x24x256xf32> to vector<24x256xf32>
    %29 = arith.truncf %28 : vector<24x256xf32> to vector<24x256xbf16>
    %cst_31 = arith.constant dense<0.000000e+00> : vector<24x256xf32>
    %30 = tpu.matmul %29, %26, %cst_31 {dimension_numbers = #tpu.dot_dimension_numbers<[1], [0], [0], [1], [0, 0, 1, 1], [], []>} : vector<24x256xbf16>, vector<256x256xbf16>, vector<24x256xf32> -> vector<24x256xf32>
    %c0_32 = arith.constant 0 : index
    %c0_33 = arith.constant 0 : index
    %31 = vector.load %arg6[%c0_32, %c0_33] : memref<24x256xf32, #tpu.memory_space<vmem>>, vector<24x256xf32>
    %32 = arith.addf %31, %30 : vector<24x256xf32>
    %c0_34 = arith.constant 0 : index
    %c0_35 = arith.constant 0 : index
    %33 = vector.load %arg6[%c0_34, %c0_35] : memref<24x256xf32, #tpu.memory_space<vmem>>, vector<24x256xf32>
    tpu.vector_store %arg6[%c0_34, %c0_35], %32 {strides = array<i32>} : memref<24x256xf32, #tpu.memory_space<vmem>>, vector<24x256xf32>,
    %c4 = arith.constant 4 : index
    %c0_36 = arith.constant 0 : index
    %c0_37 = arith.constant 0 : index
    %34 = vector.load %arg2[%c4, %c0_36, %c0_37] : memref<9x256x256xbf16, #tpu.memory_space<vmem>>, vector<1x256x256xbf16>
    %35 = vector.shape_cast %34 : vector<1x256x256xbf16> to vector<256x256xbf16>
    %c0_38 = arith.constant 0 : index
    %c7 = arith.constant 7 : index
    %c0_39 = arith.constant 0 : index
    %36 = vector.load %arg1[%c0_38, %c7, %c0_39] : memref<1x42x256xf32, #tpu.memory_space<vmem>>, vector<1x24x256xf32>
    %37 = vector.shape_cast %36 : vector<1x24x256xf32> to vector<24x256xf32>
    %38 = arith.truncf %37 : vector<24x256xf32> to vector<24x256xbf16>
    %cst_40 = arith.constant dense<0.000000e+00> : vector<24x256xf32>
    %39 = tpu.matmul %38, %35, %cst_40 {dimension_numbers = #tpu.dot_dimension_numbers<[1], [0], [0], [1], [0, 0, 1, 1], [], []>} : vector<24x256xbf16>, vector<256x256xbf16>, vector<24x256xf32> -> vector<24x256xf32>
    %c0_41 = arith.constant 0 : index
    %c0_42 = arith.constant 0 : index
    %40 = vector.load %arg6[%c0_41, %c0_42] : memref<24x256xf32, #tpu.memory_space<vmem>>, vector<24x256xf32>
    %41 = arith.addf %40, %39 : vector<24x256xf32>
    %c0_43 = arith.constant 0 : index
    %c0_44 = arith.constant 0 : index
    %42 = vector.load %arg6[%c0_43, %c0_44] : memref<24x256xf32, #tpu.memory_space<vmem>>, vector<24x256xf32>
    tpu.vector_store %arg6[%c0_43, %c0_44], %41 {strides = array<i32>} : memref<24x256xf32, #tpu.memory_space<vmem>>, vector<24x256xf32>,
    %c5 = arith.constant 5 : index
    %c0_45 = arith.constant 0 : index
    %c0_46 = arith.constant 0 : index
    %43 = vector.load %arg2[%c5, %c0_45, %c0_46] : memref<9x256x256xbf16, #tpu.memory_space<vmem>>, vector<1x256x256xbf16>
    %44 = vector.shape_cast %43 : vector<1x256x256xbf16> to vector<256x256xbf16>
    %c0_47 = arith.constant 0 : index
    %c8 = arith.constant 8 : index
    %c0_48 = arith.constant 0 : index
    %45 = vector.load %arg1[%c0_47, %c8, %c0_48] : memref<1x42x256xf32, #tpu.memory_space<vmem>>, vector<1x24x256xf32>
    %46 = vector.shape_cast %45 : vector<1x24x256xf32> to vector<24x256xf32>
    %47 = arith.truncf %46 : vector<24x256xf32> to vector<24x256xbf16>
    %cst_49 = arith.constant dense<0.000000e+00> : vector<24x256xf32>
    %48 = tpu.matmul %47, %44, %cst_49 {dimension_numbers = #tpu.dot_dimension_numbers<[1], [0], [0], [1], [0, 0, 1, 1], [], []>} : vector<24x256xbf16>, vector<256x256xbf16>, vector<24x256xf32> -> vector<24x256xf32>
    %c0_50 = arith.constant 0 : index
    %c0_51 = arith.constant 0 : index
    %49 = vector.load %arg6[%c0_50, %c0_51] : memref<24x256xf32, #tpu.memory_space<vmem>>, vector<24x256xf32>
    %50 = arith.addf %49, %48 : vector<24x256xf32>
    %c0_52 = arith.constant 0 : index
    %c0_53 = arith.constant 0 : index
    %51 = vector.load %arg6[%c0_52, %c0_53] : memref<24x256xf32, #tpu.memory_space<vmem>>, vector<24x256xf32>
    tpu.vector_store %arg6[%c0_52, %c0_53], %50 {strides = array<i32>} : memref<24x256xf32, #tpu.memory_space<vmem>>, vector<24x256xf32>,
    %c6_54 = arith.constant 6 : index
    %c0_55 = arith.constant 0 : index
    %c0_56 = arith.constant 0 : index
    %52 = vector.load %arg2[%c6_54, %c0_55, %c0_56] : memref<9x256x256xbf16, #tpu.memory_space<vmem>>, vector<1x256x256xbf16>
    %53 = vector.shape_cast %52 : vector<1x256x256xbf16> to vector<256x256xbf16>
    %c0_57 = arith.constant 0 : index
    %c12 = arith.constant 12 : index
    %c0_58 = arith.constant 0 : index
    %54 = vector.load %arg1[%c0_57, %c12, %c0_58] : memref<1x42x256xf32, #tpu.memory_space<vmem>>, vector<1x24x256xf32>
    %55 = vector.shape_cast %54 : vector<1x24x256xf32> to vector<24x256xf32>
    %56 = arith.truncf %55 : vector<24x256xf32> to vector<24x256xbf16>
    %cst_59 = arith.constant dense<0.000000e+00> : vector<24x256xf32>
    %57 = tpu.matmul %56, %53, %cst_59 {dimension_numbers = #tpu.dot_dimension_numbers<[1], [0], [0], [1], [0, 0, 1, 1], [], []>} : vector<24x256xbf16>, vector<256x256xbf16>, vector<24x256xf32> -> vector<24x256xf32>
    %c0_60 = arith.constant 0 : index
    %c0_61 = arith.constant 0 : index
    %58 = vector.load %arg6[%c0_60, %c0_61] : memref<24x256xf32, #tpu.memory_space<vmem>>, vector<24x256xf32>
    %59 = arith.addf %58, %57 : vector<24x256xf32>
    %c0_62 = arith.constant 0 : index
    %c0_63 = arith.constant 0 : index
    %60 = vector.load %arg6[%c0_62, %c0_63] : memref<24x256xf32, #tpu.memory_space<vmem>>, vector<24x256xf32>
    tpu.vector_store %arg6[%c0_62, %c0_63], %59 {strides = array<i32>} : memref<24x256xf32, #tpu.memory_space<vmem>>, vector<24x256xf32>,
    %c7_64 = arith.constant 7 : index
    %c0_65 = arith.constant 0 : index
    %c0_66 = arith.constant 0 : index
    %61 = vector.load %arg2[%c7_64, %c0_65, %c0_66] : memref<9x256x256xbf16, #tpu.memory_space<vmem>>, vector<1x256x256xbf16>
    %62 = vector.shape_cast %61 : vector<1x256x256xbf16> to vector<256x256xbf16>
    %c0_67 = arith.constant 0 : index
    %c13 = arith.constant 13 : index
    %c0_68 = arith.constant 0 : index
    %63 = vector.load %arg1[%c0_67, %c13, %c0_68] : memref<1x42x256xf32, #tpu.memory_space<vmem>>, vector<1x24x256xf32>
    %64 = vector.shape_cast %63 : vector<1x24x256xf32> to vector<24x256xf32>
    %65 = arith.truncf %64 : vector<24x256xf32> to vector<24x256xbf16>
    %cst_69 = arith.constant dense<0.000000e+00> : vector<24x256xf32>
    %66 = tpu.matmul %65, %62, %cst_69 {dimension_numbers = #tpu.dot_dimension_numbers<[1], [0], [0], [1], [0, 0, 1, 1], [], []>} : vector<24x256xbf16>, vector<256x256xbf16>, vector<24x256xf32> -> vector<24x256xf32>
    %c0_70 = arith.constant 0 : index
    %c0_71 = arith.constant 0 : index
    %67 = vector.load %arg6[%c0_70, %c0_71] : memref<24x256xf32, #tpu.memory_space<vmem>>, vector<24x256xf32>
    %68 = arith.addf %67, %66 : vector<24x256xf32>
    %c0_72 = arith.constant 0 : index
    %c0_73 = arith.constant 0 : index
    %69 = vector.load %arg6[%c0_72, %c0_73] : memref<24x256xf32, #tpu.memory_space<vmem>>, vector<24x256xf32>
    tpu.vector_store %arg6[%c0_72, %c0_73], %68 {strides = array<i32>} : memref<24x256xf32, #tpu.memory_space<vmem>>, vector<24x256xf32>,
    %c8_74 = arith.constant 8 : index
    %c0_75 = arith.constant 0 : index
    %c0_76 = arith.constant 0 : index
    %70 = vector.load %arg2[%c8_74, %c0_75, %c0_76] : memref<9x256x256xbf16, #tpu.memory_space<vmem>>, vector<1x256x256xbf16>
    %71 = vector.shape_cast %70 : vector<1x256x256xbf16> to vector<256x256xbf16>
    %c0_77 = arith.constant 0 : index
    %c14 = arith.constant 14 : index
    %c0_78 = arith.constant 0 : index
    %72 = vector.load %arg1[%c0_77, %c14, %c0_78] : memref<1x42x256xf32, #tpu.memory_space<vmem>>, vector<1x24x256xf32>
    %73 = vector.shape_cast %72 : vector<1x24x256xf32> to vector<24x256xf32>
    %74 = arith.truncf %73 : vector<24x256xf32> to vector<24x256xbf16>
    %cst_79 = arith.constant dense<0.000000e+00> : vector<24x256xf32>
    %75 = tpu.matmul %74, %71, %cst_79 {dimension_numbers = #tpu.dot_dimension_numbers<[1], [0], [0], [1], [0, 0, 1, 1], [], []>} : vector<24x256xbf16>, vector<256x256xbf16>, vector<24x256xf32> -> vector<24x256xf32>
    %c0_80 = arith.constant 0 : index
    %c0_81 = arith.constant 0 : index
    %76 = vector.load %arg6[%c0_80, %c0_81] : memref<24x256xf32, #tpu.memory_space<vmem>>, vector<24x256xf32>
    %77 = arith.addf %76, %75 : vector<24x256xf32>
    %c0_82 = arith.constant 0 : index
    %c0_83 = arith.constant 0 : index
    %78 = vector.load %arg6[%c0_82, %c0_83] : memref<24x256xf32, #tpu.memory_space<vmem>>, vector<24x256xf32>
    tpu.vector_store %arg6[%c0_82, %c0_83], %77 {strides = array<i32>} : memref<24x256xf32, #tpu.memory_space<vmem>>, vector<24x256xf32>,
    %c0_84 = arith.constant 0 : index
    %c0_85 = arith.constant 0 : index
    %79 = vector.load %arg6[%c0_84, %c0_85] : memref<24x256xf32, #tpu.memory_space<vmem>>, vector<24x256xf32>
    %c0_86 = arith.constant 0 : index
    %c0_87 = arith.constant 0 : index
    %80 = vector.load %arg3[%c0_86, %c0_87] : memref<1x256xf32, #tpu.memory_space<vmem>>, vector<1x256xf32>
    %81 = vector.broadcast %80 : vector<1x256xf32> to vector<24x256xf32>
    %82 = arith.addf %79, %81 : vector<24x256xf32>
    %cst_88 = arith.constant 0.000000e+00 : f32
    %83 = vector.broadcast %cst_88 : f32 to vector<24x256xf32>
    %84 = arith.maximumf %82, %83 : vector<24x256xf32>
    %c0_89 = arith.constant 0 : index
    %c0_90 = arith.constant 0 : index
    %85 = vector.load %arg4[%c0_89, %c0_90] : memref<24x1xf32, #tpu.memory_space<vmem>>, vector<24x1xf32>
    %86 = vector.broadcast %85 : vector<24x1xf32> to vector<24x256xf32>
    %87 = arith.mulf %84, %86 : vector<24x256xf32>
    %cst_91 = arith.constant 0.000000e+00 : f32
    %88 = vector.broadcast %cst_91 : f32 to vector<42x256xf32>
    %c0_92 = arith.constant 0 : index
    %c0_93 = arith.constant 0 : index
    %c0_94 = arith.constant 0 : index
    %89 = vector.load %arg5[%c0_92, %c0_93, %c0_94] : memref<1x42x256xf32, #tpu.memory_space<vmem>>, vector<1x42x256xf32>
    %90 = vector.shape_cast %89 : vector<1x42x256xf32> to vector<42x256xf32>
    %91 = vector.shape_cast %88 : vector<42x256xf32> to vector<1x42x256xf32>
    tpu.vector_store %arg5[%c0_92, %c0_93, %c0_94], %91 {strides = array<i32>} : memref<1x42x256xf32, #tpu.memory_space<vmem>>, vector<1x42x256xf32>,
    %c0_95 = arith.constant 0 : index
    %c7_96 = arith.constant 7 : index
    %c0_97 = arith.constant 0 : index
    %92 = vector.load %arg5[%c0_95, %c7_96, %c0_97] : memref<1x42x256xf32, #tpu.memory_space<vmem>>, vector<1x24x256xf32>
    %93 = vector.shape_cast %92 : vector<1x24x256xf32> to vector<24x256xf32>
    %94 = vector.shape_cast %87 : vector<24x256xf32> to vector<1x24x256xf32>
    tpu.vector_store %arg5[%c0_95, %c7_96, %c0_97], %94 {strides = array<i32>} : memref<1x42x256xf32, #tpu.memory_space<vmem>>, vector<1x24x256xf32>,
    return
  }
  func.func @transform_0(%arg0: i32) -> (i32, i32, i32) {
    %c0_i32 = arith.constant 0 : i32
    %c0_i32_0 = arith.constant 0 : i32
    %c0_i32_1 = arith.constant 0 : i32
    return %arg0, %c0_i32, %c0_i32_0 : i32, i32, i32
  }
  func.func @transform_1(%arg0: i32) -> (i32, i32, i32) {
    %c0_i32 = arith.constant 0 : i32
    %c0_i32_0 = arith.constant 0 : i32
    %c0_i32_1 = arith.constant 0 : i32
    %c0_i32_2 = arith.constant 0 : i32
    return %c0_i32, %c0_i32_0, %c0_i32_1 : i32, i32, i32
  }
  func.func @transform_2(%arg0: i32) -> (i32, i32) {
    %c0_i32 = arith.constant 0 : i32
    %c0_i32_0 = arith.constant 0 : i32
    %c0_i32_1 = arith.constant 0 : i32
    return %c0_i32, %c0_i32_0 : i32, i32
  }
  func.func @transform_3(%arg0: i32) -> (i32, i32) {
    %c0_i32 = arith.constant 0 : i32
    %c0_i32_0 = arith.constant 0 : i32
    %c0_i32_1 = arith.constant 0 : i32
    return %c0_i32, %c0_i32_0 : i32, i32
  }
  func.func @transform_4(%arg0: i32) -> (i32, i32, i32) {
    %c0_i32 = arith.constant 0 : i32
    %c0_i32_0 = arith.constant 0 : i32
    %c0_i32_1 = arith.constant 0 : i32
    return %arg0, %c0_i32, %c0_i32_0 : i32, i32, i32
  }
}

</mosaic_0001>

<bundles_post_ra>
// kernel: tower_forward.6
= control target key start
LH: loop header
LB: loop body
LE: loop exit
PB: predicated region body
PF: predicated region fallthrough
CT: control target
= control target key end

     0   :  { %8 = vsyncpa [#allocation3], 0  ;;  %s632_s0 = inlined_call_operand.vmem [shape: bf16[128,12], index: 0, kind: input, shape index: {}]   ;;  %s633_s1 = inlined_call_operand.hbm [shape: bf16[12,256], index: 1, kind: input, shape index: {}]   ;;  %s634_s2 = inlined_call_operand.hbm [shape: f32[1,256], index: 2, kind: input, shape index: {}]   ;;  %s635_s3 = inlined_call_operand.vmem [shape: f32[128,256], index: 3, kind: output, shape index: {}]  }
   0x1   :  { %9 = vsyncpa [#allocation5], 0  ;;  %s419_s12 = smov [#allocation2]   ;;  %s371_s16 = scalar_lea.hbm %s633_s1, 256 }
   0x2   :  { %s17_s13 = sshll.u32 %s419_s12, 4  ;;  %p372_p0 = scmp.ne.s32.totalorder %s633_s1, %s371_s16  ;;  %s18_s13 = int_to_ptr.vmem [resolvable:$true] %s17_s13 }
   0x3   :  { %p375_p1 = scmp.lt.u32.totalorder %s371_s16, %s633_s1 }
   0x5   :  { %p377_p2 = pnand %p375_p1, %p372_p0 }
   0x7   :  { %380 = shalt.err (!%p377_p2)
}
   0x8   :  { %s381_s21 = scalar_lea.vmem %s18_s13, 256  ;;  %p386_p4 = scmp.lt.s32.totalorder %s18_s13, %s18_s13 }
   0x9   :  { %p382_p3 = scmp.ne.s32.totalorder %s18_s13, %s381_s21  ;;  %p387_p5 = scmp.lt.s32.totalorder %s381_s21, %s381_s21 }
   0xb   :  { %p388_p6 = por %p387_p5, %p386_p4 }
   0xd   :  { %p389_p7 = pnand %p388_p6, %p382_p3 }
   0xf   :  { %392 = shalt.err (!%p389_p7)
}
  0x10   :  { %s420_s22 = smov 128   ;;  %s421_s23 = smov 8  }
  0x11   :  { %23 = dma.hbm_to_vmem [thread:$0]  %s633_s1, 256, %s18_s13, [#allocation3], %s420_s22, %s420_s22, %s421_s23  }
  0x12   :  { %s422_s26 = smov [#allocation4]   ;;  %s393_s30 = scalar_lea.hbm %s634_s2, 32 }
  0x13   :  { %s30_s27 = sshll.u32 %s422_s26, 4  ;;  %p394_p8 = scmp.ne.s32.totalorder %s634_s2, %s393_s30  ;;  %s31_s27 = int_to_ptr.vmem [resolvable:$true] %s30_s27 }
  0x14   :  { %p397_p9 = scmp.lt.u32.totalorder %s393_s30, %s634_s2 }
  0x16   :  { %p399_p10 = pnand %p397_p9, %p394_p8 }
  0x18   :  { %402 = shalt.err (!%p399_p10)
}
  0x19   :  { %s403_s8 = scalar_lea.vmem %s31_s27, 32  ;;  %p408_p12 = scmp.lt.s32.totalorder %s31_s27, %s31_s27 }
  0x1a   :  { %p404_p11 = scmp.ne.s32.totalorder %s31_s27, %s403_s8  ;;  %p409_p13 = scmp.lt.s32.totalorder %s403_s8, %s403_s8 }
  0x1c   :  { %p410_p0 = por %p409_p13, %p408_p12 }
  0x1e   :  { %p411_p1 = pnand %p410_p0, %p404_p11 }
  0x20   :  { %414 = shalt.err (!%p411_p1)
}
  0x21   :  { %33 = dma.hbm_to_vmem [thread:$0]  %s634_s2, 32, %s31_s27, [#allocation5]  }
  0x22   :  { %415 = dma.done.wait [#allocation3], 256  }
  0x23   :  { %416 = vsyncadd [#allocation3], 4294967040 }
  0x24   :  { %417 = dma.done.wait [#allocation5], 32  }
  0x25   :  { %418 = vsyncadd [#allocation5], 4294967264  ;;  %v423_v0 = vmov 0   ;;  %vm144_vm0 = vcmask 1045504   ;;  %v363_v3 = vld [vmem:[%s632_s0] sm:$0xff]   ;;  %vm119_vm1 = vcmask 97280   ;;  %v61_v12 = vlaneseq }
  0x26   :  { %183 = vmatprep.mubr.bf16.mxu0 %v423_v0  ;;  %223 = vmatprep.mubr.bf16.mxu1 %v423_v0  ;;  %v360_v1 = vld [vmem:[#allocation2 + $0x4] ss:$8 sps:$4 sm:$0x3f]   ;;  %v362_v2 = vld [vmem:[#allocation2] ss:$8 sps:$4 sm:$0x3f]  }
  0x27   :  { %344 = vmatprep.subr.msk.bf16.mxu0 %vm144_vm0, %v360_v1  ;;  %353 = vmatprep.subr.msk.bf16.mxu1 %vm144_vm0, %v360_v1  ;;  %v146_v4 = vsel %vm144_vm0, %v362_v2, 0  ;;  %v364_v5 = vld [vmem:[%s632_s0 + $0x20] sm:$0xff]   ;;  %v365_v6 = vld [vmem:[%s632_s0 + $0x8] sm:$0xff]   ;;  %v367_v8 = vld [vmem:[%s632_s0 + $0x10] sm:$0xff]   ;;  %v62_v13 = vshrl.u32 %v61_v12, 7 }
  0x28   :  { %152 = vmatpush1.bf16.msra.mxu0 %v146_v4  ;;  %354 = vmatpush1.bf16.msra.mxu1 %v146_v4  ;;  %v366_v7 = vld [vmem:[%s632_s0 + $0x28] sm:$0xff]   ;;  %v368_v9 = vld [vmem:[%s632_s0 + $0x30] sm:$0xff]   ;;  %v369_v10 = vld [vmem:[%s632_s0 + $0x18] sm:$0xff]  }
  0x29   :  { %v370_v11 = vld [vmem:[%s632_s0 + $0x38] sm:$0xff]   ;;  %v63_v14 = vsub.s32 0, %v62_v13  ;;  %v59_v15 = vld [vmem:[#allocation4] sm:$0x3]  ;;  %v67_v16 = vsub.s32 1, %v62_v13 }
  0x2b   :  { %345 = vmatmul.mubr.msk.bf16.vlgmr.msra.gmra.mrb[0].mxu0 %vm119_vm1, %v363_v3  ;;  %349 = vmatmul.mubr.msk.bf16.vlgmr.msra.gmra.mrb[0].mxu1 %vm119_vm1, %v364_v5  ;;  %v500_v17 = vrot.slane %v59_v15, %v63_v14  ;;  %v502_v18 = vrot.slane %v59_v15, %v67_v16 }
  0x2c   :  { %193 = vmatprep.mubr.bf16.mxu0 %v423_v0  ;;  %233 = vmatprep.mubr.bf16.mxu1 %v423_v0 }
  0x33   :  { %346 = vmatmul.mubr.msk.bf16.gmra.mrb[4].mxu0 %vm119_vm1, %v365_v6  ;;  %350 = vmatmul.mubr.msk.bf16.gmra.mrb[4].mxu1 %vm119_vm1, %v366_v7 }
  0x34   :  { %203 = vmatprep.mubr.bf16.mxu0 %v423_v0  ;;  %243 = vmatprep.mubr.bf16.mxu1 %v423_v0 }
  0x3b   :  { %347 = vmatmul.mubr.msk.bf16.gmra.mrb[8].mxu0 %vm119_vm1, %v367_v8  ;;  %351 = vmatmul.mubr.msk.bf16.gmra.mrb[8].mxu1 %vm119_vm1, %v368_v9 }
  0x3c   :  { %213 = vmatprep.mubr.bf16.mxu0 %v423_v0  ;;  %253 = vmatprep.mubr.bf16.mxu1 %v423_v0 }
  0x43   :  { %348 = vmatmul.mubr.msk.bf16.gmra.mrb[12].mxu0 %vm119_vm1, %v369_v10  ;;  %352 = vmatmul.mubr.msk.bf16.gmra.mrb[12].mxu1 %vm119_vm1, %v370_v11 }
  0xfe   :  { %v185_v19 = vpop.f32.mrb[0].mxu0  ;;  %v225_v20 = vpop.f32.mrb[0].mxu1 }
  0xff   :  { %v186_v21 = vadd.f32 %v185_v19, %v500_v17  ;;  %v226_v22 = vadd.f32 %v225_v20, %v500_v17  ;;  %v187_v23 = vpop.f32.mrb[1].mxu0  ;;  %v227_v24 = vpop.f32.mrb[1].mxu1 }
 0x100   :  { %v188_v25 = vadd.f32 %v187_v23, %v502_v18  ;;  %v228_v26 = vadd.f32 %v227_v24, %v502_v18  ;;  %v189_v27 = vpop.f32.mrb[2].mxu0  ;;  %v229_v28 = vpop.f32.mrb[2].mxu1 }
 0x101   :  { %v264_v29 = vmax.f32 %v186_v21, 0.0  ;;  %v280_v30 = vmax.f32 %v226_v22, 0.0  ;;  %v190_v31 = vadd.f32 %v189_v27, %v500_v17  ;;  %v230_v32 = vadd.f32 %v229_v28, %v500_v17  ;;  %v191_v33 = vpop.f32.mrb[3].mxu0  ;;  %v231_v34 = vpop.f32.mrb[3].mxu1 }
 0x102   :  { %v265_v35 = vmax.f32 %v188_v25, 0.0  ;;  %v281_v36 = vmax.f32 %v228_v26, 0.0  ;;  %v192_v37 = vadd.f32 %v191_v33, %v502_v18  ;;  %v232_v38 = vadd.f32 %v231_v34, %v502_v18 }
 0x103   :  { %296 = vst [vmem:[%s635_s3] sm:$0xff] %v264_v29  ;;  %312 = vst [vmem:[%s635_s3 + $0x80] sm:$0xff] %v280_v30  ;;  %v266_v39 = vmax.f32 %v190_v31, 0.0  ;;  %v282_v40 = vmax.f32 %v230_v32, 0.0 }
 0x104   :  { %297 = vst [vmem:[%s635_s3 + $0x8] sm:$0xff] %v265_v35  ;;  %313 = vst [vmem:[%s635_s3 + $0x88] sm:$0xff] %v281_v36  ;;  %v267_v41 = vmax.f32 %v192_v37, 0.0  ;;  %v283_v42 = vmax.f32 %v232_v38, 0.0 }
 0x105   :  { %298 = vst [vmem:[%s635_s3 + $0x10] sm:$0xff] %v266_v39  ;;  %314 = vst [vmem:[%s635_s3 + $0x90] sm:$0xff] %v282_v40 }
 0x106   :  { %299 = vst [vmem:[%s635_s3 + $0x18] sm:$0xff] %v267_v41  ;;  %315 = vst [vmem:[%s635_s3 + $0x98] sm:$0xff] %v283_v42  ;;  %v195_v43 = vpop.f32.mrb[4].mxu0  ;;  %v235_v44 = vpop.f32.mrb[4].mxu1 }
 0x107   :  { %v196_v45 = vadd.f32 %v195_v43, %v500_v17  ;;  %v236_v46 = vadd.f32 %v235_v44, %v500_v17  ;;  %v197_v47 = vpop.f32.mrb[5].mxu0  ;;  %v237_v48 = vpop.f32.mrb[5].mxu1 }
 0x108   :  { %v198_v49 = vadd.f32 %v197_v47, %v502_v18  ;;  %v238_v50 = vadd.f32 %v237_v48, %v502_v18  ;;  %v199_v51 = vpop.f32.mrb[6].mxu0  ;;  %v239_v52 = vpop.f32.mrb[6].mxu1 }
 0x109   :  { %v268_v53 = vmax.f32 %v196_v45, 0.0  ;;  %v284_v54 = vmax.f32 %v236_v46, 0.0  ;;  %v200_v55 = vadd.f32 %v199_v51, %v500_v17  ;;  %v240_v56 = vadd.f32 %v239_v52, %v500_v17  ;;  %v201_v57 = vpop.f32.mrb[7].mxu0  ;;  %v241_v58 = vpop.f32.mrb[7].mxu1 }
 0x10a   :  { %v269_v59 = vmax.f32 %v198_v49, 0.0  ;;  %v285_v60 = vmax.f32 %v238_v50, 0.0  ;;  %v202_v61 = vadd.f32 %v201_v57, %v502_v18  ;;  %v242_v62 = vadd.f32 %v241_v58, %v502_v18 }
 0x10b   :  { %300 = vst [vmem:[%s635_s3 + $0x20] sm:$0xff] %v268_v53  ;;  %316 = vst [vmem:[%s635_s3 + $0xa0] sm:$0xff] %v284_v54  ;;  %v270_v63 = vmax.f32 %v200_v55, 0.0  ;;  %v286_v0 = vmax.f32 %v240_v56, 0.0 }
 0x10c   :  { %301 = vst [vmem:[%s635_s3 + $0x28] sm:$0xff] %v269_v59  ;;  %317 = vst [vmem:[%s635_s3 + $0xa8] sm:$0xff] %v285_v60  ;;  %v271_v1 = vmax.f32 %v202_v61, 0.0  ;;  %v287_v2 = vmax.f32 %v242_v62, 0.0 }
 0x10d   :  { %302 = vst [vmem:[%s635_s3 + $0x30] sm:$0xff] %v270_v63  ;;  %318 = vst [vmem:[%s635_s3 + $0xb0] sm:$0xff] %v286_v0 }
 0x10e   :  { %303 = vst [vmem:[%s635_s3 + $0x38] sm:$0xff] %v271_v1  ;;  %319 = vst [vmem:[%s635_s3 + $0xb8] sm:$0xff] %v287_v2  ;;  %v205_v3 = vpop.f32.mrb[8].mxu0  ;;  %v245_v4 = vpop.f32.mrb[8].mxu1 }
 0x10f   :  { %v206_v5 = vadd.f32 %v205_v3, %v500_v17  ;;  %v246_v6 = vadd.f32 %v245_v4, %v500_v17  ;;  %v207_v7 = vpop.f32.mrb[9].mxu0  ;;  %v247_v8 = vpop.f32.mrb[9].mxu1 }
 0x110   :  { %v208_v9 = vadd.f32 %v207_v7, %v502_v18  ;;  %v248_v10 = vadd.f32 %v247_v8, %v502_v18  ;;  %v209_v11 = vpop.f32.mrb[10].mxu0  ;;  %v249_v12 = vpop.f32.mrb[10].mxu1 }
 0x111   :  { %v272_v13 = vmax.f32 %v206_v5, 0.0  ;;  %v288_v14 = vmax.f32 %v246_v6, 0.0  ;;  %v210_v15 = vadd.f32 %v209_v11, %v500_v17  ;;  %v250_v16 = vadd.f32 %v249_v12, %v500_v17  ;;  %v211_v19 = vpop.f32.mrb[11].mxu0  ;;  %v251_v20 = vpop.f32.mrb[11].mxu1 }
 0x112   :  { %v273_v21 = vmax.f32 %v208_v9, 0.0  ;;  %v289_v22 = vmax.f32 %v248_v10, 0.0  ;;  %v212_v23 = vadd.f32 %v211_v19, %v502_v18  ;;  %v252_v24 = vadd.f32 %v251_v20, %v502_v18 }
 0x113   :  { %304 = vst [vmem:[%s635_s3 + $0x40] sm:$0xff] %v272_v13  ;;  %320 = vst [vmem:[%s635_s3 + $0xc0] sm:$0xff] %v288_v14  ;;  %v274_v25 = vmax.f32 %v210_v15, 0.0  ;;  %v290_v26 = vmax.f32 %v250_v16, 0.0 }
 0x114   :  { %305 = vst [vmem:[%s635_s3 + $0x48] sm:$0xff] %v273_v21  ;;  %321 = vst [vmem:[%s635_s3 + $0xc8] sm:$0xff] %v289_v22  ;;  %v275_v27 = vmax.f32 %v212_v23, 0.0  ;;  %v291_v28 = vmax.f32 %v252_v24, 0.0 }
 0x115   :  { %306 = vst [vmem:[%s635_s3 + $0x50] sm:$0xff] %v274_v25  ;;  %322 = vst [vmem:[%s635_s3 + $0xd0] sm:$0xff] %v290_v26 }
 0x116   :  { %307 = vst [vmem:[%s635_s3 + $0x58] sm:$0xff] %v275_v27  ;;  %323 = vst [vmem:[%s635_s3 + $0xd8] sm:$0xff] %v291_v28  ;;  %v215_v29 = vpop.f32.mrb[12].mxu0  ;;  %v255_v30 = vpop.f32.mrb[12].mxu1 }
 0x117   :  { %v216_v31 = vadd.f32 %v215_v29, %v500_v17  ;;  %v256_v32 = vadd.f32 %v255_v30, %v500_v17  ;;  %v217_v33 = vpop.f32.mrb[13].mxu0  ;;  %v257_v34 = vpop.f32.mrb[13].mxu1 }
 0x118   :  { %v218_v35 = vadd.f32 %v217_v33, %v502_v18  ;;  %v258_v36 = vadd.f32 %v257_v34, %v502_v18  ;;  %v219_v37 = vpop.f32.mrb[14].mxu0  ;;  %v259_v38 = vpop.f32.mrb[14].mxu1 }
 0x119   :  { %v276_v39 = vmax.f32 %v216_v31, 0.0  ;;  %v292_v40 = vmax.f32 %v256_v32, 0.0  ;;  %v220_v41 = vadd.f32 %v219_v37, %v500_v17  ;;  %v260_v42 = vadd.f32 %v259_v38, %v500_v17  ;;  %v221_v43 = vpop.f32.mrb[15].mxu0  ;;  %v261_v44 = vpop.f32.mrb[15].mxu1 }
 0x11a   :  { %v277_v45 = vmax.f32 %v218_v35, 0.0  ;;  %v293_v46 = vmax.f32 %v258_v36, 0.0  ;;  %v222_v47 = vadd.f32 %v221_v43, %v502_v18  ;;  %v262_v48 = vadd.f32 %v261_v44, %v502_v18 }
 0x11b   :  { %308 = vst [vmem:[%s635_s3 + $0x60] sm:$0xff] %v276_v39  ;;  %324 = vst [vmem:[%s635_s3 + $0xe0] sm:$0xff] %v292_v40  ;;  %v278_v49 = vmax.f32 %v220_v41, 0.0  ;;  %v294_v50 = vmax.f32 %v260_v42, 0.0 }
 0x11c   :  { %309 = vst [vmem:[%s635_s3 + $0x68] sm:$0xff] %v277_v45  ;;  %325 = vst [vmem:[%s635_s3 + $0xe8] sm:$0xff] %v293_v46  ;;  %v279_v17 = vmax.f32 %v222_v47, 0.0  ;;  %v295_v18 = vmax.f32 %v262_v48, 0.0 }
 0x11d   :  { %310 = vst [vmem:[%s635_s3 + $0x70] sm:$0xff] %v278_v49  ;;  %326 = vst [vmem:[%s635_s3 + $0xf0] sm:$0xff] %v294_v50 }
 0x11e   :  { %311 = vst [vmem:[%s635_s3 + $0x78] sm:$0xff] %v279_v17  ;;  %327 = vst [vmem:[%s635_s3 + $0xf8] sm:$0xff] %v295_v18 }
 0x11f   :  { %332 = vsyncpa [#allocation3], 1 }
 0x120   :  { %333 = vsyncpa [#allocation5], 1 }

// kernel: tower_forward.8
= control target key start
LH: loop header
LB: loop body
LE: loop exit
PB: predicated region body
PF: predicated region fallthrough
CT: control target
= control target key end

     0   :  { %s1043_s1 = inlined_call_operand.vmem [shape: bf16[512,256], index: 1, kind: input, shape index: {}]   ;;  %s1044_s0 = inlined_call_operand.vmem [shape: bf16[32,512], index: 0, kind: input, shape index: {}]   ;;  %s1045_s2 = inlined_call_operand.vmem [shape: f32[1,256], index: 2, kind: input, shape index: {}]   ;;  %s1046_s3 = inlined_call_operand.vmem [shape: f32[32,256], index: 3, kind: output, shape index: {}]  }
   0x1   :  { %v672_v0 = vld [vmem:[%s1043_s1 + $0x4] ss:$8 sps:$4 sm:$0xff]   ;;  %v676_v2 = vld [vmem:[%s1043_s1] ss:$8 sps:$4 sm:$0xff]   ;;  %v678_v4 = vld [vmem:[%s1043_s1 + $0x14] ss:$8 sps:$4 sm:$0xff]  }
   0x2   :  { %v674_v1 = vld [vmem:[%s1043_s1 + $0x104] ss:$8 sps:$4 sm:$0xff]   ;;  %458 = vmatprep.subr.bf16.mxu1 %v672_v0  ;;  %v677_v3 = vld [vmem:[%s1043_s1 + $0x100] ss:$8 sps:$4 sm:$0xff]   ;;  %v680_v5 = vld [vmem:[%s1043_s1 + $0x114] ss:$8 sps:$4 sm:$0xff]  }
   0x3   :  { %511 = vmatprep.subr.bf16.mxu0 %v674_v1  ;;  %459 = vmatpush1.bf16.msra.mxu1 %v676_v2  ;;  %v682_v6 = vld [vmem:[%s1043_s1 + $0x10] ss:$8 sps:$4 sm:$0xff]   ;;  %v684_v8 = vld [vmem:[%s1043_s1 + $0x24] ss:$8 sps:$4 sm:$0xff]   ;;  %v688_v10 = vld [vmem:[%s1043_s1 + $0x20] ss:$8 sps:$4 sm:$0xff]  }
   0x4   :  { %512 = vmatpush1.bf16.msra.mxu0 %v677_v3  ;;  %460 = vmatprep.subr.bf16.mxu1 %v678_v4  ;;  %v683_v7 = vld [vmem:[%s1043_s1 + $0x110] ss:$8 sps:$4 sm:$0xff]   ;;  %v686_v9 = vld [vmem:[%s1043_s1 + $0x124] ss:$8 sps:$4 sm:$0xff]   ;;  %v689_v11 = vld [vmem:[%s1043_s1 + $0x120] ss:$8 sps:$4 sm:$0xff]  }
   0x5   :  { %513 = vmatprep.subr.bf16.mxu0 %v680_v5  ;;  %v690_v12 = vld [vmem:[%s1043_s1 + $0x34] ss:$8 sps:$4 sm:$0xff]   ;;  %v694_v14 = vld [vmem:[%s1043_s1 + $0x30] ss:$8 sps:$4 sm:$0xff]   ;;  %v696_v16 = vld [vmem:[%s1043_s1 + $0x44] ss:$8 sps:$4 sm:$0xff]  }
   0x6   :  { %v692_v13 = vld [vmem:[%s1043_s1 + $0x134] ss:$8 sps:$4 sm:$0xff]   ;;  %v695_v15 = vld [vmem:[%s1043_s1 + $0x130] ss:$8 sps:$4 sm:$0xff]   ;;  %v698_v17 = vld [vmem:[%s1043_s1 + $0x144] ss:$8 sps:$4 sm:$0xff]  }
   0x7   :  { %461 = vmatpush1.bf16.msra.mxu1 %v682_v6  ;;  %v700_v18 = vld [vmem:[%s1043_s1 + $0x40] ss:$8 sps:$4 sm:$0xff]   ;;  %v702_v20 = vld [vmem:[%s1043_s1 + $0x54] ss:$8 sps:$4 sm:$0xff]   ;;  %v706_v22 = vld [vmem:[%s1043_s1 + $0x50] ss:$8 sps:$4 sm:$0xff]  }
   0x8   :  { %514 = vmatpush1.bf16.msra.mxu0 %v683_v7  ;;  %462 = vmatprep.subr.bf16.mxu1 %v684_v8  ;;  %v701_v19 = vld [vmem:[%s1043_s1 + $0x140] ss:$8 sps:$4 sm:$0xff]   ;;  %v704_v21 = vld [vmem:[%s1043_s1 + $0x154] ss:$8 sps:$4 sm:$0xff]   ;;  %v707_v23 = vld [vmem:[%s1043_s1 + $0x150] ss:$8 sps:$4 sm:$0xff]   ;;  %v88_v8 = vlaneseq }
   0x9   :  { %515 = vmatprep.subr.bf16.mxu0 %v686_v9  ;;  %v708_v24 = vld [vmem:[%s1043_s1 + $0x64] ss:$8 sps:$4 sm:$0xff]   ;;  %v712_v26 = vld [vmem:[%s1043_s1 + $0x60] ss:$8 sps:$4 sm:$0xff]   ;;  %v714_v28 = vld [vmem:[%s1043_s1 + $0x74] ss:$8 sps:$4 sm:$0xff]  }
   0xa   :  { %v710_v25 = vld [vmem:[%s1043_s1 + $0x164] ss:$8 sps:$4 sm:$0xff]   ;;  %v713_v27 = vld [vmem:[%s1043_s1 + $0x160] ss:$8 sps:$4 sm:$0xff]   ;;  %v716_v29 = vld [vmem:[%s1043_s1 + $0x174] ss:$8 sps:$4 sm:$0xff]  }
   0xb   :  { %463 = vmatpush1.bf16.msra.mxu1 %v688_v10  ;;  %v718_v30 = vld [vmem:[%s1043_s1 + $0x70] ss:$8 sps:$4 sm:$0xff]   ;;  %v720_v32 = vld [vmem:[%s1043_s1 + $0x84] ss:$8 sps:$4 sm:$0xff]   ;;  %v724_v34 = vld [vmem:[%s1043_s1 + $0x80] ss:$8 sps:$4 sm:$0xff]  }
   0xc   :  { %516 = vmatpush1.bf16.msra.mxu0 %v689_v11  ;;  %464 = vmatprep.subr.bf16.mxu1 %v690_v12  ;;  %v719_v31 = vld [vmem:[%s1043_s1 + $0x170] ss:$8 sps:$4 sm:$0xff]   ;;  %v722_v33 = vld [vmem:[%s1043_s1 + $0x184] ss:$8 sps:$4 sm:$0xff]   ;;  %v725_v35 = vld [vmem:[%s1043_s1 + $0x180] ss:$8 sps:$4 sm:$0xff]  }
   0xd   :  { %517 = vmatprep.subr.bf16.mxu0 %v692_v13  ;;  %v726_v36 = vld [vmem:[%s1043_s1 + $0x94] ss:$8 sps:$4 sm:$0xff]   ;;  %v730_v38 = vld [vmem:[%s1043_s1 + $0x90] ss:$8 sps:$4 sm:$0xff]   ;;  %v732_v40 = vld [vmem:[%s1043_s1 + $0xa4] ss:$8 sps:$4 sm:$0xff]  }
   0xe   :  { %v728_v37 = vld [vmem:[%s1043_s1 + $0x194] ss:$8 sps:$4 sm:$0xff]   ;;  %v731_v39 = vld [vmem:[%s1043_s1 + $0x190] ss:$8 sps:$4 sm:$0xff]   ;;  %v734_v41 = vld [vmem:[%s1043_s1 + $0x1a4] ss:$8 sps:$4 sm:$0xff]  }
   0xf   :  { %465 = vmatpush1.bf16.msra.mxu1 %v694_v14  ;;  %v736_v42 = vld [vmem:[%s1043_s1 + $0xa0] ss:$8 sps:$4 sm:$0xff]   ;;  %v738_v44 = vld [vmem:[%s1043_s1 + $0xb4] ss:$8 sps:$4 sm:$0xff]   ;;  %v742_v46 = vld [vmem:[%s1043_s1 + $0xb0] ss:$8 sps:$4 sm:$0xff]  }
  0x10   :  { %518 = vmatpush1.bf16.msra.mxu0 %v695_v15  ;;  %466 = vmatprep.subr.bf16.mxu1 %v696_v16  ;;  %v737_v43 = vld [vmem:[%s1043_s1 + $0x1a0] ss:$8 sps:$4 sm:$0xff]   ;;  %v740_v45 = vld [vmem:[%s1043_s1 + $0x1b4] ss:$8 sps:$4 sm:$0xff]   ;;  %v743_v47 = vld [vmem:[%s1043_s1 + $0x1b0] ss:$8 sps:$4 sm:$0xff]  }
  0x11   :  { %519 = vmatprep.subr.bf16.mxu0 %v698_v17  ;;  %v744_v48 = vld [vmem:[%s1043_s1 + $0xc4] ss:$8 sps:$4 sm:$0xff]   ;;  %v748_v52 = vld [vmem:[%s1043_s1 + $0xc0] ss:$8 sps:$4 sm:$0xff]   ;;  %v750_v54 = vld [vmem:[%s1043_s1 + $0xd4] ss:$8 sps:$4 sm:$0xff]  }
  0x12   :  { %v770_v49 = vld [vmem:[%s1044_s0 + $0x4] ss:$16 sps:$4 sm:$0xff]   ;;  %v773_v51 = vld [vmem:[%s1044_s0 + $0xc] ss:$16 sps:$4 sm:$0xff]   ;;  %v749_v53 = vld [vmem:[%s1043_s1 + $0x1c0] ss:$8 sps:$4 sm:$0xff]  }
  0x13   :  { %467 = vmatpush1.bf16.msra.mxu1 %v700_v18  ;;  %v746_v50 = vld [vmem:[%s1043_s1 + $0x1c4] ss:$8 sps:$4 sm:$0xff]   ;;  %490 = vmatprep.mubr.bf16.mxu1 %v770_v49  ;;  %v752_v55 = vld [vmem:[%s1043_s1 + $0x1d4] ss:$8 sps:$4 sm:$0xff]   ;;  %v754_v56 = vld [vmem:[%s1043_s1 + $0xd0] ss:$8 sps:$4 sm:$0xff]  }
  0x14   :  { %520 = vmatpush1.bf16.msra.mxu0 %v701_v19  ;;  %468 = vmatprep.subr.bf16.mxu1 %v702_v20  ;;  %v755_v57 = vld [vmem:[%s1043_s1 + $0x1d0] ss:$8 sps:$4 sm:$0xff]   ;;  %v756_v58 = vld [vmem:[%s1043_s1 + $0xe4] ss:$8 sps:$4 sm:$0xff]   ;;  %v760_v60 = vld [vmem:[%s1043_s1 + $0xe0] ss:$8 sps:$4 sm:$0xff]  }
  0x15   :  { %521 = vmatprep.subr.bf16.mxu0 %v704_v21  ;;  %543 = vmatprep.mubr.bf16.mxu0 %v773_v51  ;;  %v758_v59 = vld [vmem:[%s1043_s1 + $0x1e4] ss:$8 sps:$4 sm:$0xff]   ;;  %v761_v61 = vld [vmem:[%s1043_s1 + $0x1e0] ss:$8 sps:$4 sm:$0xff]   ;;  %v762_v62 = vld [vmem:[%s1043_s1 + $0xf4] ss:$8 sps:$4 sm:$0xff]  }
  0x16   :  { %v764_v63 = vld [vmem:[%s1043_s1 + $0x1f4] ss:$8 sps:$4 sm:$0xff]   ;;  %v766_v0 = vld [vmem:[%s1043_s1 + $0xf0] ss:$8 sps:$4 sm:$0xff]   ;;  %v89_v9 = vshrl.u32 %v88_v8, 7 }
  0x17   :  { %469 = vmatpush1.bf16.msra.mxu1 %v706_v22  ;;  %v767_v1 = vld [vmem:[%s1043_s1 + $0x1f0] ss:$8 sps:$4 sm:$0xff]   ;;  %v774_v4 = vld [vmem:[%s1044_s0 + $0x24] ss:$16 sps:$4 sm:$0xff]   ;;  %v776_v5 = vld [vmem:[%s1044_s0 + $0x2c] ss:$16 sps:$4 sm:$0xff]  }
  0x18   :  { %522 = vmatpush1.bf16.msra.mxu0 %v707_v23  ;;  %470 = vmatprep.subr.bf16.mxu1 %v708_v24  ;;  %v768_v2 = vld [vmem:[%s1044_s0] ss:$16 sps:$4 sm:$0xff]   ;;  %v771_v3 = vld [vmem:[%s1044_s0 + $0x8] ss:$16 sps:$4 sm:$0xff]   ;;  %v90_v10 = vsub.s32 0, %v89_v9  ;;  %v94_v12 = vsub.s32 1, %v89_v9 }
  0x19   :  { %523 = vmatprep.subr.bf16.mxu0 %v710_v25  ;;  %v778_v6 = vld [vmem:[%s1044_s0 + $0x20] ss:$16 sps:$4 sm:$0xff]   ;;  %v779_v7 = vld [vmem:[%s1044_s0 + $0x28] ss:$16 sps:$4 sm:$0xff]  }
  0x1a   :  { %v86_v11 = vld [vmem:[%s1045_s2] sm:$0x3] }
  0x1b   :  { %471 = vmatpush1.bf16.msra.mxu1 %v712_v26  ;;  %v91_v13 = vrot.slane %v86_v11, %v90_v10  ;;  %v95_v14 = vrot.slane %v86_v11, %v94_v12 }
  0x1c   :  { %524 = vmatpush1.bf16.msra.mxu0 %v713_v27  ;;  %472 = vmatprep.subr.bf16.mxu1 %v714_v28 }
  0x1d   :  { %525 = vmatprep.subr.bf16.mxu0 %v716_v29 }
  0x1f   :  { %473 = vmatpush1.bf16.msra.mxu1 %v718_v30 }
  0x20   :  { %526 = vmatpush1.bf16.msra.mxu0 %v719_v31  ;;  %474 = vmatprep.subr.bf16.mxu1 %v720_v32 }
  0x21   :  { %527 = vmatprep.subr.bf16.mxu0 %v722_v33 }
  0x23   :  { %475 = vmatpush1.bf16.msra.mxu1 %v724_v34 }
  0x24   :  { %528 = vmatpush1.bf16.msra.mxu0 %v725_v35  ;;  %476 = vmatprep.subr.bf16.mxu1 %v726_v36 }
  0x25   :  { %529 = vmatprep.subr.bf16.mxu0 %v728_v37 }
  0x27   :  { %477 = vmatpush1.bf16.msra.mxu1 %v730_v38 }
  0x28   :  { %530 = vmatpush1.bf16.msra.mxu0 %v731_v39  ;;  %478 = vmatprep.subr.bf16.mxu1 %v732_v40 }
  0x29   :  { %531 = vmatprep.subr.bf16.mxu0 %v734_v41 }
  0x2b   :  { %479 = vmatpush1.bf16.msra.mxu1 %v736_v42 }
  0x2c   :  { %532 = vmatpush1.bf16.msra.mxu0 %v737_v43  ;;  %480 = vmatprep.subr.bf16.mxu1 %v738_v44 }
  0x2d   :  { %533 = vmatprep.subr.bf16.mxu0 %v740_v45 }
  0x2f   :  { %481 = vmatpush1.bf16.msra.mxu1 %v742_v46 }
  0x30   :  { %534 = vmatpush1.bf16.msra.mxu0 %v743_v47  ;;  %482 = vmatprep.subr.bf16.mxu1 %v744_v48 }
  0x31   :  { %535 = vmatprep.subr.bf16.mxu0 %v746_v50 }
  0x33   :  { %483 = vmatpush1.bf16.msra.mxu1 %v748_v52 }
  0x34   :  { %536 = vmatpush1.bf16.msra.mxu0 %v749_v53  ;;  %484 = vmatprep.subr.bf16.mxu1 %v750_v54 }
  0x35   :  { %537 = vmatprep.subr.bf16.mxu0 %v752_v55 }
  0x37   :  { %485 = vmatpush1.bf16.msra.mxu1 %v754_v56 }
  0x38   :  { %538 = vmatpush1.bf16.msra.mxu0 %v755_v57  ;;  %486 = vmatprep.subr.bf16.mxu1 %v756_v58 }
  0x39   :  { %539 = vmatprep.subr.bf16.mxu0 %v758_v59 }
  0x3b   :  { %487 = vmatpush1.bf16.msra.mxu1 %v760_v60 }
  0x3c   :  { %540 = vmatpush1.bf16.msra.mxu0 %v761_v61  ;;  %488 = vmatprep.subr.bf16.mxu1 %v762_v62 }
  0x3d   :  { %541 = vmatprep.subr.bf16.mxu0 %v764_v63 }
  0x3f   :  { %489 = vmatpush1.bf16.msra.mxu1 %v766_v0 }
  0x40   :  { %542 = vmatpush1.bf16.msra.mxu0 %v767_v1 }
  0x42   :  { %491 = vmatmul.mubr.bf16.vlgmr.msra.gmra.mrb[0].mxu1 %v768_v2 }
  0x43   :  { %544 = vmatmul.mubr.bf16.vlgmr.msra.gmra.mrb[0].mxu0 %v771_v3  ;;  %500 = vmatprep.mubr.bf16.mxu1 %v774_v4 }
  0x44   :  { %553 = vmatprep.mubr.bf16.mxu0 %v776_v5 }
  0x4a   :  { %501 = vmatmul.mubr.bf16.gmra.mrb[4].mxu1 %v778_v6 }
  0x4b   :  { %554 = vmatmul.mubr.bf16.gmra.mrb[4].mxu0 %v779_v7 }
 0x115   :  { %v492_v15 = vpop.f32.mrb[0].mxu1 }
 0x116   :  { %v545_v16 = vpop.f32.mrb[0].mxu0  ;;  %v493_v17 = vadd.f32 %v492_v15, %v91_v13  ;;  %v494_v18 = vpop.f32.mrb[1].mxu1 }
 0x117   :  { %v547_v19 = vpop.f32.mrb[1].mxu0  ;;  %v495_v20 = vadd.f32 %v494_v18, %v95_v14  ;;  %v496_v21 = vpop.f32.mrb[2].mxu1 }
 0x118   :  { %v549_v22 = vpop.f32.mrb[2].mxu0  ;;  %v546_v23 = vadd.f32 %v545_v16, %v493_v17  ;;  %v497_v24 = vadd.f32 %v496_v21, %v91_v13  ;;  %v498_v25 = vpop.f32.mrb[3].mxu1 }
 0x119   :  { %v551_v26 = vpop.f32.mrb[3].mxu0  ;;  %v548_v27 = vadd.f32 %v547_v19, %v495_v20  ;;  %v499_v28 = vadd.f32 %v498_v25, %v95_v14 }
 0x11a   :  { %v564_v29 = vmax.f32 %v546_v23, 0.0  ;;  %v550_v30 = vadd.f32 %v549_v22, %v497_v24 }
 0x11b   :  { %v565_v31 = vmax.f32 %v548_v27, 0.0  ;;  %v552_v32 = vadd.f32 %v551_v26, %v499_v28 }
 0x11c   :  { %572 = vst [vmem:[%s1046_s3] sm:$0xff] %v564_v29  ;;  %v566_v33 = vmax.f32 %v550_v30, 0.0 }
 0x11d   :  { %573 = vst [vmem:[%s1046_s3 + $0x8] sm:$0xff] %v565_v31  ;;  %v567_v34 = vmax.f32 %v552_v32, 0.0  ;;  %v502_v35 = vpop.f32.mrb[4].mxu1 }
 0x11e   :  { %v555_v36 = vpop.f32.mrb[4].mxu0  ;;  %574 = vst [vmem:[%s1046_s3 + $0x10] sm:$0xff] %v566_v33  ;;  %v503_v37 = vadd.f32 %v502_v35, %v91_v13  ;;  %v504_v38 = vpop.f32.mrb[5].mxu1 }
 0x11f   :  { %v557_v39 = vpop.f32.mrb[5].mxu0  ;;  %575 = vst [vmem:[%s1046_s3 + $0x18] sm:$0xff] %v567_v34  ;;  %v505_v40 = vadd.f32 %v504_v38, %v95_v14  ;;  %v506_v41 = vpop.f32.mrb[6].mxu1 }
 0x120   :  { %v559_v42 = vpop.f32.mrb[6].mxu0  ;;  %v556_v43 = vadd.f32 %v555_v36, %v503_v37  ;;  %v507_v44 = vadd.f32 %v506_v41, %v91_v13  ;;  %v508_v45 = vpop.f32.mrb[7].mxu1 }
 0x121   :  { %v561_v46 = vpop.f32.mrb[7].mxu0  ;;  %v558_v47 = vadd.f32 %v557_v39, %v505_v40  ;;  %v509_v48 = vadd.f32 %v508_v45, %v95_v14 }
 0x122   :  { %v568_v49 = vmax.f32 %v556_v43, 0.0  ;;  %v560_v50 = vadd.f32 %v559_v42, %v507_v44 }
 0x123   :  { %v569_v51 = vmax.f32 %v558_v47, 0.0  ;;  %v562_v52 = vadd.f32 %v561_v46, %v509_v48 }
 0x124   :  { %576 = vst [vmem:[%s1046_s3 + $0x20] sm:$0xff] %v568_v49  ;;  %v570_v53 = vmax.f32 %v560_v50, 0.0 }
 0x125   :  { %577 = vst [vmem:[%s1046_s3 + $0x28] sm:$0xff] %v569_v51  ;;  %v571_v54 = vmax.f32 %v562_v52, 0.0 }
 0x126   :  { %578 = vst [vmem:[%s1046_s3 + $0x30] sm:$0xff] %v570_v53 }
 0x127   :  { %579 = vst [vmem:[%s1046_s3 + $0x38] sm:$0xff] %v571_v54 }

// kernel: tower_forward.7
= control target key start
LH: loop header
LB: loop body
LE: loop exit
PB: predicated region body
PF: predicated region fallthrough
CT: control target
= control target key end

     0   :  { %s4343_s15 = smov 0   ;;  %s5417_s0 = inlined_call_operand.vmem [shape: f32[2,110,256], index: 0, kind: input, shape index: {}]   ;;  %s5418_s1 = inlined_call_operand.vmem [shape: bf16[9,256,128], index: 1, kind: input, shape index: {}]   ;;  %s5419_s2 = inlined_call_operand.vmem [shape: f32[1,128], index: 2, kind: input, shape index: {}]   ;;  %s5420_s3 = inlined_call_operand.vmem [shape: f32[80,1], index: 3, kind: input, shape index: {}]   ;;  %s5421_s4 = inlined_call_operand.vmem [shape: f32[2,110,128], index: 4, kind: output, shape index: {}]  }
   0x1 LB: > { %s3310_s16 = sadd.s32 4294967295, %s4314_s15   ;;  %p3314_p0 = scmp.ge.s32.totalorder %s4314_s15, 1  ;;  %s4314_s15 = sphi %s4343_s15, %s14_s15  }
   0x2   : > { %p162_p1 = scmp.lt.s32.totalorder %s4314_s15, 3 }
   0x4   : > { %p163_p2 = pnand %p3314_p0, %p162_p1 }
   0x5   : > { %v4164_v0 = vld [vmem:[%s5418_s1 + $0x40] sm:$0xff] (!%p163_p2)   ;;  %v4168_v4 = vld [vmem:[%s5418_s1 + $0x48] sm:$0xff] (!%p163_p2)   ;;  %v4172_v8 = vld [vmem:[%s5418_s1 + $0x50] sm:$0xff] (!%p163_p2)   ;;  %p188_p3 = scmp.lt.s32.totalorder (!%p163_p2), %s3310_s16, 1  ;;  %vm507_vm0 = vsmask.f32 (!%p163_p2), 7424 }
   0x6   : > { %166 = sbr.rel (%p163_p2) target bundleno = 441 (0x1b9), region = 36  ;;  %v4165_v1 = vld [vmem:[%s5418_s1 + $0xc0] sm:$0xff] (!%p163_p2)   ;;  %3720 = vmatprep.subr.bf16.mxu0 (!%p163_p2), %v4164_v0  ;;  %v4169_v5 = vld [vmem:[%s5418_s1 + $0xc8] sm:$0xff] (!%p163_p2)   ;;  %v4173_v9 = vld [vmem:[%s5418_s1 + $0xd0] sm:$0xff] (!%p163_p2)   ;;  %vm884_vm1 = vcmask (!%p163_p2), 1046528   ;;  %vm1888_vm2 = vcmask (!%p163_p2), 1045504  }
   0x7   : > { %v4166_v2 = vld [vmem:[%s5418_s1] sm:$0xff] (!%p163_p2)   ;;  %3766 = vmatprep.subr.bf16.mxu1 (!%p163_p2), %v4165_v1  ;;  %v4170_v6 = vld [vmem:[%s5418_s1 + $0x8] sm:$0xff] (!%p163_p2)   ;;  %v4174_v10 = vld [vmem:[%s5418_s1 + $0x10] sm:$0xff] (!%p163_p2)   ;;  %vm1493_vm3 = vsmask.f32 (!%p163_p2), 6400  ;;  %vm2892_vm5 = vcmask (!%p163_p2), 1044480  }
   0x8   : > { %v4167_v3 = vld [vmem:[%s5418_s1 + $0x80] sm:$0xff] (!%p163_p2)   ;;  %3721 = vmatpush3.bf16.msra.mxu0 (!%p163_p2), %v4166_v2  ;;  %v4171_v7 = vld [vmem:[%s5418_s1 + $0x88] sm:$0xff] (!%p163_p2)   ;;  %v4175_v11 = vld [vmem:[%s5418_s1 + $0x90] sm:$0xff] (!%p163_p2)   ;;  %vm2497_vm4 = vsmask.f32 (!%p163_p2), 5376 }
   0x9   : > { %3767 = vmatpush3.bf16.msra.mxu1 (!%p163_p2), %v4167_v3  ;;  %3722 = vmatprep.subr.bf16.mxu0 (!%p163_p2), %v4168_v4  ;;  %v4176_v12 = vld [vmem:[%s5418_s1 + $0x58] sm:$0xff] (!%p163_p2)   ;;  %v4180_v16 = vld [vmem:[%s5418_s1 + $0x60] sm:$0xff] (!%p163_p2)   ;;  %v4184_v20 = vld [vmem:[%s5418_s1 + $0x68] sm:$0xff] (!%p163_p2)  }
   0xa   : > { %3768 = vmatprep.subr.bf16.mxu1 (!%p163_p2), %v4169_v5  ;;  %v4177_v13 = vld [vmem:[%s5418_s1 + $0xd8] sm:$0xff] (!%p163_p2)   ;;  %v4181_v17 = vld [vmem:[%s5418_s1 + $0xe0] sm:$0xff] (!%p163_p2)   ;;  %v4185_v21 = vld [vmem:[%s5418_s1 + $0xe8] sm:$0xff] (!%p163_p2)  }
   0xb   : > { %v4178_v14 = vld [vmem:[%s5418_s1 + $0x18] sm:$0xff] (!%p163_p2)   ;;  %v4182_v18 = vld [vmem:[%s5418_s1 + $0x20] sm:$0xff] (!%p163_p2)   ;;  %v4186_v22 = vld [vmem:[%s5418_s1 + $0x28] sm:$0xff] (!%p163_p2)  }
   0xc   : > { %3723 = vmatpush3.bf16.msra.mxu0 (!%p163_p2), %v4170_v6  ;;  %v4179_v15 = vld [vmem:[%s5418_s1 + $0x98] sm:$0xff] (!%p163_p2)   ;;  %v4183_v19 = vld [vmem:[%s5418_s1 + $0xa0] sm:$0xff] (!%p163_p2)   ;;  %v4187_v23 = vld [vmem:[%s5418_s1 + $0xa8] sm:$0xff] (!%p163_p2)  }
   0xd   : > { %3769 = vmatpush3.bf16.msra.mxu1 %v4171_v7  ;;  %3724 = vmatprep.subr.bf16.mxu0 %v4172_v8  ;;  %s5423_s16 = smov (!%p188_p3, %s3310_s16), 1  ;;  %v4188_v24 = vld [vmem:[%s5418_s1 + $0x70] sm:$0xff]   ;;  %v4192_v28 = vld [vmem:[%s5418_s1 + $0x78] sm:$0xff]   ;;  %v4196_v49 = vld [vmem:[%s5418_s1 + $0x140] sm:$0xff]  }
   0xe   : > { %3770 = vmatprep.subr.bf16.mxu1 %v4173_v9  ;;  %v4189_v25 = vld [vmem:[%s5418_s1 + $0xf0] sm:$0xff]   ;;  %s4150_s21 = smul.u32 224, %s5423_s16  ;;  %v4193_v29 = vld [vmem:[%s5418_s1 + $0xf8] sm:$0xff]   ;;  %v4197_v52 = vld [vmem:[%s5418_s1 + $0x100] sm:$0xff]  }
   0xf   : > { %v4190_v26 = vld [vmem:[%s5418_s1 + $0x30] sm:$0xff]   ;;  %v4194_v30 = vld [vmem:[%s5418_s1 + $0x38] sm:$0xff]   ;;  %v4198_v56 = vld [vmem:[%s5418_s1 + $0x148] sm:$0xff]   ;;  %s4151_s26 = smul.u32 112, %s5423_s16 }
  0x10   : > { %3725 = vmatpush3.bf16.msra.mxu0 %v4174_v10  ;;  %v4191_v27 = vld [vmem:[%s5418_s1 + $0xb0] sm:$0xff]   ;;  %s4451_s6 = scalar_lea.vmem %s5417_s0, %s4150_s21  ;;  %v4195_v31 = vld [vmem:[%s5418_s1 + $0xb8] sm:$0xff]   ;;  %v4199_v61 = vld [vmem:[%s5418_s1 + $0x108] sm:$0xff]  }
  0x11   : > { %3771 = vmatpush3.bf16.msra.mxu1 %v4175_v11  ;;  %3726 = vmatprep.subr.bf16.mxu0 %v4176_v12  ;;  %v232_v32 = vld [vmem:[%s4451_s6 + $0x8] sm:$0xff]  ;;  %v4461_v33 = vld [vmem:[%s4451_s6 + $0x18] sm:$0xff]  ;;  %v231_v39 = vld [vmem:[%s4451_s6] sm:$0xff]  ;;  %s5278_s29 = scalar_lea.vmem %s5421_s4, %s4151_s26 }
  0x12   : > { %3772 = vmatprep.subr.bf16.mxu1 %v4177_v13  ;;  %v474_v34 = vld [vmem:[%s4451_s6 + $0x8] sm:$0xfe]  ;;  %v252_v35 = vpack.c.bf16 %v4461_v33, %v232_v32  ;;  %v4469_v37 = vld [vmem:[%s4451_s6 + $0x38] sm:$0xff]  ;;  %v4478_v41 = vld [vmem:[%s4451_s6 + $0x10] sm:$0xff] }
  0x13   : > { %v4466_v36 = vld [vmem:[%s4451_s6 + $0x28] sm:$0xff]  ;;  %v496_v38 = vpack.c.bf16 %v4461_v33, %v474_v34  ;;  %v473_v42 = vld [vmem:[%s4451_s6] sm:$0xfe]  ;;  %v251_v46 = vpack.c.bf16 %v4478_v41, %v231_v39  ;;  %v4486_v47 = vld [vmem:[%s4451_s6 + $0x30] sm:$0xff] }
  0x14   : > { %3727 = vmatpush3.bf16.msra.mxu0 %v4178_v14  ;;  %v4475_v40 = vpack.c.bf16 %v4469_v37, %v4466_v36  ;;  %v4482_v43 = vld [vmem:[%s4451_s6 + $0x20] sm:$0xff]  ;;  %389 = vmatprep.mubr.bf16.mxu0 %v252_v35  ;;  %v495_v48 = vpack.c.bf16 %v4478_v41, %v473_v42  ;;  %v4509_v63 = vld [vmem:[%s4451_s6 + $0x48] sm:$0xff]  ;;  %v4512_v0 = vld [vmem:[%s4451_s6 + $0x58] sm:$0xff] }
  0x15   : > { %3773 = vmatpush3.bf16.msra.mxu1 %v4179_v15  ;;  %3728 = vmatprep.subr.bf16.mxu0 %v4180_v16  ;;  %v521_v44 = vshrl.u32 %v496_v38, 16  ;;  %v523_v45 = vshll.u32 %v496_v38, 16  ;;  %v4495_v51 = vpack.c.bf16 %v4486_v47, %v4482_v43  ;;  %v4516_v2 = vld [vmem:[%s4451_s6 + $0x40] sm:$0xff]  ;;  %v4521_v5 = vpack.c.bf16 %v4512_v0, %v4509_v63  ;;  %v4524_v6 = vld [vmem:[%s4451_s6 + $0x50] sm:$0xff]  ;;  %v4207_v38 = vld [vmem:[%s5418_s1 + $0x118] sm:$0xff]  }
  0x16   : > { %3774 = vmatprep.subr.bf16.mxu1 %v4181_v17  ;;  %v528_v50 = vshll.u32 %v4475_v40, 16  ;;  %v509_v54 = vshrl.u32 %v495_v48, 16  ;;  %v511_v55 = vshll.u32 %v495_v48, 16  ;;  %v540_v1 = vshrl.u32 %v4475_v40, 16  ;;  %v4200_v9 = vld [vmem:[%s5418_s1 + $0x1c0] sm:$0xff]   ;;  %v4202_v15 = vld [vmem:[%s5418_s1 + $0x150] sm:$0xff]  }
  0x17   : > { %v525_v53 = vrot.slane %v523_v45, 1  ;;  %v516_v58 = vshll.u32 %v4495_v51, 16  ;;  %v532_v7 = vshrl.u32 %v4495_v51, 16  ;;  %v4529_v8 = vpack.c.bf16 %v4524_v6, %v4516_v2  ;;  %v4201_v13 = vld [vmem:[%s5418_s1 + $0x180] sm:$0xff]   ;;  %v4208_v39 = vld [vmem:[%s5418_s1 + $0x1d0] sm:$0xff]  }
  0x18   : > { %3729 = vmatpush3.bf16.msra.mxu0 %v4182_v18  ;;  %v530_v57 = vrot.slane %v528_v50, 1  ;;  %v513_v60 = vrot.slane %v511_v55, 1  ;;  %v544_v12 = vshll.u32 %v4521_v5, 16  ;;  %v4203_v18 = vld [vmem:[%s5418_s1 + $0x110] sm:$0xff]   ;;  %v4608_v55 = vld [vmem:[%s4451_s6 + $0x88] sm:$0xff] }
  0x19   : > { %3775 = vmatpush3.bf16.msra.mxu1 %v4183_v19  ;;  %3730 = vmatprep.subr.bf16.mxu0 %v4184_v20  ;;  %v526_v59 = vor.u32 %v525_v53, %v521_v44  ;;  %v518_v62 = vrot.slane %v516_v58, 1  ;;  %v536_v14 = vshll.u32 %v4529_v8, 16  ;;  %v4204_v20 = vld [vmem:[%s5418_s1 + $0x1c8] sm:$0xff]   ;;  %v4209_v45 = vld [vmem:[%s5418_s1 + $0x190] sm:$0xff]   ;;  %v4212_v53 = vld [vmem:[%s5418_s1 + $0x120] sm:$0xff]  }
  0x1a   : > { %3776 = vmatprep.subr.bf16.mxu1 %v4185_v21  ;;  %v514_v4 = vor.u32 %v513_v60, %v509_v54  ;;  %v542_v11 = vor.u32 %v540_v1, %v530_v57  ;;  %v546_v16 = vrot.slane %v544_v12, 1  ;;  %v4213_v54 = vld [vmem:[%s5418_s1 + $0x198] sm:$0xff]   ;;  %v4619_v60 = vld [vmem:[%s4451_s6 + $0x90] sm:$0xff]  ;;  %v4216_v12 = vld [vmem:[%s5418_s1 + $0x1a0] sm:$0xff]  }
  0x1b   : > { %v531_v3 = vsel %vm507_vm0, %v526_v59, %v530_v57  ;;  %v534_v17 = vor.u32 %v532_v7, %v518_v62  ;;  %v538_v19 = vrot.slane %v536_v14, 1  ;;  %v4613_v58 = vld [vmem:[%s4451_s6 + $0x98] sm:$0xff]  ;;  %v4616_v59 = vld [vmem:[%s4451_s6 + $0x80] sm:$0xff] }
  0x1c   : > { %3731 = vmatpush3.bf16.msra.mxu0 %v4186_v22  ;;  %734 = vmatprep.mubr.bf16.mxu1 %v531_v3  ;;  %v519_v10 = vsel %vm507_vm0, %v514_v4, %v518_v62  ;;  %v547_v21 = vsel %vm507_vm0, %v542_v11, %v546_v16  ;;  %v4205_v22 = vld [vmem:[%s5418_s1 + $0x188] sm:$0xff]   ;;  %v4624_v62 = vpack.c.bf16 %v4613_v58, %v4608_v55  ;;  %v4214_v3 = vld [vmem:[%s5418_s1 + $0x1e0] sm:$0xff]  }
  0x1d   : > { %3777 = vmatpush3.bf16.msra.mxu1 %v4187_v23  ;;  %3732 = vmatprep.subr.bf16.mxu0 %v4188_v24  ;;  %v4556_v23 = vld [vmem:[%s4451_s6 + $0x68] sm:$0xff]  ;;  %v4559_v24 = vld [vmem:[%s4451_s6 + $0x78] sm:$0xff]  ;;  %v4628_v1 = vpack.c.bf16 %v4619_v60, %v4616_v59 }
  0x1e   : > { %3778 = vmatprep.subr.bf16.mxu1 %v4189_v25  ;;  %v556_v25 = vshrl.u32 %v4521_v5, 16  ;;  %v4215_v4 = vld [vmem:[%s5418_s1 + $0x168] sm:$0xff]  }
  0x20   : > { %3733 = vmatpush3.bf16.msra.mxu0 %v4190_v26  ;;  %v4564_v26 = vpack.c.bf16 %v4559_v24, %v4556_v23  ;;  %v558_v32 = vor.u32 %v556_v25, %v546_v16  ;;  %v4217_v16 = vld [vmem:[%s5418_s1 + $0x128] sm:$0xff]   ;;  %v4220_v25 = vld [vmem:[%s5418_s1 + $0x170] sm:$0xff]  }
  0x21   : > { %3779 = vmatpush3.bf16.msra.mxu1 %v4191_v27  ;;  %3734 = vmatprep.subr.bf16.mxu0 %v4192_v28  ;;  %v4206_v27 = vld [vmem:[%s5418_s1 + $0x158] sm:$0xff]   ;;  %v539_v28 = vsel %vm507_vm0, %v534_v17, %v538_v19  ;;  %v4218_v17 = vld [vmem:[%s5418_s1 + $0x1e8] sm:$0xff]  }
  0x22   : > { %3780 = vmatprep.subr.bf16.mxu1 %v4193_v29  ;;  %v4571_v29 = vld [vmem:[%s4451_s6 + $0x60] sm:$0xff]  ;;  %v560_v34 = vshll.u32 %v4564_v26, 16 }
  0x24   : > { %3735 = vmatpush3.bf16.msra.mxu0 %v4194_v30  ;;  %v4574_v30 = vld [vmem:[%s4451_s6 + $0x70] sm:$0xff]  ;;  %v562_v42 = vrot.slane %v560_v34, 1  ;;  %v886_v34 = vrot.slane %v4495_v51, 1 }
  0x25   : > { %3781 = vmatpush3.bf16.msra.mxu1 %v4195_v31  ;;  %3812 = vmatprep.subr.bf16.mxu0 %v4196_v49  ;;  %v548_v31 = vshrl.u32 %v4529_v8, 16  ;;  %v4580_v35 = vpack.c.bf16 %v4574_v30, %v4571_v29 }
  0x26   : > { %3858 = vmatprep.subr.bf16.mxu1 %v4200_v9  ;;  %v563_v49 = vsel %vm507_vm0, %v558_v32, %v562_v42  ;;  %v576_v9 = vshll.u32 %v4624_v62, 16  ;;  %v493_v32 = vld [vmem:[%s4451_s6 + $0xa0] sm:$0x1] }
  0x27   : > { %390 = vmatmul.mubr.bf16.vlgmr.msra.gmra.mrb[0].mxu0 %v251_v46  ;;  %v552_v44 = vshll.u32 %v4580_v35, 16  ;;  %v4210_v46 = vld [vmem:[%s5418_s1 + $0x160] sm:$0xff]   ;;  %v550_v48 = vor.u32 %v548_v31, %v538_v19  ;;  %v4221_v31 = vld [vmem:[%s5418_s1 + $0x130] sm:$0xff]  }
  0x28   : > { %3813 = vmatpush3.bf16.msra.mxu0 %v4197_v52  ;;  %397 = vmatprep.mubr.bf16.mxu0 %v4475_v40  ;;  %v4211_v52 = vld [vmem:[%s5418_s1 + $0x1d8] sm:$0xff]   ;;  %v578_v14 = vrot.slane %v576_v9, 1  ;;  %v839_v9 = vld [vmem:[%s4451_s6 + $0x8] sm:$0xfc] }
  0x29   : > { %3814 = vmatprep.subr.bf16.mxu0 %v4198_v56  ;;  %735 = vmatmul.mubr.bf16.vlgmr.msra.gmra.mrb[0].mxu1 %v519_v10  ;;  %v554_v50 = vrot.slane %v552_v44, 1  ;;  %v572_v56 = vshrl.u32 %v4564_v26, 16  ;;  %v568_v10 = vshll.u32 %v4628_v1, 16 }
  0x2a   : > { %3859 = vmatpush3.bf16.msra.mxu1 %v4201_v13  ;;  %742 = vmatprep.mubr.bf16.mxu1 %v547_v21  ;;  %v889_v13 = vrot.slane %v4475_v40, 1  ;;  %v588_v21 = vshrl.u32 %v4624_v62, 16  ;;  %v4232_v40 = vld [vmem:[%s5418_s1 + $0x2c0] sm:$0xff]  }
  0x2b   : > { %3860 = vmatprep.subr.bf16.mxu1 %v4204_v20  ;;  %v555_v57 = vsel %vm507_vm0, %v550_v48, %v554_v50  ;;  %v574_v7 = vor.u32 %v572_v56, %v562_v42  ;;  %v4219_v20 = vld [vmem:[%s5418_s1 + $0x1a8] sm:$0xff]   ;;  %v4226_v56 = vld [vmem:[%s5418_s1 + $0x1f8] sm:$0xff]  }
  0x2c   : > { %3815 = vmatpush3.bf16.msra.mxu0 %v4199_v61  ;;  %v564_v61 = vshrl.u32 %v4580_v35, 16  ;;  %v590_v44 = vor.u32 %v588_v21, %v578_v14 }
  0x2d   : > { %3816 = vmatprep.subr.bf16.mxu0 %v4202_v15  ;;  %v570_v15 = vrot.slane %v568_v10, 1  ;;  %v579_v19 = vsel %vm507_vm0, %v574_v7, %v578_v14  ;;  %v1150_v10 = vld [vmem:[%s4451_s6 + $0x18] sm:$0xfc] }
  0x2e   : > { %3861 = vmatpush3.bf16.msra.mxu1 %v4205_v22  ;;  %v566_v11 = vor.u32 %v564_v61, %v554_v50  ;;  %v4224_v50 = vld [vmem:[%s5418_s1 + $0x178] sm:$0xff]   ;;  %v1172_v14 = vpack.c.bf16 %v4466_v36, %v1150_v10  ;;  %v4795_v10 = vld [vmem:[%s4451_s6 + $0xa0] sm:$0xff] }
  0x2f   : > { %398 = vmatmul.mubr.bf16.gmra.mrb[4].mxu0 %v4495_v51  ;;  %3862 = vmatprep.subr.bf16.mxu1 %v4208_v39  ;;  %v4222_v39 = vld [vmem:[%s5418_s1 + $0x1f0] sm:$0xff]   ;;  %v4227_v61 = vld [vmem:[%s5418_s1 + $0x1b8] sm:$0xff]  }
  0x30   : > { %405 = vmatprep.mubr.bf16.mxu0 %v4521_v5  ;;  %3817 = vmatpush3.bf16.msra.mxu0 %v4203_v18  ;;  %v1174_v18 = vpack.c.bf16 %v4509_v63, %v4469_v37  ;;  %v571_v22 = vsel %vm507_vm0, %v566_v11, %v570_v15  ;;  %v580_v37 = vshrl.u32 %v4628_v1, 16  ;;  %v838_v11 = vld [vmem:[%s4451_s6] sm:$0xfc]  ;;  %v4239_v51 = vld [vmem:[%s5418_s1 + $0x218] sm:$0xff]  }
  0x31   : > { %3818 = vmatprep.subr.bf16.mxu0 %v4206_v27  ;;  %743 = vmatmul.mubr.bf16.gmra.mrb[4].mxu1 %v539_v28  ;;  %v494_v27 = vld [vmem:[%s4451_s6 + $0xa8] sm:$0x1] }
  0x32   : > { %3863 = vmatpush3.bf16.msra.mxu1 %v4209_v45  ;;  %750 = vmatprep.mubr.bf16.mxu1 %v563_v49  ;;  %v506_v28 = vpack.c.bf16 %v494_v27, %v494_v27  ;;  %v4671_v42 = vrot.slane %v1174_v18, 1  ;;  %v582_v48 = vor.u32 %v580_v37, %v570_v15  ;;  %v860_v15 = vpack.c.bf16 %v4478_v41, %v838_v11  ;;  %v4229_v41 = vld [vmem:[%s5418_s1 + $0x200] sm:$0xff]  }
  0x33   : > { %3864 = vmatprep.subr.bf16.mxu1 %v4211_v52 }
  0x34   : > { %3819 = vmatpush3.bf16.msra.mxu0 %v4207_v38  ;;  %v505_v38 = vpack.c.bf16 %v493_v32, %v493_v32  ;;  %v592_v45 = vshll.u32 %v506_v28, 16  ;;  %v891_v28 = vrot.slane %v4529_v8, 1  ;;  %v4233_v32 = vld [vmem:[%s5418_s1 + $0x280] sm:$0xff]  }
  0x35   : > { %3820 = vmatprep.subr.bf16.mxu0 %v4210_v46  ;;  %v4223_v46 = vld [vmem:[%s5418_s1 + $0x1b0] sm:$0xff]  }
  0x36   : > { %3865 = vmatpush3.bf16.msra.mxu1 %v4213_v54  ;;  %v584_v49 = vshll.u32 %v505_v38, 16  ;;  %v594_v52 = vrot.slane %v592_v45, 1  ;;  %v4235_v45 = vld [vmem:[%s5418_s1 + $0x210] sm:$0xff]  }
  0x37   : > { %406 = vmatmul.mubr.bf16.gmra.mrb[8].mxu0 %v4529_v8  ;;  %3866 = vmatprep.subr.bf16.mxu1 %v4214_v3  ;;  %v1173_v3 = vpack.c.bf16 %v4516_v2, %v4486_v47  ;;  %v1178_v8 = vpack.c.bf16 %v4608_v55, %v4559_v24  ;;  %v4237_v24 = vld [vmem:[%s5418_s1 + $0x288] sm:$0xff]  }
  0x38   : > { %413 = vmatprep.mubr.bf16.mxu0 %v4564_v26  ;;  %3821 = vmatpush3.bf16.msra.mxu0 %v4212_v53  ;;  %v4225_v53 = vld [vmem:[%s5418_s1 + $0x138] sm:$0xff]   ;;  %v586_v54 = vrot.slane %v584_v49, 1 }
  0x39   : > { %751 = vmatmul.mubr.bf16.gmra.mrb[8].mxu1 %v555_v57  ;;  %3822 = vmatprep.subr.bf16.mxu0 %v4215_v4  ;;  %v595_v57 = vsel %vm507_vm0, %v590_v44, %v594_v52  ;;  %v893_v4 = vrot.slane %v4521_v5, 1  ;;  %v4228_v5 = vld [vmem:[%s5418_s1 + $0x240] sm:$0xff]   ;;  %v897_v44 = vrot.slane %v4564_v26, 1  ;;  %v4238_v49 = vld [vmem:[%s5418_s1 + $0x258] sm:$0xff]  }
  0x3a   : > { %3867 = vmatpush3.bf16.msra.mxu1 %v4216_v12  ;;  %758 = vmatprep.mubr.bf16.mxu1 %v579_v19  ;;  %v587_v7 = vsel %vm507_vm0, %v582_v48, %v586_v54  ;;  %v861_v12 = vpack.c.bf16 %v4461_v33, %v839_v9  ;;  %v1198_v19 = vrot.slane %v1172_v14, 1  ;;  %v885_v33 = vrot.slane %v860_v15, 1  ;;  %v4247_v15 = vld [vmem:[%s5418_s1 + $0x268] sm:$0xff]  }
  0x3b   : > { %3868 = vmatprep.subr.bf16.mxu1 %v4218_v17  ;;  %v1176_v17 = vpack.c.bf16 %v4556_v23, %v4512_v0  ;;  %v894_v0 = vsel %vm884_vm1, %v889_v13, %v893_v4  ;;  %v898_v26 = vsel %vm884_vm1, %v893_v4, %v897_v44  ;;  %v1207_v48 = vrot.slane %v1178_v8, 1  ;;  %v4789_v4 = vld [vmem:[%s4451_s6 + $0xa8] sm:$0xff]  ;;  %v4257_v8 = vld [vmem:[%s5418_s1 + $0x238] sm:$0xff]  }
  0x3c   : > { %3823 = vmatpush3.bf16.msra.mxu0 %v4217_v16  ;;  %v1149_v16 = vld [vmem:[%s4451_s6 + $0x10] sm:$0xfc]  ;;  %v888_v18 = vrot.slane %v861_v12, 1  ;;  %v1200_v21 = vsel %vm884_vm1, %v1198_v19, %v4671_v42  ;;  %v1177_v54 = vpack.c.bf16 %v4616_v59, %v4574_v30  ;;  %v4244_v30 = vld [vmem:[%s5418_s1 + $0x220] sm:$0xff]  }
  0x3d   : > { %3824 = vmatprep.subr.bf16.mxu0 %v4220_v25  ;;  %v1171_v47 = vpack.c.bf16 %v4482_v43, %v1149_v16  ;;  %v4230_v25 = vld [vmem:[%s5418_s1 + $0x248] sm:$0xff]   ;;  %v1203_v27 = vrot.slane %v1176_v17, 1  ;;  %v4246_v12 = vld [vmem:[%s5418_s1 + $0x2e0] sm:$0xff]   ;;  %v899_v16 = vrot.slane %v4628_v1, 1  ;;  %v1179_v17 = vpack.c.bf16 %v4795_v10, %v4619_v60  ;;  %v4252_v19 = vld [vmem:[%s5418_s1 + $0x270] sm:$0xff]  }
  0x3e   : > { %3869 = vmatpush3.bf16.msra.mxu1 %v4219_v20  ;;  %v1196_v20 = vrot.slane %v1173_v3, 1  ;;  %v890_v43 = vsel %vm884_vm1, %v888_v18, %v889_v13  ;;  %v4231_v13 = vld [vmem:[%s5418_s1 + $0x208] sm:$0xff]   ;;  %v901_v3 = vrot.slane %v4624_v62, 1  ;;  %v1205_v9 = vrot.slane %v1177_v54, 1  ;;  %v4248_v18 = vld [vmem:[%s5418_s1 + $0x2a0] sm:$0xff]  }
  0x3f   : > { %414 = vmatmul.mubr.bf16.gmra.mrb[12].mxu0 %v4580_v35  ;;  %3870 = vmatprep.subr.bf16.mxu1 %v4222_v39  ;;  %v1195_v36 = vrot.slane %v1171_v47, 1  ;;  %v1204_v38 = vsel %vm884_vm1, %v4671_v42, %v1203_v27  ;;  %v4234_v39 = vld [vmem:[%s5418_s1 + $0x250] sm:$0xff]   ;;  %v892_v42 = vsel %vm884_vm1, %v886_v34, %v891_v28  ;;  %v4249_v47 = vld [vmem:[%s5418_s1 + $0x228] sm:$0xff]   ;;  %v1461_v54 = vld [vmem:[%s4451_s6 + $0x20] sm:$0xff] }
  0x40   : > { %421 = vmatprep.mubr.bf16.mxu0 %v4624_v62  ;;  %3825 = vmatpush3.bf16.msra.mxu0 %v4221_v31  ;;  %v1175_v31 = vpack.c.bf16 %v4571_v29, %v4524_v6  ;;  %v4236_v6 = vld [vmem:[%s5418_s1 + $0x2c8] sm:$0xff]   ;;  %v1180_v62 = vpack.c.bf16 %v4789_v4, %v4613_v58  ;;  %v902_v11 = vsel %vm884_vm1, %v897_v44, %v901_v3  ;;  %v4256_v44 = vld [vmem:[%s5418_s1 + $0x278] sm:$0xff]  }
  0x41   : > { %759 = vmatmul.mubr.bf16.gmra.mrb[12].mxu1 %v571_v22  ;;  %3826 = vmatprep.subr.bf16.mxu0 %v4224_v50  ;;  %v887_v22 = vsel %vm884_vm1, %v885_v33, %v886_v34  ;;  %v1197_v37 = vsel %vm884_vm1, %v1195_v36, %v1196_v20  ;;  %v4240_v34 = vld [vmem:[%s5418_s1 + $0x2d0] sm:$0xff]   ;;  %v4251_v60 = vld [vmem:[%s5418_s1 + $0x2a8] sm:$0xff]  }
  0x42   : > { %3871 = vmatpush3.bf16.msra.mxu1 %v4223_v46  ;;  %766 = vmatprep.mubr.bf16.mxu1 %v595_v57  ;;  %v1201_v46 = vrot.slane %v1175_v31, 1  ;;  %v4241_v50 = vld [vmem:[%s5418_s1 + $0x290] sm:$0xff]   ;;  %v1208_v57 = vsel %vm884_vm1, %v1203_v27, %v1207_v48  ;;  %v1211_v14 = vrot.slane %v1180_v62, 1  ;;  %v859_v33 = vld [vmem:[%s4451_s6 + $0xa8] sm:$0x3]  ;;  %v4260_v62 = vld [vmem:[%s5418_s1 + $0x340] sm:$0xff]  }
  0x43   : > { %3872 = vmatprep.subr.bf16.mxu1 %v4226_v56  ;;  %v4242_v56 = vld [vmem:[%s5418_s1 + $0x260] sm:$0xff]   ;;  %v4255_v31 = vld [vmem:[%s5418_s1 + $0x2b0] sm:$0xff]  }
  0x44   : > { %3827 = vmatpush3.bf16.msra.mxu0 %v4225_v53  ;;  %v1202_v52 = vsel %vm884_vm1, %v1196_v20, %v1201_v46  ;;  %v895_v53 = vrot.slane %v4580_v35, 1  ;;  %v4245_v35 = vld [vmem:[%s5418_s1 + $0x298] sm:$0xff]   ;;  %v1206_v58 = vsel %vm884_vm1, %v1201_v46, %v1205_v9 }
  0x45   : > { %3904 = vmatprep.subr.bf16.mxu0 %v4228_v5  ;;  %v1212_v5 = vsel %vm884_vm1, %v1207_v48, %v1211_v14  ;;  %v1170_v20 = vld [vmem:[%s4451_s6 + $0xb8] sm:$0x3]  ;;  %v1462_v48 = vld [vmem:[%s4451_s6 + $0x28] sm:$0xff] }
  0x46   : > { %3873 = vmatpush3.bf16.msra.mxu1 %v4227_v61  ;;  %v4243_v61 = vld [vmem:[%s5418_s1 + $0x2d8] sm:$0xff]   ;;  %v900_v36 = vsel %vm884_vm1, %v895_v53, %v899_v16 }
  0x47   : > { %422 = vmatmul.mubr.bf16.gmra.mrb[16].mxu0 %v4628_v1  ;;  %3950 = vmatprep.subr.bf16.mxu1 %v4232_v40  ;;  %v4250_v1 = vld [vmem:[%s5418_s1 + $0x2e8] sm:$0xff]   ;;  %v4259_v46 = vld [vmem:[%s5418_s1 + $0x2b8] sm:$0xff]  }
  0x48   : > { %1045 = vmatprep.mubr.bf16.mxu0 %v890_v43  ;;  %v1182_v43 = vpack.c.bf16 %v1170_v20, %v1170_v20 }
  0x49   : > { %767 = vmatmul.mubr.bf16.gmra.mrb[16].mxu1 %v587_v7  ;;  %v896_v7 = vsel %vm884_vm1, %v891_v28, %v895_v53  ;;  %v4254_v28 = vld [vmem:[%s5418_s1 + $0x2f0] sm:$0xff]  }
  0x4a   : > { %1355 = vmatprep.mubr.bf16.mxu1 %v1200_v21  ;;  %v4253_v21 = vld [vmem:[%s5418_s1 + $0x230] sm:$0xff]   ;;  %v1215_v40 = vrot.slane %v1182_v43, 1  ;;  %v4886_v43 = vld [vmem:[%s4451_s6 + $0x58] sm:$0xff] }
  0x4b   : > { %v1459_v53 = vld [vmem:[%s4451_s6 + $0x10] sm:$0xf8] }
  0x4f   : > { %1046 = vmatmul.mubr.bf16.vlgmr.msra.gmra.mrb[20].mxu0 %v887_v22  ;;  %v858_v22 = vld [vmem:[%s4451_s6 + $0xa0] sm:$0x3] }
  0x50   : > { %3905 = vmatpush3.bf16.msra.mxu0 %v4229_v41  ;;  %1053 = vmatprep.mubr.bf16.mxu0 %v894_v0  ;;  %v1209_v41 = vrot.slane %v1179_v17, 1  ;;  %v871_v0 = vpack.c.bf16 %v859_v33, %v859_v33 }
  0x51   : > { %3906 = vmatprep.subr.bf16.mxu0 %v4230_v25  ;;  %1356 = vmatmul.mubr.bf16.vlgmr.msra.gmra.mrb[20].mxu1 %v1197_v37  ;;  %v1169_v25 = vld [vmem:[%s4451_s6 + $0xb0] sm:$0x3] }
  0x52   : > { %1363 = vmatprep.mubr.bf16.mxu1 %v1204_v38  ;;  %3951 = vmatpush3.bf16.msra.mxu1 %v4233_v32  ;;  %v905_v27 = vrot.slane %v871_v0, 1  ;;  %v1181_v37 = vpack.c.bf16 %v1169_v25, %v1169_v25  ;;  %v1210_v32 = vsel %vm884_vm1, %v1205_v9, %v1209_v41 }
  0x53   : > { %3952 = vmatprep.subr.bf16.mxu1 %v4236_v6  ;;  %v1216_v6 = vsel %vm884_vm1, %v1211_v14, %v1215_v40  ;;  %v1486_v40 = vpack.c.bf16 %v4556_v23, %v4886_v43 }
  0x54   : > { %3907 = vmatpush3.bf16.msra.mxu0 %v4231_v13  ;;  %v870_v13 = vpack.c.bf16 %v858_v22, %v858_v22  ;;  %v906_v38 = vsel %vm884_vm1, %v901_v3, %v905_v27 }
  0x55   : > { %3908 = vmatprep.subr.bf16.mxu0 %v4234_v39  ;;  %v1541_v23 = vshll.u32 %v1486_v40, 16 }
  0x56   : > { %3953 = vmatpush3.bf16.msra.mxu1 %v4237_v24  ;;  %v903_v39 = vrot.slane %v870_v13, 1  ;;  %v1460_v24 = vld [vmem:[%s4451_s6 + $0x18] sm:$0xf8] }
  0x57   : > { %1054 = vmatmul.mubr.bf16.gmra.mrb[24].mxu0 %v892_v42  ;;  %3954 = vmatprep.subr.bf16.mxu1 %v4240_v34  ;;  %v4258_v42 = vld [vmem:[%s5418_s1 + $0x2f8] sm:$0xff]   ;;  %v1482_v34 = vpack.c.bf16 %v1462_v48, %v1460_v24  ;;  %v4263_v24 = vld [vmem:[%s5418_s1 + $0x308] sm:$0xff]  }
  0x58   : > { %3909 = vmatpush3.bf16.msra.mxu0 %v4235_v45  ;;  %1061 = vmatprep.mubr.bf16.mxu0 %v898_v26  ;;  %v1213_v45 = vrot.slane %v1181_v37, 1  ;;  %v904_v26 = vsel %vm884_vm1, %v899_v16, %v903_v39  ;;  %v4264_v37 = vld [vmem:[%s5418_s1 + $0x3c0] sm:$0xff]  }
  0x59   : > { %3910 = vmatprep.subr.bf16.mxu0 %v4238_v49  ;;  %1364 = vmatmul.mubr.bf16.gmra.mrb[24].mxu1 %v1202_v52  ;;  %v4857_v49 = vld [vmem:[%s4451_s6 + $0x38] sm:$0xff] }
  0x5a   : > { %1371 = vmatprep.mubr.bf16.mxu1 %v1208_v57  ;;  %3955 = vmatpush3.bf16.msra.mxu1 %v4241_v50  ;;  %v4862_v50 = vpack.c.bf16 %v4509_v63, %v4857_v49  ;;  %v1214_v57 = vsel %vm884_vm1, %v1209_v41, %v1213_v45 }
  0x5b   : > { %3956 = vmatprep.subr.bf16.mxu1 %v4243_v61  ;;  %v1481_v61 = vpack.c.bf16 %v1461_v54, %v1459_v53 }
  0x5c   : > { %3911 = vmatpush3.bf16.msra.mxu0 %v4239_v51  ;;  %v1843_v51 = vld [vmem:[%s4451_s6 + $0x18] sm:$0xf0]  ;;  %v1520_v63 = vshrl.u32 %v4862_v50, 16  ;;  %v1523_v9 = vshll.u32 %v4862_v50, 16 }
  0x5d   : > { %3912 = vmatprep.subr.bf16.mxu0 %v4242_v56  ;;  %v1865_v52 = vpack.c.bf16 %v1462_v48, %v1843_v51  ;;  %v4867_v56 = vld [vmem:[%s4451_s6 + $0x30] sm:$0xff]  ;;  %v1495_v14 = vshrl.u32 %v1481_v61, 16 }
  0x5e   : > { %3957 = vmatpush3.bf16.msra.mxu1 %v4245_v35  ;;  %v4872_v3 = vpack.c.bf16 %v4516_v2, %v4867_v56  ;;  %v1512_v35 = vshrl.u32 %v1482_v34, 16  ;;  %v1522_v16 = vrot.slane %v1520_v63, 1  ;;  %v1525_v17 = vrot.slane %v1523_v9, 2 }
  0x5f   : > { %1062 = vmatmul.mubr.bf16.gmra.mrb[28].mxu0 %v896_v7  ;;  %3958 = vmatprep.subr.bf16.mxu1 %v4246_v12  ;;  %v1515_v7 = vshll.u32 %v1482_v34, 16  ;;  %v1893_v12 = vrot.slane %v4862_v50, 2  ;;  %v4268_v34 = vld [vmem:[%s5418_s1 + $0x3c8] sm:$0xff]  }
  0x60   : > { %3913 = vmatpush3.bf16.msra.mxu0 %v4244_v30  ;;  %1069 = vmatprep.mubr.bf16.mxu0 %v902_v11  ;;  %v1842_v30 = vld [vmem:[%s4451_s6 + $0x10] sm:$0xf0]  ;;  %v1892_v11 = vrot.slane %v1865_v52, 2  ;;  %v1514_v2 = vrot.slane %v1512_v35, 1  ;;  %v1506_v33 = vshll.u32 %v4872_v3, 16  ;;  %v1890_v0 = vrot.slane %v4872_v3, 2 }
  0x61   : > { %3914 = vmatprep.subr.bf16.mxu0 %v4247_v15  ;;  %1372 = vmatmul.mubr.bf16.gmra.mrb[28].mxu1 %v1206_v58  ;;  %v1498_v15 = vshll.u32 %v1481_v61, 16  ;;  %v1517_v58 = vrot.slane %v1515_v7, 2  ;;  %v1864_v20 = vpack.c.bf16 %v1461_v54, %v1842_v30  ;;  %v4266_v54 = vld [vmem:[%s5418_s1 + $0x350] sm:$0xff]  }
  0x62   : > { %1379 = vmatprep.mubr.bf16.mxu1 %v1212_v5  ;;  %3959 = vmatpush3.bf16.msra.mxu1 %v4248_v18  ;;  %v1497_v5 = vrot.slane %v1495_v14, 1  ;;  %v1508_v25 = vrot.slane %v1506_v33, 2  ;;  %v4937_v35 = vld [vmem:[%s4451_s6 + $0x70] sm:$0xff] }
  0x63   : > { %3960 = vmatprep.subr.bf16.mxu1 %v4250_v1  ;;  %v1500_v18 = vrot.slane %v1498_v15, 2  ;;  %v1503_v1 = vshrl.u32 %v4872_v3, 16  ;;  %v1889_v27 = vrot.slane %v1864_v20, 2  ;;  %v4269_v3 = vld [vmem:[%s5418_s1 + $0x388] sm:$0xff]   ;;  %v4267_v7 = vld [vmem:[%s5418_s1 + $0x310] sm:$0xff]   ;;  %v4944_v63 = vpack.c.bf16 %v4616_v59, %v4937_v35  ;;  %v4270_v59 = vld [vmem:[%s5418_s1 + $0x358] sm:$0xff]  }
  0x64   : > { %3915 = vmatpush3.bf16.msra.mxu0 %v4249_v47  ;;  %v1894_v47 = vsel %vm1888_vm2, %v1892_v11, %v1893_v12 }
  0x65   : > { %3916 = vmatprep.subr.bf16.mxu0 %v4252_v19  ;;  %v1526_v19 = vor.u32 %v1525_v17, %v1522_v16  ;;  %v1505_v41 = vrot.slane %v1503_v1, 1  ;;  %v1891_v39 = vsel %vm1888_vm2, %v1889_v27, %v1890_v0  ;;  %v1547_v15 = vshrl.u32 %v4944_v63, 16  ;;  %v4984_v27 = vld [vmem:[%s4451_s6 + $0x90] sm:$0xff] }
  0x66   : > { %3961 = vmatpush3.bf16.msra.mxu1 %v4251_v60  ;;  %v1518_v60 = vor.u32 %v1517_v58, %v1514_v2  ;;  %v1550_v2 = vshll.u32 %v4944_v63, 16  ;;  %v4273_v58 = vld [vmem:[%s5418_s1 + $0x390] sm:$0xff]   ;;  %v1899_v20 = vrot.slane %v4944_v63, 2 }
  0x67   : > { %1070 = vmatmul.mubr.bf16.gmra.mrb[32].mxu0 %v900_v36  ;;  %3962 = vmatprep.subr.bf16.mxu1 %v4254_v28  ;;  %v1501_v36 = vor.u32 %v1500_v18, %v1497_v5  ;;  %v1509_v28 = vor.u32 %v1508_v25, %v1505_v41  ;;  %v4271_v5 = vld [vmem:[%s5418_s1 + $0x318] sm:$0xff]   ;;  %v1549_v18 = vrot.slane %v1547_v15, 1  ;;  %v4285_v63 = vld [vmem:[%s5418_s1 + $0x330] sm:$0xff]  }
  0x68   : > { %3917 = vmatpush3.bf16.msra.mxu0 %v4253_v21  ;;  %1077 = vmatprep.mubr.bf16.mxu0 %v906_v38  ;;  %v4889_v21 = vld [vmem:[%s4451_s6 + $0x50] sm:$0xff]  ;;  %v1527_v22 = vsel %vm1493_vm3, %v1518_v60, %v1526_v19  ;;  %v1538_v38 = vshrl.u32 %v1486_v40, 16  ;;  %v1552_v1 = vrot.slane %v1550_v2, 2  ;;  %v4981_v25 = vld [vmem:[%s4451_s6 + $0x98] sm:$0xff] }
  0x69   : > { %3918 = vmatprep.subr.bf16.mxu0 %v4256_v44  ;;  %1380 = vmatmul.mubr.bf16.gmra.mrb[32].mxu1 %v1210_v32  ;;  %v4896_v13 = vpack.c.bf16 %v4571_v29, %v4889_v21  ;;  %v4262_v32 = vld [vmem:[%s5418_s1 + $0x348] sm:$0xff]   ;;  %v1897_v44 = vrot.slane %v1486_v40, 2  ;;  %v1510_v45 = vsel %vm1493_vm3, %v1501_v36, %v1509_v28  ;;  %v4275_v36 = vld [vmem:[%s5418_s1 + $0x3d8] sm:$0xff]   ;;  %v4286_v15 = vld [vmem:[%s5418_s1 + $0x3f0] sm:$0xff]  }
  0x6a   : > { %1387 = vmatprep.mubr.bf16.mxu1 %v1216_v6  ;;  %3963 = vmatpush3.bf16.msra.mxu1 %v4255_v31  ;;  %v4261_v31 = vld [vmem:[%s5418_s1 + $0x300] sm:$0xff]   ;;  %v1553_v33 = vor.u32 %v1552_v1, %v1549_v18 }
  0x6b   : > { %3964 = vmatprep.subr.bf16.mxu1 %v4258_v42  ;;  %v1529_v29 = vshrl.u32 %v4896_v13, 16  ;;  %v4265_v6 = vld [vmem:[%s5418_s1 + $0x380] sm:$0xff]   ;;  %v1540_v42 = vrot.slane %v1538_v38, 1  ;;  %v1895_v53 = vrot.slane %v4896_v13, 2 }
  0x6c   : > { %3919 = vmatpush3.bf16.msra.mxu0 %v4257_v8  ;;  %v1532_v8 = vshll.u32 %v4896_v13, 16  ;;  %v4989_v13 = vpack.c.bf16 %v4789_v4, %v4981_v25 }
  0x6d   : > { %3996 = vmatprep.subr.bf16.mxu0 %v4260_v62  ;;  %v1531_v48 = vrot.slane %v1529_v29, 1  ;;  %v1896_v14 = vsel %vm1888_vm2, %v1890_v0, %v1895_v53  ;;  %v4276_v0 = vld [vmem:[%s5418_s1 + $0x320] sm:$0xff]  }
  0x6e   : > { %3965 = vmatpush3.bf16.msra.mxu1 %v4259_v46  ;;  %v1543_v46 = vrot.slane %v1541_v23, 2  ;;  %v1534_v51 = vrot.slane %v1532_v8, 2  ;;  %v1574_v38 = vshrl.u32 %v4989_v13, 16  ;;  %v1577_v4 = vshll.u32 %v4989_v13, 16  ;;  %v4280_v29 = vld [vmem:[%s5418_s1 + $0x3a0] sm:$0xff]   ;;  %v4281_v8 = vld [vmem:[%s5418_s1 + $0x328] sm:$0xff]  }
  0x6f   : > { %1078 = vmatmul.mubr.bf16.gmra.mrb[36].mxu0 %v904_v26  ;;  %4042 = vmatprep.subr.bf16.mxu1 %v4264_v37  ;;  %v1898_v26 = vsel %vm1888_vm2, %v1893_v12, %v1897_v44  ;;  %v4272_v12 = vld [vmem:[%s5418_s1 + $0x3d0] sm:$0xff]   ;;  %v4993_v37 = vpack.c.bf16 %v4795_v10, %v4984_v27  ;;  %v1905_v23 = vrot.slane %v4989_v13, 2  ;;  %v2154_v13 = vld [vmem:[%s4451_s6 + $0x28] sm:$0xf0] }
  0x70   : > { %1738 = vmatprep.mubr.bf16.mxu0 %v1527_v22  ;;  %v1544_v50 = vor.u32 %v1543_v46, %v1540_v42  ;;  %v1535_v52 = vor.u32 %v1534_v51, %v1531_v48  ;;  %v4277_v22 = vld [vmem:[%s5418_s1 + $0x398] sm:$0xff]   ;;  %v4283_v48 = vld [vmem:[%s5418_s1 + $0x3a8] sm:$0xff]  }
  0x71   : > { %1388 = vmatmul.mubr.bf16.gmra.mrb[36].mxu1 %v1214_v57  ;;  %v4926_v57 = vld [vmem:[%s4451_s6 + $0x78] sm:$0xff]  ;;  %v1565_v10 = vshrl.u32 %v4993_v37, 16 }
  0x72   : > { %2049 = vmatprep.mubr.bf16.mxu1 %v1894_v47  ;;  %v1545_v61 = vsel %vm1493_vm3, %v1526_v19, %v1544_v50  ;;  %v4934_v30 = vpack.c.bf16 %v4608_v55, %v4926_v57  ;;  %v1536_v9 = vsel %vm1493_vm3, %v1509_v28, %v1535_v52  ;;  %v4274_v19 = vld [vmem:[%s5418_s1 + $0x360] sm:$0xff]   ;;  %v1554_v40 = vsel %vm1493_vm3, %v1535_v52, %v1553_v33 }
  0x73   : > { %v4278_v28 = vld [vmem:[%s5418_s1 + $0x3e0] sm:$0xff]   ;;  %v1567_v46 = vrot.slane %v1565_v10, 1 }
  0x74   : > { %v1556_v62 = vshrl.u32 %v4934_v30, 16  ;;  %v1559_v55 = vshll.u32 %v4934_v30, 16  ;;  %v1901_v11 = vrot.slane %v4934_v30, 2 }
  0x76   : > { %v1558_v16 = vrot.slane %v1556_v62, 1  ;;  %v1561_v17 = vrot.slane %v1559_v55, 2  ;;  %v1902_v47 = vsel %vm1888_vm2, %v1897_v44, %v1901_v11  ;;  %v1903_v44 = vrot.slane %v4993_v37, 2  ;;  %v1862_v55 = vld [vmem:[%s4451_s6 + $0xb0] sm:$0xf] }
  0x77   : > { %1739 = vmatmul.mubr.bf16.vlgmr.msra.gmra.mrb[40].mxu0 %v1510_v45  ;;  %v1579_v45 = vrot.slane %v1577_v4, 2  ;;  %v1906_v42 = vsel %vm1888_vm2, %v1901_v11, %v1905_v23  ;;  %v2153_v4 = vld [vmem:[%s4451_s6 + $0x20] sm:$0xf0] }
  0x78   : > { %3997 = vmatpush3.bf16.msra.mxu0 %v4261_v31  ;;  %1746 = vmatprep.mubr.bf16.mxu0 %v1545_v61  ;;  %v1562_v60 = vor.u32 %v1561_v17, %v1558_v16  ;;  %v1900_v31 = vsel %vm1888_vm2, %v1895_v53, %v1899_v20  ;;  %v1904_v53 = vsel %vm1888_vm2, %v1899_v20, %v1903_v44  ;;  %v1863_v61 = vld [vmem:[%s4451_s6 + $0xb8] sm:$0xf]  ;;  %v4287_v16 = vld [vmem:[%s5418_s1 + $0x3b0] sm:$0xff]  }
  0x79   : > { %2050 = vmatmul.mubr.bf16.vlgmr.msra.gmra.mrb[40].mxu1 %v1891_v39  ;;  %3998 = vmatprep.subr.bf16.mxu0 %v4262_v32  ;;  %v4279_v32 = vld [vmem:[%s5418_s1 + $0x368] sm:$0xff]   ;;  %v1568_v39 = vshll.u32 %v4993_v37, 16  ;;  %v4288_v17 = vld [vmem:[%s5418_s1 + $0x378] sm:$0xff]  }
  0x7a   : > { %2057 = vmatprep.mubr.bf16.mxu1 %v1898_v26  ;;  %4043 = vmatpush3.bf16.msra.mxu1 %v4265_v6  ;;  %v1563_v41 = vsel %vm1493_vm3, %v1544_v50, %v1562_v60  ;;  %v1576_v6 = vrot.slane %v1574_v38, 1  ;;  %v4284_v50 = vld [vmem:[%s5418_s1 + $0x370] sm:$0xff]   ;;  %v2464_v37 = vld [vmem:[%s4451_s6 + $0x28] sm:$0xe0] }
  0x7b   : > { %4044 = vmatprep.subr.bf16.mxu1 %v4268_v34  ;;  %v1570_v26 = vrot.slane %v1568_v39, 2  ;;  %v2486_v10 = vpack.c.bf16 %v4857_v49, %v2464_v37  ;;  %v2175_v39 = vpack.c.bf16 %v4867_v56, %v2153_v4 }
  0x7c   : > { %3999 = vmatpush3.bf16.msra.mxu0 %v4263_v24  ;;  %v4282_v24 = vld [vmem:[%s5418_s1 + $0x3e8] sm:$0xff]   ;;  %v1580_v51 = vor.u32 %v1579_v45, %v1576_v6 }
  0x7d   : > { %4000 = vmatprep.subr.bf16.mxu0 %v4266_v54  ;;  %v1571_v34 = vor.u32 %v1570_v26, %v1567_v46  ;;  %v1480_v54 = vld [vmem:[%s4451_s6 + $0xb8] sm:$0x7]  ;;  %v2516_v46 = vshrl.u32 %v2486_v10, 16 }
  0x7e   : > { %4045 = vmatpush3.bf16.msra.mxu1 %v4269_v3  ;;  %v1581_v52 = vsel %vm1493_vm3, %v1562_v60, %v1580_v51  ;;  %v1492_v30 = vpack.c.bf16 %v1480_v54, %v1480_v54  ;;  %v4289_v60 = vld [vmem:[%s5418_s1 + $0x338] sm:$0xff]  }
  0x7f   : > { %1747 = vmatmul.mubr.bf16.gmra.mrb[44].mxu0 %v1536_v9  ;;  %4046 = vmatprep.subr.bf16.mxu1 %v4272_v12  ;;  %v1572_v3 = vsel %vm1493_vm3, %v1553_v33, %v1571_v34  ;;  %v1479_v9 = vld [vmem:[%s4451_s6 + $0xb0] sm:$0x7] }
  0x80   : > { %4001 = vmatpush3.bf16.msra.mxu0 %v4267_v7  ;;  %1754 = vmatprep.mubr.bf16.mxu0 %v1563_v41  ;;  %v1875_v7 = vpack.c.bf16 %v1863_v61, %v1863_v61  ;;  %v1491_v62 = vpack.c.bf16 %v1479_v9, %v1479_v9  ;;  %v1592_v11 = vshrl.u32 %v1492_v30, 16  ;;  %v1595_v12 = vshll.u32 %v1492_v30, 16  ;;  %v4290_v41 = vld [vmem:[%s5418_s1 + $0x3f8] sm:$0xff]   ;;  %v4293_v61 = vld [vmem:[%s5418_s1 + $0x400] sm:$0xff]  }
  0x81   : > { %2058 = vmatmul.mubr.bf16.gmra.mrb[44].mxu1 %v1896_v14  ;;  %4002 = vmatprep.subr.bf16.mxu0 %v4270_v59  ;;  %v1874_v59 = vpack.c.bf16 %v1862_v55, %v1862_v55  ;;  %v2162_v55 = vld [vmem:[%s4451_s6 + $0x68] sm:$0xff] }
  0x82   : > { %2065 = vmatprep.mubr.bf16.mxu1 %v1902_v47  ;;  %4047 = vmatpush3.bf16.msra.mxu1 %v4273_v58  ;;  %v1909_v14 = vrot.slane %v1875_v7, 2  ;;  %v1583_v2 = vshrl.u32 %v1491_v62, 16  ;;  %v1586_v58 = vshll.u32 %v1491_v62, 16  ;;  %v1594_v47 = vrot.slane %v1592_v11, 1  ;;  %v2161_v11 = vld [vmem:[%s4451_s6 + $0x60] sm:$0xff] }
  0x83   : > { %4048 = vmatprep.subr.bf16.mxu1 %v4275_v36  ;;  %v1907_v1 = vrot.slane %v1874_v59, 2 }
  0x84   : > { %4003 = vmatpush3.bf16.msra.mxu0 %v4271_v5  ;;  %v1597_v5 = vrot.slane %v1595_v12, 2  ;;  %v1910_v18 = vsel %vm1888_vm2, %v1905_v23, %v1909_v14  ;;  %v1588_v33 = vrot.slane %v1586_v58, 2  ;;  %v2157_v23 = vld [vmem:[%s4451_s6 + $0x40] sm:$0xff] }
  0x85   : > { %4004 = vmatprep.subr.bf16.mxu0 %v4274_v19  ;;  %v1585_v19 = vrot.slane %v1583_v2, 1  ;;  %v5099_v2 = vpack.c.bf16 %v4926_v57, %v2162_v55  ;;  %v4296_v57 = vld [vmem:[%s5418_s1 + $0x450] sm:$0xff]   ;;  %v4302_v55 = vld [vmem:[%s5418_s1 + $0x468] sm:$0xff]  }
  0x86   : > { %4049 = vmatpush3.bf16.msra.mxu1 %v4277_v22  ;;  %v1598_v20 = vor.u32 %v1597_v5, %v1594_v47  ;;  %v1908_v22 = vsel %vm1888_vm2, %v1903_v44, %v1907_v1  ;;  %v5072_v44 = vpack.c.bf16 %v4889_v21, %v2157_v23  ;;  %v2166_v1 = vld [vmem:[%s4451_s6 + $0x88] sm:$0xff] }
  0x87   : > { %1755 = vmatmul.mubr.bf16.gmra.mrb[48].mxu0 %v1554_v40  ;;  %4050 = vmatprep.subr.bf16.mxu1 %v4278_v28  ;;  %v1589_v36 = vor.u32 %v1588_v33, %v1585_v19  ;;  %v4291_v40 = vld [vmem:[%s5418_s1 + $0x3b8] sm:$0xff]   ;;  %v2158_v28 = vld [vmem:[%s4451_s6 + $0x48] sm:$0xff]  ;;  %v2207_v5 = vrot.slane %v5099_v2, 2 }
  0x88   : > { %4005 = vmatpush3.bf16.msra.mxu0 %v4276_v0  ;;  %1762 = vmatprep.mubr.bf16.mxu0 %v1581_v52  ;;  %v1599_v0 = vsel %vm1493_vm3, %v1580_v51, %v1598_v20  ;;  %v5064_v38 = vpack.c.bf16 %v4886_v43, %v2158_v28  ;;  %v2200_v26 = vrot.slane %v5072_v44, 2  ;;  %v2507_v54 = vshrl.u32 %v5072_v44, 16 }
  0x89   : > { %2066 = vmatmul.mubr.bf16.gmra.mrb[48].mxu1 %v1900_v31  ;;  %4006 = vmatprep.subr.bf16.mxu0 %v4279_v32  ;;  %v1590_v31 = vsel %vm1493_vm3, %v1571_v34, %v1589_v36  ;;  %v2176_v32 = vpack.c.bf16 %v4857_v49, %v2154_v13  ;;  %v2519_v49 = vshll.u32 %v2486_v10, 16 }
  0x8a   : > { %2073 = vmatprep.mubr.bf16.mxu1 %v1906_v42  ;;  %4051 = vmatpush3.bf16.msra.mxu1 %v4280_v29  ;;  %v2463_v29 = vld [vmem:[%s4451_s6 + $0x20] sm:$0xe0]  ;;  %v2203_v6 = vrot.slane %v5064_v38, 2  ;;  %v2524_v43 = vshrl.u32 %v5064_v38, 16  ;;  %v2527_v45 = vshll.u32 %v5064_v38, 16  ;;  %v2509_v62 = vrot.slane %v2507_v54, 2 }
  0x8b   : > { %4052 = vmatprep.subr.bf16.mxu1 %v4282_v24  ;;  %v4292_v42 = vld [vmem:[%s5418_s1 + $0x440] sm:$0xff]   ;;  %v2199_v24 = vrot.slane %v2175_v39, 2  ;;  %v2485_v34 = vpack.c.bf16 %v4867_v56, %v2463_v29  ;;  %v2521_v52 = vrot.slane %v2519_v49, 3  ;;  %v2510_v56 = vshll.u32 %v5072_v44, 16 }
  0x8c   : > { %4007 = vmatpush3.bf16.msra.mxu0 %v4281_v8  ;;  %v2202_v8 = vrot.slane %v2176_v32, 2  ;;  %v2529_v51 = vrot.slane %v2527_v45, 3  ;;  %v2208_v36 = vsel %vm1888_vm2, %v2203_v6, %v2207_v5  ;;  %v4297_v32 = vld [vmem:[%s5418_s1 + $0x410] sm:$0xff]   ;;  %v2170_v45 = vld [vmem:[%s4451_s6 + $0xa8] sm:$0xff]  ;;  %v4300_v54 = vld [vmem:[%s5418_s1 + $0x460] sm:$0xff]  }
  0x8d   : > { %4008 = vmatprep.subr.bf16.mxu0 %v4284_v50  ;;  %v2518_v50 = vrot.slane %v2516_v46, 2  ;;  %v2499_v30 = vshrl.u32 %v2485_v34, 16  ;;  %v2502_v7 = vshll.u32 %v2485_v34, 16  ;;  %v2512_v59 = vrot.slane %v2510_v56, 3  ;;  %v4299_v34 = vld [vmem:[%s5418_s1 + $0x418] sm:$0xff]  }
  0x8e   : > { %4053 = vmatpush3.bf16.msra.mxu1 %v4283_v48  ;;  %v2204_v21 = vsel %vm1888_vm2, %v2202_v8, %v2203_v6  ;;  %v2526_v48 = vrot.slane %v2524_v43, 2  ;;  %v4298_v43 = vld [vmem:[%s5418_s1 + $0x458] sm:$0xff]  }
  0x8f   : > { %1763 = vmatmul.mubr.bf16.gmra.mrb[52].mxu0 %v1572_v3  ;;  %4054 = vmatprep.subr.bf16.mxu1 %v4286_v15  ;;  %v2522_v9 = vor.u32 %v2521_v52, %v2518_v50  ;;  %v2501_v12 = vrot.slane %v2499_v30, 2  ;;  %v2504_v14 = vrot.slane %v2502_v7, 3  ;;  %v4295_v15 = vld [vmem:[%s5418_s1 + $0x408] sm:$0xff]   ;;  %v2513_v47 = vor.u32 %v2512_v59, %v2509_v62 }
  0x90   : > { %4009 = vmatpush3.bf16.msra.mxu0 %v4285_v63  ;;  %1770 = vmatprep.mubr.bf16.mxu0 %v1599_v0  ;;  %v2530_v3 = vor.u32 %v2529_v51, %v2526_v48  ;;  %v4294_v63 = vld [vmem:[%s5418_s1 + $0x448] sm:$0xff]   ;;  %v5118_v0 = vpack.c.bf16 %v4981_v25, %v2166_v1 }
  0x91   : > { %2074 = vmatmul.mubr.bf16.gmra.mrb[52].mxu1 %v1904_v53  ;;  %4010 = vmatprep.subr.bf16.mxu0 %v4288_v17  ;;  %v2201_v53 = vsel %vm1888_vm2, %v2199_v24, %v2200_v26  ;;  %v2505_v17 = vor.u32 %v2504_v14, %v2501_v12  ;;  %v2169_v24 = vld [vmem:[%s4451_s6 + $0xa0] sm:$0xff] }
  0x92   : > { %2081 = vmatprep.mubr.bf16.mxu1 %v1910_v18  ;;  %4055 = vmatpush3.bf16.msra.mxu1 %v4287_v16  ;;  %v2531_v58 = vsel %vm2497_vm4, %v2522_v9, %v2530_v3  ;;  %v5103_v16 = vpack.c.bf16 %v4937_v35, %v2161_v11  ;;  %v2542_v18 = vshrl.u32 %v5099_v2, 16  ;;  %v2211_v25 = vrot.slane %v5118_v0, 2 }
  0x93   : > { %4056 = vmatprep.subr.bf16.mxu1 %v4290_v41  ;;  %v2514_v20 = vsel %vm2497_vm4, %v2505_v17, %v2513_v47  ;;  %v2560_v37 = vshrl.u32 %v5118_v0, 16  ;;  %v2563_v4 = vshll.u32 %v5118_v0, 16 }
  0x94   : > { %4011 = vmatpush3.bf16.msra.mxu0 %v4289_v60  ;;  %v2545_v60 = vshll.u32 %v5099_v2, 16  ;;  %v2205_v35 = vrot.slane %v5103_v16, 2  ;;  %v2533_v19 = vshrl.u32 %v5103_v16, 16  ;;  %v2536_v33 = vshll.u32 %v5103_v16, 16 }
  0x95   : > { %4088 = vmatprep.subr.bf16.mxu0 %v4292_v42  ;;  %v2544_v41 = vrot.slane %v2542_v18, 2  ;;  %v2212_v29 = vsel %vm1888_vm2, %v2207_v5, %v2211_v25  ;;  %v2562_v8 = vrot.slane %v2560_v37, 2  ;;  %v2565_v6 = vrot.slane %v2563_v4, 3  ;;  %v2849_v37 = vld [vmem:[%s4451_s6 + $0x38] sm:$0xff] }
  0x96   : > { %4057 = vmatpush3.bf16.msra.mxu1 %v4291_v40  ;;  %v2547_v40 = vrot.slane %v2545_v60, 3  ;;  %v2206_v13 = vsel %vm1888_vm2, %v2200_v26, %v2205_v35  ;;  %v2535_v28 = vrot.slane %v2533_v19, 2  ;;  %v2171_v26 = vld [vmem:[%s4451_s6 + $0xb0] sm:$0xff] }
  0x97   : > { %1771 = vmatmul.mubr.bf16.gmra.mrb[56].mxu0 %v1590_v31  ;;  %4134 = vmatprep.subr.bf16.mxu1 %v4292_v42  ;;  %v2538_v31 = vrot.slane %v2536_v33, 3  ;;  %v2172_v42 = vld [vmem:[%s4451_s6 + $0xb8] sm:$0xff]  ;;  %v2566_v48 = vor.u32 %v2565_v6, %v2562_v8  ;;  %v4303_v33 = vld [vmem:[%s5418_s1 + $0x428] sm:$0xff]  }
  0x98   : > { %2359 = vmatprep.mubr.bf16.mxu0 %v2204_v21  ;;  %v2548_v10 = vor.u32 %v2547_v40, %v2544_v41  ;;  %v5149_v50 = vpack.c.bf16 %v2172_v42, %v2170_v45  ;;  %v4304_v40 = vld [vmem:[%s5418_s1 + $0x470] sm:$0xff]   ;;  %v4306_v42 = vld [vmem:[%s5418_s1 + $0x478] sm:$0xff]  }
  0x99   : > { %2082 = vmatmul.mubr.bf16.gmra.mrb[56].mxu1 %v1908_v22  ;;  %v2165_v22 = vld [vmem:[%s4451_s6 + $0x80] sm:$0xff]  ;;  %v2539_v39 = vor.u32 %v2538_v31, %v2535_v28 }
  0x9a   : > { %2742 = vmatprep.mubr.bf16.mxu1 %v2531_v58  ;;  %v5131_v23 = vpack.c.bf16 %v4984_v27, %v2165_v22  ;;  %v2549_v46 = vsel %vm2497_vm4, %v2530_v3, %v2548_v10  ;;  %v2567_v3 = vsel %vm2497_vm4, %v2548_v10, %v2566_v48  ;;  %v2215_v30 = vrot.slane %v5149_v50, 2  ;;  %v2484_v58 = vld [vmem:[%s4451_s6 + $0xc8] sm:$0x1f]  ;;  %v2173_v28 = vld [vmem:[%s4451_s6 + $0xc0] sm:$0xf] }
  0x9b   : > { %v2540_v21 = vsel %vm2497_vm4, %v2513_v47, %v2539_v39  ;;  %v2578_v7 = vshrl.u32 %v5149_v50, 16  ;;  %v2581_v56 = vshll.u32 %v5149_v50, 16  ;;  %v2496_v60 = vpack.c.bf16 %v2484_v58, %v2484_v58 }
  0x9c   : > { %v2551_v27 = vshrl.u32 %v5131_v23, 16  ;;  %v2554_v49 = vshll.u32 %v5131_v23, 16  ;;  %v2209_v51 = vrot.slane %v5131_v23, 2  ;;  %v2216_v17 = vsel %vm1888_vm2, %v2211_v25, %v2215_v30  ;;  %v2847_v25 = vld [vmem:[%s4451_s6 + $0x28] sm:$0xc0] }
  0x9d   : > { %v2580_v14 = vrot.slane %v2578_v7, 2  ;;  %v2583_v59 = vrot.slane %v2581_v56, 3 }
  0x9e   : > { %v2553_v52 = vrot.slane %v2551_v27, 2  ;;  %v2210_v11 = vsel %vm1888_vm2, %v2205_v35, %v2209_v51  ;;  %v2483_v35 = vld [vmem:[%s4451_s6 + $0xc0] sm:$0x1f] }
  0x9f   : > { %2360 = vmatmul.mubr.bf16.vlgmr.msra.gmra.mrb[60].mxu0 %v2201_v53  ;;  %v2556_v53 = vrot.slane %v2554_v49, 3  ;;  %v2584_v18 = vor.u32 %v2583_v59, %v2580_v14  ;;  %v2495_v41 = vpack.c.bf16 %v2483_v35, %v2483_v35  ;;  %v3167_v35 = vld [vmem:[%s5420_s3 + $0x30] sm:$0xff] }
  0xa0   : > { %4089 = vmatpush3.bf16.msra.mxu0 %v4293_v61  ;;  %2367 = vmatprep.mubr.bf16.mxu0 %v2208_v36  ;;  %v2599_v36 = vshll.u32 %v2496_v60, 16 }
  0xa1   : > { %4090 = vmatprep.subr.bf16.mxu0 %v4294_v63  ;;  %2743 = vmatmul.mubr.bf16.vlgmr.msra.gmra.mrb[60].mxu1 %v2514_v20  ;;  %v2557_v12 = vor.u32 %v2556_v53, %v2553_v52  ;;  %v2596_v20 = vshrl.u32 %v2496_v60, 16  ;;  %v2585_v22 = vsel %vm2497_vm4, %v2566_v48, %v2584_v18  ;;  %v2587_v8 = vshrl.u32 %v2495_v41, 16  ;;  %v2846_v52 = vld [vmem:[%s4451_s6 + $0x20] sm:$0xc0]  ;;  %v2848_v53 = vld [vmem:[%s4451_s6 + $0x30] sm:$0xff]  ;;  %v3168_v60 = vld [vmem:[%s5420_s3 + $0x38] sm:$0xff] }
  0xa2   : > { %4142 = vmatpush3.bf16.msra.mxu1 %v4293_v61  ;;  %2750 = vmatprep.mubr.bf16.mxu1 %v2549_v46  ;;  %v5154_v61 = vpack.c.bf16 %v2171_v26, %v2169_v24  ;;  %v2590_v6 = vshll.u32 %v2495_v41, 16  ;;  %v2869_v46 = vpack.c.bf16 %v2849_v37, %v2847_v25  ;;  %v2868_v56 = vpack.c.bf16 %v2848_v53, %v2846_v52 }
  0xa3   : > { %4135 = vmatprep.subr.bf16.mxu1 %v4294_v63  ;;  %v4301_v63 = vld [vmem:[%s5418_s1 + $0x420] sm:$0xff]   ;;  %v2558_v19 = vsel %vm2497_vm4, %v2539_v39, %v2557_v12  ;;  %v2598_v31 = vrot.slane %v2596_v20, 2  ;;  %v4305_v39 = vld [vmem:[%s5418_s1 + $0x430] sm:$0xff]   ;;  %v2589_v24 = vrot.slane %v2587_v8, 2  ;;  %v3170_v20 = vld [vmem:[%s5420_s3 + $0x48] sm:$0xff] }
  0xa4   : > { %4091 = vmatpush3.bf16.msra.mxu0 %v4295_v15  ;;  %v2569_v9 = vshrl.u32 %v5154_v61, 16  ;;  %v2572_v62 = vshll.u32 %v5154_v61, 16  ;;  %v2213_v47 = vrot.slane %v5154_v61, 2  ;;  %v2592_v26 = vrot.slane %v2590_v6, 3 }
  0xa5   : > { %4092 = vmatprep.subr.bf16.mxu0 %v4296_v57  ;;  %v2893_v59 = vrot.slane %v2868_v56, 3 }
  0xa6   : > { %4143 = vmatpush3.bf16.msra.mxu1 %v4295_v15  ;;  %v2174_v15 = vld [vmem:[%s4451_s6 + $0xc8] sm:$0xf]  ;;  %v2571_v5 = vrot.slane %v2569_v9, 2  ;;  %v2214_v10 = vsel %vm1888_vm2, %v2209_v51, %v2213_v47  ;;  %v2896_v51 = vrot.slane %v2869_v46, 3  ;;  %v2593_v7 = vor.u32 %v2592_v26, %v2589_v24 }
  0xa7   : > { %2368 = vmatmul.mubr.bf16.gmra.mrb[64].mxu0 %v2206_v13  ;;  %4136 = vmatprep.subr.bf16.mxu1 %v4296_v57  ;;  %v2574_v57 = vrot.slane %v2572_v62, 3  ;;  %v2186_v1 = vpack.c.bf16 %v2174_v15, %v2174_v15  ;;  %v2905_v9 = vrot.slane %v5118_v0, 3  ;;  %v2909_v62 = vrot.slane %v5149_v50, 3 }
  0xa8   : > { %4093 = vmatpush3.bf16.msra.mxu0 %v4297_v32  ;;  %2375 = vmatprep.mubr.bf16.mxu0 %v2212_v29  ;;  %v2185_v29 = vpack.c.bf16 %v2173_v28, %v2173_v28  ;;  %v2894_v0 = vrot.slane %v5072_v44, 3  ;;  %v2901_v15 = vrot.slane %v5099_v2, 3 }
  0xa9   : > { %4094 = vmatprep.subr.bf16.mxu0 %v4298_v43  ;;  %2751 = vmatmul.mubr.bf16.gmra.mrb[64].mxu1 %v2540_v21  ;;  %v2219_v13 = vrot.slane %v2186_v1, 2  ;;  %v2575_v4 = vor.u32 %v2574_v57, %v2571_v5  ;;  %v4307_v21 = vld [vmem:[%s5418_s1 + $0x438] sm:$0xff]   ;;  %v2910_v50 = vsel %vm2892_vm5, %v2905_v9, %v2909_v62  ;;  %v2903_v5 = vrot.slane %v5131_v23, 3  ;;  %v2866_v1 = vld [vmem:[%s4451_s6 + $0xc0] sm:$0x3f] }
  0xaa   : > { %2758 = vmatprep.mubr.bf16.mxu1 %v2567_v3  ;;  %4144 = vmatpush3.bf16.msra.mxu1 %v4297_v32  ;;  %v2601_v32 = vrot.slane %v2599_v36, 3  ;;  %v2217_v49 = vrot.slane %v2185_v29, 2  ;;  %v3163_v3 = vld [vmem:[%s5420_s3 + $0x10] sm:$0xff]  ;;  %v2895_v44 = vsel %vm2892_vm5, %v2893_v59, %v2894_v0  ;;  %v2899_v23 = vrot.slane %v5103_v16, 3  ;;  %v3169_v36 = vld [vmem:[%s5420_s3 + $0x40] sm:$0xff] }
  0xab   : > { %4137 = vmatprep.subr.bf16.mxu1 %v4298_v43  ;;  %v2220_v43 = vsel %vm1888_vm2, %v2215_v30, %v2219_v13  ;;  %v2576_v27 = vsel %vm2497_vm4, %v2557_v12, %v2575_v4  ;;  %v3161_v30 = vld [vmem:[%s5420_s3] sm:$0xff]  ;;  %v3162_v12 = vld [vmem:[%s5420_s3 + $0x8] sm:$0xff]  ;;  %v2594_v14 = vsel %vm2497_vm4, %v2575_v4, %v2593_v7  ;;  %v2906_v16 = vsel %vm2892_vm5, %v2901_v15, %v2905_v9 }
  0xac   : > { %4095 = vmatpush3.bf16.msra.mxu0 %v4299_v34  ;;  %v2602_v45 = vor.u32 %v2601_v32, %v2598_v31  ;;  %v2900_v41 = vsel %vm2892_vm5, %v2894_v0, %v2899_v23  ;;  %v2904_v13 = vsel %vm2892_vm5, %v2899_v23, %v2903_v5 }
  0xad   : > { %4096 = vmatprep.subr.bf16.mxu0 %v4300_v54 }
  0xae   : > { %4145 = vmatpush3.bf16.msra.mxu1 %v4299_v34  ;;  %v2603_v48 = vsel %vm2497_vm4, %v2584_v18, %v2602_v45  ;;  %v2897_v34 = vrot.slane %v5064_v38, 3  ;;  %v2218_v38 = vsel %vm1888_vm2, %v2213_v47, %v2217_v49  ;;  %v3165_v47 = vld [vmem:[%s5420_s3 + $0x20] sm:$0xff]  ;;  %v2907_v18 = vrot.slane %v5154_v61, 3 }
  0xaf   : > { %2376 = vmatmul.mubr.bf16.gmra.mrb[68].mxu0 %v2210_v11  ;;  %4138 = vmatprep.subr.bf16.mxu1 %v4300_v54  ;;  %v4316_v54 = vmov 0   ;;  %v3164_v11 = vld [vmem:[%s5420_s3 + $0x18] sm:$0xff]  ;;  %v2878_v61 = vpack.c.bf16 %v2866_v1, %v2866_v1 }
  0xb0   : > { %4097 = vmatpush3.bf16.msra.mxu0 %v4301_v63  ;;  %2383 = vmatprep.mubr.bf16.mxu0 %v2216_v17  ;;  %v3166_v17 = vld [vmem:[%s5420_s3 + $0x28] sm:$0xff]  ;;  %v2902_v2 = vsel %vm2892_vm5, %v2897_v34, %v2901_v15 }
  0xb1   : > { %4098 = vmatprep.subr.bf16.mxu0 %v4302_v55  ;;  %2759 = vmatmul.mubr.bf16.gmra.mrb[68].mxu1 %v2558_v19  ;;  %v2908_v19 = vsel %vm2892_vm5, %v2903_v5, %v2907_v18 }
  0xb2   : > { %2766 = vmatprep.mubr.bf16.mxu1 %v2585_v22  ;;  %4146 = vmatpush3.bf16.msra.mxu1 %v4301_v63  ;;  %v2898_v63 = vsel %vm2892_vm5, %v2896_v51, %v2897_v34  ;;  %v2911_v22 = vrot.slane %v2878_v61, 3 }
  0xb3   : > { %4139 = vmatprep.subr.bf16.mxu1 %v4302_v55  ;;  %4163 = vset.pattern.permute.xlu1 %v4316_v54  ;;  %v2867_v55 = vld [vmem:[%s4451_s6 + $0xc8] sm:$0x3f] }
  0xb4   : > { %4099 = vmatpush3.bf16.msra.mxu0 %v4303_v33  ;;  %4162 = vset.pattern.permute.xlu0 %v4316_v54  ;;  %v2879_v58 = vpack.c.bf16 %v2867_v55, %v2867_v55 }
  0xb5   : > { %4100 = vmatprep.subr.bf16.mxu0 %v4304_v40  ;;  %3183 = vperm.xlu1 %4163, %v3163_v3  }
  0xb6   : > { %4147 = vmatpush3.bf16.msra.mxu1 %v4303_v33  ;;  %3173 = vperm.xlu0 %4162, %v3161_v30   ;;  %v2913_v57 = vrot.slane %v2879_v58, 3 }
  0xb7   : > { %2384 = vmatmul.mubr.bf16.gmra.mrb[72].mxu0 %v2214_v10  ;;  %4140 = vmatprep.subr.bf16.mxu1 %v4304_v40  ;;  %v2912_v40 = vsel %vm2892_vm5, %v2907_v18, %v2911_v22 }
  0xb8   : > { %2391 = vmatprep.mubr.bf16.mxu0 %v2220_v43  ;;  %4101 = vmatpush3.bf16.msra.mxu0 %v4305_v39  ;;  %v2914_v33 = vsel %vm2892_vm5, %v2909_v62, %v2913_v57 }
  0xb9   : > { %4102 = vmatprep.subr.bf16.mxu0 %v4306_v42  ;;  %2767 = vmatmul.mubr.bf16.gmra.mrb[72].mxu1 %v2576_v27 }
  0xba   : > { %2774 = vmatprep.mubr.bf16.mxu1 %v2603_v48  ;;  %4148 = vmatpush3.bf16.msra.mxu1 %v4305_v39 }
  0xbb   : > { %4141 = vmatprep.subr.bf16.mxu1 %v4306_v42  ;;  %3188 = vperm.xlu1 %4163, %v3164_v11  }
  0xbc   : > { %4103 = vmatpush3.bf16.msra.mxu0 %v4307_v21  ;;  %3178 = vperm.xlu0 %4162, %v3162_v12  }
  0xbe   : > { %4149 = vmatpush3.bf16.msra.mxu1 %v4307_v21 }
  0xbf   : > { %2392 = vmatmul.mubr.bf16.gmra.mrb[76].mxu0 %v2218_v38  ;;  %3198 = vperm.xlu1 %4163, %v3166_v17  }
  0xc0   : > { %3053 = vmatprep.mubr.bf16.mxu0 %v2898_v63  ;;  %3193 = vperm.xlu0 %4162, %v3165_v47  }
  0xc1   : > { %2775 = vmatmul.mubr.bf16.gmra.mrb[76].mxu1 %v2594_v14 }
  0xc2   : > { %3077 = vmatprep.mubr.bf16.mxu1 %v2910_v50 }
  0xc3   : > { %3208 = vperm.xlu1 %4163, %v3168_v60  }
  0xc4   : > { %3203 = vperm.xlu0 %4162, %v3167_v35  }
  0xc7   : > { %3054 = vmatmul.mubr.bf16.vlgmr.msra.gmra.mrb[80].mxu0 %v2895_v44  ;;  %3218 = vperm.xlu1 %4163, %v3170_v20  }
  0xc8   : > { %3061 = vmatprep.mubr.bf16.mxu0 %v2902_v2  ;;  %3213 = vperm.xlu0 %4162, %v3169_v36  }
  0xc9   : > { %3078 = vmatmul.mubr.bf16.vlgmr.msra.gmra.mrb[80].mxu1 %v2908_v19 }
  0xca   : > { %3085 = vmatprep.mubr.bf16.mxu1 %v2914_v33 }
  0xcf   : > { %3062 = vmatmul.mubr.bf16.gmra.mrb[84].mxu0 %v2900_v41 }
  0xd0   : > { %3069 = vmatprep.mubr.bf16.mxu0 %v2906_v16 }
  0xd1   : > { %3086 = vmatmul.mubr.bf16.gmra.mrb[84].mxu1 %v2912_v40 }
  0xd7   : > { %3070 = vmatmul.mubr.bf16.gmra.mrb[88].mxu0 %v2904_v13 }
  0xfa   : > { %v3736_v28 = vpop.f32.mrb[0].mxu0 }
  0xfb   : > { %v3737_v31 = vpop.f32.mrb[1].mxu0 }
  0xfc   : > { %v3738_v32 = vadd.f32 %v3737_v31, %v3736_v28  ;;  %v3739_v25 = vpop.f32.mrb[2].mxu0  ;;  %v3782_v10 = vpop.f32.mrb[0].mxu1 }
  0xfd   : > { %v3740_v37 = vpop.f32.mrb[3].mxu0  ;;  %v3783_v39 = vpop.f32.mrb[1].mxu1 }
  0xfe   : > { %v3741_v4 = vadd.f32 %v3740_v37, %v3739_v25  ;;  %v3784_v8 = vadd.f32 %v3783_v39, %v3782_v10  ;;  %v3785_v6 = vpop.f32.mrb[2].mxu1 }
  0xff   : > { %v3786_v45 = vpop.f32.mrb[3].mxu1 }
 0x100   : > { %v785_v27 = vadd.f32 %v3784_v8, %v3738_v32  ;;  %v3787_v49 = vadd.f32 %v3786_v45, %v3785_v6 }
 0x102   : > { %v3742_v29 = vpop.f32.mrb[4].mxu0  ;;  %v786_v21 = vadd.f32 %v3787_v49, %v3741_v4 }
 0x103   : > { %v3743_v43 = vpop.f32.mrb[5].mxu0 }
 0x104   : > { %v3744_v42 = vadd.f32 %v3743_v43, %v3742_v29  ;;  %v3745_v46 = vpop.f32.mrb[6].mxu0  ;;  %v3788_v48 = vpop.f32.mrb[4].mxu1 }
 0x105   : > { %v3746_v24 = vpop.f32.mrb[7].mxu0  ;;  %v3789_v51 = vpop.f32.mrb[5].mxu1 }
 0x106   : > { %v3747_v26 = vadd.f32 %v3746_v24, %v3745_v46  ;;  %v3790_v52 = vadd.f32 %v3789_v51, %v3788_v48  ;;  %v3791_v53 = vpop.f32.mrb[6].mxu1  ;;  %v4317_v48 = vmov 0.0  }
 0x107   : > { %v3792_v3 = vpop.f32.mrb[7].mxu1  ;;  %3231 = vst [vmem:[%s5278_s29] sm:$0xff] %v4317_v48  ;;  %3232 = vst [vmem:[%s5278_s29 + $0x8] sm:$0xff] %v4317_v48 }
 0x108   : > { %v5258_v7 = vadd.f32 %v3790_v52, %v3744_v42  ;;  %v3793_v56 = vadd.f32 %v3792_v3, %v3791_v53  ;;  %3233 = vst [vmem:[%s5278_s29 + $0x10] sm:$0xff] %v4317_v48  ;;  %3243 = vst [vmem:[%s5278_s29 + $0x60] sm:$0xff] %v4317_v48 }
 0x109   : > { %3244 = vst [vmem:[%s5278_s29 + $0x68] sm:$0x3f] %v4317_v48  ;;  %3234 = vst [vmem:[%s5278_s29 + $0x18] sm:$0xff] %v4317_v48 }
 0x10a   : > { %v3748_v34 = vpop.f32.mrb[8].mxu0  ;;  %v5260_v62 = vadd.f32 %v3793_v56, %v3747_v26  ;;  %3235 = vst [vmem:[%s5278_s29 + $0x20] sm:$0xff] %v4317_v48  ;;  %3236 = vst [vmem:[%s5278_s29 + $0x28] sm:$0xff] %v4317_v48 }
 0x10b   : > { %v3749_v54 = vpop.f32.mrb[9].mxu0  ;;  %3237 = vst [vmem:[%s5278_s29 + $0x30] sm:$0xff] %v4317_v48  ;;  %3238 = vst [vmem:[%s5278_s29 + $0x38] sm:$0xff] %v4317_v48 }
 0x10c   : > { %v3750_v30 = vadd.f32 %v3749_v54, %v3748_v34  ;;  %v3751_v38 = vpop.f32.mrb[10].mxu0  ;;  %v3794_v55 = vpop.f32.mrb[8].mxu1  ;;  %3239 = vst [vmem:[%s5278_s29 + $0x40] sm:$0xff] %v4317_v48  ;;  %3240 = vst [vmem:[%s5278_s29 + $0x48] sm:$0xff] %v4317_v48 }
 0x10d   : > { %v3752_v63 = vpop.f32.mrb[11].mxu0  ;;  %v3795_v11 = vpop.f32.mrb[9].mxu1  ;;  %3241 = vst [vmem:[%s5278_s29 + $0x50] sm:$0xff] %v4317_v48  ;;  %3242 = vst [vmem:[%s5278_s29 + $0x58] sm:$0xff] %v4317_v48 }
 0x10e   : > { %v3753_v9 = vadd.f32 %v3752_v63, %v3751_v38  ;;  %v3796_v14 = vadd.f32 %v3795_v11, %v3794_v55  ;;  %v3797_v59 = vpop.f32.mrb[10].mxu1 }
 0x10f   : > { %v3798_v50 = vpop.f32.mrb[11].mxu1 }
 0x110   : > { %v5262_v17 = vadd.f32 %v3796_v14, %v3750_v30  ;;  %v3799_v47 = vadd.f32 %v3798_v50, %v3797_v59 }
 0x112   : > { %v3754_v12 = vpop.f32.mrb[12].mxu0  ;;  %v5264_v18 = vadd.f32 %v3799_v47, %v3753_v9 }
 0x113   : > { %v3755_v0 = vpop.f32.mrb[13].mxu0 }
 0x114   : > { %v3756_v15 = vadd.f32 %v3755_v0, %v3754_v12  ;;  %v3757_v58 = vpop.f32.mrb[14].mxu0  ;;  %v3800_v2 = vpop.f32.mrb[12].mxu1 }
 0x115   : > { %v3758_v44 = vpop.f32.mrb[15].mxu0  ;;  %v3801_v57 = vpop.f32.mrb[13].mxu1 }
 0x116   : > { %v3759_v5 = vadd.f32 %v3758_v44, %v3757_v58  ;;  %v3802_v60 = vadd.f32 %v3801_v57, %v3800_v2  ;;  %v3803_v35 = vpop.f32.mrb[14].mxu1 }
 0x117   : > { %v3804_v23 = vpop.f32.mrb[15].mxu1 }
 0x118   : > { %v5266_v20 = vadd.f32 %v3802_v60, %v3756_v15  ;;  %v3805_v36 = vadd.f32 %v3804_v23, %v3803_v35 }
 0x11a   : > { %v3760_v1 = vpop.f32.mrb[16].mxu0  ;;  %v5268_v16 = vadd.f32 %v3805_v36, %v3759_v5 }
 0x11b   : > { %v3761_v19 = vpop.f32.mrb[17].mxu0 }
 0x11c   : > { %v3762_v61 = vadd.f32 %v3761_v19, %v3760_v1  ;;  %v3763_v33 = vpop.f32.mrb[18].mxu0  ;;  %v3806_v40 = vpop.f32.mrb[16].mxu1 }
 0x11d   : > { %v3764_v41 = vpop.f32.mrb[19].mxu0  ;;  %v3807_v13 = vpop.f32.mrb[17].mxu1 }
 0x11e   : > { %v3765_v22 = vadd.f32 %v3764_v41, %v3763_v33  ;;  %v3808_v28 = vadd.f32 %v3807_v13, %v3806_v40  ;;  %v3809_v31 = vpop.f32.mrb[18].mxu1 }
 0x11f   : > { %v3810_v32 = vpop.f32.mrb[19].mxu1 }
 0x120   : > { %v5271_v25 = vadd.f32 %v3808_v28, %v3762_v61  ;;  %v3811_v37 = vadd.f32 %v3810_v32, %v3809_v31 }
 0x122   : > { %v3828_v4 = vpop.f32.mrb[20].mxu0  ;;  %v5273_v39 = vadd.f32 %v3811_v37, %v3765_v22 }
 0x123   : > { %v3829_v10 = vpop.f32.mrb[21].mxu0 }
 0x124   : > { %v3830_v29 = vadd.f32 %v3829_v10, %v3828_v4  ;;  %v3831_v8 = vpop.f32.mrb[22].mxu0  ;;  %v3874_v45 = vpop.f32.mrb[20].mxu1 }
 0x125   : > { %v3832_v6 = vpop.f32.mrb[23].mxu0  ;;  %v3875_v46 = vpop.f32.mrb[21].mxu1 }
 0x126   : > { %v1096_v43 = vadd.f32 %v3830_v29, %v785_v27  ;;  %v3833_v42 = vadd.f32 %v3832_v6, %v3831_v8  ;;  %v3876_v24 = vadd.f32 %v3875_v46, %v3874_v45  ;;  %v3877_v26 = vpop.f32.mrb[22].mxu1 }
 0x127   : > { %v3878_v27 = vpop.f32.mrb[23].mxu1 }
 0x128   : > { %v1097_v49 = vadd.f32 %v3833_v42, %v786_v21  ;;  %v5294_v21 = vadd.f32 %v3876_v24, %v1096_v43  ;;  %v3879_v51 = vadd.f32 %v3878_v27, %v3877_v26 }
 0x12a   : > { %v3834_v34 = vpop.f32.mrb[24].mxu0  ;;  %v5296_v53 = vadd.f32 %v3879_v51, %v1097_v49 }
 0x12b   : > { %v3835_v52 = vpop.f32.mrb[25].mxu0 }
 0x12c   : > { %v3836_v54 = vadd.f32 %v3835_v52, %v3834_v34  ;;  %v3837_v3 = vpop.f32.mrb[26].mxu0  ;;  %v3880_v56 = vpop.f32.mrb[24].mxu1 }
 0x12d   : > { %v3838_v30 = vpop.f32.mrb[27].mxu0  ;;  %v3881_v9 = vpop.f32.mrb[25].mxu1 }
 0x12e   : > { %v1098_v38 = vadd.f32 %v3836_v54, %v5258_v7  ;;  %v3839_v63 = vadd.f32 %v3838_v30, %v3837_v3  ;;  %v3882_v11 = vadd.f32 %v3881_v9, %v3880_v56  ;;  %v3883_v12 = vpop.f32.mrb[26].mxu1 }
 0x12f   : > { %v3884_v14 = vpop.f32.mrb[27].mxu1 }
 0x130   : > { %v1099_v55 = vadd.f32 %v3839_v63, %v5260_v62  ;;  %v5300_v59 = vadd.f32 %v3882_v11, %v1098_v38  ;;  %v3885_v0 = vadd.f32 %v3884_v14, %v3883_v12 }
 0x132   : > { %v3840_v50 = vpop.f32.mrb[28].mxu0  ;;  %v5302_v58 = vadd.f32 %v3885_v0, %v1099_v55 }
 0x133   : > { %v3841_v15 = vpop.f32.mrb[29].mxu0 }
 0x134   : > { %v3842_v47 = vadd.f32 %v3841_v15, %v3840_v50  ;;  %v3843_v44 = vpop.f32.mrb[30].mxu0  ;;  %v3886_v2 = vpop.f32.mrb[28].mxu1 }
 0x135   : > { %v3844_v5 = vpop.f32.mrb[31].mxu0  ;;  %v3887_v1 = vpop.f32.mrb[29].mxu1 }
 0x136   : > { %v1100_v7 = vadd.f32 %v3842_v47, %v5262_v17  ;;  %v3845_v57 = vadd.f32 %v3844_v5, %v3843_v44  ;;  %v3888_v60 = vadd.f32 %v3887_v1, %v3886_v2  ;;  %v3889_v35 = vpop.f32.mrb[30].mxu1 }
 0x137   : > { %v3890_v19 = vpop.f32.mrb[31].mxu1 }
 0x138   : > { %v1101_v62 = vadd.f32 %v3845_v57, %v5264_v18  ;;  %v5306_v23 = vadd.f32 %v3888_v60, %v1100_v7  ;;  %v3891_v61 = vadd.f32 %v3890_v19, %v3889_v35 }
 0x13a   : > { %v3846_v33 = vpop.f32.mrb[32].mxu0  ;;  %v5308_v41 = vadd.f32 %v3891_v61, %v1101_v62 }
 0x13b   : > { %v3847_v36 = vpop.f32.mrb[33].mxu0 }
 0x13c   : > { %v3848_v22 = vadd.f32 %v3847_v36, %v3846_v33  ;;  %v3849_v40 = vpop.f32.mrb[34].mxu0  ;;  %v3892_v28 = vpop.f32.mrb[32].mxu1 }
 0x13d   : > { %v3850_v13 = vpop.f32.mrb[35].mxu0  ;;  %v3893_v32 = vpop.f32.mrb[33].mxu1 }
 0x13e   : > { %v1102_v17 = vadd.f32 %v3848_v22, %v5266_v20  ;;  %v3851_v31 = vadd.f32 %v3850_v13, %v3849_v40  ;;  %v3894_v37 = vadd.f32 %v3893_v32, %v3892_v28  ;;  %v3895_v4 = vpop.f32.mrb[34].mxu1 }
 0x13f   : > { %v3896_v10 = vpop.f32.mrb[35].mxu1 }
 0x140   : > { %v1103_v18 = vadd.f32 %v3851_v31, %v5268_v16  ;;  %v5312_v29 = vadd.f32 %v3894_v37, %v1102_v17  ;;  %v3897_v8 = vadd.f32 %v3896_v10, %v3895_v4 }
 0x142   : > { %v3852_v6 = vpop.f32.mrb[36].mxu0  ;;  %v5314_v45 = vadd.f32 %v3897_v8, %v1103_v18 }
 0x143   : > { %v3853_v43 = vpop.f32.mrb[37].mxu0 }
 0x144   : > { %v3854_v42 = vadd.f32 %v3853_v43, %v3852_v6  ;;  %v3855_v46 = vpop.f32.mrb[38].mxu0  ;;  %v3898_v24 = vpop.f32.mrb[36].mxu1 }
 0x145   : > { %v3856_v49 = vpop.f32.mrb[39].mxu0  ;;  %v3899_v48 = vpop.f32.mrb[37].mxu1 }
 0x146   : > { %v1104_v20 = vadd.f32 %v3854_v42, %v5271_v25  ;;  %v3857_v26 = vadd.f32 %v3856_v49, %v3855_v46  ;;  %v3900_v27 = vadd.f32 %v3899_v48, %v3898_v24  ;;  %v3901_v51 = vpop.f32.mrb[38].mxu1 }
 0x147   : > { %v3902_v34 = vpop.f32.mrb[39].mxu1 }
 0x148   : > { %v1105_v16 = vadd.f32 %v3857_v26, %v5273_v39  ;;  %v5318_v52 = vadd.f32 %v3900_v27, %v1104_v20  ;;  %v3903_v54 = vadd.f32 %v3902_v34, %v3901_v51 }
 0x14a   : > { %v5320_v3 = vadd.f32 %v3903_v54, %v1105_v16  ;;  %v3920_v30 = vpop.f32.mrb[40].mxu0 }
 0x14b   : > { %v3921_v38 = vpop.f32.mrb[41].mxu0 }
 0x14c   : > { %v3966_v56 = vpop.f32.mrb[40].mxu1  ;;  %v3922_v63 = vadd.f32 %v3921_v38, %v3920_v30  ;;  %v3923_v9 = vpop.f32.mrb[42].mxu0 }
 0x14d   : > { %v3967_v55 = vpop.f32.mrb[41].mxu1  ;;  %v3924_v25 = vpop.f32.mrb[43].mxu0 }
 0x14e   : > { %v3968_v11 = vadd.f32 %v3967_v55, %v3966_v56  ;;  %v3969_v12 = vpop.f32.mrb[42].mxu1  ;;  %v1789_v14 = vadd.f32 %v3922_v63, %v5294_v21  ;;  %v3925_v39 = vadd.f32 %v3924_v25, %v3923_v9 }
 0x14f   : > { %v3970_v0 = vpop.f32.mrb[43].mxu1 }
 0x150   : > { %v3971_v50 = vadd.f32 %v3970_v0, %v3969_v12  ;;  %v1790_v15 = vadd.f32 %v3925_v39, %v5296_v53  ;;  %v5324_v47 = vadd.f32 %v3968_v11, %v1789_v14 }
 0x152   : > { %v5326_v44 = vadd.f32 %v3971_v50, %v1790_v15  ;;  %v3926_v5 = vpop.f32.mrb[44].mxu0 }
 0x153   : > { %v3927_v7 = vpop.f32.mrb[45].mxu0 }
 0x154   : > { %v3972_v2 = vpop.f32.mrb[44].mxu1  ;;  %v3928_v57 = vadd.f32 %v3927_v7, %v3926_v5  ;;  %v3929_v1 = vpop.f32.mrb[46].mxu0 }
 0x155   : > { %v3973_v62 = vpop.f32.mrb[45].mxu1  ;;  %v3930_v60 = vpop.f32.mrb[47].mxu0 }
 0x156   : > { %v3974_v35 = vadd.f32 %v3973_v62, %v3972_v2  ;;  %v3975_v19 = vpop.f32.mrb[46].mxu1  ;;  %v1791_v21 = vadd.f32 %v3928_v57, %v5300_v59  ;;  %v3931_v61 = vadd.f32 %v3930_v60, %v3929_v1 }
 0x157   : > { %v3976_v33 = vpop.f32.mrb[47].mxu1 }
 0x158   : > { %v3977_v36 = vadd.f32 %v3976_v33, %v3975_v19  ;;  %v1792_v53 = vadd.f32 %v3931_v61, %v5302_v58  ;;  %v5330_v22 = vadd.f32 %v3974_v35, %v1791_v21 }
 0x15a   : > { %v5332_v40 = vadd.f32 %v3977_v36, %v1792_v53  ;;  %v3932_v13 = vpop.f32.mrb[48].mxu0 }
 0x15b   : > { %v3933_v17 = vpop.f32.mrb[49].mxu0 }
 0x15c   : > { %v3978_v28 = vpop.f32.mrb[48].mxu1  ;;  %v3934_v31 = vadd.f32 %v3933_v17, %v3932_v13  ;;  %v3935_v32 = vpop.f32.mrb[50].mxu0 }
 0x15d   : > { %v3979_v18 = vpop.f32.mrb[49].mxu1  ;;  %v3936_v37 = vpop.f32.mrb[51].mxu0 }
 0x15e   : > { %v3980_v4 = vadd.f32 %v3979_v18, %v3978_v28  ;;  %v3981_v10 = vpop.f32.mrb[50].mxu1  ;;  %v1793_v59 = vadd.f32 %v3934_v31, %v5306_v23  ;;  %v3937_v8 = vadd.f32 %v3936_v37, %v3935_v32 }
 0x15f   : > { %v3982_v6 = vpop.f32.mrb[51].mxu1 }
 0x160   : > { %v3983_v43 = vadd.f32 %v3982_v6, %v3981_v10  ;;  %v1794_v58 = vadd.f32 %v3937_v8, %v5308_v41  ;;  %v5336_v42 = vadd.f32 %v3980_v4, %v1793_v59 }
 0x162   : > { %v5338_v46 = vadd.f32 %v3983_v43, %v1794_v58  ;;  %v3938_v49 = vpop.f32.mrb[52].mxu0 }
 0x163   : > { %v3939_v20 = vpop.f32.mrb[53].mxu0 }
 0x164   : > { %v3984_v24 = vpop.f32.mrb[52].mxu1  ;;  %v3940_v26 = vadd.f32 %v3939_v20, %v3938_v49  ;;  %v3941_v48 = vpop.f32.mrb[54].mxu0 }
 0x165   : > { %v3985_v16 = vpop.f32.mrb[53].mxu1  ;;  %v3942_v27 = vpop.f32.mrb[55].mxu0 }
 0x166   : > { %v3986_v51 = vadd.f32 %v3985_v16, %v3984_v24  ;;  %v3987_v34 = vpop.f32.mrb[54].mxu1  ;;  %v1795_v23 = vadd.f32 %v3940_v26, %v5312_v29  ;;  %v3943_v54 = vadd.f32 %v3942_v27, %v3941_v48 }
 0x167   : > { %v3988_v30 = vpop.f32.mrb[55].mxu1 }
 0x168   : > { %v3989_v38 = vadd.f32 %v3988_v30, %v3987_v34  ;;  %v1796_v41 = vadd.f32 %v3943_v54, %v5314_v45  ;;  %v5342_v56 = vadd.f32 %v3986_v51, %v1795_v23 }
 0x16a   : > { %v5344_v63 = vadd.f32 %v3989_v38, %v1796_v41  ;;  %v3944_v9 = vpop.f32.mrb[56].mxu0 }
 0x16b   : > { %v3945_v55 = vpop.f32.mrb[57].mxu0 }
 0x16c   : > { %v3990_v25 = vpop.f32.mrb[56].mxu1  ;;  %v3946_v11 = vadd.f32 %v3945_v55, %v3944_v9  ;;  %v3947_v12 = vpop.f32.mrb[58].mxu0 }
 0x16d   : > { %v3991_v14 = vpop.f32.mrb[57].mxu1  ;;  %v3948_v39 = vpop.f32.mrb[59].mxu0 }
 0x16e   : > { %v3992_v0 = vadd.f32 %v3991_v14, %v3990_v25  ;;  %v3993_v50 = vpop.f32.mrb[58].mxu1  ;;  %v1797_v29 = vadd.f32 %v3946_v11, %v5318_v52  ;;  %v3949_v15 = vadd.f32 %v3948_v39, %v3947_v12 }
 0x16f   : > { %v3994_v5 = vpop.f32.mrb[59].mxu1 }
 0x170   : > { %v3995_v7 = vadd.f32 %v3994_v5, %v3993_v50  ;;  %v1798_v45 = vadd.f32 %v3949_v15, %v5320_v3  ;;  %v5348_v2 = vadd.f32 %v3992_v0, %v1797_v29 }
 0x172   : > { %v5350_v57 = vadd.f32 %v3995_v7, %v1798_v45  ;;  %v4012_v1 = vpop.f32.mrb[60].mxu0 }
 0x173   : > { %v4013_v62 = vpop.f32.mrb[61].mxu0 }
 0x174   : > { %v4014_v60 = vadd.f32 %v4013_v62, %v4012_v1  ;;  %v4015_v35 = vpop.f32.mrb[62].mxu0  ;;  %v4058_v61 = vpop.f32.mrb[60].mxu1 }
 0x175   : > { %v4016_v19 = vpop.f32.mrb[63].mxu0  ;;  %v4059_v36 = vpop.f32.mrb[61].mxu1 }
 0x176   : > { %v2410_v21 = vadd.f32 %v4014_v60, %v5324_v47  ;;  %v4017_v33 = vadd.f32 %v4016_v19, %v4015_v35  ;;  %v4060_v53 = vadd.f32 %v4059_v36, %v4058_v61  ;;  %v4061_v13 = vpop.f32.mrb[62].mxu1 }
 0x177   : > { %v4062_v17 = vpop.f32.mrb[63].mxu1 }
 0x178   : > { %v2411_v52 = vadd.f32 %v4017_v33, %v5326_v44  ;;  %v5354_v3 = vadd.f32 %v4060_v53, %v2410_v21  ;;  %v4063_v28 = vadd.f32 %v4062_v17, %v4061_v13 }
 0x17a   : > { %v4018_v31 = vpop.f32.mrb[64].mxu0  ;;  %v5356_v18 = vadd.f32 %v4063_v28, %v2411_v52  ;;  %v3174_v52 = vpop.permute.xlu0 %3173 }
 0x17b   : > { %v4019_v32 = vpop.f32.mrb[65].mxu0  ;;  %v5373_v28 = vpop.permute.xlu1 %3183 }
 0x17c   : > { %v4020_v37 = vadd.f32 %v4019_v32, %v4018_v31  ;;  %v4021_v4 = vpop.f32.mrb[66].mxu0  ;;  %v4064_v59 = vpop.f32.mrb[64].mxu1 }
 0x17d   : > { %v4022_v10 = vpop.f32.mrb[67].mxu0  ;;  %v4065_v6 = vpop.f32.mrb[65].mxu1 }
 0x17e   : > { %v2412_v47 = vadd.f32 %v4020_v37, %v5330_v22  ;;  %v4023_v8 = vadd.f32 %v4022_v10, %v4021_v4  ;;  %v4066_v43 = vadd.f32 %v4065_v6, %v4064_v59  ;;  %v4067_v58 = vpop.f32.mrb[66].mxu1  ;;  %v3179_v59 = vpop.permute.xlu0 %3178 }
 0x17f   : > { %v4068_v49 = vpop.f32.mrb[67].mxu1 }
 0x180   : > { %v2413_v44 = vadd.f32 %v4023_v8, %v5332_v40  ;;  %v5360_v20 = vadd.f32 %v4066_v43, %v2412_v47  ;;  %v4069_v24 = vadd.f32 %v4068_v49, %v4067_v58  ;;  %v3189_v58 = vpop.permute.xlu1 %3188 }
 0x182   : > { %v4024_v26 = vpop.f32.mrb[68].mxu0  ;;  %v5362_v16 = vadd.f32 %v4069_v24, %v2413_v44 }
 0x183   : > { %v4025_v48 = vpop.f32.mrb[69].mxu0 }
 0x184   : > { %v4026_v27 = vadd.f32 %v4025_v48, %v4024_v26  ;;  %v4027_v51 = vpop.f32.mrb[70].mxu0  ;;  %v4070_v23 = vpop.f32.mrb[68].mxu1 }
 0x185   : > { %v4028_v34 = vpop.f32.mrb[71].mxu0  ;;  %v4071_v30 = vpop.f32.mrb[69].mxu1 }
 0x186   : > { %v2414_v22 = vadd.f32 %v4026_v27, %v5336_v42  ;;  %v4029_v54 = vadd.f32 %v4028_v34, %v4027_v51  ;;  %v4072_v38 = vadd.f32 %v4071_v30, %v4070_v23  ;;  %v4073_v41 = vpop.f32.mrb[70].mxu1 }
 0x187   : > { %v4074_v9 = vpop.f32.mrb[71].mxu1 }
 0x188   : > { %v2415_v40 = vadd.f32 %v4029_v54, %v5338_v46  ;;  %v5366_v55 = vadd.f32 %v4072_v38, %v2414_v22  ;;  %v4075_v25 = vadd.f32 %v4074_v9, %v4073_v41  ;;  %v5384_v54 = vpop.permute.xlu0 %3193 }
 0x18a   : > { %v4030_v11 = vpop.f32.mrb[72].mxu0  ;;  %v5368_v14 = vadd.f32 %v4075_v25, %v2415_v40  ;;  %v5387_v25 = vpop.permute.xlu1 %3198 }
 0x18b   : > { %v4031_v12 = vpop.f32.mrb[73].mxu0 }
 0x18c   : > { %v4032_v39 = vadd.f32 %v4031_v12, %v4030_v11  ;;  %v4033_v0 = vpop.f32.mrb[74].mxu0  ;;  %v4076_v29 = vpop.f32.mrb[72].mxu1 }
 0x18d   : > { %v4034_v50 = vpop.f32.mrb[75].mxu0  ;;  %v4077_v5 = vpop.f32.mrb[73].mxu1 }
 0x18e   : > { %v2416_v42 = vadd.f32 %v4032_v39, %v5342_v56  ;;  %v4035_v15 = vadd.f32 %v4034_v50, %v4033_v0  ;;  %v4078_v7 = vadd.f32 %v4077_v5, %v4076_v29  ;;  %v4079_v45 = vpop.f32.mrb[74].mxu1 }
 0x18f   : > { %v4080_v1 = vpop.f32.mrb[75].mxu1 }
 0x190   : > { %v2417_v46 = vadd.f32 %v4035_v15, %v5344_v63  ;;  %v2799_v62 = vadd.f32 %v4078_v7, %v2416_v42  ;;  %v4081_v60 = vadd.f32 %v4080_v1, %v4079_v45  ;;  %v3204_v45 = vpop.permute.xlu0 %3203 }
 0x192   : > { %v4036_v35 = vpop.f32.mrb[76].mxu0  ;;  %v2800_v21 = vadd.f32 %v4081_v60, %v2417_v46 }
 0x193   : > { %v4037_v19 = vpop.f32.mrb[77].mxu0 }
 0x194   : > { %v4038_v61 = vadd.f32 %v4037_v19, %v4036_v35  ;;  %v4039_v33 = vpop.f32.mrb[78].mxu0  ;;  %v4082_v56 = vpop.f32.mrb[76].mxu1 }
 0x195   : > { %v4040_v36 = vpop.f32.mrb[79].mxu0  ;;  %v4083_v17 = vpop.f32.mrb[77].mxu1 }
 0x196   : > { %v2418_v53 = vadd.f32 %v4038_v61, %v5348_v2  ;;  %v4041_v13 = vadd.f32 %v4040_v36, %v4039_v33  ;;  %v4084_v31 = vadd.f32 %v4083_v17, %v4082_v56  ;;  %v4085_v32 = vpop.f32.mrb[78].mxu1  ;;  %v5379_v2 = vld [vmem:[%s5419_s2] ss:$0 sm:$0xff]  ;;  %v3209_v33 = vpop.permute.xlu1 %3208 }
 0x197   : > { %v4086_v37 = vpop.f32.mrb[79].mxu1 }
 0x198   : > { %v2419_v63 = vadd.f32 %v4041_v13, %v5350_v57  ;;  %v2801_v4 = vadd.f32 %v4084_v31, %v2418_v53  ;;  %v4087_v10 = vadd.f32 %v4086_v37, %v4085_v32 }
 0x19a   : > { %v4104_v47 = vpop.f32.mrb[80].mxu0  ;;  %v2802_v6 = vadd.f32 %v4087_v10, %v2419_v63 }
 0x19b   : > { %v4105_v8 = vpop.f32.mrb[81].mxu0 }
 0x19c   : > { %v4106_v44 = vadd.f32 %v4105_v8, %v4104_v47  ;;  %v4107_v43 = vpop.f32.mrb[82].mxu0  ;;  %v4122_v24 = vpop.f32.mrb[80].mxu1 }
 0x19d   : > { %v4108_v49 = vpop.f32.mrb[83].mxu0  ;;  %v4123_v48 = vpop.f32.mrb[81].mxu1 }
 0x19e   : > { %v3104_v57 = vadd.f32 %v4106_v44, %v5354_v3  ;;  %v4109_v26 = vadd.f32 %v4108_v49, %v4107_v43  ;;  %v4124_v51 = vadd.f32 %v4123_v48, %v4122_v24  ;;  %v4125_v34 = vpop.f32.mrb[82].mxu1  ;;  %v3214_v24 = vpop.permute.xlu0 %3213 }
 0x19f   : > { %v4126_v23 = vpop.f32.mrb[83].mxu1 }
 0x1a0   : > { %v3141_v27 = vadd.f32 %v5379_v2, %v3104_v57  ;;  %v3105_v22 = vadd.f32 %v4109_v26, %v5356_v18  ;;  %v3110_v40 = vadd.f32 %v4124_v51, %v2799_v62  ;;  %v4127_v41 = vadd.f32 %v4126_v23, %v4125_v34 }
 0x1a2   : > { %v3151_v30 = vmax.f32 %v3141_v27, 0.0  ;;  %v3142_v38 = vadd.f32 %v5379_v2, %v3105_v22  ;;  %v4110_v9 = vpop.f32.mrb[84].mxu0  ;;  %v3111_v39 = vadd.f32 %v4127_v41, %v2800_v21  ;;  %v3147_v0 = vadd.f32 %v5379_v2, %v3110_v40 }
 0x1a3   : > { %v4111_v3 = vpop.f32.mrb[85].mxu0 }
 0x1a4   : > { %v3221_v11 = vmul.f32 %v3174_v52, %v3151_v30  ;;  %v3152_v12 = vmax.f32 %v3142_v38, 0.0  ;;  %v4113_v18 = vpop.f32.mrb[86].mxu0  ;;  %v4112_v50 = vadd.f32 %v4111_v3, %v4110_v9  ;;  %v3148_v15 = vadd.f32 %v5379_v2, %v3111_v39  ;;  %v4128_v46 = vpop.f32.mrb[84].mxu1 }
 0x1a5   : > { %v4114_v42 = vpop.f32.mrb[87].mxu0  ;;  %v3157_v5 = vmax.f32 %v3147_v0, 0.0  ;;  %v4129_v62 = vpop.f32.mrb[85].mxu1 }
 0x1a6   : > { %3245 = vst [vmem:[%s5278_s29 + $0xb] sm:$0xff] %v3221_v11  ;;  %v3222_v29 = vmul.f32 %v3179_v59, %v3152_v12  ;;  %v4115_v7 = vadd.f32 %v4114_v42, %v4113_v18  ;;  %v3106_v1 = vadd.f32 %v4112_v50, %v5360_v20  ;;  %v3158_v60 = vmax.f32 %v3148_v15, 0.0  ;;  %v4131_v21 = vpop.f32.mrb[86].mxu1 }
 0x1a7   : > { %v3227_v35 = vmul.f32 %v3204_v45, %v3157_v5  ;;  %v4130_v19 = vadd.f32 %v4129_v62, %v4128_v46  ;;  %v4132_v52 = vpop.f32.mrb[87].mxu1 }
 0x1a8   : > { %3246 = vst [vmem:[%s5278_s29 + $0x13] sm:$0xff] %v3222_v29  ;;  %v3107_v61 = vadd.f32 %v4115_v7, %v5362_v16  ;;  %v3143_v36 = vadd.f32 %v5379_v2, %v3106_v1  ;;  %v3228_v53 = vmul.f32 %v3209_v33, %v3158_v60  ;;  %v4133_v17 = vadd.f32 %v4132_v52, %v4131_v21 }
 0x1a9   : > { %3251 = vst [vmem:[%s5278_s29 + $0x3b] sm:$0xff] %v3227_v35  ;;  %v3112_v56 = vadd.f32 %v4130_v19, %v2801_v4 }
 0x1aa   : > { %v3144_v13 = vadd.f32 %v5379_v2, %v3107_v61  ;;  %v4116_v20 = vpop.f32.mrb[88].mxu0  ;;  %v3153_v63 = vmax.f32 %v3143_v36, 0.0  ;;  %3252 = vst [vmem:[%s5278_s29 + $0x43] sm:$0xff] %v3228_v53  ;;  %v3113_v37 = vadd.f32 %v4133_v17, %v2802_v6 }
 0x1ab   : > { %v4117_v31 = vpop.f32.mrb[89].mxu0  ;;  %v3149_v16 = vadd.f32 %v5379_v2, %v3112_v56 }
 0x1ac   : > { %v3154_v32 = vmax.f32 %v3144_v13, 0.0  ;;  %v4118_v10 = vadd.f32 %v4117_v31, %v4116_v20  ;;  %v4119_v47 = vpop.f32.mrb[90].mxu0  ;;  %v3223_v59 = vmul.f32 %v5373_v28, %v3153_v63  ;;  %v3150_v44 = vadd.f32 %v5379_v2, %v3113_v37  ;;  %v3219_v28 = vpop.permute.xlu1 %3218 }
 0x1ad   : > { %v4120_v8 = vpop.f32.mrb[91].mxu0  ;;  %v3159_v43 = vmax.f32 %v3149_v16, 0.0 }
 0x1ae   : > { %v3224_v4 = vmul.f32 %v3189_v58, %v3154_v32  ;;  %v3108_v49 = vadd.f32 %v4118_v10, %v5366_v55  ;;  %3247 = vst [vmem:[%s5278_s29 + $0x1b] sm:$0xff] %v3223_v59  ;;  %v4121_v57 = vadd.f32 %v4120_v8, %v4119_v47  ;;  %v3160_v6 = vmax.f32 %v3150_v44, 0.0 }
 0x1af   : > { %v3229_v26 = vmul.f32 %v3214_v24, %v3159_v43 }
 0x1b0   : > { %3248 = vst [vmem:[%s5278_s29 + $0x23] sm:$0xff] %v3224_v4  ;;  %v3145_v48 = vadd.f32 %v5379_v2, %v3108_v49  ;;  %v3109_v27 = vadd.f32 %v4121_v57, %v5368_v14  ;;  %v3230_v58 = vmul.f32 %v3219_v28, %v3160_v6 }
 0x1b1   : > { %3253 = vst [vmem:[%s5278_s29 + $0x4b] sm:$0xff] %v3229_v26 }
 0x1b2   : > { %v3155_v51 = vmax.f32 %v3145_v48, 0.0  ;;  %v3146_v34 = vadd.f32 %v5379_v2, %v3109_v27  ;;  %3254 = vst [vmem:[%s5278_s29 + $0x53] sm:$0xff] %v3230_v58 }
 0x1b4   : > { %v3225_v55 = vmul.f32 %v5384_v54, %v3155_v51  ;;  %v3156_v22 = vmax.f32 %v3146_v34, 0.0 }
 0x1b6   : > { %3249 = vst [vmem:[%s5278_s29 + $0x2b] sm:$0xff] %v3225_v55  ;;  %v3226_v23 = vmul.f32 %v5387_v25, %v3156_v22 }
 0x1b8   : > { %3250 = vst [vmem:[%s5278_s29 + $0x33] sm:$0xff] %v3226_v23 }
 0x1b9 PF: > { %s14_s15 = sadd.s32 1, %s4314_s15  }
 0x1ba   : > { %p11_p4 = scmp.ge.s32.totalorder %s14_s15, 4  }
 0x1bc   :  { %13 = sbr.rel (!%p11_p4) target bundleno = 1 (0x1), region = 74 }

// kernel: tower_forward.10
= control target key start
LH: loop header
LB: loop body
LE: loop exit
PB: predicated region body
PF: predicated region fallthrough
CT: control target
= control target key end

     0   :  { %s2473_s15 = smov 0   ;;  %s3018_s0 = inlined_call_operand.vmem [shape: f32[2,42,128], index: 0, kind: input, shape index: {}]   ;;  %s3019_s1 = inlined_call_operand.vmem [shape: bf16[9,128,256], index: 1, kind: input, shape index: {}]   ;;  %s3020_s2 = inlined_call_operand.vmem [shape: f32[1,256], index: 2, kind: input, shape index: {}]   ;;  %s3021_s3 = inlined_call_operand.vmem [shape: f32[24,1], index: 3, kind: input, shape index: {}]   ;;  %s3022_s4 = inlined_call_operand.vmem [shape: f32[2,42,256], index: 4, kind: output, shape index: {}]  }
   0x1 LB: > { %s1879_s16 = sadd.s32 4294967295, %s2444_s15   ;;  %p1883_p0 = scmp.ge.s32.totalorder %s2444_s15, 1  ;;  %s2444_s15 = sphi %s2473_s15, %s14_s15  }
   0x2   : > { %p162_p1 = scmp.lt.s32.totalorder %s2444_s15, 3 }
   0x4   : > { %p163_p2 = pnand %p1883_p0, %p162_p1 }
   0x5   : > { %v2222_v0 = vld [vmem:[%s3019_s1 + $0x4] ss:$8 sps:$4 sm:$0xff] (!%p163_p2)   ;;  %v2446_v2 = vmov (!%p163_p2), 0   ;;  %v2226_v3 = vld [vmem:[%s3019_s1] ss:$8 sps:$4 sm:$0xff] (!%p163_p2)   ;;  %p188_p3 = scmp.lt.s32.totalorder (!%p163_p2), %s1879_s16, 1 }
   0x6   : > { %166 = sbr.rel (%p163_p2) target bundleno = 395 (0x18b), region = 36  ;;  %v2224_v1 = vld [vmem:[%s3019_s1 + $0x204] ss:$8 sps:$4 sm:$0xff] (!%p163_p2)   ;;  %332 = vmatprep.mubr.bf16.mxu1 (!%p163_p2), %v2446_v2  ;;  %1004 = vmatprep.mubr.bf16.mxu0 (!%p163_p2), %v2446_v2  ;;  %v2227_v4 = vld [vmem:[%s3019_s1 + $0x200] ss:$8 sps:$4 sm:$0xff] (!%p163_p2)   ;;  %vm1797_vm0 = vcmask (!%p163_p2), 1046528  }
   0x7   : > { %300 = vmatprep.subr.bf16.mxu1 (!%p163_p2), %v2222_v0  ;;  %2220 = vset.pattern.permute.xlu0 (!%p163_p2), %v2446_v2  ;;  %v2228_v5 = vld [vmem:[%s3019_s1 + $0x14] ss:$8 sps:$4 sm:$0xff] (!%p163_p2)   ;;  %v2232_v7 = vld [vmem:[%s3019_s1 + $0x10] ss:$8 sps:$4 sm:$0xff] (!%p163_p2)   ;;  %v2234_v9 = vld [vmem:[%s3019_s1 + $0x24] ss:$8 sps:$4 sm:$0xff] (!%p163_p2)  }
   0x8   : > { %972 = vmatprep.subr.bf16.mxu0 (!%p163_p2), %v2224_v1  ;;  %2221 = vset.pattern.permute.xlu1 (!%p163_p2), %v2446_v2  ;;  %v2230_v6 = vld [vmem:[%s3019_s1 + $0x214] ss:$8 sps:$4 sm:$0xff] (!%p163_p2)   ;;  %v2233_v8 = vld [vmem:[%s3019_s1 + $0x210] ss:$8 sps:$4 sm:$0xff] (!%p163_p2)   ;;  %v2236_v10 = vld [vmem:[%s3019_s1 + $0x224] ss:$8 sps:$4 sm:$0xff] (!%p163_p2)  }
   0x9   : > { %301 = vmatpush1.bf16.msra.mxu1 (!%p163_p2), %v2226_v3  ;;  %973 = vmatpush1.bf16.msra.mxu0 (!%p163_p2), %v2227_v4  ;;  %v2238_v11 = vld [vmem:[%s3019_s1 + $0x20] ss:$8 sps:$4 sm:$0xff] (!%p163_p2)   ;;  %v2240_v13 = vld [vmem:[%s3019_s1 + $0x34] ss:$8 sps:$4 sm:$0xff] (!%p163_p2)   ;;  %v2244_v15 = vld [vmem:[%s3019_s1 + $0x30] ss:$8 sps:$4 sm:$0xff] (!%p163_p2)  }
   0xa   : > { %302 = vmatprep.subr.bf16.mxu1 (!%p163_p2), %v2228_v5  ;;  %974 = vmatprep.subr.bf16.mxu0 (!%p163_p2), %v2230_v6  ;;  %v2239_v12 = vld [vmem:[%s3019_s1 + $0x220] ss:$8 sps:$4 sm:$0xff] (!%p163_p2)   ;;  %v2242_v14 = vld [vmem:[%s3019_s1 + $0x234] ss:$8 sps:$4 sm:$0xff] (!%p163_p2)   ;;  %v2245_v16 = vld [vmem:[%s3019_s1 + $0x230] ss:$8 sps:$4 sm:$0xff] (!%p163_p2)  }
   0xb   : > { %v2246_v17 = vld [vmem:[%s3019_s1 + $0x44] ss:$8 sps:$4 sm:$0xff] (!%p163_p2)   ;;  %v2250_v19 = vld [vmem:[%s3019_s1 + $0x40] ss:$8 sps:$4 sm:$0xff] (!%p163_p2)   ;;  %v2252_v21 = vld [vmem:[%s3019_s1 + $0x54] ss:$8 sps:$4 sm:$0xff] (!%p163_p2)  }
   0xc   : > { %v2248_v18 = vld [vmem:[%s3019_s1 + $0x244] ss:$8 sps:$4 sm:$0xff] (!%p163_p2)   ;;  %v2251_v20 = vld [vmem:[%s3019_s1 + $0x240] ss:$8 sps:$4 sm:$0xff] (!%p163_p2)   ;;  %v2254_v22 = vld [vmem:[%s3019_s1 + $0x254] ss:$8 sps:$4 sm:$0xff] (!%p163_p2)  }
   0xd   : > { %303 = vmatpush1.bf16.msra.mxu1 %v2232_v7  ;;  %975 = vmatpush1.bf16.msra.mxu0 %v2233_v8  ;;  %s3024_s16 = smov (!%p188_p3, %s1879_s16), 1  ;;  %v2256_v23 = vld [vmem:[%s3019_s1 + $0x50] ss:$8 sps:$4 sm:$0xff]   ;;  %v2258_v25 = vld [vmem:[%s3019_s1 + $0x64] ss:$8 sps:$4 sm:$0xff]  }
   0xe   : > { %304 = vmatprep.subr.bf16.mxu1 %v2234_v9  ;;  %976 = vmatprep.subr.bf16.mxu0 %v2236_v10  ;;  %s2208_s13 = smul.u32 48, %s3024_s16  ;;  %v2257_v24 = vld [vmem:[%s3019_s1 + $0x250] ss:$8 sps:$4 sm:$0xff]   ;;  %v2260_v26 = vld [vmem:[%s3019_s1 + $0x264] ss:$8 sps:$4 sm:$0xff]  }
   0xf   : > { %v2262_v27 = vld [vmem:[%s3019_s1 + $0x60] ss:$8 sps:$4 sm:$0xff]   ;;  %v2264_v29 = vld [vmem:[%s3019_s1 + $0x74] ss:$8 sps:$4 sm:$0xff]   ;;  %v2268_v31 = vld [vmem:[%s3019_s1 + $0x70] ss:$8 sps:$4 sm:$0xff]  }
  0x10   : > { %s2573_s24 = scalar_lea.vmem %s3018_s0, %s2208_s13  ;;  %v2263_v28 = vld [vmem:[%s3019_s1 + $0x260] ss:$8 sps:$4 sm:$0xff]   ;;  %v2266_v30 = vld [vmem:[%s3019_s1 + $0x274] ss:$8 sps:$4 sm:$0xff]   ;;  %v2269_v32 = vld [vmem:[%s3019_s1 + $0x270] ss:$8 sps:$4 sm:$0xff]  }
  0x11   : > { %305 = vmatpush1.bf16.msra.mxu1 %v2238_v11  ;;  %977 = vmatpush1.bf16.msra.mxu0 %v2239_v12  ;;  %v215_v33 = vld [vmem:[%s2573_s24] sm:$0xff]  ;;  %v2598_v35 = vld [vmem:[%s2573_s24 + $0x8] sm:$0xff]  ;;  %v2278_v43 = vld [vmem:[%s3019_s1 + $0x94] ss:$8 sps:$4 sm:$0xff]   ;;  %s2209_s11 = smul.u32 96, %s3024_s16 }
  0x12   : > { %306 = vmatprep.subr.bf16.mxu1 %v2240_v13  ;;  %978 = vmatprep.subr.bf16.mxu0 %v2242_v14  ;;  %v2272_v34 = vld [vmem:[%s3019_s1 + $0x84] ss:$8 sps:$4 sm:$0xff]   ;;  %v2270_v39 = vld [vmem:[%s3019_s1 + $0x80] ss:$8 sps:$4 sm:$0xff]   ;;  %v218_v41 = vpack.c.bf16 %v2598_v35, %v215_v33  ;;  %v2281_v44 = vld [vmem:[%s3019_s1 + $0x294] ss:$8 sps:$4 sm:$0xff]  }
  0x13   : > { %v887_v36 = vld [vmem:[%s2573_s24 + $0x7] sm:$0xff]  ;;  %v888_v37 = vld [vmem:[%s2573_s24 + $0xf] sm:$0xff]  ;;  %v889_v49 = vld [vmem:[%s2573_s24 + $0x17] sm:$0xff]  ;;  %s2994_s14 = scalar_lea.vmem %s3022_s4, %s2209_s11 }
  0x14   : > { %v2275_v38 = vld [vmem:[%s3019_s1 + $0x284] ss:$8 sps:$4 sm:$0xff]   ;;  %v2273_v40 = vld [vmem:[%s3019_s1 + $0x280] ss:$8 sps:$4 sm:$0xff]   ;;  %v890_v42 = vpack.c.bf16 %v888_v37, %v887_v36  ;;  %v2276_v45 = vld [vmem:[%s3019_s1 + $0x90] ss:$8 sps:$4 sm:$0xff]   ;;  %v891_v50 = vpack.c.bf16 %v889_v49, %v889_v49 }
  0x15   : > { %307 = vmatpush1.bf16.msra.mxu1 %v2244_v15  ;;  %979 = vmatpush1.bf16.msra.mxu0 %v2245_v16  ;;  %v2279_v46 = vld [vmem:[%s3019_s1 + $0x290] ss:$8 sps:$4 sm:$0xff]   ;;  %v2284_v47 = vld [vmem:[%s3019_s1 + $0xa4] ss:$8 sps:$4 sm:$0xff]   ;;  %v2282_v52 = vld [vmem:[%s3019_s1 + $0xa0] ss:$8 sps:$4 sm:$0xff]  }
  0x16   : > { %308 = vmatprep.subr.bf16.mxu1 %v2246_v17  ;;  %980 = vmatprep.subr.bf16.mxu0 %v2248_v18  ;;  %v2287_v48 = vld [vmem:[%s3019_s1 + $0x2a4] ss:$8 sps:$4 sm:$0xff]   ;;  %v2634_v51 = vld [vmem:[%s2573_s24 + $0x10] sm:$0xff]  ;;  %v2285_v53 = vld [vmem:[%s3019_s1 + $0x2a0] ss:$8 sps:$4 sm:$0xff]  }
  0x17   : > { %v219_v54 = vpack.c.bf16 %v2634_v51, %v2634_v51  ;;  %v2290_v55 = vld [vmem:[%s3019_s1 + $0xb4] ss:$8 sps:$4 sm:$0xff]   ;;  %v2288_v57 = vld [vmem:[%s3019_s1 + $0xb0] ss:$8 sps:$4 sm:$0xff]   ;;  %v2296_v59 = vld [vmem:[%s3019_s1 + $0xc4] ss:$8 sps:$4 sm:$0xff]   ;;  %v1061_v17 = vpack.c.bf16 %v2634_v51, %v2598_v35 }
  0x18   : > { %v2293_v56 = vld [vmem:[%s3019_s1 + $0x2b4] ss:$8 sps:$4 sm:$0xff]   ;;  %v2291_v58 = vld [vmem:[%s3019_s1 + $0x2b0] ss:$8 sps:$4 sm:$0xff]   ;;  %v2299_v60 = vld [vmem:[%s3019_s1 + $0x2c4] ss:$8 sps:$4 sm:$0xff]  }
  0x19   : > { %309 = vmatpush1.bf16.msra.mxu1 %v2250_v19  ;;  %981 = vmatpush1.bf16.msra.mxu0 %v2251_v20  ;;  %v2294_v61 = vld [vmem:[%s3019_s1 + $0xc0] ss:$8 sps:$4 sm:$0xff]   ;;  %v2302_v63 = vld [vmem:[%s3019_s1 + $0xd4] ss:$8 sps:$4 sm:$0xff]   ;;  %v2300_v1 = vld [vmem:[%s3019_s1 + $0xd0] ss:$8 sps:$4 sm:$0xff]  }
  0x1a   : > { %310 = vmatprep.subr.bf16.mxu1 %v2252_v21  ;;  %982 = vmatprep.subr.bf16.mxu0 %v2254_v22  ;;  %v2297_v62 = vld [vmem:[%s3019_s1 + $0x2c0] ss:$8 sps:$4 sm:$0xff]   ;;  %v2305_v0 = vld [vmem:[%s3019_s1 + $0x2d4] ss:$8 sps:$4 sm:$0xff]   ;;  %v2303_v3 = vld [vmem:[%s3019_s1 + $0x2d0] ss:$8 sps:$4 sm:$0xff]  }
  0x1b   : > { %v2308_v4 = vld [vmem:[%s3019_s1 + $0xe4] ss:$8 sps:$4 sm:$0xff]   ;;  %v2306_v6 = vld [vmem:[%s3019_s1 + $0xe0] ss:$8 sps:$4 sm:$0xff]   ;;  %v2314_v8 = vld [vmem:[%s3019_s1 + $0xf4] ss:$8 sps:$4 sm:$0xff]  }
  0x1c   : > { %v2311_v5 = vld [vmem:[%s3019_s1 + $0x2e4] ss:$8 sps:$4 sm:$0xff]   ;;  %v2309_v7 = vld [vmem:[%s3019_s1 + $0x2e0] ss:$8 sps:$4 sm:$0xff]   ;;  %v2317_v9 = vld [vmem:[%s3019_s1 + $0x2f4] ss:$8 sps:$4 sm:$0xff]  }
  0x1d   : > { %311 = vmatpush1.bf16.msra.mxu1 %v2256_v23  ;;  %983 = vmatpush1.bf16.msra.mxu0 %v2257_v24  ;;  %v2312_v10 = vld [vmem:[%s3019_s1 + $0xf0] ss:$8 sps:$4 sm:$0xff]   ;;  %v374_v12 = vld [vmem:[%s2573_s24 + $0x1] sm:$0xff]  ;;  %v2326_v20 = vld [vmem:[%s3019_s1 + $0x114] ss:$8 sps:$4 sm:$0xff]  }
  0x1e   : > { %312 = vmatprep.subr.bf16.mxu1 %v2258_v25  ;;  %984 = vmatprep.subr.bf16.mxu0 %v2260_v26  ;;  %v2315_v11 = vld [vmem:[%s3019_s1 + $0x2f0] ss:$8 sps:$4 sm:$0xff]   ;;  %v2320_v14 = vld [vmem:[%s3019_s1 + $0x104] ss:$8 sps:$4 sm:$0xff]   ;;  %v2318_v18 = vld [vmem:[%s3019_s1 + $0x100] ss:$8 sps:$4 sm:$0xff]  }
  0x1f   : > { %v375_v13 = vld [vmem:[%s2573_s24 + $0x9] sm:$0xff]  ;;  %v2329_v21 = vld [vmem:[%s3019_s1 + $0x314] ss:$8 sps:$4 sm:$0xff]  }
  0x20   : > { %v2323_v15 = vld [vmem:[%s3019_s1 + $0x304] ss:$8 sps:$4 sm:$0xff]   ;;  %v377_v16 = vpack.c.bf16 %v375_v13, %v374_v12  ;;  %v2321_v19 = vld [vmem:[%s3019_s1 + $0x300] ss:$8 sps:$4 sm:$0xff]   ;;  %v2324_v22 = vld [vmem:[%s3019_s1 + $0x110] ss:$8 sps:$4 sm:$0xff]  }
  0x21   : > { %313 = vmatpush1.bf16.msra.mxu1 %v2262_v27  ;;  %985 = vmatpush1.bf16.msra.mxu0 %v2263_v28  ;;  %v2327_v23 = vld [vmem:[%s3019_s1 + $0x310] ss:$8 sps:$4 sm:$0xff]   ;;  %v2332_v25 = vld [vmem:[%s3019_s1 + $0x124] ss:$8 sps:$4 sm:$0xff]   ;;  %v2341_v33 = vld [vmem:[%s3019_s1 + $0x334] ss:$8 sps:$4 sm:$0xff]  }
  0x22   : > { %314 = vmatprep.subr.bf16.mxu1 %v2264_v29  ;;  %986 = vmatprep.subr.bf16.mxu0 %v2266_v30  ;;  %v376_v24 = vld [vmem:[%s2573_s24 + $0x11] sm:$0xff]  ;;  %v2335_v27 = vld [vmem:[%s3019_s1 + $0x324] ss:$8 sps:$4 sm:$0xff]   ;;  %v2330_v30 = vld [vmem:[%s3019_s1 + $0x120] ss:$8 sps:$4 sm:$0xff]  }
  0x23   : > { %v1060_v26 = vld [vmem:[%s2573_s24 + $0x18] sm:$0xff]  ;;  %v378_v28 = vpack.c.bf16 %v376_v24, %v376_v24  ;;  %v2344_v36 = vld [vmem:[%s3019_s1 + $0x144] ss:$8 sps:$4 sm:$0xff]   ;;  %v1757_v12 = vld [vmem:[%s3021_s3 + $0x10] sm:$0xff] }
  0x24   : > { %v1062_v29 = vpack.c.bf16 %v1060_v26, %v1060_v26  ;;  %v2339_v35 = vld [vmem:[%s3019_s1 + $0x330] ss:$8 sps:$4 sm:$0xff]   ;;  %v2347_v37 = vld [vmem:[%s3019_s1 + $0x344] ss:$8 sps:$4 sm:$0xff]   ;;  %v2365_v49 = vld [vmem:[%s3019_s1 + $0x374] ss:$8 sps:$4 sm:$0xff]   ;;  %1770 = vperm.xlu1 %2221, %v1757_v12  }
  0x25   : > { %315 = vmatpush1.bf16.msra.mxu1 %v2268_v31  ;;  %987 = vmatpush1.bf16.msra.mxu0 %v2269_v32  ;;  %v2333_v31 = vld [vmem:[%s3019_s1 + $0x320] ss:$8 sps:$4 sm:$0xff]   ;;  %v2338_v32 = vld [vmem:[%s3019_s1 + $0x134] ss:$8 sps:$4 sm:$0xff]   ;;  %v2363_v51 = vld [vmem:[%s3019_s1 + $0x370] ss:$8 sps:$4 sm:$0xff]  }
  0x26   : > { %459 = vmatprep.subr.bf16.mxu1 %v2272_v34  ;;  %1143 = vmatprep.subr.bf16.mxu0 %v2275_v38  ;;  %v2336_v34 = vld [vmem:[%s3019_s1 + $0x130] ss:$8 sps:$4 sm:$0xff]   ;;  %v2342_v38 = vld [vmem:[%s3019_s1 + $0x140] ss:$8 sps:$4 sm:$0xff]   ;;  %v2386_v13 = vld [vmem:[%s3019_s1 + $0x1b4] ss:$8 sps:$4 sm:$0xff]  }
  0x27   : > { %v2396_v24 = vld [vmem:[%s3019_s1 + $0x1d0] ss:$8 sps:$4 sm:$0xff]   ;;  %v2404_v26 = vld [vmem:[%s3019_s1 + $0x1e4] ss:$8 sps:$4 sm:$0xff]  }
  0x28   : > { %333 = vmatmul.mubr.bf16.vlgmr.msra.gmra.mrb[0].mxu1 %v218_v41  ;;  %1005 = vmatmul.mubr.bf16.vlgmr.msra.gmra.mrb[0].mxu0 %v890_v42  ;;  %v2353_v41 = vld [vmem:[%s3019_s1 + $0x354] ss:$8 sps:$4 sm:$0xff]   ;;  %v2348_v42 = vld [vmem:[%s3019_s1 + $0x150] ss:$8 sps:$4 sm:$0xff]  }
  0x29   : > { %460 = vmatpush1.bf16.msra.mxu1 %v2270_v39  ;;  %1144 = vmatpush1.bf16.msra.mxu0 %v2273_v40  ;;  %v2345_v39 = vld [vmem:[%s3019_s1 + $0x340] ss:$8 sps:$4 sm:$0xff]   ;;  %v2350_v40 = vld [vmem:[%s3019_s1 + $0x154] ss:$8 sps:$4 sm:$0xff]  }
  0x2a   : > { %461 = vmatprep.subr.bf16.mxu1 %v2278_v43  ;;  %1145 = vmatprep.subr.bf16.mxu0 %v2281_v44  ;;  %v2351_v43 = vld [vmem:[%s3019_s1 + $0x350] ss:$8 sps:$4 sm:$0xff]   ;;  %v2356_v44 = vld [vmem:[%s3019_s1 + $0x164] ss:$8 sps:$4 sm:$0xff]  }
  0x2b   : > { %1014 = vmatprep.mubr.bf16.mxu0 %v2446_v2  ;;  %342 = vmatprep.mubr.bf16.mxu1 %v2446_v2 }
  0x2d   : > { %462 = vmatpush1.bf16.msra.mxu1 %v2276_v45  ;;  %1146 = vmatpush1.bf16.msra.mxu0 %v2279_v46  ;;  %v2359_v45 = vld [vmem:[%s3019_s1 + $0x364] ss:$8 sps:$4 sm:$0xff]   ;;  %v2354_v46 = vld [vmem:[%s3019_s1 + $0x160] ss:$8 sps:$4 sm:$0xff]  }
  0x2e   : > { %463 = vmatprep.subr.bf16.mxu1 %v2284_v47  ;;  %1147 = vmatprep.subr.bf16.mxu0 %v2287_v48  ;;  %v2357_v47 = vld [vmem:[%s3019_s1 + $0x360] ss:$8 sps:$4 sm:$0xff]   ;;  %v2362_v48 = vld [vmem:[%s3019_s1 + $0x174] ss:$8 sps:$4 sm:$0xff]  }
  0x30   : > { %1015 = vmatmul.mubr.bf16.gmra.mrb[4].mxu0 %v891_v50  ;;  %343 = vmatmul.mubr.bf16.gmra.mrb[4].mxu1 %v219_v54  ;;  %v2360_v50 = vld [vmem:[%s3019_s1 + $0x170] ss:$8 sps:$4 sm:$0xff]   ;;  %v2368_v54 = vld [vmem:[%s3019_s1 + $0x184] ss:$8 sps:$4 sm:$0xff]  }
  0x31   : > { %464 = vmatpush1.bf16.msra.mxu1 %v2282_v52  ;;  %1148 = vmatpush1.bf16.msra.mxu0 %v2285_v53  ;;  %v545_v52 = vld [vmem:[%s2573_s24 + $0x2] sm:$0xff]  ;;  %v546_v53 = vld [vmem:[%s2573_s24 + $0xa] sm:$0xff] }
  0x32   : > { %465 = vmatprep.subr.bf16.mxu1 %v2290_v55  ;;  %1149 = vmatprep.subr.bf16.mxu0 %v2293_v56  ;;  %v1229_v55 = vld [vmem:[%s2573_s24 + $0xc] sm:$0xff]  ;;  %v1230_v56 = vld [vmem:[%s2573_s24 + $0x14] sm:$0xff] }
  0x33   : > { %491 = vmatprep.mubr.bf16.mxu1 %v2446_v2  ;;  %1175 = vmatprep.mubr.bf16.mxu0 %v2446_v2 }
  0x35   : > { %466 = vmatpush1.bf16.msra.mxu1 %v2288_v57  ;;  %1150 = vmatpush1.bf16.msra.mxu0 %v2291_v58  ;;  %v2371_v57 = vld [vmem:[%s3019_s1 + $0x384] ss:$8 sps:$4 sm:$0xff]   ;;  %v548_v58 = vpack.c.bf16 %v546_v53, %v545_v52  ;;  %v2426_v53 = vld [vmem:[%s3019_s1 + $0x440] ss:$8 sps:$4 sm:$0xff]  }
  0x36   : > { %467 = vmatprep.subr.bf16.mxu1 %v2296_v59  ;;  %1151 = vmatprep.subr.bf16.mxu0 %v2299_v60  ;;  %v2366_v59 = vld [vmem:[%s3019_s1 + $0x180] ss:$8 sps:$4 sm:$0xff]   ;;  %v1232_v60 = vpack.c.bf16 %v1230_v56, %v1229_v55  ;;  %v2428_v52 = vld [vmem:[%s3019_s1 + $0x444] ss:$8 sps:$4 sm:$0xff]   ;;  %v2429_v55 = vld [vmem:[%s3019_s1 + $0x450] ss:$8 sps:$4 sm:$0xff]  }
  0x37   : > { %v2432_v56 = vld [vmem:[%s3019_s1 + $0x460] ss:$8 sps:$4 sm:$0xff]  }
  0x39   : > { %468 = vmatpush1.bf16.msra.mxu1 %v2294_v61  ;;  %1152 = vmatpush1.bf16.msra.mxu0 %v2297_v62  ;;  %v2369_v61 = vld [vmem:[%s3019_s1 + $0x380] ss:$8 sps:$4 sm:$0xff]   ;;  %v2374_v62 = vld [vmem:[%s3019_s1 + $0x194] ss:$8 sps:$4 sm:$0xff]  }
  0x3a   : > { %469 = vmatprep.subr.bf16.mxu1 %v2302_v63  ;;  %1153 = vmatprep.subr.bf16.mxu0 %v2305_v0  ;;  %v2377_v63 = vld [vmem:[%s3019_s1 + $0x394] ss:$8 sps:$4 sm:$0xff]   ;;  %v2372_v0 = vld [vmem:[%s3019_s1 + $0x190] ss:$8 sps:$4 sm:$0xff]  }
  0x3d   : > { %470 = vmatpush1.bf16.msra.mxu1 %v2300_v1  ;;  %1154 = vmatpush1.bf16.msra.mxu0 %v2303_v3  ;;  %v2375_v1 = vld [vmem:[%s3019_s1 + $0x390] ss:$8 sps:$4 sm:$0xff]  }
  0x3e   : > { %471 = vmatprep.subr.bf16.mxu1 %v2308_v4  ;;  %1155 = vmatprep.subr.bf16.mxu0 %v2311_v5  ;;  %v547_v3 = vld [vmem:[%s2573_s24 + $0x12] sm:$0xff]  ;;  %v1231_v4 = vld [vmem:[%s2573_s24 + $0x1c] sm:$0xff]  ;;  %v2380_v5 = vld [vmem:[%s3019_s1 + $0x1a4] ss:$8 sps:$4 sm:$0xff]  }
  0x41   : > { %472 = vmatpush1.bf16.msra.mxu1 %v2306_v6  ;;  %1156 = vmatpush1.bf16.msra.mxu0 %v2309_v7  ;;  %v2383_v6 = vld [vmem:[%s3019_s1 + $0x3a4] ss:$8 sps:$4 sm:$0xff]   ;;  %v549_v7 = vpack.c.bf16 %v547_v3, %v547_v3 }
  0x42   : > { %473 = vmatprep.subr.bf16.mxu1 %v2314_v8  ;;  %1157 = vmatprep.subr.bf16.mxu0 %v2317_v9  ;;  %v1233_v8 = vpack.c.bf16 %v1231_v4, %v1231_v4  ;;  %v1755_v9 = vld [vmem:[%s3021_s3] sm:$0xff] }
  0x43   : > { %1760 = vperm.xlu0 %2220, %v1755_v9  }
  0x45   : > { %474 = vmatpush1.bf16.msra.mxu1 %v2312_v10  ;;  %1158 = vmatpush1.bf16.msra.mxu0 %v2315_v11  ;;  %v2378_v10 = vld [vmem:[%s3019_s1 + $0x1a0] ss:$8 sps:$4 sm:$0xff]  }
  0x46   : > { %630 = vmatprep.subr.bf16.mxu1 %v2320_v14  ;;  %1314 = vmatprep.subr.bf16.mxu0 %v2323_v15  ;;  %v2381_v11 = vld [vmem:[%s3019_s1 + $0x3a0] ss:$8 sps:$4 sm:$0xff]   ;;  %v2389_v14 = vld [vmem:[%s3019_s1 + $0x3b4] ss:$8 sps:$4 sm:$0xff]   ;;  %v2384_v15 = vld [vmem:[%s3019_s1 + $0x1b0] ss:$8 sps:$4 sm:$0xff]  }
  0x48   : > { %492 = vmatmul.mubr.bf16.vlgmr.msra.gmra.mrb[0].mxu1 %v377_v16  ;;  %1176 = vmatmul.mubr.bf16.vlgmr.msra.gmra.mrb[0].mxu0 %v1061_v17  ;;  %v2387_v16 = vld [vmem:[%s3019_s1 + $0x3b0] ss:$8 sps:$4 sm:$0xff]   ;;  %v1756_v17 = vld [vmem:[%s3021_s3 + $0x8] sm:$0xff] }
  0x49   : > { %631 = vmatpush1.bf16.msra.mxu1 %v2318_v18  ;;  %1315 = vmatpush1.bf16.msra.mxu0 %v2321_v19  ;;  %v2392_v18 = vld [vmem:[%s3019_s1 + $0x1c4] ss:$8 sps:$4 sm:$0xff]  }
  0x4a   : > { %632 = vmatprep.subr.bf16.mxu1 %v2326_v20  ;;  %1316 = vmatprep.subr.bf16.mxu0 %v2329_v21  ;;  %v2395_v19 = vld [vmem:[%s3019_s1 + $0x3c4] ss:$8 sps:$4 sm:$0xff]   ;;  %v2390_v20 = vld [vmem:[%s3019_s1 + $0x1c0] ss:$8 sps:$4 sm:$0xff]  }
  0x4b   : > { %501 = vmatprep.mubr.bf16.mxu1 %v2446_v2  ;;  %1185 = vmatprep.mubr.bf16.mxu0 %v2446_v2  ;;  %v2393_v21 = vld [vmem:[%s3019_s1 + $0x3c0] ss:$8 sps:$4 sm:$0xff]  }
  0x4c   : > { %1765 = vperm.xlu0 %2220, %v1756_v17  }
  0x4d   : > { %633 = vmatpush1.bf16.msra.mxu1 %v2324_v22  ;;  %1317 = vmatpush1.bf16.msra.mxu0 %v2327_v23  ;;  %v2398_v22 = vld [vmem:[%s3019_s1 + $0x1d4] ss:$8 sps:$4 sm:$0xff]  }
  0x4e   : > { %634 = vmatprep.subr.bf16.mxu1 %v2332_v25  ;;  %1318 = vmatprep.subr.bf16.mxu0 %v2335_v27  ;;  %v2401_v23 = vld [vmem:[%s3019_s1 + $0x3d4] ss:$8 sps:$4 sm:$0xff]   ;;  %v2399_v25 = vld [vmem:[%s3019_s1 + $0x3d0] ss:$8 sps:$4 sm:$0xff]   ;;  %v2407_v27 = vld [vmem:[%s3019_s1 + $0x3e4] ss:$8 sps:$4 sm:$0xff]  }
  0x50   : > { %502 = vmatmul.mubr.bf16.gmra.mrb[8].mxu1 %v378_v28  ;;  %1186 = vmatmul.mubr.bf16.gmra.mrb[8].mxu0 %v1062_v29  ;;  %v2402_v28 = vld [vmem:[%s3019_s1 + $0x1e0] ss:$8 sps:$4 sm:$0xff]  }
  0x51   : > { %635 = vmatpush1.bf16.msra.mxu1 %v2330_v30  ;;  %1319 = vmatpush1.bf16.msra.mxu0 %v2333_v31  ;;  %v2405_v29 = vld [vmem:[%s3019_s1 + $0x3e0] ss:$8 sps:$4 sm:$0xff]   ;;  %v2410_v30 = vld [vmem:[%s3019_s1 + $0x1f4] ss:$8 sps:$4 sm:$0xff]  }
  0x52   : > { %636 = vmatprep.subr.bf16.mxu1 %v2338_v32  ;;  %1320 = vmatprep.subr.bf16.mxu0 %v2341_v33  ;;  %v2413_v31 = vld [vmem:[%s3019_s1 + $0x3f4] ss:$8 sps:$4 sm:$0xff]   ;;  %v2408_v32 = vld [vmem:[%s3019_s1 + $0x1f0] ss:$8 sps:$4 sm:$0xff]  }
  0x53   : > { %662 = vmatprep.mubr.bf16.mxu1 %v2446_v2  ;;  %1346 = vmatprep.mubr.bf16.mxu0 %v2446_v2  ;;  %v2411_v33 = vld [vmem:[%s3019_s1 + $0x3f0] ss:$8 sps:$4 sm:$0xff]  }
  0x55   : > { %637 = vmatpush1.bf16.msra.mxu1 %v2336_v34  ;;  %1321 = vmatpush1.bf16.msra.mxu0 %v2339_v35  ;;  %v716_v34 = vld [vmem:[%s2573_s24 + $0x6] sm:$0xff]  ;;  %v2929_v35 = vld [vmem:[%s2573_s24 + $0xe] sm:$0xff] }
  0x56   : > { %638 = vmatprep.subr.bf16.mxu1 %v2344_v36  ;;  %1322 = vmatprep.subr.bf16.mxu0 %v2347_v37  ;;  %v1400_v36 = vld [vmem:[%s2573_s24 + $0xd] sm:$0xff]  ;;  %v1401_v37 = vld [vmem:[%s2573_s24 + $0x15] sm:$0xff] }
  0x59   : > { %639 = vmatpush1.bf16.msra.mxu1 %v2342_v38  ;;  %1323 = vmatpush1.bf16.msra.mxu0 %v2345_v39  ;;  %v2416_v38 = vld [vmem:[%s3019_s1 + $0x404] ss:$8 sps:$4 sm:$0xff]   ;;  %v719_v39 = vpack.c.bf16 %v2929_v35, %v716_v34 }
  0x5a   : > { %640 = vmatprep.subr.bf16.mxu1 %v2350_v40  ;;  %1324 = vmatprep.subr.bf16.mxu0 %v2353_v41  ;;  %v1403_v40 = vpack.c.bf16 %v1401_v37, %v1400_v36  ;;  %v2414_v41 = vld [vmem:[%s3019_s1 + $0x400] ss:$8 sps:$4 sm:$0xff]  }
  0x5d   : > { %641 = vmatpush1.bf16.msra.mxu1 %v2348_v42  ;;  %1325 = vmatpush1.bf16.msra.mxu0 %v2351_v43  ;;  %v2419_v42 = vld [vmem:[%s3019_s1 + $0x414] ss:$8 sps:$4 sm:$0xff]   ;;  %v2417_v43 = vld [vmem:[%s3019_s1 + $0x410] ss:$8 sps:$4 sm:$0xff]  }
  0x5e   : > { %642 = vmatprep.subr.bf16.mxu1 %v2356_v44  ;;  %1326 = vmatprep.subr.bf16.mxu0 %v2359_v45  ;;  %v718_v44 = vld [vmem:[%s2573_s24 + $0x16] sm:$0xff] }
  0x5f   : > { %v1402_v45 = vld [vmem:[%s2573_s24 + $0x1d] sm:$0xff] }
  0x61   : > { %643 = vmatpush1.bf16.msra.mxu1 %v2354_v46  ;;  %1327 = vmatpush1.bf16.msra.mxu0 %v2357_v47  ;;  %v2422_v46 = vld [vmem:[%s3019_s1 + $0x424] ss:$8 sps:$4 sm:$0xff]   ;;  %v720_v47 = vpack.c.bf16 %v718_v44, %v718_v44 }
  0x62   : > { %644 = vmatprep.subr.bf16.mxu1 %v2362_v48  ;;  %1328 = vmatprep.subr.bf16.mxu0 %v2365_v49  ;;  %v1404_v48 = vpack.c.bf16 %v1402_v45, %v1402_v45  ;;  %v2420_v49 = vld [vmem:[%s3019_s1 + $0x420] ss:$8 sps:$4 sm:$0xff]  }
  0x65   : > { %645 = vmatpush1.bf16.msra.mxu1 %v2360_v50  ;;  %1329 = vmatpush1.bf16.msra.mxu0 %v2363_v51  ;;  %v2425_v50 = vld [vmem:[%s3019_s1 + $0x434] ss:$8 sps:$4 sm:$0xff]   ;;  %v2423_v51 = vld [vmem:[%s3019_s1 + $0x430] ss:$8 sps:$4 sm:$0xff]  }
  0x66   : > { %801 = vmatprep.subr.bf16.mxu1 %v2368_v54  ;;  %1485 = vmatprep.subr.bf16.mxu0 %v2371_v57  ;;  %v2431_v54 = vld [vmem:[%s3019_s1 + $0x454] ss:$8 sps:$4 sm:$0xff]  }
  0x67   : > { %v2437_v57 = vld [vmem:[%s3019_s1 + $0x474] ss:$8 sps:$4 sm:$0xff]  }
  0x68   : > { %663 = vmatmul.mubr.bf16.vlgmr.msra.gmra.mrb[0].mxu1 %v548_v58  ;;  %1347 = vmatmul.mubr.bf16.vlgmr.msra.gmra.mrb[0].mxu0 %v1232_v60  ;;  %v2435_v58 = vld [vmem:[%s3019_s1 + $0x470] ss:$8 sps:$4 sm:$0xff]   ;;  %v1574_v60 = vpack.c.bf16 %v718_v44, %v2929_v35 }
  0x69   : > { %802 = vmatpush1.bf16.msra.mxu1 %v2366_v59  ;;  %1486 = vmatpush1.bf16.msra.mxu0 %v2369_v61  ;;  %v1573_v59 = vld [vmem:[%s2573_s24 + $0x1e] sm:$0xff] }
  0x6a   : > { %803 = vmatprep.subr.bf16.mxu1 %v2374_v62  ;;  %1487 = vmatprep.subr.bf16.mxu0 %v2377_v63  ;;  %v1575_v61 = vpack.c.bf16 %v1573_v59, %v1573_v59 }
  0x6b   : > { %672 = vmatprep.mubr.bf16.mxu1 %v2446_v2  ;;  %1356 = vmatprep.mubr.bf16.mxu0 %v2446_v2 }
  0x6d   : > { %804 = vmatpush1.bf16.msra.mxu1 %v2372_v0  ;;  %1488 = vmatpush1.bf16.msra.mxu0 %v2375_v1  ;;  %v2447_v0 = vmov 0.0  }
  0x6e   : > { %805 = vmatprep.subr.bf16.mxu1 %v2380_v5  ;;  %1489 = vmatprep.subr.bf16.mxu0 %v2383_v6  ;;  %1779 = vst [vmem:[%s2994_s14] sm:$0xff] %v2447_v0  ;;  %1787 = vst [vmem:[%s2994_s14 + $0x40] sm:$0xff] %v2447_v0 }
  0x6f   : > { %1788 = vst [vmem:[%s2994_s14 + $0x48] sm:$0xff] %v2447_v0  ;;  %1789 = vst [vmem:[%s2994_s14 + $0x50] sm:$0x3] %v2447_v0 }
  0x70   : > { %673 = vmatmul.mubr.bf16.gmra.mrb[12].mxu1 %v549_v7  ;;  %1357 = vmatmul.mubr.bf16.gmra.mrb[12].mxu0 %v1233_v8  ;;  %1790 = vst [vmem:[%s2994_s14 + $0x58] sm:$0x3] %v2447_v0  ;;  %1780 = vst [vmem:[%s2994_s14 + $0x8] sm:$0xff] %v2447_v0 }
  0x71   : > { %806 = vmatpush1.bf16.msra.mxu1 %v2378_v10  ;;  %1490 = vmatpush1.bf16.msra.mxu0 %v2381_v11  ;;  %1785 = vst [vmem:[%s2994_s14 + $0x30] sm:$0xff] %v2447_v0  ;;  %1786 = vst [vmem:[%s2994_s14 + $0x38] sm:$0xff] %v2447_v0 }
  0x72   : > { %807 = vmatprep.subr.bf16.mxu1 %v2386_v13  ;;  %1491 = vmatprep.subr.bf16.mxu0 %v2389_v14 }
  0x73   : > { %833 = vmatprep.mubr.bf16.mxu1 %v2446_v2  ;;  %1517 = vmatprep.mubr.bf16.mxu0 %v2446_v2 }
  0x75   : > { %808 = vmatpush1.bf16.msra.mxu1 %v2384_v15  ;;  %1492 = vmatpush1.bf16.msra.mxu0 %v2387_v16 }
  0x76   : > { %809 = vmatprep.subr.bf16.mxu1 %v2392_v18  ;;  %1493 = vmatprep.subr.bf16.mxu0 %v2395_v19 }
  0x79   : > { %810 = vmatpush1.bf16.msra.mxu1 %v2390_v20  ;;  %1494 = vmatpush1.bf16.msra.mxu0 %v2393_v21 }
  0x7a   : > { %811 = vmatprep.subr.bf16.mxu1 %v2398_v22  ;;  %1495 = vmatprep.subr.bf16.mxu0 %v2401_v23 }
  0x7d   : > { %812 = vmatpush1.bf16.msra.mxu1 %v2396_v24  ;;  %1496 = vmatpush1.bf16.msra.mxu0 %v2399_v25 }
  0x7e   : > { %813 = vmatprep.subr.bf16.mxu1 %v2404_v26  ;;  %1497 = vmatprep.subr.bf16.mxu0 %v2407_v27 }
  0x81   : > { %814 = vmatpush1.bf16.msra.mxu1 %v2402_v28  ;;  %1498 = vmatpush1.bf16.msra.mxu0 %v2405_v29 }
  0x82   : > { %815 = vmatprep.subr.bf16.mxu1 %v2410_v30  ;;  %1499 = vmatprep.subr.bf16.mxu0 %v2413_v31 }
  0x85   : > { %816 = vmatpush1.bf16.msra.mxu1 %v2408_v32  ;;  %1500 = vmatpush1.bf16.msra.mxu0 %v2411_v33 }
  0x86   : > { %1656 = vmatprep.subr.bf16.mxu0 %v2416_v38  ;;  %2160 = vmatprep.subr.bf16.mxu1 %v2416_v38 }
  0x88   : > { %834 = vmatmul.mubr.bf16.vlgmr.msra.gmra.mrb[0].mxu1 %v719_v39  ;;  %1518 = vmatmul.mubr.bf16.vlgmr.msra.gmra.mrb[0].mxu0 %v1403_v40 }
  0x89   : > { %1657 = vmatpush1.bf16.msra.mxu0 %v2414_v41  ;;  %2168 = vmatpush1.bf16.msra.mxu1 %v2414_v41 }
  0x8a   : > { %1658 = vmatprep.subr.bf16.mxu0 %v2419_v42  ;;  %2161 = vmatprep.subr.bf16.mxu1 %v2419_v42 }
  0x8b   : > { %843 = vmatprep.mubr.bf16.mxu1 %v2446_v2  ;;  %1527 = vmatprep.mubr.bf16.mxu0 %v2446_v2 }
  0x8d   : > { %1659 = vmatpush1.bf16.msra.mxu0 %v2417_v43  ;;  %2169 = vmatpush1.bf16.msra.mxu1 %v2417_v43 }
  0x8e   : > { %1660 = vmatprep.subr.bf16.mxu0 %v2422_v46  ;;  %2162 = vmatprep.subr.bf16.mxu1 %v2422_v46 }
  0x90   : > { %844 = vmatmul.mubr.bf16.gmra.mrb[16].mxu1 %v720_v47  ;;  %1528 = vmatmul.mubr.bf16.gmra.mrb[16].mxu0 %v1404_v48 }
  0x91   : > { %1661 = vmatpush1.bf16.msra.mxu0 %v2420_v49  ;;  %2170 = vmatpush1.bf16.msra.mxu1 %v2420_v49 }
  0x92   : > { %1662 = vmatprep.subr.bf16.mxu0 %v2425_v50  ;;  %2163 = vmatprep.subr.bf16.mxu1 %v2425_v50  ;;  %v1733_v50 = vlaneseq }
  0x93   : > { %1688 = vmatprep.mubr.bf16.mxu0 %v2446_v2  ;;  %1698 = vmatprep.mubr.bf16.mxu1 %v2446_v2  ;;  %v2434_v2 = vld [vmem:[%s3019_s1 + $0x464] ss:$8 sps:$4 sm:$0xff]  }
  0x95   : > { %1663 = vmatpush1.bf16.msra.mxu0 %v2423_v51  ;;  %2171 = vmatpush1.bf16.msra.mxu1 %v2423_v51  ;;  %v1734_v51 = vshrl.u32 %v1733_v50, 7 }
  0x96   : > { %1664 = vmatprep.subr.bf16.mxu0 %v2428_v52  ;;  %2164 = vmatprep.subr.bf16.mxu1 %v2428_v52 }
  0x97   : > { %v1735_v52 = vsub.s32 0, %v1734_v51 }
  0x99   : > { %1665 = vmatpush1.bf16.msra.mxu0 %v2426_v53  ;;  %2172 = vmatpush1.bf16.msra.mxu1 %v2426_v53  ;;  %v1731_v53 = vld [vmem:[%s3020_s2] sm:$0x3] }
  0x9a   : > { %1666 = vmatprep.subr.bf16.mxu0 %v2431_v54  ;;  %2165 = vmatprep.subr.bf16.mxu1 %v2431_v54  ;;  %v1739_v54 = vsub.s32 1, %v1734_v51 }
  0x9d   : > { %1667 = vmatpush1.bf16.msra.mxu0 %v2429_v55  ;;  %2173 = vmatpush1.bf16.msra.mxu1 %v2429_v55  ;;  %v1736_v55 = vrot.slane %v1731_v53, %v1735_v52 }
  0x9e   : > { %1668 = vmatprep.subr.bf16.mxu0 %v2434_v2  ;;  %2166 = vmatprep.subr.bf16.mxu1 %v2434_v2 }
  0xa1   : > { %1669 = vmatpush1.bf16.msra.mxu0 %v2432_v56  ;;  %2174 = vmatpush1.bf16.msra.mxu1 %v2432_v56 }
  0xa2   : > { %1670 = vmatprep.subr.bf16.mxu0 %v2437_v57  ;;  %2167 = vmatprep.subr.bf16.mxu1 %v2437_v57 }
  0xa5   : > { %1671 = vmatpush1.bf16.msra.mxu0 %v2435_v58  ;;  %2175 = vmatpush1.bf16.msra.mxu1 %v2435_v58  ;;  %v1740_v58 = vrot.slane %v1731_v53, %v1739_v54 }
  0xa8   : > { %1689 = vmatmul.mubr.bf16.vlgmr.msra.gmra.mrb[0].mxu0 %v1574_v60  ;;  %1699 = vmatmul.mubr.bf16.vlgmr.msra.gmra.mrb[20].mxu1 %v1575_v61 }
  0xc2   : > { %v1761_v2 = vpop.permute.xlu0 %1760 }
 0x103   : > { %v1016_v62 = vpop.f32.mrb[4].mxu0  ;;  %v344_v63 = vpop.f32.mrb[4].mxu1 }
 0x104   : > { %v1018_v1 = vpop.f32.mrb[5].mxu0  ;;  %v346_v3 = vpop.f32.mrb[5].mxu1 }
 0x105   : > { %v1020_v4 = vpop.f32.mrb[6].mxu0  ;;  %v348_v5 = vpop.f32.mrb[6].mxu1 }
 0x106   : > { %v1021_v6 = vpop.f32.mrb[7].mxu0  ;;  %v349_v7 = vpop.f32.mrb[7].mxu1 }
 0x123   : > { %v503_v8 = vpop.f32.mrb[8].mxu1  ;;  %v1187_v9 = vpop.f32.mrb[8].mxu0 }
 0x124   : > { %v520_v10 = vadd.f32 %v503_v8, %v344_v63  ;;  %v505_v11 = vpop.f32.mrb[9].mxu1  ;;  %v1189_v12 = vpop.f32.mrb[9].mxu0 }
 0x125   : > { %v521_v13 = vadd.f32 %v505_v11, %v346_v3  ;;  %v1191_v14 = vpop.f32.mrb[10].mxu0  ;;  %v507_v15 = vpop.f32.mrb[10].mxu1 }
 0x126   : > { %v1192_v16 = vpop.f32.mrb[11].mxu0  ;;  %v508_v17 = vpop.f32.mrb[11].mxu1 }
 0x143   : > { %v674_v18 = vpop.f32.mrb[12].mxu1  ;;  %v1358_v19 = vpop.f32.mrb[12].mxu0 }
 0x144   : > { %v691_v20 = vadd.f32 %v674_v18, %v520_v10  ;;  %v676_v21 = vpop.f32.mrb[13].mxu1  ;;  %v1360_v22 = vpop.f32.mrb[13].mxu0 }
 0x145   : > { %v692_v23 = vadd.f32 %v676_v21, %v521_v13  ;;  %v1362_v24 = vpop.f32.mrb[14].mxu0  ;;  %v678_v25 = vpop.f32.mrb[14].mxu1 }
 0x146   : > { %v1363_v26 = vpop.f32.mrb[15].mxu0  ;;  %v679_v27 = vpop.f32.mrb[15].mxu1 }
 0x15b   : > { %v835_v28 = vpop.f32.mrb[0].mxu1 }
 0x15c   : > { %v837_v29 = vpop.f32.mrb[1].mxu1 }
 0x15d   : > { %v839_v30 = vpop.f32.mrb[2].mxu1 }
 0x15e   : > { %v841_v31 = vpop.f32.mrb[3].mxu1 }
 0x163   : > { %v845_v32 = vpop.f32.mrb[16].mxu1  ;;  %v1529_v33 = vpop.f32.mrb[16].mxu0 }
 0x164   : > { %v862_v34 = vadd.f32 %v845_v32, %v691_v20  ;;  %v847_v35 = vpop.f32.mrb[17].mxu1  ;;  %v1531_v36 = vpop.f32.mrb[17].mxu0 }
 0x165   : > { %v863_v37 = vadd.f32 %v847_v35, %v692_v23  ;;  %v849_v38 = vpop.f32.mrb[18].mxu1  ;;  %v1533_v39 = vpop.f32.mrb[18].mxu0 }
 0x166   : > { %v1033_v40 = vadd.f32 %v1016_v62, %v862_v34  ;;  %v850_v41 = vpop.f32.mrb[19].mxu1  ;;  %v1534_v42 = vpop.f32.mrb[19].mxu0 }
 0x167   : > { %v1034_v43 = vadd.f32 %v1018_v1, %v863_v37  ;;  %v1766_v23 = vpop.permute.xlu0 %1765 }
 0x168   : > { %v1204_v44 = vadd.f32 %v1187_v9, %v1033_v40 }
 0x169   : > { %v1205_v45 = vadd.f32 %v1189_v12, %v1034_v43  ;;  %v1771_v12 = vpop.permute.xlu1 %1770 }
 0x16a   : > { %v1375_v46 = vadd.f32 %v1358_v19, %v1204_v44 }
 0x16b   : > { %v1376_v47 = vadd.f32 %v1360_v22, %v1205_v45 }
 0x16c   : > { %v1546_v48 = vadd.f32 %v1529_v33, %v1375_v46 }
 0x16d   : > { %v1547_v49 = vadd.f32 %v1531_v36, %v1376_v47 }
 0x17b   : > { %v1690_v56 = vpop.f32.mrb[0].mxu0  ;;  %v1700_v57 = vpop.f32.mrb[20].mxu1 }
 0x17c   : > { %v2176_v59 = vadd.f32 %v1690_v56, %v835_v28  ;;  %v1717_v60 = vadd.f32 %v1700_v57, %v1546_v48  ;;  %v1692_v61 = vpop.f32.mrb[1].mxu0  ;;  %v1702_v62 = vpop.f32.mrb[21].mxu1 }
 0x17d   : > { %v2177_v63 = vadd.f32 %v1692_v61, %v837_v29  ;;  %v1718_v0 = vadd.f32 %v1702_v62, %v1547_v49  ;;  %v1694_v1 = vpop.f32.mrb[2].mxu0  ;;  %v1704_v3 = vpop.f32.mrb[22].mxu1 }
 0x17e   : > { %v1743_v4 = vadd.f32 %v2176_v59, %v1736_v55  ;;  %v1747_v5 = vadd.f32 %v1736_v55, %v1717_v60  ;;  %v2178_v6 = vadd.f32 %v1694_v1, %v839_v30  ;;  %v1696_v7 = vpop.f32.mrb[3].mxu0  ;;  %v1705_v8 = vpop.f32.mrb[23].mxu1 }
 0x17f   : > { %v1744_v9 = vadd.f32 %v2177_v63, %v1740_v58  ;;  %v1748_v10 = vadd.f32 %v1740_v58, %v1718_v0  ;;  %v2179_v11 = vadd.f32 %v1696_v7, %v841_v31 }
 0x180   : > { %v1749_v13 = vmax.f32 %v1743_v4, 0.0  ;;  %v1745_v14 = vadd.f32 %v2178_v6, %v1736_v55  ;;  %v1753_v15 = vmax.f32 %v1747_v5, 0.0 }
 0x181   : > { %v1750_v16 = vmax.f32 %v1744_v9, 0.0  ;;  %v1746_v17 = vadd.f32 %v2179_v11, %v1740_v58  ;;  %v1754_v18 = vmax.f32 %v1748_v10, 0.0 }
 0x182   : > { %v1773_v19 = vmul.f32 %v1761_v2, %v1749_v13  ;;  %v1751_v20 = vmax.f32 %v1745_v14, 0.0  ;;  %v1777_v21 = vmul.f32 %v1771_v12, %v1753_v15 }
 0x183   : > { %v1774_v22 = vmul.f32 %v1761_v2, %v1750_v16  ;;  %v1752_v24 = vmax.f32 %v1746_v17, 0.0  ;;  %v1778_v25 = vmul.f32 %v1771_v12, %v1754_v18 }
 0x184   : > { %v1798_v26 = vrot.slane %v1773_v19, 1  ;;  %v1775_v27 = vmul.f32 %v1766_v23, %v1751_v20  ;;  %v1804_v28 = vrot.slane %v1777_v21, 1 }
 0x185   : > { %v1799_v29 = vrot.slane %v1774_v22, 1  ;;  %v1776_v30 = vmul.f32 %v1766_v23, %v1752_v24  ;;  %v1806_v31 = vrot.slane %v1778_v25, 1 }
 0x186   : > { %1816 = vst [vmem:[%s2994_s14] sm:$0x80] %v1798_v26  ;;  %v1800_v32 = vrot.slane %v1775_v27, 1  ;;  %1822 = vst [vmem:[%s2994_s14 + $0x30] sm:$0x7f] %v1804_v28 }
 0x187   : > { %1817 = vst [vmem:[%s2994_s14 + $0x8] sm:$0x80] %v1799_v29  ;;  %v1802_v33 = vrot.slane %v1776_v30, 1  ;;  %1823 = vst [vmem:[%s2994_s14 + $0x38] sm:$0x7f] %v1806_v31 }
 0x188   : > { %v1801_v34 = vsel %vm1797_vm0, %v1798_v26, %v1800_v32  ;;  %v1805_v35 = vsel %vm1797_vm0, %v1800_v32, %v1804_v28 }
 0x189   : > { %v1803_v36 = vsel %vm1797_vm0, %v1799_v29, %v1802_v33  ;;  %1818 = vst [vmem:[%s2994_s14 + $0x10] sm:$0xff] %v1801_v34  ;;  %v1807_v37 = vsel %vm1797_vm0, %v1802_v33, %v1806_v31  ;;  %1820 = vst [vmem:[%s2994_s14 + $0x20] sm:$0xff] %v1805_v35 }
 0x18a   : > { %1819 = vst [vmem:[%s2994_s14 + $0x18] sm:$0xff] %v1803_v36  ;;  %1821 = vst [vmem:[%s2994_s14 + $0x28] sm:$0xff] %v1807_v37 }
 0x18b PF: > { %s14_s15 = sadd.s32 1, %s2444_s15  }
 0x18c   : > { %p11_p4 = scmp.ge.s32.totalorder %s14_s15, 4  }
 0x18e   :  { %13 = sbr.rel (!%p11_p4) target bundleno = 1 (0x1), region = 74 }

// kernel: tower_forward.9
= control target key start
LH: loop header
LB: loop body
LE: loop exit
PB: predicated region body
PF: predicated region fallthrough
CT: control target
= control target key end

     0   :  { %s3905_s15 = smov 0   ;;  %s4623_s0 = inlined_call_operand.vmem [shape: f32[2,42,264], index: 0, kind: input, shape index: {}]   ;;  %s4624_s1 = inlined_call_operand.vmem [shape: bf16[9,264,128], index: 1, kind: input, shape index: {}]   ;;  %s4625_s2 = inlined_call_operand.vmem [shape: f32[1,128], index: 2, kind: input, shape index: {}]   ;;  %s4626_s3 = inlined_call_operand.vmem [shape: f32[24,1], index: 3, kind: input, shape index: {}]   ;;  %s4627_s4 = inlined_call_operand.vmem [shape: f32[2,42,128], index: 4, kind: output, shape index: {}]  }
   0x1 LB: > { %s2915_s16 = sadd.s32 4294967295, %s3876_s15   ;;  %p2919_p0 = scmp.ge.s32.totalorder %s3876_s15, 1  ;;  %s3876_s15 = sphi %s3905_s15, %s14_s15  }
   0x2   : > { %p162_p1 = scmp.lt.s32.totalorder %s3876_s15, 3 }
   0x4   : > { %p163_p2 = pnand %p2919_p0, %p162_p1 }
   0x5   : > { %v3716_v0 = vld [vmem:[%s4624_s1 + $0x40] sm:$0xff] (!%p163_p2)   ;;  %vm353_vm0 = vcmask (!%p163_p2), 1043456   ;;  %p188_p3 = scmp.lt.s32.totalorder (!%p163_p2), %s2915_s16, 1  ;;  %v3719_v3 = vld [vmem:[%s4624_s1 + $0x48] sm:$0xff] (!%p163_p2)   ;;  %v3722_v7 = vld [vmem:[%s4624_s1 + $0x50] sm:$0xff] (!%p163_p2)   ;;  %vm346_vm1 = vcmask (!%p163_p2), 64512  }
   0x6   : > { %166 = sbr.rel (%p163_p2) target bundleno = 447 (0x1bf), region = 36  ;;  %v3717_v1 = vld [vmem:[%s4624_s1] sm:$0xff] (!%p163_p2)   ;;  %3360 = vmatprep.subr.bf16.mxu0 (!%p163_p2), %v3716_v0  ;;  %v3720_v5 = vld [vmem:[%s4624_s1 + $0x8] sm:$0xff] (!%p163_p2)   ;;  %v3724_v14 = vld [vmem:[%s4624_s1 + $0x10] sm:$0xff] (!%p163_p2)   ;;  %vm508_vm2 = vsmask.f32 (!%p163_p2), 7424 }
   0x7   : > { %v3718_v2 = vld [vmem:[%s4624_s1 + $0x80] ss:$0 sps:$4 sm:$0xff] (!%p163_p2)   ;;  %3361 = vmatpush3.bf16.msra.mxu0 (!%p163_p2), %v3717_v1  ;;  %v3721_v6 = vld [vmem:[%s4624_s1 + $0xc4] sm:$0xff] (!%p163_p2)   ;;  %v3725_v15 = vld [vmem:[%s4624_s1 + $0xcc] sm:$0xff] (!%p163_p2)   ;;  %vm829_vm3 = vcmask (!%p163_p2), 1046528   ;;  %vm1114_vm4 = vcmask (!%p163_p2), 1044480  }
   0x8   : > { %3693 = vmatprep.subr.msk.bf16.mxu1 (!%p163_p2), %vm353_vm0, %v3718_v2  ;;  %v355_v4 = vsel (!%p163_p2), %vm353_vm0, %v3718_v2, 0  ;;  %3362 = vmatprep.subr.bf16.mxu0 (!%p163_p2), %v3719_v3  ;;  %v3723_v8 = vld [vmem:[%s4624_s1 + $0x84] sm:$0xff] (!%p163_p2)   ;;  %v3726_v16 = vld [vmem:[%s4624_s1 + $0x58] sm:$0xff] (!%p163_p2)   ;;  %v3727_v17 = vld [vmem:[%s4624_s1 + $0x8c] sm:$0xff] (!%p163_p2)   ;;  %vm1393_vm5 = vsmask.f32 (!%p163_p2), 4352 }
   0x9   : > { %3640 = vmatpush3.bf16.msra.mxu1 (!%p163_p2), %v355_v4  ;;  %v3728_v18 = vld [vmem:[%s4624_s1 + $0x18] sm:$0xff] (!%p163_p2)   ;;  %v3730_v20 = vld [vmem:[%s4624_s1 + $0x60] sm:$0xff] (!%p163_p2)   ;;  %v3734_v24 = vld [vmem:[%s4624_s1 + $0x68] sm:$0xff] (!%p163_p2)   ;;  %vm1982_vm6 = vcmask (!%p163_p2), 1045504   ;;  %vm2261_vm7 = vsmask.f32 (!%p163_p2), 5376 }
   0xa   : > { %3391 = vmatprep.subr.bf16.mxu1 (!%p163_p2), %v3721_v6  ;;  %v3729_v19 = vld [vmem:[%s4624_s1 + $0xd4] sm:$0xff] (!%p163_p2)   ;;  %v3732_v22 = vld [vmem:[%s4624_s1 + $0x20] sm:$0xff] (!%p163_p2)   ;;  %v3736_v26 = vld [vmem:[%s4624_s1 + $0x28] sm:$0xff] (!%p163_p2)  }
   0xb   : > { %3363 = vmatpush3.bf16.msra.mxu0 (!%p163_p2), %v3720_v5  ;;  %v3731_v21 = vld [vmem:[%s4624_s1 + $0x94] sm:$0xff] (!%p163_p2)   ;;  %v3733_v23 = vld [vmem:[%s4624_s1 + $0xdc] sm:$0xff] (!%p163_p2)   ;;  %v3737_v27 = vld [vmem:[%s4624_s1 + $0xe4] sm:$0xff] (!%p163_p2)  }
   0xc   : > { %3364 = vmatprep.subr.bf16.mxu0 (!%p163_p2), %v3722_v7  ;;  %v3735_v25 = vld [vmem:[%s4624_s1 + $0x9c] sm:$0xff] (!%p163_p2)   ;;  %v3738_v28 = vld [vmem:[%s4624_s1 + $0x70] sm:$0xff] (!%p163_p2)   ;;  %v3739_v29 = vld [vmem:[%s4624_s1 + $0xa4] sm:$0xff] (!%p163_p2)  }
   0xd   : > { %s4629_s16 = smov (!%p188_p3, %s2915_s16), 1  ;;  %v3740_v30 = vld [vmem:[%s4624_s1 + $0x30] sm:$0xff]   ;;  %v3742_v32 = vld [vmem:[%s4624_s1 + $0x78] sm:$0xff]   ;;  %v3747_v43 = vld [vmem:[%s4624_s1 + $0x104] ss:$0 sps:$4 sm:$0xff]  }
   0xe   : > { %s3702_s29 = smul.u32 144, %s4629_s16  ;;  %v3741_v31 = vld [vmem:[%s4624_s1 + $0xec] sm:$0xff]   ;;  %v3744_v34 = vld [vmem:[%s4624_s1 + $0x38] sm:$0xff]   ;;  %v664_v45 = vsel %vm353_vm0, %v3747_v43, 0 }
   0xf   : > { %3365 = vmatpush3.bf16.msra.mxu0 %v3724_v14  ;;  %v3743_v33 = vld [vmem:[%s4624_s1 + $0xac] sm:$0xff]   ;;  %v3745_v38 = vld [vmem:[%s4624_s1 + $0xf4] sm:$0xff]   ;;  %v3748_v44 = vld [vmem:[%s4624_s1 + $0xfc] sm:$0xff]   ;;  %s3703_s6 = smul.u32 48, %s4629_s16 }
  0x10   : > { %s3942_s8 = scalar_lea.vmem %s4623_s0, %s3702_s29  ;;  %3366 = vmatprep.subr.bf16.mxu0 %v3726_v16  ;;  %v3746_v42 = vld [vmem:[%s4624_s1 + $0xb4] sm:$0xff]   ;;  %v3749_v46 = vld [vmem:[%s4624_s1 + $0xbc] sm:$0xff]   ;;  %v3750_v60 = vld [vmem:[%s4624_s1 + $0x148] sm:$0xff]  }
  0x11   : > { %v234_v9 = vld [vmem:[%s3942_s8 + $0x10] sm:$0xff]  ;;  %v3949_v10 = vld [vmem:[%s3942_s8 + $0x28] sm:$0xff]  ;;  %v3952_v11 = vld [vmem:[%s3942_s8 + $0x40] sm:$0xff]  ;;  %s4606_s10 = scalar_lea.vmem %s4627_s4, %s3703_s6 }
  0x12   : > { %v243_v12 = vpack.c.bf16 %v3949_v10, %v234_v9  ;;  %v246_v13 = vpack.c.bf16 %v3952_v11, %v3952_v11  ;;  %v233_v35 = vld [vmem:[%s3942_s8 + $0x8] sm:$0xff]  ;;  %v4024_v36 = vld [vmem:[%s3942_s8 + $0x20] sm:$0xff]  ;;  %v4032_v40 = vld [vmem:[%s3942_s8 + $0x18] sm:$0xff] }
  0x13   : > { %3367 = vmatpush3.bf16.msra.mxu0 %v3728_v18  ;;  %v242_v37 = vpack.c.bf16 %v4024_v36, %v233_v35  ;;  %v232_v39 = vld [vmem:[%s3942_s8] sm:$0xff]  ;;  %v491_v47 = vld [vmem:[%s3942_s8 + $0x8] sm:$0xfe]  ;;  %v4051_v48 = vld [vmem:[%s3942_s8 + $0x38] sm:$0xff] }
  0x14   : > { %3641 = vmatprep.mubr.msk.bf16.mxu1 %vm346_vm1, %v243_v12  ;;  %3368 = vmatprep.subr.bf16.mxu0 %v3730_v20  ;;  %v241_v41 = vpack.c.bf16 %v4032_v40, %v232_v39  ;;  %v500_v49 = vld [vmem:[%s3942_s8 + $0x50] sm:$0x1]  ;;  %v503_v50 = vpack.c.bf16 %v4024_v36, %v491_v47  ;;  %v490_v51 = vld [vmem:[%s3942_s8] sm:$0xfe]  ;;  %v245_v53 = vpack.c.bf16 %v4051_v48, %v4051_v48  ;;  %v499_v55 = vld [vmem:[%s3942_s8 + $0x48] sm:$0x1] }
  0x15   : > { %3642 = vmatmul.mubr.msk.bf16.vlgmr.msra.gmra.mrb[0].mxu1 %vm346_vm1, %v246_v13  ;;  %389 = vmatprep.mubr.bf16.mxu0 %v242_v37  ;;  %v506_v52 = vpack.c.bf16 %v500_v49, %v4051_v48  ;;  %v4060_v54 = vld [vmem:[%s3942_s8 + $0x30] sm:$0xff]  ;;  %v502_v56 = vpack.c.bf16 %v4032_v40, %v490_v51  ;;  %v3751_v7 = vld [vmem:[%s4624_s1 + $0x108] sm:$0xff]   ;;  %v501_v13 = vld [vmem:[%s3942_s8 + $0x58] sm:$0x1] }
  0x16   : > { %3392 = vmatpush3.bf16.msra.mxu1 %v3723_v8  ;;  %v522_v57 = vshrl.u32 %v503_v50, 16  ;;  %v524_v58 = vshll.u32 %v503_v50, 16  ;;  %v505_v59 = vpack.c.bf16 %v499_v55, %v4060_v54  ;;  %v244_v61 = vpack.c.bf16 %v4060_v54, %v4060_v54  ;;  %v492_v12 = vld [vmem:[%s3942_s8 + $0x10] sm:$0xfe]  ;;  %v3755_v35 = vld [vmem:[%s4624_s1 + $0x118] sm:$0xff]   ;;  %v3759_v49 = vld [vmem:[%s4624_s1 + $0x168] sm:$0xff]  }
  0x17   : > { %3393 = vmatprep.subr.bf16.mxu1 %v3725_v15  ;;  %3369 = vmatpush3.bf16.msra.mxu0 %v3732_v22  ;;  %v529_v62 = vshll.u32 %v506_v52, 16  ;;  %v510_v63 = vshrl.u32 %v502_v56, 16  ;;  %v512_v0 = vshll.u32 %v502_v56, 16  ;;  %v548_v8 = vshrl.u32 %v506_v52, 16  ;;  %v3752_v15 = vld [vmem:[%s4624_s1 + $0x150] sm:$0xff]   ;;  %v3761_v50 = vld [vmem:[%s4624_s1 + $0x128] sm:$0xff]  }
  0x18   : > { %3370 = vmatprep.subr.bf16.mxu0 %v3734_v24  ;;  %v526_v1 = vrot.slane %v524_v58, 1  ;;  %v517_v2 = vshll.u32 %v505_v59, 16  ;;  %v507_v20 = vpack.c.bf16 %v501_v13, %v3952_v11  ;;  %v3753_v24 = vld [vmem:[%s4624_s1 + $0x110] sm:$0xff]   ;;  %v3768_v58 = vld [vmem:[%s4624_s1 + $0x1dc] sm:$0xff]  }
  0x19   : > { %v531_v3 = vrot.slane %v529_v62, 1  ;;  %v514_v4 = vrot.slane %v512_v0, 1  ;;  %v3762_v51 = vld [vmem:[%s4624_s1 + $0x18c] sm:$0xff]   ;;  %v3766_v56 = vld [vmem:[%s4624_s1 + $0x194] sm:$0xff]   ;;  %v805_v0 = vld [vmem:[%s3942_s8] sm:$0xfc] }
  0x1a   : > { %3394 = vmatpush3.bf16.msra.mxu1 %v3727_v17  ;;  %v527_v5 = vor.u32 %v526_v1, %v522_v57  ;;  %v519_v6 = vrot.slane %v517_v2, 1  ;;  %v504_v17 = vpack.c.bf16 %v3949_v10, %v492_v12  ;;  %v3763_v52 = vld [vmem:[%s4624_s1 + $0x170] sm:$0xff]   ;;  %v3767_v57 = vld [vmem:[%s4624_s1 + $0x178] sm:$0xff]   ;;  %v814_v1 = vld [vmem:[%s3942_s8 + $0x48] sm:$0x3] }
  0x1b   : > { %3395 = vmatprep.subr.bf16.mxu1 %v3729_v19  ;;  %3371 = vmatpush3.bf16.msra.mxu0 %v3736_v26  ;;  %v515_v9 = vor.u32 %v514_v4, %v510_v63  ;;  %v550_v16 = vor.u32 %v548_v8, %v531_v3  ;;  %v545_v19 = vshrl.u32 %v505_v59, 16  ;;  %v551_v26 = vshrl.u32 %v507_v20, 16  ;;  %v3765_v55 = vld [vmem:[%s4624_s1 + $0x130] sm:$0xff]   ;;  %v3769_v59 = vld [vmem:[%s4624_s1 + $0x138] sm:$0xff]   ;;  %v3771_v2 = vld [vmem:[%s4624_s1 + $0x180] sm:$0xff]  }
  0x1c   : > { %3372 = vmatprep.subr.bf16.mxu0 %v3738_v28  ;;  %v532_v14 = vsel %vm508_vm2, %v527_v5, %v531_v3  ;;  %v536_v22 = vshll.u32 %v504_v17, 16  ;;  %v3754_v28 = vld [vmem:[%s4624_s1 + $0x158] sm:$0xff]   ;;  %v815_v62 = vld [vmem:[%s3942_s8 + $0x50] sm:$0x3]  ;;  %v817_v4 = vpack.c.bf16 %v4032_v40, %v805_v0  ;;  %v820_v5 = vpack.c.bf16 %v814_v1, %v4060_v54  ;;  %v3773_v8 = vld [vmem:[%s4624_s1 + $0x140] sm:$0xff]  }
  0x1d   : > { %698 = vmatprep.mubr.bf16.mxu1 %v532_v14  ;;  %v520_v18 = vsel %vm508_vm2, %v515_v9, %v519_v6  ;;  %v821_v3 = vpack.c.bf16 %v815_v62, %v4051_v48  ;;  %v3774_v9 = vld [vmem:[%s4624_s1 + $0x1a4] sm:$0xff]   ;;  %v3775_v13 = vld [vmem:[%s4624_s1 + $0x1ec] sm:$0xff]  }
  0x1e   : > { %3396 = vmatpush3.bf16.msra.mxu1 %v3731_v21  ;;  %v534_v21 = vshrl.u32 %v504_v17, 16  ;;  %v3776_v17 = vld [vmem:[%s4624_s1 + $0x250] sm:$0xff]   ;;  %v1375_v1 = vld [vmem:[%s3942_s8] sm:$0x80] }
  0x1f   : > { %3397 = vmatprep.subr.bf16.mxu1 %v3733_v23  ;;  %3373 = vmatpush3.bf16.msra.mxu0 %v3740_v30  ;;  %v3756_v23 = vld [vmem:[%s4624_s1 + $0x188] ss:$0 sps:$4 sm:$0xff]   ;;  %v547_v30 = vor.u32 %v545_v19, %v519_v6  ;;  %v834_v12 = vrot.slane %v821_v3, 1  ;;  %v3778_v19 = vld [vmem:[%s4624_s1 + $0x210] sm:$0xff]   ;;  %v3796_v3 = vld [vmem:[%s4624_s1 + $0x280] sm:$0xff]  }
  0x20   : > { %3374 = vmatprep.subr.bf16.mxu0 %v3742_v32  ;;  %v807_v32 = vld [vmem:[%s3942_s8 + $0x10] sm:$0xfc]  ;;  %v3772_v6 = vld [vmem:[%s4624_s1 + $0x1e4] sm:$0xff]  }
  0x21   : > { %v819_v37 = vpack.c.bf16 %v3949_v10, %v807_v32  ;;  %v1100_v32 = vld [vmem:[%s3942_s8 + $0x50] sm:$0x3f] }
  0x22   : > { %3398 = vmatpush3.bf16.msra.mxu1 %v3735_v25  ;;  %v541_v25 = vshll.u32 %v507_v20, 16 }
  0x23   : > { %3399 = vmatprep.subr.bf16.mxu1 %v3737_v27  ;;  %3375 = vmatpush3.bf16.msra.mxu0 %v3744_v34  ;;  %v538_v27 = vrot.slane %v536_v22, 1  ;;  %v3780_v22 = vld [vmem:[%s4624_s1 + $0x258] sm:$0xff]  }
  0x24   : > { %3694 = vmatprep.subr.msk.bf16.mxu0 %vm353_vm0, %v3747_v43  ;;  %v836_v43 = vrot.slane %v819_v37, 1  ;;  %v1099_v37 = vld [vmem:[%s3942_s8 + $0x48] sm:$0x3f] }
  0x26   : > { %3400 = vmatpush3.bf16.msra.mxu1 %v3739_v29  ;;  %390 = vmatmul.mubr.bf16.vlgmr.msra.gmra.mrb[0].mxu0 %v241_v41  ;;  %v543_v29 = vrot.slane %v541_v25, 1  ;;  %v949_v41 = vsel %vm353_vm0, %v3756_v23, 0  ;;  %v3783_v25 = vld [vmem:[%s4624_s1 + $0x1fc] sm:$0xff]  }
  0x27   : > { %3401 = vmatprep.subr.bf16.mxu1 %v3741_v31  ;;  %3646 = vmatpush3.bf16.msra.mxu0 %v664_v45  ;;  %v539_v31 = vor.u32 %v538_v27, %v534_v21  ;;  %v3760_v45 = vld [vmem:[%s4624_s1 + $0x1cc] sm:$0xff]   ;;  %v3779_v21 = vld [vmem:[%s4624_s1 + $0x1f4] sm:$0xff]   ;;  %v3785_v27 = vld [vmem:[%s4624_s1 + $0x1bc] sm:$0xff]  }
  0x28   : > { %397 = vmatprep.mubr.bf16.mxu0 %v245_v53  ;;  %3695 = vmatprep.subr.msk.bf16.mxu0 %vm353_vm0, %v3756_v23  ;;  %v553_v34 = vor.u32 %v551_v26, %v543_v29  ;;  %v3764_v53 = vld [vmem:[%s4624_s1 + $0x1d4] sm:$0xff]   ;;  %v3784_v26 = vld [vmem:[%s4624_s1 + $0x260] sm:$0xff]  }
  0x29   : > { %v544_v39 = vsel %vm508_vm2, %v539_v31, %v543_v29  ;;  %v3781_v23 = vld [vmem:[%s4624_s1 + $0x1b4] sm:$0xff]   ;;  %v3787_v29 = vld [vmem:[%s4624_s1 + $0x204] sm:$0xff]   ;;  %v1091_v31 = vld [vmem:[%s3942_s8 + $0x8] sm:$0xc0] }
  0x2a   : > { %3402 = vmatpush3.bf16.msra.mxu1 %v3743_v33  ;;  %v816_v33 = vld [vmem:[%s3942_s8 + $0x58] sm:$0x3] }
  0x2b   : > { %3403 = vmatprep.subr.bf16.mxu1 %v3745_v38  ;;  %v822_v38 = vpack.c.bf16 %v816_v33, %v3952_v11  ;;  %v1103_v33 = vpack.c.bf16 %v4024_v36, %v1091_v31 }
  0x2e   : > { %3404 = vmatpush3.bf16.msra.mxu1 %v3746_v42  ;;  %398 = vmatmul.mubr.bf16.gmra.mrb[4].mxu0 %v244_v61  ;;  %v3757_v42 = vld [vmem:[%s4624_s1 + $0x160] sm:$0xff]   ;;  %v806_v61 = vld [vmem:[%s3942_s8 + $0x8] sm:$0xfc] }
  0x2f   : > { %3405 = vmatprep.subr.bf16.mxu1 %v3748_v44  ;;  %3647 = vmatprep.mubr.msk.bf16.mxu0 %vm346_vm1, %v544_v39  ;;  %v837_v44 = vrot.slane %v822_v38, 1  ;;  %v818_v63 = vpack.c.bf16 %v4024_v36, %v806_v61  ;;  %v3789_v38 = vld [vmem:[%s4624_s1 + $0x1c4] sm:$0xff]   ;;  %v1385_v61 = vld [vmem:[%s3942_s8 + $0x50] sm:$0x7f] }
  0x30   : > { %v1391_v0 = vpack.c.bf16 %v1385_v61, %v4051_v48  ;;  %v4313_v61 = vld [vmem:[%s3942_s8 + $0x58] sm:$0xff] }
  0x31   : > { %v838_v47 = vsel %vm829_vm3, %v836_v43, %v837_v44 }
  0x32   : > { %3406 = vmatpush3.bf16.msra.mxu1 %v3749_v46  ;;  %v3758_v46 = vld [vmem:[%s4624_s1 + $0x120] sm:$0xff]  }
  0x33   : > { %3422 = vmatprep.subr.bf16.mxu1 %v3750_v60  ;;  %v3770_v60 = vld [vmem:[%s4624_s1 + $0x19c] sm:$0xff]  }
  0x35   : > { %699 = vmatmul.mubr.bf16.vlgmr.msra.gmra.mrb[4].mxu1 %v520_v18  ;;  %v3777_v18 = vld [vmem:[%s4624_s1 + $0x1ac] sm:$0xff]  }
  0x36   : > { %3423 = vmatpush3.bf16.msra.mxu1 %v3751_v7  ;;  %706 = vmatprep.mubr.bf16.mxu1 %v550_v16  ;;  %v833_v7 = vrot.slane %v818_v63, 1  ;;  %v831_v16 = vrot.slane %v820_v5, 1  ;;  %v1387_v5 = vpack.c.bf16 %v4032_v40, %v1375_v1  ;;  %v3809_v1 = vld [vmem:[%s4624_s1 + $0x318] sm:$0xff]  }
  0x37   : > { %3424 = vmatprep.subr.bf16.mxu1 %v3752_v15  ;;  %3648 = vmatmul.mubr.msk.bf16.vlgmr.msra.gmra.mrb[8].mxu0 %vm346_vm1, %v553_v34  ;;  %v830_v15 = vrot.slane %v817_v4, 1  ;;  %v1106_v34 = vpack.c.bf16 %v1100_v32, %v4051_v48  ;;  %v3799_v32 = vld [vmem:[%s4624_s1 + $0x248] sm:$0xff]  }
  0x38   : > { %3652 = vmatpush3.bf16.msra.mxu0 %v949_v41  ;;  %3653 = vmatprep.mubr.msk.bf16.mxu0 %vm346_vm1, %v838_v47  ;;  %v835_v14 = vsel %vm829_vm3, %v833_v7, %v834_v12  ;;  %v1105_v41 = vpack.c.bf16 %v1099_v37, %v4060_v54 }
  0x39   : > { %3453 = vmatprep.subr.bf16.mxu0 %v3760_v45  ;;  %v832_v20 = vsel %vm829_vm3, %v830_v15, %v831_v16  ;;  %v1119_v43 = vrot.slane %v1106_v34, 3  ;;  %v3790_v45 = vld [vmem:[%s4624_s1 + $0x228] sm:$0xff]  }
  0x3a   : > { %3425 = vmatpush3.bf16.msra.mxu1 %v3753_v24  ;;  %v3782_v24 = vld [vmem:[%s4624_s1 + $0x218] sm:$0xff]   ;;  %v1116_v47 = vrot.slane %v1105_v41, 3 }
  0x3b   : > { %3426 = vmatprep.subr.bf16.mxu1 %v3754_v28  ;;  %v3786_v28 = vld [vmem:[%s4624_s1 + $0x220] sm:$0xff]  }
  0x3d   : > { %707 = vmatmul.mubr.bf16.gmra.mrb[8].mxu1 %v547_v30  ;;  %v3788_v30 = vld [vmem:[%s4624_s1 + $0x268] sm:$0xff]  }
  0x3e   : > { %3427 = vmatpush3.bf16.msra.mxu1 %v3755_v35  ;;  %983 = vmatprep.mubr.bf16.mxu1 %v835_v14  ;;  %v1090_v35 = vld [vmem:[%s3942_s8] sm:$0xc0]  ;;  %v1398_v14 = vshll.u32 %v1387_v5, 16 }
  0x3f   : > { %3428 = vmatprep.subr.bf16.mxu1 %v3757_v42  ;;  %3654 = vmatmul.mubr.msk.bf16.vlgmr.msra.gmra.mrb[12].mxu0 %vm346_vm1, %v837_v44  ;;  %v1102_v39 = vpack.c.bf16 %v4032_v40, %v1090_v35  ;;  %v1118_v42 = vrot.slane %v1103_v33, 3  ;;  %v3791_v44 = vld [vmem:[%s4624_s1 + $0x20c] ss:$0 sps:$4 sm:$0xff]   ;;  %v3797_v40 = vld [vmem:[%s4624_s1 + $0x240] sm:$0xff]  }
  0x40   : > { %3454 = vmatpush3.bf16.msra.mxu0 %v3762_v51 }
  0x41   : > { %3455 = vmatprep.subr.bf16.mxu0 %v3764_v53  ;;  %v1234_v53 = vsel %vm353_vm0, %v3791_v44, 0 }
  0x42   : > { %3429 = vmatpush3.bf16.msra.mxu1 %v3758_v46  ;;  %v1115_v46 = vrot.slane %v1102_v39, 3 }
  0x43   : > { %3430 = vmatprep.subr.bf16.mxu1 %v3759_v49  ;;  %v3792_v49 = vld [vmem:[%s4624_s1 + $0x270] sm:$0xff]  }
  0x44   : > { %3456 = vmatpush3.bf16.msra.mxu0 %v3766_v56  ;;  %v1117_v51 = vsel %vm1114_vm4, %v1115_v46, %v1116_v47  ;;  %v3795_v56 = vld [vmem:[%s4624_s1 + $0x238] sm:$0xff]  }
  0x45   : > { %3457 = vmatprep.subr.bf16.mxu0 %v3768_v58  ;;  %v1101_v58 = vld [vmem:[%s3942_s8 + $0x58] sm:$0x3f] }
  0x46   : > { %3431 = vmatpush3.bf16.msra.mxu1 %v3761_v50  ;;  %v1120_v50 = vsel %vm1114_vm4, %v1118_v42, %v1119_v43  ;;  %v1107_v62 = vpack.c.bf16 %v1101_v58, %v3952_v11 }
  0x47   : > { %3432 = vmatprep.subr.bf16.mxu1 %v3763_v52  ;;  %1268 = vmatprep.mubr.bf16.mxu0 %v1120_v50  ;;  %v3793_v52 = vld [vmem:[%s4624_s1 + $0x230] sm:$0xff]  }
  0x48   : > { %3458 = vmatpush3.bf16.msra.mxu0 %v3770_v60  ;;  %v1376_v60 = vld [vmem:[%s3942_s8 + $0x8] sm:$0x80]  ;;  %v1122_v48 = vrot.slane %v1107_v62, 3  ;;  %v3802_v50 = vld [vmem:[%s4624_s1 + $0x2d4] sm:$0xff]   ;;  %v3806_v62 = vld [vmem:[%s4624_s1 + $0x2e4] sm:$0xff]  }
  0x49   : > { %3459 = vmatprep.subr.bf16.mxu0 %v3772_v6  ;;  %v1388_v63 = vpack.c.bf16 %v4024_v36, %v1376_v60  ;;  %v3800_v36 = vld [vmem:[%s4624_s1 + $0x290] ss:$0 sps:$4 sm:$0xff]   ;;  %v3805_v60 = vld [vmem:[%s4624_s1 + $0x29c] sm:$0xff]  }
  0x4a   : > { %3433 = vmatpush3.bf16.msra.mxu1 %v3765_v55  ;;  %v3794_v55 = vld [vmem:[%s4624_s1 + $0x278] sm:$0xff]   ;;  %v1555_v46 = vsel %vm353_vm0, %v3800_v36, 0 }
  0x4b   : > { %3434 = vmatprep.subr.bf16.mxu1 %v3767_v57  ;;  %v1092_v57 = vld [vmem:[%s3942_s8 + $0x10] sm:$0xc0]  ;;  %v1412_v7 = vshrl.u32 %v1388_v63, 16 }
  0x4c   : > { %3460 = vmatpush3.bf16.msra.mxu0 %v3774_v9  ;;  %v1420_v9 = vshrl.u32 %v1391_v0, 16 }
  0x4d   : > { %3461 = vmatprep.subr.bf16.mxu0 %v3775_v13  ;;  %v1395_v13 = vshrl.u32 %v1387_v5, 16  ;;  %v3813_v5 = vld [vmem:[%s4624_s1 + $0x320] sm:$0xff]  }
  0x4e   : > { %3435 = vmatpush3.bf16.msra.mxu1 %v3769_v59  ;;  %v1104_v59 = vpack.c.bf16 %v3949_v10, %v1092_v57  ;;  %v3803_v57 = vld [vmem:[%s4624_s1 + $0x294] sm:$0xff]  }
  0x4f   : > { %3436 = vmatprep.subr.bf16.mxu1 %v3771_v2  ;;  %v1384_v2 = vld [vmem:[%s3942_s8 + $0x48] sm:$0x7f] }
  0x50   : > { %3462 = vmatpush3.bf16.msra.mxu0 %v3777_v18  ;;  %v1121_v4 = vrot.slane %v1104_v59, 3  ;;  %v1390_v6 = vpack.c.bf16 %v1384_v2, %v4060_v54  ;;  %v1414_v54 = vrot.slane %v1412_v7, 3  ;;  %v1422_v18 = vrot.slane %v1420_v9, 3  ;;  %v3804_v59 = vld [vmem:[%s4624_s1 + $0x2dc] sm:$0xff]   ;;  %v3810_v2 = vld [vmem:[%s4624_s1 + $0x2ec] sm:$0xff]  }
  0x51   : > { %3463 = vmatprep.subr.bf16.mxu0 %v3779_v21  ;;  %v3817_v7 = vld [vmem:[%s4624_s1 + $0x328] sm:$0xff]   ;;  %v4353_v9 = vld [vmem:[%s3942_s8 + $0x38] sm:$0xff] }
  0x52   : > { %3437 = vmatpush3.bf16.msra.mxu1 %v3773_v8  ;;  %v1415_v8 = vshll.u32 %v1388_v63, 16  ;;  %v1403_v15 = vshrl.u32 %v1390_v6, 16  ;;  %v1123_v21 = vsel %vm1114_vm4, %v1121_v4, %v1122_v48  ;;  %v3808_v63 = vld [vmem:[%s4624_s1 + $0x2a4] sm:$0xff]   ;;  %v3812_v4 = vld [vmem:[%s4624_s1 + $0x2ac] sm:$0xff]  }
  0x53   : > { %3484 = vmatprep.subr.bf16.mxu1 %v3776_v17 }
  0x54   : > { %3464 = vmatpush3.bf16.msra.mxu0 %v3781_v23  ;;  %v1417_v17 = vrot.slane %v1415_v8, 4  ;;  %v1397_v23 = vrot.slane %v1395_v13, 3  ;;  %v1697_v8 = vld [vmem:[%s3942_s8 + $0x20] sm:$0xff] }
  0x55   : > { %984 = vmatmul.mubr.bf16.vlgmr.msra.gmra.mrb[12].mxu1 %v832_v20  ;;  %3465 = vmatprep.subr.bf16.mxu0 %v3783_v25  ;;  %v3798_v20 = vld [vmem:[%s4624_s1 + $0x288] sm:$0xff]   ;;  %v1706_v13 = vpack.c.bf16 %v4353_v9, %v1697_v8 }
  0x56   : > { %3485 = vmatpush3.bf16.msra.mxu1 %v3778_v19  ;;  %991 = vmatprep.mubr.bf16.mxu1 %v834_v12  ;;  %v1423_v12 = vshll.u32 %v1391_v0, 16  ;;  %v1386_v19 = vld [vmem:[%s3942_s8 + $0x58] sm:$0x7f]  ;;  %v1418_v25 = vor.u32 %v1417_v17, %v1414_v54  ;;  %v1710_v0 = vpack.c.bf16 %v4313_v61, %v4313_v61  ;;  %v4372_v54 = vld [vmem:[%s3942_s8 + $0x50] sm:$0xff] }
  0x57   : > { %3486 = vmatprep.subr.bf16.mxu1 %v3780_v22  ;;  %v1392_v31 = vpack.c.bf16 %v1386_v19, %v3952_v11  ;;  %v3823_v17 = vld [vmem:[%s4624_s1 + $0x378] sm:$0xff]   ;;  %v1968_v19 = vld [vmem:[%s3942_s8 + $0x68] sm:$0xf] }
  0x58   : > { %3466 = vmatpush3.bf16.msra.mxu0 %v3785_v27  ;;  %v1425_v22 = vrot.slane %v1423_v12, 4  ;;  %v1406_v27 = vshll.u32 %v1390_v6, 16  ;;  %v3814_v6 = vld [vmem:[%s4624_s1 + $0x2f4] sm:$0xff]   ;;  %v3818_v12 = vld [vmem:[%s4624_s1 + $0x2fc] sm:$0xff]  }
  0x59   : > { %3467 = vmatprep.subr.bf16.mxu0 %v3787_v29  ;;  %v3801_v29 = vld [vmem:[%s4624_s1 + $0x314] ss:$0 sps:$4 sm:$0xff]   ;;  %v1437_v39 = vshrl.u32 %v1392_v31, 16 }
  0x5a   : > { %3487 = vmatpush3.bf16.msra.mxu1 %v3782_v24  ;;  %v1400_v24 = vrot.slane %v1398_v14, 4  ;;  %v1408_v34 = vrot.slane %v1406_v27, 4  ;;  %v3819_v14 = vld [vmem:[%s4624_s1 + $0x370] sm:$0xff]   ;;  %v3827_v27 = vld [vmem:[%s4624_s1 + $0x380] sm:$0xff]  }
  0x5b   : > { %3488 = vmatprep.subr.bf16.mxu1 %v3784_v26  ;;  %v1405_v26 = vrot.slane %v1403_v15, 3  ;;  %v3820_v15 = vld [vmem:[%s4624_s1 + $0x2bc] sm:$0xff]  }
  0x5c   : > { %3468 = vmatpush3.bf16.msra.mxu0 %v3789_v38  ;;  %v1401_v33 = vor.u32 %v1400_v24, %v1397_v23  ;;  %v3825_v23 = vld [vmem:[%s4624_s1 + $0x338] sm:$0xff]  }
  0x5d   : > { %992 = vmatmul.mubr.bf16.gmra.mrb[16].mxu1 %v831_v16  ;;  %3696 = vmatprep.subr.msk.bf16.mxu0 %vm353_vm0, %v3791_v44  ;;  %v1377_v16 = vld [vmem:[%s3942_s8 + $0x10] sm:$0x80]  ;;  %v1409_v41 = vor.u32 %v1408_v34, %v1405_v26  ;;  %v3826_v26 = vld [vmem:[%s4624_s1 + $0x30c] sm:$0xff]  }
  0x5e   : > { %3489 = vmatpush3.bf16.msra.mxu1 %v3786_v28  ;;  %v1426_v28 = vor.u32 %v1425_v22, %v1422_v18  ;;  %v1959_v18 = vld [vmem:[%s3942_s8 + $0x20] sm:$0xf0]  ;;  %v3830_v34 = vld [vmem:[%s4624_s1 + $0x388] sm:$0xff]  }
  0x5f   : > { %3490 = vmatprep.subr.bf16.mxu1 %v3788_v30  ;;  %1269 = vmatmul.mubr.bf16.vlgmr.msra.gmra.mrb[16].mxu0 %v1117_v51  ;;  %v1389_v30 = vpack.c.bf16 %v3949_v10, %v1377_v16  ;;  %v1440_v10 = vshll.u32 %v1392_v31, 16  ;;  %v1410_v44 = vsel %vm1393_vm5, %v1401_v33, %v1409_v41  ;;  %v3821_v16 = vld [vmem:[%s4624_s1 + $0x330] sm:$0xff]   ;;  %v3824_v22 = vld [vmem:[%s4624_s1 + $0x2c4] sm:$0xff]   ;;  %v1958_v33 = vld [vmem:[%s3942_s8 + $0x18] sm:$0xf0] }
  0x60   : > { %3658 = vmatpush3.bf16.msra.mxu0 %v1234_v53  ;;  %1276 = vmatprep.mubr.bf16.mxu0 %v1119_v43  ;;  %v1427_v35 = vsel %vm1393_vm5, %v1418_v25, %v1426_v28  ;;  %v1439_v43 = vrot.slane %v1437_v39, 3  ;;  %v1960_v39 = vld [vmem:[%s3942_s8 + $0x28] sm:$0xf0] }
  0x61   : > { %3697 = vmatprep.subr.msk.bf16.mxu0 %vm353_vm0, %v3800_v36  ;;  %v1429_v37 = vshrl.u32 %v1389_v30, 16  ;;  %v1432_v38 = vshll.u32 %v1389_v30, 16  ;;  %1589 = vmatprep.mubr.bf16.mxu1 %v1427_v35  ;;  %v3815_v36 = vld [vmem:[%s4624_s1 + $0x368] sm:$0xff]   ;;  %v1696_v30 = vld [vmem:[%s3942_s8 + $0x18] sm:$0xff] }
  0x62   : > { %3491 = vmatpush3.bf16.msra.mxu1 %v3790_v45  ;;  %v1442_v45 = vrot.slane %v1440_v10, 4  ;;  %v3831_v35 = vld [vmem:[%s4624_s1 + $0x398] ss:$0 sps:$4 sm:$0xff]   ;;  %v2254_v10 = vld [vmem:[%s3942_s8 + $0x70] sm:$0x1f] }
  0x63   : > { %3492 = vmatprep.subr.bf16.mxu1 %v3792_v49  ;;  %v1431_v42 = vrot.slane %v1429_v37, 3  ;;  %v1434_v11 = vrot.slane %v1432_v38, 4  ;;  %v4415_v37 = vld [vmem:[%s3942_s8 + $0x30] sm:$0xff]  ;;  %v1967_v38 = vld [vmem:[%s3942_s8 + $0x60] sm:$0xf] }
  0x64   : > { %v1443_v51 = vor.u32 %v1442_v45, %v1439_v43  ;;  %v1970_v43 = vpack.c.bf16 %v4415_v37, %v1958_v33  ;;  %v1969_v45 = vld [vmem:[%s3942_s8 + $0x70] sm:$0xf] }
  0x65   : > { %v1435_v49 = vor.u32 %v1434_v11, %v1431_v42  ;;  %v3869_v42 = vld [vmem:[%s3942_s8 + $0x30] sm:$0xff] }
  0x66   : > { %3493 = vmatpush3.bf16.msra.mxu1 %v3793_v52  ;;  %v3807_v52 = vld [vmem:[%s4624_s1 + $0x358] sm:$0xff]   ;;  %v1705_v11 = vpack.c.bf16 %v3869_v42, %v1696_v30 }
  0x67   : > { %3494 = vmatprep.subr.bf16.mxu1 %v3794_v55  ;;  %1277 = vmatmul.mubr.bf16.gmra.mrb[20].mxu0 %v1116_v47  ;;  %v1817_v47 = vsel %vm353_vm0, %v3801_v29, 0  ;;  %v1444_v53 = vsel %vm1393_vm5, %v1435_v49, %v1443_v51  ;;  %v1698_v55 = vld [vmem:[%s3942_s8 + $0x28] sm:$0xff]  ;;  %v2102_v49 = vsel %vm353_vm0, %v3831_v35, 0  ;;  %v2243_v42 = vld [vmem:[%s3942_s8 + $0x18] sm:$0xe0] }
  0x68   : > { %3659 = vmatprep.mubr.msk.bf16.mxu0 %vm346_vm1, %v1123_v21  ;;  %v1974_v21 = vpack.c.bf16 %v1968_v19, %v4372_v54  ;;  %v3839_v19 = vld [vmem:[%s4624_s1 + $0x3a4] sm:$0xff]  }
  0x6a   : > { %3495 = vmatpush3.bf16.msra.mxu1 %v3795_v56  ;;  %v4298_v56 = vld [vmem:[%s3942_s8 + $0x40] sm:$0xff]  ;;  %v4387_v25 = vrot.slane %v1974_v21, 2 }
  0x6b   : > { %3496 = vmatprep.subr.bf16.mxu1 %v3796_v3  ;;  %v1707_v58 = vpack.c.bf16 %v4298_v56, %v1698_v55  ;;  %v3811_v3 = vld [vmem:[%s4624_s1 + $0x360] sm:$0xff]   ;;  %v1972_v55 = vpack.c.bf16 %v4298_v56, %v1960_v39 }
  0x6c   : > { %v2244_v21 = vld [vmem:[%s3942_s8 + $0x20] sm:$0xe0] }
  0x6e   : > { %3497 = vmatpush3.bf16.msra.mxu1 %v3797_v40  ;;  %v3822_v40 = vld [vmem:[%s4624_s1 + $0x304] sm:$0xff]  }
  0x6f   : > { %3498 = vmatprep.subr.bf16.mxu1 %v3798_v20  ;;  %3660 = vmatmul.mubr.msk.bf16.vlgmr.msra.gmra.mrb[24].mxu0 %vm346_vm1, %v1122_v48  ;;  %v3816_v48 = vld [vmem:[%s4624_s1 + $0x2b4] sm:$0xff]   ;;  %v1971_v20 = vpack.c.bf16 %v4353_v9, %v1959_v18 }
  0x70   : > { %3664 = vmatpush3.bf16.msra.mxu0 %v1555_v46  ;;  %3665 = vmatprep.mubr.msk.bf16.mxu0 %vm346_vm1, %v1444_v53  ;;  %v3834_v53 = vld [vmem:[%s4624_s1 + $0x350] sm:$0xff]  }
  0x71   : > { %3515 = vmatprep.subr.bf16.mxu0 %v3802_v50  ;;  %v1986_v24 = vrot.slane %v1971_v20, 2  ;;  %v3833_v50 = vld [vmem:[%s4624_s1 + $0x390] sm:$0xff]  }
  0x72   : > { %3499 = vmatpush3.bf16.msra.mxu1 %v3799_v32  ;;  %v4405_v32 = vld [vmem:[%s3942_s8 + $0x48] sm:$0xff] }
  0x73   : > { %3698 = vmatprep.subr.msk.bf16.mxu1 %vm353_vm0, %v3801_v29  ;;  %v3829_v29 = vld [vmem:[%s4624_s1 + $0x340] sm:$0xff]   ;;  %v1988_v31 = vsel %vm1982_vm6, %v1986_v24, %v4387_v25  ;;  %v3840_v20 = vld [vmem:[%s4624_s1 + $0x3ec] sm:$0xff]   ;;  %v2256_v24 = vpack.c.bf16 %v4353_v9, %v2244_v21 }
  0x75   : > { %1590 = vmatmul.mubr.bf16.vlgmr.msra.gmra.mrb[20].mxu1 %v1410_v44  ;;  %v1973_v44 = vpack.c.bf16 %v1967_v38, %v4405_v32  ;;  %v2283_v30 = vshll.u32 %v2256_v24, 16 }
  0x76   : > { %3670 = vmatpush3.bf16.msra.mxu1 %v1817_v47  ;;  %1597 = vmatprep.mubr.bf16.mxu1 %v1426_v28  ;;  %v3828_v28 = vld [vmem:[%s4624_s1 + $0x2cc] sm:$0xff]  }
  0x77   : > { %3546 = vmatprep.subr.bf16.mxu1 %v3807_v52  ;;  %3666 = vmatmul.mubr.msk.bf16.vlgmr.msra.gmra.mrb[28].mxu0 %vm346_vm1, %v1443_v51  ;;  %v3832_v47 = vld [vmem:[%s4624_s1 + $0x348] sm:$0xff]   ;;  %v1709_v51 = vpack.c.bf16 %v4372_v54, %v4372_v54  ;;  %v2260_v52 = vpack.c.bf16 %v2254_v10, %v4313_v61  ;;  %v2285_v39 = vrot.slane %v2283_v30, 3  ;;  %v3866_v30 = vld [vmem:[%s4624_s1 + $0x450] sm:$0xff]  }
  0x78   : > { %3516 = vmatpush3.bf16.msra.mxu0 %v3803_v57  ;;  %1851 = vmatprep.mubr.bf16.mxu0 %v1706_v13  ;;  %v1975_v57 = vpack.c.bf16 %v1969_v45, %v4313_v61 }
  0x79   : > { %3517 = vmatprep.subr.bf16.mxu0 %v3804_v59  ;;  %v1983_v59 = vrot.slane %v1970_v43, 2  ;;  %v3848_v43 = vld [vmem:[%s4624_s1 + $0x3fc] sm:$0xff]  }
  0x7c   : > { %3518 = vmatpush3.bf16.msra.mxu0 %v3805_v60  ;;  %v1984_v60 = vrot.slane %v1973_v44, 2  ;;  %v3849_v44 = vld [vmem:[%s4624_s1 + $0x470] sm:$0xff]  }
  0x7d   : > { %1598 = vmatmul.mubr.bf16.gmra.mrb[24].mxu1 %v1409_v41  ;;  %3519 = vmatprep.subr.bf16.mxu0 %v3806_v62  ;;  %v2245_v41 = vld [vmem:[%s3942_s8 + $0x28] sm:$0xe0]  ;;  %v3835_v62 = vld [vmem:[%s4624_s1 + $0x41c] ss:$0 sps:$4 sm:$0xff]  }
  0x7e   : > { %3671 = vmatprep.mubr.msk.bf16.mxu1 %vm346_vm1, %v1707_v58  ;;  %v2257_v46 = vpack.c.bf16 %v4298_v56, %v2245_v41  ;;  %v3836_v58 = vld [vmem:[%s4624_s1 + $0x3dc] sm:$0xff]  }
  0x80   : > { %3520 = vmatpush3.bf16.msra.mxu0 %v3808_v63  ;;  %v2297_v63 = vshrl.u32 %v2257_v46, 16 }
  0x81   : > { %3521 = vmatprep.subr.bf16.mxu0 %v3810_v2  ;;  %v2308_v2 = vshll.u32 %v2260_v52, 16 }
  0x83   : > { %v2310_v13 = vrot.slane %v2308_v2, 3  ;;  %v3854_v2 = vld [vmem:[%s4624_s1 + $0x3c4] sm:$0xff]  }
  0x84   : > { %3522 = vmatpush3.bf16.msra.mxu0 %v3812_v4  ;;  %v1990_v4 = vrot.slane %v1975_v57, 2 }
  0x85   : > { %3672 = vmatmul.mubr.msk.bf16.vlgmr.msra.gmra.mrb[28].mxu1 %vm346_vm1, %v1710_v0  ;;  %3523 = vmatprep.subr.bf16.mxu0 %v3814_v6  ;;  %v2300_v0 = vshll.u32 %v2257_v46, 16  ;;  %v2423_v6 = vsel %vm353_vm0, %v3835_v62, 0 }
  0x86   : > { %3547 = vmatpush3.bf16.msra.mxu1 %v3809_v1  ;;  %2136 = vmatprep.mubr.bf16.mxu1 %v1988_v31  ;;  %v2305_v1 = vshrl.u32 %v2260_v52, 16  ;;  %v3850_v52 = vld [vmem:[%s4624_s1 + $0x3bc] sm:$0xff]  }
  0x87   : > { %3548 = vmatprep.subr.bf16.mxu1 %v3811_v3  ;;  %v1989_v3 = vrot.slane %v1972_v55, 2  ;;  %v2302_v8 = vrot.slane %v2300_v0, 3 }
  0x88   : > { %3524 = vmatpush3.bf16.msra.mxu0 %v3816_v48  ;;  %v1985_v48 = vsel %vm1982_vm6, %v1983_v59, %v1984_v60  ;;  %v3852_v59 = vld [vmem:[%s4624_s1 + $0x404] sm:$0xff]  }
  0x89   : > { %3525 = vmatprep.subr.bf16.mxu0 %v3818_v12  ;;  %v2307_v12 = vrot.slane %v2305_v1, 2  ;;  %v2832_v1 = vld [vmem:[%s4626_s3 + $0x10] sm:$0xff] }
  0x8a   : > { %3549 = vmatpush3.bf16.msra.mxu1 %v3813_v5  ;;  %v1708_v5 = vpack.c.bf16 %v4405_v32, %v4405_v32 }
  0x8b   : > { %3550 = vmatprep.subr.bf16.mxu1 %v3815_v36  ;;  %v3841_v36 = vld [vmem:[%s4624_s1 + $0x460] sm:$0xff]  }
  0x8c   : > { %3526 = vmatpush3.bf16.msra.mxu0 %v3820_v15 }
  0x8d   : > { %3527 = vmatprep.subr.bf16.mxu0 %v3822_v40  ;;  %v3837_v40 = vld [vmem:[%s4624_s1 + $0x39c] sm:$0xff]  }
  0x8e   : > { %3551 = vmatpush3.bf16.msra.mxu1 %v3817_v7  ;;  %v2299_v7 = vrot.slane %v2297_v63, 2 }
  0x8f   : > { %3552 = vmatprep.subr.bf16.mxu1 %v3819_v14  ;;  %v1991_v14 = vsel %vm1982_vm6, %v1989_v3, %v1990_v4  ;;  %v3855_v3 = vld [vmem:[%s4624_s1 + $0x438] sm:$0xff]  }
  0x90   : > { %3528 = vmatpush3.bf16.msra.mxu0 %v3824_v22  ;;  %v2303_v15 = vor.u32 %v2302_v8, %v2299_v7  ;;  %v3842_v22 = vld [vmem:[%s4624_s1 + $0x3ac] sm:$0xff]   ;;  %v3857_v8 = vld [vmem:[%s4624_s1 + $0x480] sm:$0xff]  }
  0x91   : > { %3529 = vmatprep.subr.bf16.mxu0 %v3826_v26  ;;  %v3856_v7 = vld [vmem:[%s4624_s1 + $0x40c] sm:$0xff]  }
  0x92   : > { %3553 = vmatpush3.bf16.msra.mxu1 %v3821_v16  ;;  %v2311_v16 = vor.u32 %v2310_v13, %v2307_v12  ;;  %v3858_v12 = vld [vmem:[%s4624_s1 + $0x3cc] sm:$0xff]   ;;  %v3859_v13 = vld [vmem:[%s4624_s1 + $0x440] sm:$0xff]  }
  0x93   : > { %3554 = vmatprep.subr.bf16.mxu1 %v3823_v17  ;;  %v3838_v17 = vld [vmem:[%s4624_s1 + $0x3e4] sm:$0xff]  }
  0x94   : > { %3530 = vmatpush3.bf16.msra.mxu0 %v3828_v28  ;;  %v2312_v18 = vsel %vm2261_vm7, %v2303_v15, %v2311_v16  ;;  %v3845_v28 = vld [vmem:[%s4624_s1 + $0x468] sm:$0xff]  }
  0x95   : > { %3699 = vmatprep.subr.msk.bf16.mxu0 %vm353_vm0, %v3831_v35  ;;  %v3847_v35 = vld [vmem:[%s4624_s1 + $0x428] sm:$0xff]  }
  0x96   : > { %3555 = vmatpush3.bf16.msra.mxu1 %v3825_v23  ;;  %v2253_v23 = vld [vmem:[%s3942_s8 + $0x68] sm:$0x1f] }
  0x97   : > { %3556 = vmatprep.subr.bf16.mxu1 %v3827_v27  ;;  %1852 = vmatmul.mubr.bf16.vlgmr.msra.gmra.mrb[32].mxu0 %v1705_v11  ;;  %v2259_v26 = vpack.c.bf16 %v2253_v23, %v4372_v54  ;;  %v3844_v27 = vld [vmem:[%s4624_s1 + $0x3f4] sm:$0xff]   ;;  %v2252_v11 = vld [vmem:[%s3942_s8 + $0x60] sm:$0x1f] }
  0x98   : > { %3676 = vmatpush3.bf16.msra.mxu0 %v2102_v49  ;;  %1859 = vmatprep.mubr.bf16.mxu0 %v1709_v51  ;;  %v2258_v49 = vpack.c.bf16 %v2252_v11, %v4405_v32  ;;  %v2574_v51 = vld [vmem:[%s3942_s8 + $0x68] sm:$0x3f]  ;;  %v3864_v23 = vld [vmem:[%s4624_s1 + $0x490] sm:$0xff]  }
  0x99   : > { %3577 = vmatprep.subr.bf16.mxu0 %v3836_v58  ;;  %v2288_v31 = vshrl.u32 %v2259_v26, 16  ;;  %v2291_v33 = vshll.u32 %v2259_v26, 16  ;;  %v2580_v58 = vpack.c.bf16 %v2574_v51, %v4372_v54  ;;  %v2573_v26 = vld [vmem:[%s3942_s8 + $0x60] sm:$0x3f] }
  0x9a   : > { %3557 = vmatpush3.bf16.msra.mxu1 %v3829_v29  ;;  %v2280_v29 = vshrl.u32 %v2256_v24, 16  ;;  %v3865_v24 = vld [vmem:[%s4624_s1 + $0x4a0] ss:$0 sps:$4 sm:$0xff]  }
  0x9b   : > { %3558 = vmatprep.subr.bf16.mxu1 %v3830_v34  ;;  %v3846_v34 = vld [vmem:[%s4624_s1 + $0x3b4] sm:$0xff]   ;;  %v2290_v41 = vrot.slane %v2288_v31, 2  ;;  %v2293_v10 = vrot.slane %v2291_v33, 3  ;;  %v4530_v0 = vrot.slane %v2580_v58, 3  ;;  %v2579_v33 = vpack.c.bf16 %v2573_v26, %v4405_v32 }
  0x9c   : > { %v2282_v38 = vrot.slane %v2280_v29, 2  ;;  %v3868_v32 = vld [vmem:[%s4624_s1 + $0x458] sm:$0xff]  }
  0x9d   : > { %v4505_v46 = vor.u32 %v2293_v10, %v2290_v41  ;;  %v2589_v41 = vrot.slane %v2579_v33, 3 }
  0x9e   : > { %3559 = vmatpush3.bf16.msra.mxu1 %v3832_v47  ;;  %v2286_v45 = vor.u32 %v2285_v39, %v2282_v38  ;;  %v2255_v47 = vpack.c.bf16 %v4415_v37, %v2243_v42 }
  0x9f   : > { %3560 = vmatprep.subr.bf16.mxu1 %v3833_v50  ;;  %1860 = vmatmul.mubr.bf16.gmra.mrb[36].mxu0 %v1708_v5  ;;  %v2565_v50 = vld [vmem:[%s3942_s8 + $0x20] sm:$0xc0]  ;;  %v2271_v5 = vshrl.u32 %v2258_v49, 16 }
  0xa0   : > { %3677 = vmatprep.mubr.msk.bf16.mxu0 %vm346_vm1, %v1991_v14  ;;  %v2295_v55 = vsel %vm2261_vm7, %v2286_v45, %v4505_v46  ;;  %v2577_v57 = vpack.c.bf16 %v4353_v9, %v2565_v50  ;;  %v3878_v9 = vmov 0   ;;  %v2263_v54 = vshrl.u32 %v2255_v47, 16 }
  0xa1   : > { %3714 = vset.pattern.permute.xlu0 %v3878_v9  ;;  %3715 = vset.pattern.permute.xlu1 %v3878_v9 }
  0xa2   : > { %3561 = vmatpush3.bf16.msra.mxu1 %v3834_v53  ;;  %v3851_v53 = vld [vmem:[%s4624_s1 + $0x430] sm:$0xff]   ;;  %v2591_v63 = vrot.slane %v2577_v57, 3  ;;  %2845 = vperm.xlu1 %3715, %v2832_v1   ;;  %v2265_v14 = vrot.slane %v2263_v54, 2 }
  0xa3   : > { %3700 = vmatprep.subr.msk.bf16.mxu1 %vm353_vm0, %v3835_v62  ;;  %v2830_v62 = vld [vmem:[%s4626_s3] sm:$0xff] }
  0xa4   : > { %2835 = vperm.xlu0 %3714, %v2830_v62  }
  0xa5   : > { %2137 = vmatmul.mubr.bf16.vlgmr.msra.gmra.mrb[32].mxu1 %v1985_v48  ;;  %v2831_v48 = vld [vmem:[%s4626_s3 + $0x8] sm:$0xff] }
  0xa6   : > { %3682 = vmatpush3.bf16.msra.mxu1 %v2423_v6  ;;  %2144 = vmatprep.mubr.bf16.mxu1 %v4387_v25  ;;  %v3843_v25 = vld [vmem:[%s4624_s1 + $0x420] sm:$0xff]   ;;  %v2274_v6 = vshll.u32 %v2258_v49, 16 }
  0xa7   : > { %3608 = vmatprep.subr.bf16.mxu1 %v3841_v36  ;;  %3678 = vmatmul.mubr.msk.bf16.vlgmr.msra.gmra.mrb[40].mxu0 %vm346_vm1, %v1990_v4  ;;  %v2266_v4 = vshll.u32 %v2255_v47, 16  ;;  %v2593_v36 = vsel %vm1114_vm4, %v2591_v63, %v4530_v0 }
  0xa8   : > { %3578 = vmatpush3.bf16.msra.mxu0 %v3837_v40  ;;  %2457 = vmatprep.mubr.bf16.mxu0 %v2295_v55  ;;  %v2276_v40 = vrot.slane %v2274_v6, 3 }
  0xa9   : > { %3579 = vmatprep.subr.bf16.mxu0 %v3838_v17  ;;  %2840 = vperm.xlu0 %3714, %v2831_v48   ;;  %v2268_v15 = vrot.slane %v2266_v4, 3  ;;  %v3860_v17 = vld [vmem:[%s4624_s1 + $0x414] sm:$0xff]  }
  0xab   : > { %v2269_v21 = vor.u32 %v2268_v15, %v2265_v14 }
  0xac   : > { %3580 = vmatpush3.bf16.msra.mxu0 %v3839_v19  ;;  %v3862_v19 = vld [vmem:[%s4624_s1 + $0x3d4] sm:$0xff]  }
  0xad   : > { %2145 = vmatmul.mubr.bf16.gmra.mrb[36].mxu1 %v1984_v60  ;;  %3581 = vmatprep.subr.bf16.mxu0 %v3840_v20  ;;  %v3853_v60 = vld [vmem:[%s4624_s1 + $0x478] sm:$0xff]   ;;  %v3863_v20 = vld [vmem:[%s4624_s1 + $0x448] sm:$0xff]  }
  0xae   : > { %3683 = vmatprep.mubr.msk.bf16.mxu1 %vm346_vm1, %v2312_v18  ;;  %v3861_v18 = vld [vmem:[%s4624_s1 + $0x488] sm:$0xff]  }
  0xb0   : > { %3582 = vmatpush3.bf16.msra.mxu0 %v3842_v22 }
  0xb1   : > { %3583 = vmatprep.subr.bf16.mxu0 %v3844_v27  ;;  %v2566_v27 = vld [vmem:[%s3942_s8 + $0x28] sm:$0xc0] }
  0xb2   : > { %v2578_v38 = vpack.c.bf16 %v4298_v56, %v2566_v27 }
  0xb4   : > { %3584 = vmatpush3.bf16.msra.mxu0 %v3846_v34  ;;  %v2707_v34 = vsel %vm353_vm0, %v3865_v24, 0  ;;  %v2594_v10 = vrot.slane %v2578_v38, 3 }
  0xb5   : > { %3684 = vmatmul.mubr.msk.bf16.vlgmr.msra.gmra.mrb[40].mxu1 %vm346_vm1, %v2311_v16  ;;  %3585 = vmatprep.subr.bf16.mxu0 %v3848_v43  ;;  %v2273_v16 = vrot.slane %v2271_v5, 2 }
  0xb6   : > { %3609 = vmatpush3.bf16.msra.mxu1 %v3843_v25  ;;  %2741 = vmatprep.mubr.bf16.mxu1 %v2593_v36  ;;  %v2564_v25 = vld [vmem:[%s3942_s8 + $0x18] sm:$0xc0] }
  0xb7   : > { %3610 = vmatprep.subr.bf16.mxu1 %v3845_v28  ;;  %v2277_v22 = vor.u32 %v2276_v40, %v2273_v16  ;;  %v2575_v28 = vld [vmem:[%s3942_s8 + $0x70] sm:$0x3f]  ;;  %v2576_v31 = vpack.c.bf16 %v4415_v37, %v2564_v25 }
  0xb8   : > { %3586 = vmatpush3.bf16.msra.mxu0 %v3850_v52  ;;  %v2581_v39 = vpack.c.bf16 %v2575_v28, %v4313_v61 }
  0xb9   : > { %3587 = vmatprep.subr.bf16.mxu0 %v3852_v59  ;;  %v2278_v29 = vsel %vm2261_vm7, %v2269_v21, %v2277_v22  ;;  %v2588_v37 = vrot.slane %v2576_v31, 3 }
  0xba   : > { %3611 = vmatpush3.bf16.msra.mxu1 %v3847_v35  ;;  %v3867_v35 = vld [vmem:[%s4624_s1 + $0x498] sm:$0xff]   ;;  %v2595_v42 = vrot.slane %v2581_v39, 3 }
  0xbb   : > { %3612 = vmatprep.subr.bf16.mxu1 %v3849_v44  ;;  %v2590_v11 = vsel %vm1114_vm4, %v2588_v37, %v2589_v41 }
  0xbc   : > { %3588 = vmatpush3.bf16.msra.mxu0 %v3854_v2  ;;  %v2596_v56 = vsel %vm1114_vm4, %v2594_v10, %v2595_v42 }
  0xbd   : > { %3589 = vmatprep.subr.bf16.mxu0 %v3856_v7 }
  0xbe   : > { %3613 = vmatpush3.bf16.msra.mxu1 %v3851_v53 }
  0xbf   : > { %3614 = vmatprep.subr.bf16.mxu1 %v3853_v60 }
  0xc0   : > { %3590 = vmatpush3.bf16.msra.mxu0 %v3858_v12 }
  0xc1   : > { %3591 = vmatprep.subr.bf16.mxu0 %v3860_v17 }
  0xc2   : > { %3615 = vmatpush3.bf16.msra.mxu1 %v3855_v3 }
  0xc3   : > { %3616 = vmatprep.subr.bf16.mxu1 %v3857_v8 }
  0xc4   : > { %3592 = vmatpush3.bf16.msra.mxu0 %v3862_v19 }
  0xc5   : > { %3701 = vmatprep.subr.msk.bf16.mxu0 %vm353_vm0, %v3865_v24 }
  0xc6   : > { %3617 = vmatpush3.bf16.msra.mxu1 %v3859_v13 }
  0xc7   : > { %3618 = vmatprep.subr.bf16.mxu1 %v3861_v18  ;;  %2458 = vmatmul.mubr.bf16.vlgmr.msra.gmra.mrb[44].mxu0 %v2278_v29 }
  0xc8   : > { %3688 = vmatpush3.bf16.msra.mxu0 %v2707_v34  ;;  %2465 = vmatprep.mubr.bf16.mxu0 %v4505_v46 }
  0xca   : > { %3619 = vmatpush3.bf16.msra.mxu1 %v3863_v20 }
  0xcb   : > { %3620 = vmatprep.subr.bf16.mxu1 %v3864_v23 }
  0xce   : > { %3621 = vmatpush3.bf16.msra.mxu1 %v3866_v30 }
  0xcf   : > { %3622 = vmatprep.subr.bf16.mxu1 %v3867_v35  ;;  %2466 = vmatmul.mubr.bf16.gmra.mrb[48].mxu0 %v2277_v22 }
  0xd0   : > { %3689 = vmatprep.mubr.msk.bf16.mxu0 %vm346_vm1, %v2596_v56 }
  0xd2   : > { %3623 = vmatpush3.bf16.msra.mxu1 %v3868_v32 }
  0xd5   : > { %2742 = vmatmul.mubr.bf16.vlgmr.msra.gmra.mrb[44].mxu1 %v2590_v11  ;;  %v3879_v11 = vmov 0.0  }
  0xd6   : > { %2749 = vmatprep.mubr.bf16.mxu1 %v4530_v0  ;;  %2851 = vst [vmem:[%s4606_s10] sm:$0xff] %v3879_v11  ;;  %2852 = vst [vmem:[%s4606_s10 + $0x8] sm:$0xff] %v3879_v11 }
  0xd7   : > { %3690 = vmatmul.mubr.msk.bf16.vlgmr.msra.gmra.mrb[52].mxu0 %vm346_vm1, %v2595_v42  ;;  %2855 = vst [vmem:[%s4606_s10 + $0x20] sm:$0xff] %v3879_v11  ;;  %2856 = vst [vmem:[%s4606_s10 + $0x28] sm:$0x3] %v3879_v11 }
  0xd8   : > { %2853 = vst [vmem:[%s4606_s10 + $0x10] sm:$0xff] %v3879_v11  ;;  %2854 = vst [vmem:[%s4606_s10 + $0x18] sm:$0xff] %v3879_v11 }
  0xdd   : > { %2750 = vmatmul.mubr.bf16.gmra.mrb[48].mxu1 %v2589_v41 }
  0xe8   : > { %v3643_v61 = vpop.f32.mrb[0].mxu1 }
  0xe9   : > { %v439_v43 = vpop.f32.mrb[1].mxu1 }
  0xea   : > { %v3644_v44 = vpop.f32.mrb[2].mxu1 }
  0xeb   : > { %v442_v45 = vpop.f32.mrb[3].mxu1 }
  0xf9   : > { %v3376_v46 = vpop.f32.mrb[0].mxu0 }
  0xfa   : > { %v3377_v47 = vpop.f32.mrb[1].mxu0 }
  0xfb   : > { %v3378_v49 = vadd.f32 %v3377_v47, %v3376_v46  ;;  %v3379_v50 = vpop.f32.mrb[2].mxu0 }
  0xfc   : > { %v3380_v51 = vpop.f32.mrb[3].mxu0 }
  0xfd   : > { %v440_v52 = vadd.f32 %v3378_v49, %v439_v43  ;;  %v3381_v53 = vadd.f32 %v3380_v51, %v3379_v50 }
  0xff   : > { %v443_v55 = vadd.f32 %v3381_v53, %v442_v45 }
 0x101   : > { %v3382_v57 = vpop.f32.mrb[4].mxu0 }
 0x102   : > { %v3383_v58 = vpop.f32.mrb[5].mxu0 }
 0x103   : > { %v3384_v59 = vadd.f32 %v3383_v58, %v3382_v57  ;;  %v3385_v60 = vpop.f32.mrb[6].mxu0 }
 0x104   : > { %v3386_v62 = vpop.f32.mrb[7].mxu0 }
 0x105   : > { %v448_v0 = vadd.f32 %v3643_v61, %v3384_v59 }
 0x108   : > { %v3407_v63 = vpop.f32.mrb[4].mxu1 }
 0x109   : > { %v3408_v9 = vpop.f32.mrb[5].mxu1 }
 0x10a   : > { %v3409_v54 = vadd.f32 %v3408_v9, %v3407_v63  ;;  %v3410_v1 = vpop.f32.mrb[6].mxu1  ;;  %v3649_v5 = vpop.f32.mrb[8].mxu0 }
 0x10b   : > { %v3411_v2 = vpop.f32.mrb[7].mxu1  ;;  %v748_v36 = vpop.f32.mrb[9].mxu0 }
 0x10c   : > { %v3412_v3 = vadd.f32 %v3411_v2, %v3410_v1  ;;  %v749_v7 = vadd.f32 %v3409_v54, %v748_v36  ;;  %v3650_v8 = vpop.f32.mrb[10].mxu0 }
 0x10d   : > { %v751_v13 = vpop.f32.mrb[11].mxu0 }
 0x10e   : > { %v765_v16 = vadd.f32 %v749_v7, %v440_v52  ;;  %v752_v40 = vadd.f32 %v3412_v3, %v751_v13 }
 0x110   : > { %v3413_v4 = vpop.f32.mrb[8].mxu1  ;;  %v766_v18 = vadd.f32 %v752_v40, %v443_v55 }
 0x111   : > { %v3414_v6 = vpop.f32.mrb[9].mxu1 }
 0x112   : > { %v3415_v48 = vadd.f32 %v3414_v6, %v3413_v4  ;;  %v3416_v12 = vpop.f32.mrb[10].mxu1  ;;  %v3655_v19 = vpop.f32.mrb[12].mxu0 }
 0x113   : > { %v3417_v14 = vpop.f32.mrb[11].mxu1  ;;  %v1033_v20 = vpop.f32.mrb[13].mxu0 }
 0x114   : > { %v757_v15 = vadd.f32 %v3649_v5, %v3415_v48  ;;  %v3656_v21 = vpop.f32.mrb[14].mxu0 }
 0x115   : > { %v1036_v22 = vpop.f32.mrb[15].mxu0 }
 0x116   : > { %v767_v17 = vadd.f32 %v757_v15, %v448_v0 }
 0x128   : > { %v3438_v23 = vpop.f32.mrb[12].mxu1 }
 0x129   : > { %v3439_v24 = vpop.f32.mrb[13].mxu1 }
 0x12a   : > { %v3440_v25 = vadd.f32 %v3439_v24, %v3438_v23  ;;  %v3441_v26 = vpop.f32.mrb[14].mxu1 }
 0x12b   : > { %v3442_v27 = vpop.f32.mrb[15].mxu1 }
 0x12c   : > { %v1034_v28 = vadd.f32 %v3440_v25, %v1033_v20  ;;  %v3443_v29 = vadd.f32 %v3442_v27, %v3441_v26 }
 0x12e   : > { %v1037_v30 = vadd.f32 %v3443_v29, %v1036_v22  ;;  %v1050_v31 = vadd.f32 %v1034_v28, %v765_v16 }
 0x130   : > { %v3444_v33 = vpop.f32.mrb[16].mxu1  ;;  %v1051_v34 = vadd.f32 %v1037_v30, %v766_v18 }
 0x131   : > { %v3445_v35 = vpop.f32.mrb[17].mxu1 }
 0x132   : > { %v3446_v38 = vadd.f32 %v3445_v35, %v3444_v33  ;;  %v3447_v39 = vpop.f32.mrb[18].mxu1  ;;  %v3469_v10 = vpop.f32.mrb[16].mxu0 }
 0x133   : > { %v3448_v32 = vpop.f32.mrb[19].mxu1  ;;  %v3470_v42 = vpop.f32.mrb[17].mxu0 }
 0x134   : > { %v1042_v37 = vadd.f32 %v3655_v19, %v3446_v38  ;;  %v3471_v56 = vadd.f32 %v3470_v42, %v3469_v10  ;;  %v3472_v61 = vpop.f32.mrb[18].mxu0 }
 0x135   : > { %v3473_v43 = vpop.f32.mrb[19].mxu0 }
 0x136   : > { %v1052_v41 = vadd.f32 %v1042_v37, %v767_v17  ;;  %v3474_v44 = vadd.f32 %v3473_v43, %v3472_v61 }
 0x13a   : > { %v3475_v45 = vpop.f32.mrb[20].mxu0 }
 0x13b   : > { %v3476_v46 = vpop.f32.mrb[21].mxu0 }
 0x13c   : > { %v3477_v47 = vadd.f32 %v3476_v46, %v3475_v45  ;;  %v3478_v49 = vpop.f32.mrb[22].mxu0 }
 0x13d   : > { %v3479_v50 = vpop.f32.mrb[23].mxu0 }
 0x142   : > { %v3661_v51 = vpop.f32.mrb[24].mxu0 }
 0x143   : > { %v1327_v53 = vadd.f32 %v3661_v51, %v3477_v47  ;;  %v1318_v55 = vpop.f32.mrb[25].mxu0 }
 0x144   : > { %v1319_v58 = vadd.f32 %v3471_v56, %v1318_v55  ;;  %v3662_v60 = vpop.f32.mrb[26].mxu0 }
 0x145   : > { %v1337_v63 = vadd.f32 %v1327_v53, %v1052_v41  ;;  %v1321_v0 = vpop.f32.mrb[27].mxu0 }
 0x146   : > { %v1335_v54 = vadd.f32 %v1319_v58, %v1050_v31  ;;  %v1322_v1 = vadd.f32 %v3474_v44, %v1321_v0 }
 0x148   : > { %v3500_v52 = vpop.f32.mrb[20].mxu1  ;;  %v1336_v3 = vadd.f32 %v1322_v1, %v1051_v34 }
 0x149   : > { %v3501_v57 = vpop.f32.mrb[21].mxu1 }
 0x14a   : > { %v3502_v59 = vadd.f32 %v3501_v57, %v3500_v52  ;;  %v3503_v62 = vpop.f32.mrb[22].mxu1  ;;  %v3667_v5 = vpop.f32.mrb[28].mxu0 }
 0x14b   : > { %v3504_v9 = vpop.f32.mrb[23].mxu1  ;;  %v1639_v36 = vpop.f32.mrb[29].mxu0 }
 0x14c   : > { %v3505_v2 = vadd.f32 %v3504_v9, %v3503_v62  ;;  %v1640_v7 = vadd.f32 %v3502_v59, %v1639_v36  ;;  %v3668_v12 = vpop.f32.mrb[30].mxu0 }
 0x14d   : > { %v1642_v14 = vpop.f32.mrb[31].mxu0 }
 0x14e   : > { %v1656_v16 = vadd.f32 %v1640_v7, %v1335_v54  ;;  %v1643_v40 = vadd.f32 %v3505_v2, %v1642_v14 }
 0x150   : > { %v3506_v4 = vpop.f32.mrb[24].mxu1  ;;  %v1657_v18 = vadd.f32 %v1643_v40, %v1336_v3 }
 0x151   : > { %v3507_v6 = vpop.f32.mrb[25].mxu1 }
 0x152   : > { %v3508_v48 = vadd.f32 %v3507_v6, %v3506_v4  ;;  %v3509_v8 = vpop.f32.mrb[26].mxu1 }
 0x153   : > { %v3510_v13 = vpop.f32.mrb[27].mxu1 }
 0x154   : > { %v1648_v15 = vadd.f32 %v3667_v5, %v3508_v48 }
 0x156   : > { %v1658_v17 = vadd.f32 %v1648_v15, %v1337_v63 }
 0x158   : > { %v3673_v19 = vpop.f32.mrb[28].mxu1 }
 0x159   : > { %v1901_v20 = vpop.f32.mrb[29].mxu1 }
 0x15a   : > { %v3674_v21 = vpop.f32.mrb[30].mxu1 }
 0x15b   : > { %v1904_v22 = vpop.f32.mrb[31].mxu1 }
 0x16a   : > { %v3531_v23 = vpop.f32.mrb[32].mxu0 }
 0x16b   : > { %v3532_v24 = vpop.f32.mrb[33].mxu0 }
 0x16c   : > { %v3533_v25 = vadd.f32 %v3532_v24, %v3531_v23  ;;  %v3534_v26 = vpop.f32.mrb[34].mxu0 }
 0x16d   : > { %v3535_v27 = vpop.f32.mrb[35].mxu0 }
 0x16e   : > { %v1902_v28 = vadd.f32 %v3533_v25, %v1901_v20  ;;  %v3536_v29 = vadd.f32 %v3535_v27, %v3534_v26 }
 0x170   : > { %v1905_v30 = vadd.f32 %v3536_v29, %v1904_v22  ;;  %v1918_v31 = vadd.f32 %v1902_v28, %v1656_v16 }
 0x172   : > { %v3537_v33 = vpop.f32.mrb[36].mxu0  ;;  %v1919_v35 = vadd.f32 %v1905_v30, %v1657_v18 }
 0x173   : > { %v3538_v38 = vpop.f32.mrb[37].mxu0 }
 0x174   : > { %v3539_v32 = vadd.f32 %v3538_v38, %v3537_v33  ;;  %v3540_v41 = vpop.f32.mrb[38].mxu0 }
 0x175   : > { %v3541_v42 = vpop.f32.mrb[39].mxu0 }
 0x176   : > { %v1910_v56 = vadd.f32 %v3673_v19, %v3539_v32 }
 0x178   : > { %v3562_v34 = vpop.f32.mrb[32].mxu1  ;;  %v1920_v43 = vadd.f32 %v1910_v56, %v1658_v17 }
 0x179   : > { %v3563_v39 = vpop.f32.mrb[33].mxu1 }
 0x17a   : > { %v3564_v37 = vadd.f32 %v3563_v39, %v3562_v34  ;;  %v3565_v10 = vpop.f32.mrb[34].mxu1  ;;  %v3679_v45 = vpop.f32.mrb[40].mxu0 }
 0x17b   : > { %v3566_v11 = vpop.f32.mrb[35].mxu1  ;;  %v2186_v47 = vpop.f32.mrb[41].mxu0 }
 0x17c   : > { %v3567_v61 = vadd.f32 %v3566_v11, %v3565_v10  ;;  %v2187_v50 = vadd.f32 %v3564_v37, %v2186_v47  ;;  %v3680_v52 = vpop.f32.mrb[42].mxu0  ;;  %v2836_v37 = vpop.permute.xlu0 %2835 }
 0x17d   : > { %v2189_v55 = vpop.f32.mrb[43].mxu0 }
 0x17e   : > { %v2203_v58 = vadd.f32 %v2187_v50, %v1918_v31  ;;  %v2190_v59 = vadd.f32 %v3567_v61, %v2189_v55 }
 0x180   : > { %v3568_v44 = vpop.f32.mrb[36].mxu1  ;;  %v2204_v62 = vadd.f32 %v2190_v59, %v1919_v35  ;;  %v3357_v35 = vld [vmem:[%s4625_s2] ss:$0 sm:$0xff]  ;;  %v2841_v47 = vpop.permute.xlu0 %2840 }
 0x181   : > { %v3569_v46 = vpop.f32.mrb[37].mxu1 }
 0x182   : > { %v3570_v49 = vadd.f32 %v3569_v46, %v3568_v44  ;;  %v3571_v51 = vpop.f32.mrb[38].mxu1 }
 0x183   : > { %v3572_v53 = vpop.f32.mrb[39].mxu1 }
 0x184   : > { %v2195_v57 = vadd.f32 %v3679_v45, %v3570_v49 }
 0x186   : > { %v2205_v60 = vadd.f32 %v2195_v57, %v1920_v43  ;;  %v2846_v43 = vpop.permute.xlu1 %2845 }
 0x188   : > { %v3685_v63 = vpop.f32.mrb[40].mxu1 }
 0x189   : > { %v2507_v0 = vpop.f32.mrb[41].mxu1 }
 0x18a   : > { %v3686_v9 = vpop.f32.mrb[42].mxu1 }
 0x18b   : > { %v2510_v54 = vpop.f32.mrb[43].mxu1 }
 0x19a   : > { %v3593_v1 = vpop.f32.mrb[44].mxu0 }
 0x19b   : > { %v3594_v2 = vpop.f32.mrb[45].mxu0 }
 0x19c   : > { %v3595_v3 = vadd.f32 %v3594_v2, %v3593_v1  ;;  %v3596_v4 = vpop.f32.mrb[46].mxu0 }
 0x19d   : > { %v3597_v5 = vpop.f32.mrb[47].mxu0 }
 0x19e   : > { %v2508_v6 = vadd.f32 %v3595_v3, %v2507_v0  ;;  %v3598_v36 = vadd.f32 %v3597_v5, %v3596_v4 }
 0x1a0   : > { %v2511_v48 = vadd.f32 %v3598_v36, %v2510_v54  ;;  %v2524_v7 = vadd.f32 %v2508_v6, %v2203_v58 }
 0x1a2   : > { %v3599_v8 = vpop.f32.mrb[48].mxu0  ;;  %v2525_v13 = vadd.f32 %v2511_v48, %v2204_v62 }
 0x1a3   : > { %v3600_v14 = vpop.f32.mrb[49].mxu0 }
 0x1a4   : > { %v3601_v16 = vadd.f32 %v3600_v14, %v3599_v8  ;;  %v3602_v17 = vpop.f32.mrb[50].mxu0 }
 0x1a5   : > { %v3603_v19 = vpop.f32.mrb[51].mxu0 }
 0x1a6   : > { %v2516_v21 = vadd.f32 %v3685_v63, %v3601_v16 }
 0x1a8   : > { %v3624_v12 = vpop.f32.mrb[44].mxu1  ;;  %v2526_v23 = vadd.f32 %v2516_v21, %v2205_v60 }
 0x1a9   : > { %v3625_v15 = vpop.f32.mrb[45].mxu1 }
 0x1aa   : > { %v3626_v40 = vadd.f32 %v3625_v15, %v3624_v12  ;;  %v3627_v18 = vpop.f32.mrb[46].mxu1  ;;  %v3691_v25 = vpop.f32.mrb[52].mxu0 }
 0x1ab   : > { %v3628_v20 = vpop.f32.mrb[47].mxu1  ;;  %v2791_v27 = vpop.f32.mrb[53].mxu0 }
 0x1ac   : > { %v3629_v22 = vadd.f32 %v3628_v20, %v3627_v18  ;;  %v2792_v29 = vadd.f32 %v3626_v40, %v2791_v27  ;;  %v3692_v31 = vpop.f32.mrb[54].mxu0 }
 0x1ad   : > { %v2794_v34 = vpop.f32.mrb[55].mxu0 }
 0x1ae   : > { %v2808_v39 = vadd.f32 %v2792_v29, %v2524_v7  ;;  %v2795_v32 = vadd.f32 %v3629_v22, %v2794_v34 }
 0x1b0   : > { %v3630_v24 = vpop.f32.mrb[48].mxu1  ;;  %v2809_v10 = vadd.f32 %v2795_v32, %v2525_v13  ;;  %v2824_v42 = vadd.f32 %v3357_v35, %v2808_v39 }
 0x1b1   : > { %v3631_v26 = vpop.f32.mrb[49].mxu1 }
 0x1b2   : > { %v3632_v28 = vadd.f32 %v3631_v26, %v3630_v24  ;;  %v3633_v30 = vpop.f32.mrb[50].mxu1  ;;  %v2827_v11 = vmax.f32 %v2824_v42, 0.0  ;;  %v2825_v56 = vadd.f32 %v3357_v35, %v2809_v10 }
 0x1b3   : > { %v3634_v33 = vpop.f32.mrb[51].mxu1 }
 0x1b4   : > { %v2800_v38 = vadd.f32 %v3691_v25, %v3632_v28  ;;  %v2848_v44 = vmul.f32 %v2836_v37, %v2827_v11  ;;  %v2828_v45 = vmax.f32 %v2825_v56, 0.0 }
 0x1b6   : > { %v2810_v41 = vadd.f32 %v2800_v38, %v2526_v23  ;;  %2857 = vst [vmem:[%s4606_s10 + $0x7] sm:$0xff] %v2848_v44  ;;  %v2849_v49 = vmul.f32 %v2841_v47, %v2828_v45 }
 0x1b8   : > { %v2826_v61 = vadd.f32 %v3357_v35, %v2810_v41  ;;  %2858 = vst [vmem:[%s4606_s10 + $0xf] sm:$0xff] %v2849_v49 }
 0x1ba   : > { %v2829_v46 = vmax.f32 %v2826_v61, 0.0 }
 0x1bc   : > { %v2850_v50 = vmul.f32 %v2846_v43, %v2829_v46 }
 0x1be   : > { %2859 = vst [vmem:[%s4606_s10 + $0x17] sm:$0xff] %v2850_v50 }
 0x1bf PF: > { %s14_s15 = sadd.s32 1, %s3876_s15  }
 0x1c0   : > { %p11_p4 = scmp.ge.s32.totalorder %s14_s15, 4  }
 0x1c2   :  { %13 = sbr.rel (!%p11_p4) target bundleno = 1 (0x1), region = 74 }

// kernel: tower_forward.11
= control target key start
LH: loop header
LB: loop body
LE: loop exit
PB: predicated region body
PF: predicated region fallthrough
CT: control target
= control target key end

     0   :  { %s4072_s15 = smov 0   ;;  %s5153_s0 = inlined_call_operand.vmem [shape: f32[2,42,256], index: 0, kind: input, shape index: {}]   ;;  %s5154_s1 = inlined_call_operand.vmem [shape: bf16[9,256,256], index: 1, kind: input, shape index: {}]   ;;  %s5155_s2 = inlined_call_operand.vmem [shape: f32[1,256], index: 2, kind: input, shape index: {}]   ;;  %s5156_s3 = inlined_call_operand.vmem [shape: f32[24,1], index: 3, kind: input, shape index: {}]   ;;  %s5157_s4 = inlined_call_operand.vmem [shape: f32[2,42,256], index: 4, kind: output, shape index: {}]  }
   0x1 LB: > { %s2973_s16 = sadd.s32 4294967295, %s4043_s15   ;;  %p2977_p0 = scmp.ge.s32.totalorder %s4043_s15, 1  ;;  %s4043_s15 = sphi %s4072_s15, %s14_s15  }
   0x2   : > { %p162_p1 = scmp.lt.s32.totalorder %s4043_s15, 3 }
   0x4   : > { %p163_p2 = pnand %p2977_p0, %p162_p1 }
   0x5   : > { %v3603_v0 = vld [vmem:[%s5154_s1 + $0x4] ss:$8 sps:$4 sm:$0xff] (!%p163_p2)   ;;  %v3607_v2 = vld [vmem:[%s5154_s1] ss:$8 sps:$4 sm:$0xff] (!%p163_p2)   ;;  %v3609_v4 = vld [vmem:[%s5154_s1 + $0x14] ss:$8 sps:$4 sm:$0xff] (!%p163_p2)  }
   0x6   : > { %166 = sbr.rel (%p163_p2) target bundleno = 554 (0x22a), region = 36  ;;  %v3605_v1 = vld [vmem:[%s5154_s1 + $0x404] ss:$8 sps:$4 sm:$0xff] (!%p163_p2)   ;;  %400 = vmatprep.subr.bf16.mxu1 (!%p163_p2), %v3603_v0  ;;  %v3608_v3 = vld [vmem:[%s5154_s1 + $0x400] ss:$8 sps:$4 sm:$0xff] (!%p163_p2)   ;;  %p188_p3 = scmp.lt.s32.totalorder (!%p163_p2), %s2973_s16, 1 }
   0x7   : > { %1588 = vmatprep.subr.bf16.mxu0 (!%p163_p2), %v3605_v1  ;;  %401 = vmatpush1.bf16.msra.mxu1 (!%p163_p2), %v3607_v2  ;;  %v3611_v5 = vld [vmem:[%s5154_s1 + $0x414] ss:$8 sps:$4 sm:$0xff] (!%p163_p2)   ;;  %v3613_v6 = vld [vmem:[%s5154_s1 + $0x10] ss:$8 sps:$4 sm:$0xff] (!%p163_p2)   ;;  %v3615_v8 = vld [vmem:[%s5154_s1 + $0x24] ss:$8 sps:$4 sm:$0xff] (!%p163_p2)  }
   0x8   : > { %1589 = vmatpush1.bf16.msra.mxu0 (!%p163_p2), %v3608_v3  ;;  %402 = vmatprep.subr.bf16.mxu1 (!%p163_p2), %v3609_v4  ;;  %v3614_v7 = vld [vmem:[%s5154_s1 + $0x410] ss:$8 sps:$4 sm:$0xff] (!%p163_p2)   ;;  %v3617_v9 = vld [vmem:[%s5154_s1 + $0x424] ss:$8 sps:$4 sm:$0xff] (!%p163_p2)   ;;  %v3619_v10 = vld [vmem:[%s5154_s1 + $0x20] ss:$8 sps:$4 sm:$0xff] (!%p163_p2)  }
   0x9   : > { %1590 = vmatprep.subr.bf16.mxu0 (!%p163_p2), %v3611_v5  ;;  %v3620_v11 = vld [vmem:[%s5154_s1 + $0x420] ss:$8 sps:$4 sm:$0xff] (!%p163_p2)   ;;  %v3621_v12 = vld [vmem:[%s5154_s1 + $0x34] ss:$8 sps:$4 sm:$0xff] (!%p163_p2)   ;;  %v3625_v14 = vld [vmem:[%s5154_s1 + $0x30] ss:$8 sps:$4 sm:$0xff] (!%p163_p2)  }
   0xa   : > { %v3623_v13 = vld [vmem:[%s5154_s1 + $0x434] ss:$8 sps:$4 sm:$0xff] (!%p163_p2)   ;;  %v3626_v15 = vld [vmem:[%s5154_s1 + $0x430] ss:$8 sps:$4 sm:$0xff] (!%p163_p2)   ;;  %v3627_v16 = vld [vmem:[%s5154_s1 + $0x44] ss:$8 sps:$4 sm:$0xff] (!%p163_p2)  }
   0xb   : > { %403 = vmatpush1.bf16.msra.mxu1 (!%p163_p2), %v3613_v6  ;;  %v3629_v17 = vld [vmem:[%s5154_s1 + $0x444] ss:$8 sps:$4 sm:$0xff] (!%p163_p2)   ;;  %v3631_v18 = vld [vmem:[%s5154_s1 + $0x40] ss:$8 sps:$4 sm:$0xff] (!%p163_p2)   ;;  %v3633_v20 = vld [vmem:[%s5154_s1 + $0x54] ss:$8 sps:$4 sm:$0xff] (!%p163_p2)  }
   0xc   : > { %1591 = vmatpush1.bf16.msra.mxu0 (!%p163_p2), %v3614_v7  ;;  %404 = vmatprep.subr.bf16.mxu1 (!%p163_p2), %v3615_v8  ;;  %v3632_v19 = vld [vmem:[%s5154_s1 + $0x440] ss:$8 sps:$4 sm:$0xff] (!%p163_p2)   ;;  %v3635_v21 = vld [vmem:[%s5154_s1 + $0x454] ss:$8 sps:$4 sm:$0xff] (!%p163_p2)   ;;  %v3637_v22 = vld [vmem:[%s5154_s1 + $0x50] ss:$8 sps:$4 sm:$0xff] (!%p163_p2)  }
   0xd   : > { %1592 = vmatprep.subr.bf16.mxu0 %v3617_v9  ;;  %v3638_v23 = vld [vmem:[%s5154_s1 + $0x450] ss:$8 sps:$4 sm:$0xff]   ;;  %v3639_v24 = vld [vmem:[%s5154_s1 + $0x64] ss:$8 sps:$4 sm:$0xff]   ;;  %v3643_v26 = vld [vmem:[%s5154_s1 + $0x60] ss:$8 sps:$4 sm:$0xff]  }
   0xe   : > { %v3641_v25 = vld [vmem:[%s5154_s1 + $0x464] ss:$8 sps:$4 sm:$0xff]   ;;  %v3644_v27 = vld [vmem:[%s5154_s1 + $0x460] ss:$8 sps:$4 sm:$0xff]   ;;  %v3645_v28 = vld [vmem:[%s5154_s1 + $0x74] ss:$8 sps:$4 sm:$0xff]  }
   0xf   : > { %405 = vmatpush1.bf16.msra.mxu1 %v3619_v10  ;;  %v3647_v29 = vld [vmem:[%s5154_s1 + $0x474] ss:$8 sps:$4 sm:$0xff]   ;;  %v3649_v30 = vld [vmem:[%s5154_s1 + $0x70] ss:$8 sps:$4 sm:$0xff]   ;;  %v3651_v32 = vld [vmem:[%s5154_s1 + $0x84] ss:$8 sps:$4 sm:$0xff]  }
  0x10   : > { %1593 = vmatpush1.bf16.msra.mxu0 %v3620_v11  ;;  %406 = vmatprep.subr.bf16.mxu1 %v3621_v12  ;;  %v3650_v31 = vld [vmem:[%s5154_s1 + $0x470] ss:$8 sps:$4 sm:$0xff]   ;;  %v3653_v33 = vld [vmem:[%s5154_s1 + $0x484] ss:$8 sps:$4 sm:$0xff]   ;;  %v3655_v34 = vld [vmem:[%s5154_s1 + $0x80] ss:$8 sps:$4 sm:$0xff]  }
  0x11   : > { %1594 = vmatprep.subr.bf16.mxu0 %v3623_v13  ;;  %v3656_v35 = vld [vmem:[%s5154_s1 + $0x480] ss:$8 sps:$4 sm:$0xff]   ;;  %v3657_v36 = vld [vmem:[%s5154_s1 + $0x94] ss:$8 sps:$4 sm:$0xff]   ;;  %s5159_s16 = smov (!%p188_p3, %s2973_s16), 1  ;;  %vm815_vm2 = vcmask 1046528  }
  0x12   : > { %v3659_v37 = vld [vmem:[%s5154_s1 + $0x494] ss:$8 sps:$4 sm:$0xff]   ;;  %v3661_v38 = vld [vmem:[%s5154_s1 + $0x90] ss:$8 sps:$4 sm:$0xff]   ;;  %v3663_v40 = vld [vmem:[%s5154_s1 + $0xa4] ss:$8 sps:$4 sm:$0xff]  }
  0x13   : > { %407 = vmatpush1.bf16.msra.mxu1 %v3625_v14  ;;  %v3662_v39 = vld [vmem:[%s5154_s1 + $0x490] ss:$8 sps:$4 sm:$0xff]   ;;  %s3590_s27 = smul.u32 96, %s5159_s16  ;;  %v3665_v41 = vld [vmem:[%s5154_s1 + $0x4a4] ss:$8 sps:$4 sm:$0xff]   ;;  %vm1978_vm3 = vcmask 1045504  }
  0x14   : > { %1595 = vmatpush1.bf16.msra.mxu0 %v3626_v15  ;;  %408 = vmatprep.subr.bf16.mxu1 %v3627_v16  ;;  %v3667_v42 = vld [vmem:[%s5154_s1 + $0xa0] ss:$8 sps:$4 sm:$0xff]   ;;  %v3669_v44 = vld [vmem:[%s5154_s1 + $0xb4] ss:$8 sps:$4 sm:$0xff]   ;;  %v3673_v46 = vld [vmem:[%s5154_s1 + $0xb0] ss:$8 sps:$4 sm:$0xff]  }
  0x15   : > { %1596 = vmatprep.subr.bf16.mxu0 %v3629_v17  ;;  %v3668_v43 = vld [vmem:[%s5154_s1 + $0x4a0] ss:$8 sps:$4 sm:$0xff]   ;;  %s4227_s12 = scalar_lea.vmem %s5153_s0, %s3590_s27  ;;  %v3671_v45 = vld [vmem:[%s5154_s1 + $0x4b4] ss:$8 sps:$4 sm:$0xff]   ;;  %v3674_v47 = vld [vmem:[%s5154_s1 + $0x4b0] ss:$8 sps:$4 sm:$0xff]   ;;  %s5123_s21 = scalar_lea.vmem %s5157_s4, %s3590_s27 }
  0x16   : > { %v231_v48 = vld [vmem:[%s4227_s12 + $0x8] sm:$0xff]  ;;  %v4240_v49 = vld [vmem:[%s4227_s12 + $0x18] sm:$0xff]  ;;  %v4266_v63 = vld [vmem:[%s4227_s12 + $0x10] sm:$0xff]  ;;  %vm1389_vm0 = vsmask.f32 4352  ;;  %vm1104_vm4 = vcmask 1044480  }
  0x17   : > { %409 = vmatpush1.bf16.msra.mxu1 %v3631_v18  ;;  %v3675_v50 = vld [vmem:[%s5154_s1 + $0xc4] ss:$8 sps:$4 sm:$0xff]   ;;  %v237_v52 = vpack.c.bf16 %v4240_v49, %v231_v48  ;;  %v1384_v55 = vld [vmem:[%s4227_s12 + $0x38] sm:$0x7f]  ;;  %v3679_v57 = vld [vmem:[%s5154_s1 + $0xc0] ss:$8 sps:$4 sm:$0xff]  }
  0x18   : > { %1597 = vmatpush1.bf16.msra.mxu0 %v3632_v19  ;;  %410 = vmatprep.subr.bf16.mxu1 %v3633_v20  ;;  %v3677_v51 = vld [vmem:[%s5154_s1 + $0x4c4] ss:$8 sps:$4 sm:$0xff]   ;;  %v3680_v58 = vld [vmem:[%s5154_s1 + $0x4c0] ss:$8 sps:$4 sm:$0xff]   ;;  %v3681_v60 = vld [vmem:[%s5154_s1 + $0xd4] ss:$8 sps:$4 sm:$0xff]  }
  0x19   : > { %1598 = vmatprep.subr.bf16.mxu0 %v3635_v21  ;;  %v1378_v53 = vld [vmem:[%s4227_s12 + $0x8] sm:$0x80]  ;;  %432 = vmatprep.mubr.bf16.mxu1 %v237_v52  ;;  %v1377_v0 = vld [vmem:[%s4227_s12] sm:$0x80]  ;;  %v1383_v4 = vld [vmem:[%s4227_s12 + $0x30] sm:$0x7f] }
  0x1a   : > { %v4251_v54 = vld [vmem:[%s4227_s12 + $0x28] sm:$0xff]  ;;  %v1386_v56 = vpack.c.bf16 %v4240_v49, %v1378_v53  ;;  %v4270_v3 = vld [vmem:[%s4227_s12 + $0x20] sm:$0xff]  ;;  %v1385_v5 = vpack.c.bf16 %v4266_v63, %v1377_v0  ;;  %v3683_v6 = vld [vmem:[%s5154_s1 + $0x4d4] ss:$8 sps:$4 sm:$0xff]   ;;  %vm502_vm1 = vsmask.f32 7424 }
  0x1b   : > { %411 = vmatpush1.bf16.msra.mxu1 %v3637_v22  ;;  %v1388_v59 = vpack.c.bf16 %v1384_v55, %v4251_v54  ;;  %v1387_v9 = vpack.c.bf16 %v1383_v4, %v4270_v3  ;;  %v3685_v10 = vld [vmem:[%s5154_s1 + $0xd0] ss:$8 sps:$4 sm:$0xff]   ;;  %v3687_v20 = vld [vmem:[%s5154_s1 + $0xe4] ss:$8 sps:$4 sm:$0xff]   ;;  %v3691_v22 = vld [vmem:[%s5154_s1 + $0xe0] ss:$8 sps:$4 sm:$0xff]  }
  0x1c   : > { %1599 = vmatpush1.bf16.msra.mxu0 %v3638_v23  ;;  %412 = vmatprep.subr.bf16.mxu1 %v3639_v24  ;;  %v1408_v61 = vshrl.u32 %v1386_v56, 16  ;;  %v1411_v62 = vshll.u32 %v1386_v56, 16  ;;  %v3686_v13 = vld [vmem:[%s5154_s1 + $0x4d0] ss:$8 sps:$4 sm:$0xff]   ;;  %v1391_v15 = vshrl.u32 %v1385_v5, 16  ;;  %v1394_v17 = vshll.u32 %v1385_v5, 16 }
  0x1d   : > { %1600 = vmatprep.subr.bf16.mxu0 %v3641_v25  ;;  %v1416_v1 = vshrl.u32 %v1388_v59, 16  ;;  %v1419_v2 = vshll.u32 %v1388_v59, 16  ;;  %v1399_v18 = vshrl.u32 %v1387_v9, 16  ;;  %v1402_v19 = vshll.u32 %v1387_v9, 16  ;;  %v3689_v21 = vld [vmem:[%s5154_s1 + $0x4e4] ss:$8 sps:$4 sm:$0xff]  }
  0x1e   : > { %v1410_v7 = vrot.slane %v1408_v61, 3  ;;  %v1413_v8 = vrot.slane %v1411_v62, 4  ;;  %v3692_v24 = vld [vmem:[%s5154_s1 + $0x4e0] ss:$8 sps:$4 sm:$0xff]   ;;  %v1393_v25 = vrot.slane %v1391_v15, 3  ;;  %v1697_v56 = vpack.c.bf16 %v4251_v54, %v4240_v49 }
  0x1f   : > { %413 = vmatpush1.bf16.msra.mxu1 %v3643_v26  ;;  %v1418_v11 = vrot.slane %v1416_v1, 3  ;;  %v1421_v12 = vrot.slane %v1419_v2, 4  ;;  %v1396_v26 = vrot.slane %v1394_v17, 4  ;;  %v3716_v48 = vld [vmem:[%s5154_s1 + $0x524] ss:$8 sps:$4 sm:$0xff]  }
  0x20   : > { %1601 = vmatpush1.bf16.msra.mxu0 %v3644_v27  ;;  %414 = vmatprep.subr.bf16.mxu1 %v3645_v28  ;;  %v1414_v14 = vor.u32 %v1413_v8, %v1410_v7  ;;  %v1401_v27 = vrot.slane %v1399_v18, 3  ;;  %v1404_v28 = vrot.slane %v1402_v19, 4  ;;  %v3714_v52 = vld [vmem:[%s5154_s1 + $0x520] ss:$8 sps:$4 sm:$0xff]   ;;  %v3719_v53 = vld [vmem:[%s5154_s1 + $0x134] ss:$8 sps:$4 sm:$0xff]  }
  0x21   : > { %1602 = vmatprep.subr.bf16.mxu0 %v3647_v29  ;;  %v1422_v16 = vor.u32 %v1421_v12, %v1418_v11  ;;  %v3693_v29 = vld [vmem:[%s5154_s1 + $0xf4] ss:$8 sps:$4 sm:$0xff]   ;;  %v3725_v59 = vld [vmem:[%s5154_s1 + $0x144] ss:$8 sps:$4 sm:$0xff]   ;;  %v3723_v61 = vld [vmem:[%s5154_s1 + $0x140] ss:$8 sps:$4 sm:$0xff]  }
  0x22   : > { %v3722_v55 = vld [vmem:[%s5154_s1 + $0x534] ss:$8 sps:$4 sm:$0xff]   ;;  %v3726_v62 = vld [vmem:[%s5154_s1 + $0x540] ss:$8 sps:$4 sm:$0xff]   ;;  %v3729_v2 = vld [vmem:[%s5154_s1 + $0x150] ss:$8 sps:$4 sm:$0xff]  }
  0x23   : > { %415 = vmatpush1.bf16.msra.mxu1 %v3649_v30  ;;  %v1423_v23 = vsel %vm1389_vm0, %v1414_v14, %v1422_v16  ;;  %v3695_v30 = vld [vmem:[%s5154_s1 + $0x4f4] ss:$8 sps:$4 sm:$0xff]   ;;  %v3732_v4 = vld [vmem:[%s5154_s1 + $0x550] ss:$8 sps:$4 sm:$0xff]   ;;  %v3737_v5 = vld [vmem:[%s5154_s1 + $0x164] ss:$8 sps:$4 sm:$0xff]  }
  0x24   : > { %1603 = vmatpush1.bf16.msra.mxu0 %v3650_v31  ;;  %416 = vmatprep.subr.bf16.mxu1 %v3651_v32  ;;  %v3697_v31 = vld [vmem:[%s5154_s1 + $0xf0] ss:$8 sps:$4 sm:$0xff]   ;;  %v3731_v0 = vld [vmem:[%s5154_s1 + $0x154] ss:$8 sps:$4 sm:$0xff]   ;;  %v3735_v7 = vld [vmem:[%s5154_s1 + $0x160] ss:$8 sps:$4 sm:$0xff]  }
  0x25   : > { %1604 = vmatprep.subr.bf16.mxu0 %v3653_v33  ;;  %1620 = vmatprep.mubr.bf16.mxu0 %v1423_v23  ;;  %v3698_v32 = vld [vmem:[%s5154_s1 + $0x4f0] ss:$8 sps:$4 sm:$0xff]   ;;  %v230_v33 = vld [vmem:[%s4227_s12] sm:$0xff]  ;;  %v3734_v1 = vld [vmem:[%s5154_s1 + $0x554] ss:$8 sps:$4 sm:$0xff]  }
  0x26   : > { %v3738_v8 = vld [vmem:[%s5154_s1 + $0x560] ss:$8 sps:$4 sm:$0xff]   ;;  %v3743_v9 = vld [vmem:[%s5154_s1 + $0x174] ss:$8 sps:$4 sm:$0xff]   ;;  %v497_v12 = vld [vmem:[%s4227_s12 + $0x38] sm:$0x1] }
  0x27   : > { %417 = vmatpush1.bf16.msra.mxu1 %v3655_v34  ;;  %v1397_v34 = vor.u32 %v1396_v26, %v1393_v25  ;;  %v491_v11 = vld [vmem:[%s4227_s12 + $0x8] sm:$0xfe]  ;;  %v3741_v14 = vld [vmem:[%s5154_s1 + $0x170] ss:$8 sps:$4 sm:$0xff]   ;;  %v4415_v15 = vpack.c.bf16 %v497_v12, %v4251_v54  ;;  %v3755_v26 = vld [vmem:[%s5154_s1 + $0x194] ss:$8 sps:$4 sm:$0xff]  }
  0x28   : > { %1605 = vmatpush1.bf16.msra.mxu0 %v3656_v35  ;;  %418 = vmatprep.subr.bf16.mxu1 %v3657_v36  ;;  %v1405_v35 = vor.u32 %v1404_v28, %v1401_v27  ;;  %v3701_v36 = vld [vmem:[%s5154_s1 + $0x104] ss:$8 sps:$4 sm:$0xff]   ;;  %v3747_v23 = vld [vmem:[%s5154_s1 + $0x180] ss:$8 sps:$4 sm:$0xff]   ;;  %v3758_v28 = vld [vmem:[%s5154_s1 + $0x594] ss:$8 sps:$4 sm:$0xff]  }
  0x29   : > { %1606 = vmatprep.subr.bf16.mxu0 %v3659_v37  ;;  %v3704_v37 = vld [vmem:[%s5154_s1 + $0x504] ss:$8 sps:$4 sm:$0xff]   ;;  %v3750_v25 = vld [vmem:[%s5154_s1 + $0x580] ss:$8 sps:$4 sm:$0xff]   ;;  %vm2263_vm5 = vsmask.f32 5376 }
  0x2a   : > { %v3749_v19 = vld [vmem:[%s5154_s1 + $0x184] ss:$8 sps:$4 sm:$0xff]   ;;  %v3798_v12 = vld [vmem:[%s5154_s1 + $0x600] ss:$8 sps:$4 sm:$0xff]  }
  0x2b   : > { %419 = vmatpush1.bf16.msra.mxu1 %v3661_v38  ;;  %v3699_v38 = vld [vmem:[%s5154_s1 + $0x100] ss:$8 sps:$4 sm:$0xff]  }
  0x2c   : > { %1607 = vmatpush1.bf16.msra.mxu0 %v3662_v39  ;;  %420 = vmatprep.subr.bf16.mxu1 %v3663_v40  ;;  %v236_v39 = vpack.c.bf16 %v4266_v63, %v230_v33  ;;  %v3702_v40 = vld [vmem:[%s5154_s1 + $0x500] ss:$8 sps:$4 sm:$0xff]   ;;  %v3764_v33 = vld [vmem:[%s5154_s1 + $0x5a4] ss:$8 sps:$4 sm:$0xff]  }
  0x2d   : > { %1608 = vmatprep.subr.bf16.mxu0 %v3665_v41  ;;  %v1406_v41 = vsel %vm1389_vm0, %v1397_v34, %v1405_v35  ;;  %v3759_v34 = vld [vmem:[%s5154_s1 + $0x1a0] ss:$8 sps:$4 sm:$0xff]  }
  0x2f   : > { %421 = vmatpush1.bf16.msra.mxu1 %v3667_v42  ;;  %v3707_v42 = vld [vmem:[%s5154_s1 + $0x114] ss:$8 sps:$4 sm:$0xff]  }
  0x30   : > { %1609 = vmatpush1.bf16.msra.mxu0 %v3668_v43  ;;  %422 = vmatprep.subr.bf16.mxu1 %v3669_v44  ;;  %v3710_v43 = vld [vmem:[%s5154_s1 + $0x514] ss:$8 sps:$4 sm:$0xff]   ;;  %v239_v44 = vpack.c.bf16 %v4251_v54, %v4251_v54 }
  0x31   : > { %1610 = vmatprep.subr.bf16.mxu0 %v3671_v45  ;;  %v3705_v45 = vld [vmem:[%s5154_s1 + $0x110] ss:$8 sps:$4 sm:$0xff]  }
  0x33   : > { %423 = vmatpush1.bf16.msra.mxu1 %v3673_v46  ;;  %v3708_v46 = vld [vmem:[%s5154_s1 + $0x510] ss:$8 sps:$4 sm:$0xff]  }
  0x34   : > { %1611 = vmatpush1.bf16.msra.mxu0 %v3674_v47  ;;  %424 = vmatprep.subr.bf16.mxu1 %v3675_v50  ;;  %v3713_v47 = vld [vmem:[%s5154_s1 + $0x124] ss:$8 sps:$4 sm:$0xff]   ;;  %v3711_v50 = vld [vmem:[%s5154_s1 + $0x120] ss:$8 sps:$4 sm:$0xff]  }
  0x35   : > { %1612 = vmatprep.subr.bf16.mxu0 %v3677_v51  ;;  %v238_v51 = vpack.c.bf16 %v4270_v3, %v4270_v3 }
  0x37   : > { %425 = vmatpush1.bf16.msra.mxu1 %v3679_v57  ;;  %v3717_v57 = vld [vmem:[%s5154_s1 + $0x130] ss:$8 sps:$4 sm:$0xff]  }
  0x38   : > { %1613 = vmatpush1.bf16.msra.mxu0 %v3680_v58  ;;  %426 = vmatprep.subr.bf16.mxu1 %v3681_v60  ;;  %v3720_v58 = vld [vmem:[%s5154_s1 + $0x530] ss:$8 sps:$4 sm:$0xff]   ;;  %v3728_v60 = vld [vmem:[%s5154_s1 + $0x544] ss:$8 sps:$4 sm:$0xff]  }
  0x39   : > { %1614 = vmatprep.subr.bf16.mxu0 %v3683_v6  ;;  %v3740_v6 = vld [vmem:[%s5154_s1 + $0x564] ss:$8 sps:$4 sm:$0xff]  }
  0x3b   : > { %427 = vmatpush1.bf16.msra.mxu1 %v3685_v10  ;;  %v3746_v10 = vld [vmem:[%s5154_s1 + $0x574] ss:$8 sps:$4 sm:$0xff]  }
  0x3c   : > { %1615 = vmatpush1.bf16.msra.mxu0 %v3686_v13  ;;  %428 = vmatprep.subr.bf16.mxu1 %v3687_v20  ;;  %v499_v13 = vpack.c.bf16 %v4240_v49, %v491_v11  ;;  %v3752_v20 = vld [vmem:[%s5154_s1 + $0x584] ss:$8 sps:$4 sm:$0xff]  }
  0x3d   : > { %1616 = vmatprep.subr.bf16.mxu0 %v3689_v21  ;;  %v523_v21 = vshll.u32 %v4415_v15, 16 }
  0x3e   : > { %v516_v17 = vshrl.u32 %v499_v13, 16  ;;  %v518_v18 = vshll.u32 %v499_v13, 16  ;;  %v3803_v13 = vld [vmem:[%s5154_s1 + $0x214] ss:$8 sps:$4 sm:$0xff]  }
  0x3f   : > { %429 = vmatpush1.bf16.msra.mxu1 %v3691_v22 }
  0x40   : > { %1617 = vmatpush1.bf16.msra.mxu0 %v3692_v24  ;;  %430 = vmatprep.subr.bf16.mxu1 %v3693_v29  ;;  %v520_v22 = vrot.slane %v518_v18, 1  ;;  %v4430_v24 = vrot.slane %v523_v21, 1  ;;  %v3804_v18 = vld [vmem:[%s5154_s1 + $0x610] ss:$8 sps:$4 sm:$0xff]   ;;  %v3812_v21 = vld [vmem:[%s5154_s1 + $0x624] ss:$8 sps:$4 sm:$0xff]  }
  0x41   : > { %1618 = vmatprep.subr.bf16.mxu0 %v3695_v30  ;;  %v3753_v30 = vld [vmem:[%s5154_s1 + $0x190] ss:$8 sps:$4 sm:$0xff]  }
  0x42   : > { %v521_v27 = vor.u32 %v520_v22, %v516_v17 }
  0x43   : > { %431 = vmatpush1.bf16.msra.mxu1 %v3697_v31  ;;  %v3756_v31 = vld [vmem:[%s5154_s1 + $0x590] ss:$8 sps:$4 sm:$0xff]  }
  0x44   : > { %1619 = vmatpush1.bf16.msra.mxu0 %v3698_v32  ;;  %697 = vmatprep.subr.bf16.mxu1 %v3701_v36  ;;  %v526_v29 = vsel %vm502_vm1, %v521_v27, %v4430_v24  ;;  %v3761_v32 = vld [vmem:[%s5154_s1 + $0x1a4] ss:$8 sps:$4 sm:$0xff]   ;;  %v3767_v36 = vld [vmem:[%s5154_s1 + $0x1b4] ss:$8 sps:$4 sm:$0xff]   ;;  %v3810_v27 = vld [vmem:[%s5154_s1 + $0x620] ss:$8 sps:$4 sm:$0xff]  }
  0x45   : > { %1860 = vmatprep.subr.bf16.mxu0 %v3704_v37  ;;  %v3770_v37 = vld [vmem:[%s5154_s1 + $0x5b4] ss:$8 sps:$4 sm:$0xff]  }
  0x46   : > { %433 = vmatmul.mubr.bf16.vlgmr.msra.gmra.mrb[0].mxu1 %v236_v39  ;;  %v3768_v39 = vld [vmem:[%s5154_s1 + $0x5b0] ss:$8 sps:$4 sm:$0xff]  }
  0x47   : > { %1621 = vmatmul.mubr.bf16.vlgmr.msra.gmra.mrb[0].mxu0 %v1406_v41  ;;  %698 = vmatpush1.bf16.msra.mxu1 %v3699_v38  ;;  %v3765_v38 = vld [vmem:[%s5154_s1 + $0x1b0] ss:$8 sps:$4 sm:$0xff]   ;;  %v3776_v41 = vld [vmem:[%s5154_s1 + $0x5c4] ss:$8 sps:$4 sm:$0xff]  }
  0x48   : > { %1861 = vmatpush1.bf16.msra.mxu0 %v3702_v40  ;;  %699 = vmatprep.subr.bf16.mxu1 %v3707_v42  ;;  %v3773_v40 = vld [vmem:[%s5154_s1 + $0x1c4] ss:$8 sps:$4 sm:$0xff]  }
  0x49   : > { %1862 = vmatprep.subr.bf16.mxu0 %v3710_v43  ;;  %1630 = vmatprep.mubr.bf16.mxu0 %v1422_v16  ;;  %v3744_v16 = vld [vmem:[%s5154_s1 + $0x570] ss:$8 sps:$4 sm:$0xff]   ;;  %v490_v42 = vld [vmem:[%s4227_s12] sm:$0xfe] }
  0x4a   : > { %442 = vmatprep.mubr.bf16.mxu1 %v239_v44  ;;  %v3771_v43 = vld [vmem:[%s5154_s1 + $0x1c0] ss:$8 sps:$4 sm:$0xff]  }
  0x4b   : > { %700 = vmatpush1.bf16.msra.mxu1 %v3705_v45  ;;  %v3774_v44 = vld [vmem:[%s5154_s1 + $0x5c0] ss:$8 sps:$4 sm:$0xff]   ;;  %v3779_v45 = vld [vmem:[%s5154_s1 + $0x1d4] ss:$8 sps:$4 sm:$0xff]  }
  0x4c   : > { %1863 = vmatpush1.bf16.msra.mxu0 %v3708_v46  ;;  %701 = vmatprep.subr.bf16.mxu1 %v3713_v47  ;;  %v3782_v46 = vld [vmem:[%s5154_s1 + $0x5d4] ss:$8 sps:$4 sm:$0xff]   ;;  %v498_v47 = vpack.c.bf16 %v4266_v63, %v490_v42 }
  0x4d   : > { %1864 = vmatprep.subr.bf16.mxu0 %v3716_v48  ;;  %v496_v48 = vld [vmem:[%s4227_s12 + $0x30] sm:$0x1] }
  0x4e   : > { %443 = vmatmul.mubr.bf16.gmra.mrb[4].mxu1 %v238_v51  ;;  %v3780_v51 = vld [vmem:[%s5154_s1 + $0x5d0] ss:$8 sps:$4 sm:$0xff]  }
  0x4f   : > { %1631 = vmatmul.mubr.bf16.gmra.mrb[4].mxu0 %v1405_v35  ;;  %702 = vmatpush1.bf16.msra.mxu1 %v3711_v50  ;;  %v3762_v35 = vld [vmem:[%s5154_s1 + $0x5a0] ss:$8 sps:$4 sm:$0xff]   ;;  %v3777_v50 = vld [vmem:[%s5154_s1 + $0x1d0] ss:$8 sps:$4 sm:$0xff]  }
  0x50   : > { %1865 = vmatpush1.bf16.msra.mxu0 %v3714_v52  ;;  %703 = vmatprep.subr.bf16.mxu1 %v3719_v53  ;;  %v3785_v52 = vld [vmem:[%s5154_s1 + $0x1e4] ss:$8 sps:$4 sm:$0xff]   ;;  %v500_v53 = vpack.c.bf16 %v496_v48, %v4270_v3  ;;  %v3825_v48 = vld [vmem:[%s5154_s1 + $0x250] ss:$8 sps:$4 sm:$0xff]  }
  0x51   : > { %1866 = vmatprep.subr.bf16.mxu0 %v3722_v55  ;;  %1892 = vmatprep.mubr.bf16.mxu0 %v1697_v56  ;;  %v506_v55 = vshll.u32 %v498_v47, 16  ;;  %v3788_v56 = vld [vmem:[%s5154_s1 + $0x5e4] ss:$8 sps:$4 sm:$0xff]  }
  0x52   : > { %729 = vmatprep.mubr.bf16.mxu1 %v526_v29  ;;  %v527_v17 = vshrl.u32 %v500_v53, 16 }
  0x53   : > { %704 = vmatpush1.bf16.msra.mxu1 %v3717_v57  ;;  %v3783_v57 = vld [vmem:[%s5154_s1 + $0x1e0] ss:$8 sps:$4 sm:$0xff]  }
  0x54   : > { %1867 = vmatpush1.bf16.msra.mxu0 %v3720_v58  ;;  %705 = vmatprep.subr.bf16.mxu1 %v3725_v59  ;;  %v3786_v58 = vld [vmem:[%s5154_s1 + $0x5e0] ss:$8 sps:$4 sm:$0xff]   ;;  %v3791_v59 = vld [vmem:[%s5154_s1 + $0x1f4] ss:$8 sps:$4 sm:$0xff]  }
  0x55   : > { %1868 = vmatprep.subr.bf16.mxu0 %v3728_v60  ;;  %v504_v60 = vshrl.u32 %v498_v47, 16  ;;  %v3830_v47 = vld [vmem:[%s5154_s1 + $0x654] ss:$8 sps:$4 sm:$0xff]  }
  0x57   : > { %706 = vmatpush1.bf16.msra.mxu1 %v3723_v61  ;;  %v508_v61 = vrot.slane %v506_v55, 1  ;;  %v3834_v55 = vld [vmem:[%s5154_s1 + $0x660] ss:$8 sps:$4 sm:$0xff]  }
  0x58   : > { %1869 = vmatpush1.bf16.msra.mxu0 %v3726_v62  ;;  %707 = vmatprep.subr.bf16.mxu1 %v3731_v0  ;;  %v511_v62 = vshll.u32 %v500_v53, 16  ;;  %v3794_v0 = vld [vmem:[%s5154_s1 + $0x5f4] ss:$8 sps:$4 sm:$0xff]   ;;  %v3831_v53 = vld [vmem:[%s5154_s1 + $0x260] ss:$8 sps:$4 sm:$0xff]  }
  0x59   : > { %1870 = vmatprep.subr.bf16.mxu0 %v3734_v1  ;;  %v3789_v1 = vld [vmem:[%s5154_s1 + $0x1f0] ss:$8 sps:$4 sm:$0xff]  }
  0x5b   : > { %708 = vmatpush1.bf16.msra.mxu1 %v3729_v2  ;;  %v3792_v2 = vld [vmem:[%s5154_s1 + $0x5f0] ss:$8 sps:$4 sm:$0xff]  }
  0x5c   : > { %1871 = vmatpush1.bf16.msra.mxu0 %v3732_v4  ;;  %709 = vmatprep.subr.bf16.mxu1 %v3737_v5  ;;  %v509_v4 = vor.u32 %v508_v61, %v504_v60  ;;  %v513_v5 = vrot.slane %v511_v62, 1  ;;  %v3845_v60 = vld [vmem:[%s5154_s1 + $0x284] ss:$8 sps:$4 sm:$0xff]   ;;  %v3843_v62 = vld [vmem:[%s5154_s1 + $0x280] ss:$8 sps:$4 sm:$0xff]  }
  0x5d   : > { %1872 = vmatprep.subr.bf16.mxu0 %v3740_v6  ;;  %v3797_v6 = vld [vmem:[%s5154_s1 + $0x204] ss:$8 sps:$4 sm:$0xff]  }
  0x5e   : > { %v514_v11 = vsel %vm502_vm1, %v509_v4, %v513_v5  ;;  %v529_v22 = vor.u32 %v527_v17, %v513_v5  ;;  %v3848_v61 = vld [vmem:[%s5154_s1 + $0x684] ss:$8 sps:$4 sm:$0xff]   ;;  %v3849_v4 = vld [vmem:[%s5154_s1 + $0x290] ss:$8 sps:$4 sm:$0xff]   ;;  %v3875_v17 = vld [vmem:[%s5154_s1 + $0x2d4] ss:$8 sps:$4 sm:$0xff]  }
  0x5f   : > { %710 = vmatpush1.bf16.msra.mxu1 %v3735_v7  ;;  %v3800_v7 = vld [vmem:[%s5154_s1 + $0x604] ss:$8 sps:$4 sm:$0xff]   ;;  %v3852_v5 = vld [vmem:[%s5154_s1 + $0x690] ss:$8 sps:$4 sm:$0xff]  }
  0x60   : > { %1873 = vmatpush1.bf16.msra.mxu0 %v3738_v8  ;;  %711 = vmatprep.subr.bf16.mxu1 %v3743_v9  ;;  %v530_v8 = vshrl.u32 %v4415_v15, 16  ;;  %v3795_v9 = vld [vmem:[%s5154_s1 + $0x200] ss:$8 sps:$4 sm:$0xff]  }
  0x61   : > { %1874 = vmatprep.subr.bf16.mxu0 %v3746_v10  ;;  %v1696_v10 = vpack.c.bf16 %v4270_v3, %v4266_v63  ;;  %v4548_v63 = vld [vmem:[%s4227_s12 + $0x38] sm:$0xff] }
  0x62   : > { %v532_v3 = vor.u32 %v530_v8, %v4430_v24  ;;  %v1699_v15 = vpack.c.bf16 %v4548_v63, %v4548_v63  ;;  %v800_v24 = vld [vmem:[%s4227_s12 + $0x8] sm:$0xfc] }
  0x63   : > { %712 = vmatpush1.bf16.msra.mxu1 %v3741_v14  ;;  %v3806_v14 = vld [vmem:[%s5154_s1 + $0x614] ss:$8 sps:$4 sm:$0xff]   ;;  %v3855_v8 = vld [vmem:[%s5154_s1 + $0x2a0] ss:$8 sps:$4 sm:$0xff]  }
  0x64   : > { %1875 = vmatpush1.bf16.msra.mxu0 %v3744_v16  ;;  %713 = vmatprep.subr.bf16.mxu1 %v3749_v19  ;;  %v3801_v16 = vld [vmem:[%s5154_s1 + $0x210] ss:$8 sps:$4 sm:$0xff]  }
  0x65   : > { %1876 = vmatprep.subr.bf16.mxu0 %v3752_v20  ;;  %v4560_v19 = vld [vmem:[%s4227_s12 + $0x30] sm:$0xff]  ;;  %v3809_v20 = vld [vmem:[%s5154_s1 + $0x224] ss:$8 sps:$4 sm:$0xff]  }
  0x67   : > { %714 = vmatpush1.bf16.msra.mxu1 %v3747_v23  ;;  %v1698_v23 = vpack.c.bf16 %v4560_v19, %v4560_v19 }
  0x68   : > { %1877 = vmatpush1.bf16.msra.mxu0 %v3750_v25  ;;  %715 = vmatprep.subr.bf16.mxu1 %v3755_v26  ;;  %v806_v25 = vld [vmem:[%s4227_s12 + $0x38] sm:$0x3]  ;;  %v3807_v26 = vld [vmem:[%s5154_s1 + $0x220] ss:$8 sps:$4 sm:$0xff]  }
  0x69   : > { %1878 = vmatprep.subr.bf16.mxu0 %v3758_v28  ;;  %v808_v28 = vpack.c.bf16 %v4240_v49, %v800_v24  ;;  %v810_v29 = vpack.c.bf16 %v806_v25, %v4251_v54  ;;  %v799_v24 = vld [vmem:[%s4227_s12] sm:$0xfc]  ;;  %v805_v25 = vld [vmem:[%s4227_s12 + $0x30] sm:$0x3] }
  0x6b   : > { %716 = vmatpush1.bf16.msra.mxu1 %v3753_v30  ;;  %v3815_v30 = vld [vmem:[%s5154_s1 + $0x234] ss:$8 sps:$4 sm:$0xff]  }
  0x6c   : > { %1879 = vmatpush1.bf16.msra.mxu0 %v3756_v31  ;;  %717 = vmatprep.subr.bf16.mxu1 %v3761_v32  ;;  %v3818_v31 = vld [vmem:[%s5154_s1 + $0x634] ss:$8 sps:$4 sm:$0xff]   ;;  %v819_v32 = vrot.slane %v808_v28, 1  ;;  %v3879_v28 = vld [vmem:[%s5154_s1 + $0x2e0] ss:$8 sps:$4 sm:$0xff]  }
  0x6d   : > { %1880 = vmatprep.subr.bf16.mxu0 %v3764_v33  ;;  %v4586_v33 = vrot.slane %v810_v29, 1  ;;  %v3882_v29 = vld [vmem:[%s5154_s1 + $0x6e0] ss:$8 sps:$4 sm:$0xff]  }
  0x6f   : > { %718 = vmatpush1.bf16.msra.mxu1 %v3759_v34  ;;  %v1963_v34 = vld [vmem:[%s4227_s12 + $0x18] sm:$0xf0] }
  0x70   : > { %1881 = vmatpush1.bf16.msra.mxu0 %v3762_v35  ;;  %719 = vmatprep.subr.bf16.mxu1 %v3767_v36  ;;  %v1969_v35 = vld [vmem:[%s4227_s12 + $0x48] sm:$0xf]  ;;  %v1971_v49 = vpack.c.bf16 %v4251_v54, %v1963_v34  ;;  %v821_v54 = vsel %vm815_vm2, %v819_v32, %v4586_v33  ;;  %v2252_v34 = vld [vmem:[%s4227_s12 + $0x18] sm:$0xe0] }
  0x71   : > { %1882 = vmatprep.subr.bf16.mxu0 %v3770_v37  ;;  %v1973_v36 = vpack.c.bf16 %v1969_v35, %v4548_v63  ;;  %v3813_v37 = vld [vmem:[%s5154_s1 + $0x230] ss:$8 sps:$4 sm:$0xff]   ;;  %v4742_v32 = vld [vmem:[%s4227_s12 + $0x28] sm:$0xff]  ;;  %v4036_v35 = vld [vmem:[%s4227_s12 + $0x20] sm:$0xff] }
  0x73   : > { %720 = vmatpush1.bf16.msra.mxu1 %v3765_v38  ;;  %v3816_v38 = vld [vmem:[%s5154_s1 + $0x630] ss:$8 sps:$4 sm:$0xff]   ;;  %v4606_v42 = vrot.slane %v1973_v36, 2 }
  0x74   : > { %1883 = vmatpush1.bf16.msra.mxu0 %v3768_v39  ;;  %721 = vmatprep.subr.bf16.mxu1 %v3773_v40  ;;  %v3821_v39 = vld [vmem:[%s5154_s1 + $0x244] ss:$8 sps:$4 sm:$0xff]  }
  0x75   : > { %1884 = vmatprep.subr.bf16.mxu0 %v3776_v41  ;;  %v3824_v40 = vld [vmem:[%s5154_s1 + $0x644] ss:$8 sps:$4 sm:$0xff]   ;;  %v1982_v41 = vrot.slane %v1971_v49, 2  ;;  %v809_v49 = vpack.c.bf16 %v805_v25, %v4036_v35 }
  0x76   : > { %v3920_v25 = vld [vmem:[%s5154_s1 + $0x744] ss:$8 sps:$4 sm:$0xff]  }
  0x77   : > { %722 = vmatpush1.bf16.msra.mxu1 %v3771_v43  ;;  %v3819_v43 = vld [vmem:[%s5154_s1 + $0x240] ss:$8 sps:$4 sm:$0xff]  }
  0x78   : > { %1885 = vmatpush1.bf16.msra.mxu0 %v3774_v44  ;;  %723 = vmatprep.subr.bf16.mxu1 %v3779_v45  ;;  %v1984_v44 = vsel %vm1978_vm3, %v1982_v41, %v4606_v42  ;;  %v3822_v45 = vld [vmem:[%s5154_s1 + $0x640] ss:$8 sps:$4 sm:$0xff]   ;;  %v3888_v41 = vld [vmem:[%s5154_s1 + $0x6f0] ss:$8 sps:$4 sm:$0xff]  }
  0x79   : > { %1886 = vmatprep.subr.bf16.mxu0 %v3782_v46  ;;  %v3827_v46 = vld [vmem:[%s5154_s1 + $0x254] ss:$8 sps:$4 sm:$0xff]  }
  0x7b   : > { %724 = vmatpush1.bf16.msra.mxu1 %v3777_v50  ;;  %v3828_v50 = vld [vmem:[%s5154_s1 + $0x650] ss:$8 sps:$4 sm:$0xff]  }
  0x7c   : > { %1887 = vmatpush1.bf16.msra.mxu0 %v3780_v51  ;;  %725 = vmatprep.subr.bf16.mxu1 %v3785_v52  ;;  %v3833_v51 = vld [vmem:[%s5154_s1 + $0x264] ss:$8 sps:$4 sm:$0xff]  }
  0x7d   : > { %1888 = vmatprep.subr.bf16.mxu0 %v3788_v56  ;;  %v3836_v52 = vld [vmem:[%s5154_s1 + $0x664] ss:$8 sps:$4 sm:$0xff]   ;;  %v3839_v56 = vld [vmem:[%s5154_s1 + $0x274] ss:$8 sps:$4 sm:$0xff]  }
  0x7f   : > { %726 = vmatpush1.bf16.msra.mxu1 %v3783_v57  ;;  %v3842_v57 = vld [vmem:[%s5154_s1 + $0x674] ss:$8 sps:$4 sm:$0xff]  }
  0x80   : > { %1889 = vmatpush1.bf16.msra.mxu0 %v3786_v58  ;;  %727 = vmatprep.subr.bf16.mxu1 %v3791_v59  ;;  %v3837_v58 = vld [vmem:[%s5154_s1 + $0x270] ss:$8 sps:$4 sm:$0xff]  }
  0x81   : > { %1890 = vmatprep.subr.bf16.mxu0 %v3794_v0  ;;  %v3840_v59 = vld [vmem:[%s5154_s1 + $0x670] ss:$8 sps:$4 sm:$0xff]   ;;  %v3846_v0 = vld [vmem:[%s5154_s1 + $0x680] ss:$8 sps:$4 sm:$0xff]  }
  0x83   : > { %728 = vmatpush1.bf16.msra.mxu1 %v3789_v1  ;;  %v3851_v1 = vld [vmem:[%s5154_s1 + $0x294] ss:$8 sps:$4 sm:$0xff]  }
  0x84   : > { %1891 = vmatpush1.bf16.msra.mxu0 %v3792_v2  ;;  %986 = vmatprep.subr.bf16.mxu1 %v3797_v6  ;;  %v3854_v2 = vld [vmem:[%s5154_s1 + $0x694] ss:$8 sps:$4 sm:$0xff]   ;;  %v3857_v6 = vld [vmem:[%s5154_s1 + $0x2a4] ss:$8 sps:$4 sm:$0xff]  }
  0x85   : > { %2149 = vmatprep.subr.bf16.mxu0 %v3800_v7  ;;  %v3860_v7 = vld [vmem:[%s5154_s1 + $0x6a4] ss:$8 sps:$4 sm:$0xff]  }
  0x86   : > { %730 = vmatmul.mubr.bf16.vlgmr.msra.gmra.mrb[0].mxu1 %v514_v11  ;;  %v3866_v11 = vld [vmem:[%s5154_s1 + $0x6b4] ss:$8 sps:$4 sm:$0xff]  }
  0x87   : > { %1893 = vmatmul.mubr.bf16.vlgmr.msra.gmra.mrb[0].mxu0 %v1696_v10  ;;  %987 = vmatpush1.bf16.msra.mxu1 %v3795_v9  ;;  %v3858_v9 = vld [vmem:[%s5154_s1 + $0x6a0] ss:$8 sps:$4 sm:$0xff]   ;;  %v3863_v10 = vld [vmem:[%s5154_s1 + $0x2b4] ss:$8 sps:$4 sm:$0xff]  }
  0x88   : > { %2150 = vmatpush1.bf16.msra.mxu0 %v3798_v12  ;;  %988 = vmatprep.subr.bf16.mxu1 %v3803_v13  ;;  %v3861_v12 = vld [vmem:[%s5154_s1 + $0x2b0] ss:$8 sps:$4 sm:$0xff]  }
  0x89   : > { %2151 = vmatprep.subr.bf16.mxu0 %v3806_v14  ;;  %739 = vmatprep.mubr.bf16.mxu1 %v532_v3  ;;  %v3864_v13 = vld [vmem:[%s5154_s1 + $0x6b0] ss:$8 sps:$4 sm:$0xff]   ;;  %v3869_v14 = vld [vmem:[%s5154_s1 + $0x2c4] ss:$8 sps:$4 sm:$0xff]  }
  0x8a   : > { %1902 = vmatprep.mubr.bf16.mxu0 %v1699_v15  ;;  %v3872_v3 = vld [vmem:[%s5154_s1 + $0x6c4] ss:$8 sps:$4 sm:$0xff]   ;;  %v3867_v15 = vld [vmem:[%s5154_s1 + $0x2c0] ss:$8 sps:$4 sm:$0xff]  }
  0x8b   : > { %989 = vmatpush1.bf16.msra.mxu1 %v3801_v16  ;;  %v3870_v16 = vld [vmem:[%s5154_s1 + $0x6c0] ss:$8 sps:$4 sm:$0xff]  }
  0x8c   : > { %2152 = vmatpush1.bf16.msra.mxu0 %v3804_v18  ;;  %990 = vmatprep.subr.bf16.mxu1 %v3809_v20  ;;  %v3878_v18 = vld [vmem:[%s5154_s1 + $0x6d4] ss:$8 sps:$4 sm:$0xff]   ;;  %v3873_v20 = vld [vmem:[%s5154_s1 + $0x2d0] ss:$8 sps:$4 sm:$0xff]  }
  0x8d   : > { %2153 = vmatprep.subr.bf16.mxu0 %v3812_v21  ;;  %v3876_v21 = vld [vmem:[%s5154_s1 + $0x6d0] ss:$8 sps:$4 sm:$0xff]  }
  0x8e   : > { %740 = vmatmul.mubr.bf16.gmra.mrb[8].mxu1 %v529_v22  ;;  %v3881_v22 = vld [vmem:[%s5154_s1 + $0x2e4] ss:$8 sps:$4 sm:$0xff]  }
  0x8f   : > { %1903 = vmatmul.mubr.bf16.gmra.mrb[8].mxu0 %v1698_v23  ;;  %991 = vmatpush1.bf16.msra.mxu1 %v3807_v26  ;;  %v3884_v23 = vld [vmem:[%s5154_s1 + $0x6e4] ss:$8 sps:$4 sm:$0xff]   ;;  %v1962_v26 = vld [vmem:[%s4227_s12 + $0x10] sm:$0xf0] }
  0x90   : > { %2154 = vmatpush1.bf16.msra.mxu0 %v3810_v27  ;;  %992 = vmatprep.subr.bf16.mxu1 %v3815_v30  ;;  %v1968_v27 = vld [vmem:[%s4227_s12 + $0x40] sm:$0xf]  ;;  %v4035_v30 = vld [vmem:[%s4227_s12 + $0x10] sm:$0xff]  ;;  %v1970_v36 = vpack.c.bf16 %v4036_v35, %v1962_v26 }
  0x91   : > { %2155 = vmatprep.subr.bf16.mxu0 %v3818_v31  ;;  %1018 = vmatprep.mubr.bf16.mxu1 %v821_v54  ;;  %v807_v31 = vpack.c.bf16 %v4035_v30, %v799_v24  ;;  %v3890_v54 = vld [vmem:[%s5154_s1 + $0x6f4] ss:$8 sps:$4 sm:$0xff]   ;;  %v3917_v24 = vld [vmem:[%s5154_s1 + $0x344] ss:$8 sps:$4 sm:$0xff]   ;;  %v3915_v26 = vld [vmem:[%s5154_s1 + $0x340] ss:$8 sps:$4 sm:$0xff]  }
  0x92   : > { %2181 = vmatprep.mubr.bf16.mxu0 %v1984_v44  ;;  %v2571_v30 = vld [vmem:[%s4227_s12 + $0x48] sm:$0x3f]  ;;  %v3926_v35 = vld [vmem:[%s5154_s1 + $0x754] ss:$8 sps:$4 sm:$0xff]  }
  0x93   : > { %993 = vmatpush1.bf16.msra.mxu1 %v3813_v37  ;;  %v1972_v37 = vpack.c.bf16 %v1968_v27, %v4560_v19  ;;  %v3918_v27 = vld [vmem:[%s5154_s1 + $0x740] ss:$8 sps:$4 sm:$0xff]  }
  0x94   : > { %2156 = vmatpush1.bf16.msra.mxu0 %v3816_v38  ;;  %994 = vmatprep.subr.bf16.mxu1 %v3821_v39  ;;  %v2258_v38 = vld [vmem:[%s4227_s12 + $0x48] sm:$0x1f]  ;;  %v3887_v39 = vld [vmem:[%s5154_s1 + $0x2f4] ss:$8 sps:$4 sm:$0xff]  }
  0x95   : > { %2157 = vmatprep.subr.bf16.mxu0 %v3824_v40  ;;  %v3885_v40 = vld [vmem:[%s5154_s1 + $0x2f0] ss:$8 sps:$4 sm:$0xff]   ;;  %v2262_v44 = vpack.c.bf16 %v2258_v38, %v4548_v63 }
  0x97   : > { %995 = vmatpush1.bf16.msra.mxu1 %v3819_v43  ;;  %v2260_v43 = vpack.c.bf16 %v4742_v32, %v2252_v34  ;;  %v3923_v34 = vld [vmem:[%s5154_s1 + $0x354] ss:$8 sps:$4 sm:$0xff]  }
  0x98   : > { %2158 = vmatpush1.bf16.msra.mxu0 %v3822_v45  ;;  %996 = vmatprep.subr.bf16.mxu1 %v3827_v46  ;;  %v816_v45 = vrot.slane %v807_v31, 1  ;;  %v817_v46 = vrot.slane %v809_v49, 1  ;;  %v2564_v31 = vld [vmem:[%s4227_s12 + $0x10] sm:$0xc0] }
  0x99   : > { %2159 = vmatprep.subr.bf16.mxu0 %v3830_v47  ;;  %v3893_v47 = vld [vmem:[%s5154_s1 + $0x304] ss:$8 sps:$4 sm:$0xff]  }
  0x9b   : > { %997 = vmatpush1.bf16.msra.mxu1 %v3825_v48  ;;  %v1979_v48 = vrot.slane %v1970_v36, 2  ;;  %v2575_v36 = vpack.c.bf16 %v2571_v30, %v4548_v63 }
  0x9c   : > { %2160 = vmatpush1.bf16.msra.mxu0 %v3828_v50  ;;  %998 = vmatprep.subr.bf16.mxu1 %v3833_v51  ;;  %v1980_v50 = vrot.slane %v1972_v37, 2  ;;  %v3896_v51 = vld [vmem:[%s5154_s1 + $0x704] ss:$8 sps:$4 sm:$0xff]  }
  0x9d   : > { %2161 = vmatprep.subr.bf16.mxu0 %v3836_v52  ;;  %v3891_v52 = vld [vmem:[%s5154_s1 + $0x300] ss:$8 sps:$4 sm:$0xff]  }
  0x9e   : > { %v2570_v37 = vld [vmem:[%s4227_s12 + $0x40] sm:$0x3f] }
  0x9f   : > { %999 = vmatpush1.bf16.msra.mxu1 %v3831_v53  ;;  %v1089_v53 = vld [vmem:[%s4227_s12 + $0x8] sm:$0xc0] }
  0xa0   : > { %2162 = vmatpush1.bf16.msra.mxu0 %v3834_v55  ;;  %1000 = vmatprep.subr.bf16.mxu1 %v3839_v56  ;;  %v1091_v55 = vld [vmem:[%s4227_s12 + $0x18] sm:$0xff] }
  0xa1   : > { %2163 = vmatprep.subr.bf16.mxu0 %v3842_v57  ;;  %v1095_v56 = vld [vmem:[%s4227_s12 + $0x38] sm:$0x3f]  ;;  %v2282_v57 = vshrl.u32 %v2260_v43, 16 }
  0xa3   : > { %1001 = vmatpush1.bf16.msra.mxu1 %v3837_v58  ;;  %v2285_v58 = vshll.u32 %v2260_v43, 16  ;;  %v3921_v43 = vld [vmem:[%s5154_s1 + $0x350] ss:$8 sps:$4 sm:$0xff]  }
  0xa4   : > { %2164 = vmatpush1.bf16.msra.mxu0 %v3840_v59  ;;  %1002 = vmatprep.subr.bf16.mxu1 %v3845_v60  ;;  %v2290_v59 = vshrl.u32 %v2262_v44, 16  ;;  %v2293_v60 = vshll.u32 %v2262_v44, 16  ;;  %v3929_v44 = vld [vmem:[%s5154_s1 + $0x364] ss:$8 sps:$4 sm:$0xff]  }
  0xa5   : > { %2165 = vmatprep.subr.bf16.mxu0 %v3848_v61  ;;  %v818_v61 = vsel %vm815_vm2, %v816_v45, %v817_v46  ;;  %v3932_v45 = vld [vmem:[%s5154_s1 + $0x764] ss:$8 sps:$4 sm:$0xff]  }
  0xa7   : > { %1003 = vmatpush1.bf16.msra.mxu1 %v3843_v62  ;;  %v3894_v62 = vld [vmem:[%s5154_s1 + $0x700] ss:$8 sps:$4 sm:$0xff]  }
  0xa8   : > { %2166 = vmatpush1.bf16.msra.mxu0 %v3846_v0  ;;  %1004 = vmatprep.subr.bf16.mxu1 %v3851_v1  ;;  %v1981_v0 = vsel %vm1978_vm3, %v1979_v48, %v1980_v50  ;;  %v3899_v1 = vld [vmem:[%s5154_s1 + $0x314] ss:$8 sps:$4 sm:$0xff]   ;;  %v3927_v48 = vld [vmem:[%s5154_s1 + $0x360] ss:$8 sps:$4 sm:$0xff]  }
  0xa9   : > { %2167 = vmatprep.subr.bf16.mxu0 %v3854_v2  ;;  %v3902_v2 = vld [vmem:[%s5154_s1 + $0x714] ss:$8 sps:$4 sm:$0xff]  }
  0xab   : > { %1005 = vmatpush1.bf16.msra.mxu1 %v3849_v4  ;;  %v3897_v4 = vld [vmem:[%s5154_s1 + $0x310] ss:$8 sps:$4 sm:$0xff]  }
  0xac   : > { %2168 = vmatpush1.bf16.msra.mxu0 %v3852_v5  ;;  %1006 = vmatprep.subr.bf16.mxu1 %v3857_v6  ;;  %v3900_v5 = vld [vmem:[%s5154_s1 + $0x710] ss:$8 sps:$4 sm:$0xff]   ;;  %v1097_v6 = vpack.c.bf16 %v1091_v55, %v1089_v53 }
  0xad   : > { %2169 = vmatprep.subr.bf16.mxu0 %v3860_v7  ;;  %v1099_v7 = vpack.c.bf16 %v1095_v56, %v4742_v32  ;;  %v3933_v53 = vld [vmem:[%s5154_s1 + $0x370] ss:$8 sps:$4 sm:$0xff]   ;;  %v3941_v56 = vld [vmem:[%s5154_s1 + $0x384] ss:$8 sps:$4 sm:$0xff]  }
  0xae   : > { %v3936_v55 = vld [vmem:[%s5154_s1 + $0x770] ss:$8 sps:$4 sm:$0xff]  }
  0xaf   : > { %1007 = vmatpush1.bf16.msra.mxu1 %v3855_v8  ;;  %v2284_v8 = vrot.slane %v2282_v57, 2  ;;  %v3944_v57 = vld [vmem:[%s5154_s1 + $0x784] ss:$8 sps:$4 sm:$0xff]  }
  0xb0   : > { %2170 = vmatpush1.bf16.msra.mxu0 %v3858_v9  ;;  %1008 = vmatprep.subr.bf16.mxu1 %v3863_v10  ;;  %v2287_v9 = vrot.slane %v2285_v58, 3  ;;  %v2292_v10 = vrot.slane %v2290_v59, 2  ;;  %v3939_v58 = vld [vmem:[%s5154_s1 + $0x380] ss:$8 sps:$4 sm:$0xff]  }
  0xb1   : > { %2171 = vmatprep.subr.bf16.mxu0 %v3866_v11  ;;  %v2295_v11 = vrot.slane %v2293_v60, 3  ;;  %v3942_v59 = vld [vmem:[%s5154_s1 + $0x780] ss:$8 sps:$4 sm:$0xff]   ;;  %v3947_v60 = vld [vmem:[%s5154_s1 + $0x394] ss:$8 sps:$4 sm:$0xff]  }
  0xb3   : > { %1009 = vmatpush1.bf16.msra.mxu1 %v3861_v12  ;;  %v3905_v12 = vld [vmem:[%s5154_s1 + $0x324] ss:$8 sps:$4 sm:$0xff]  }
  0xb4   : > { %2172 = vmatpush1.bf16.msra.mxu0 %v3864_v13  ;;  %1010 = vmatprep.subr.bf16.mxu1 %v3869_v14  ;;  %v3908_v13 = vld [vmem:[%s5154_s1 + $0x724] ss:$8 sps:$4 sm:$0xff]   ;;  %v3903_v14 = vld [vmem:[%s5154_s1 + $0x320] ss:$8 sps:$4 sm:$0xff]  }
  0xb5   : > { %2173 = vmatprep.subr.bf16.mxu0 %v3872_v3  ;;  %v3906_v3 = vld [vmem:[%s5154_s1 + $0x720] ss:$8 sps:$4 sm:$0xff]  }
  0xb7   : > { %1011 = vmatpush1.bf16.msra.mxu1 %v3867_v15  ;;  %v1108_v15 = vrot.slane %v1097_v6, 3  ;;  %v3953_v6 = vld [vmem:[%s5154_s1 + $0x3a4] ss:$8 sps:$4 sm:$0xff]  }
  0xb8   : > { %2174 = vmatpush1.bf16.msra.mxu0 %v3870_v16  ;;  %1012 = vmatprep.subr.bf16.mxu1 %v3875_v17  ;;  %v4806_v16 = vrot.slane %v1099_v7, 3  ;;  %v2288_v17 = vor.u32 %v2287_v9, %v2284_v8  ;;  %v3956_v7 = vld [vmem:[%s5154_s1 + $0x7a4] ss:$8 sps:$4 sm:$0xff]   ;;  %v3951_v8 = vld [vmem:[%s5154_s1 + $0x3a0] ss:$8 sps:$4 sm:$0xff]  }
  0xb9   : > { %2175 = vmatprep.subr.bf16.mxu0 %v3878_v18  ;;  %v4808_v18 = vor.u32 %v2295_v11, %v2292_v10  ;;  %v3954_v9 = vld [vmem:[%s5154_s1 + $0x7a0] ss:$8 sps:$4 sm:$0xff]   ;;  %v3959_v10 = vld [vmem:[%s5154_s1 + $0x3b4] ss:$8 sps:$4 sm:$0xff]  }
  0xba   : > { %v3962_v11 = vld [vmem:[%s5154_s1 + $0x7b4] ss:$8 sps:$4 sm:$0xff]  }
  0xbb   : > { %1013 = vmatpush1.bf16.msra.mxu1 %v3873_v20  ;;  %v3909_v20 = vld [vmem:[%s5154_s1 + $0x330] ss:$8 sps:$4 sm:$0xff]  }
  0xbc   : > { %2176 = vmatpush1.bf16.msra.mxu0 %v3876_v21  ;;  %1014 = vmatprep.subr.bf16.mxu1 %v3881_v22  ;;  %v3912_v21 = vld [vmem:[%s5154_s1 + $0x730] ss:$8 sps:$4 sm:$0xff]   ;;  %v1110_v22 = vsel %vm1104_vm4, %v1108_v15, %v4806_v16  ;;  %v2251_v15 = vld [vmem:[%s4227_s12 + $0x10] sm:$0xe0] }
  0xbd   : > { %2177 = vmatprep.subr.bf16.mxu0 %v3884_v23  ;;  %v2297_v23 = vsel %vm2263_vm5, %v2288_v17, %v4808_v18  ;;  %v2257_v17 = vld [vmem:[%s4227_s12 + $0x40] sm:$0x1f] }
  0xbf   : > { %1015 = vmatpush1.bf16.msra.mxu1 %v3879_v28  ;;  %v4839_v28 = vld [vmem:[%s4227_s12 + $0x20] sm:$0xff] }
  0xc0   : > { %2178 = vmatpush1.bf16.msra.mxu0 %v3882_v29  ;;  %1016 = vmatprep.subr.bf16.mxu1 %v3887_v39  ;;  %v2565_v29 = vld [vmem:[%s4227_s12 + $0x18] sm:$0xc0]  ;;  %v2572_v38 = vpack.c.bf16 %v4839_v28, %v2564_v31  ;;  %v2574_v39 = vpack.c.bf16 %v2570_v37, %v4560_v19 }
  0xc1   : > { %2179 = vmatprep.subr.bf16.mxu0 %v3890_v54  ;;  %v2573_v49 = vpack.c.bf16 %v4742_v32, %v2565_v29  ;;  %v3924_v32 = vld [vmem:[%s5154_s1 + $0x750] ss:$8 sps:$4 sm:$0xff]  }
  0xc2   : > { %v4863_v63 = vrot.slane %v2574_v39, 3  ;;  %v3978_v39 = vld [vmem:[%s5154_s1 + $0x7e0] ss:$8 sps:$4 sm:$0xff]  }
  0xc3   : > { %1017 = vmatpush1.bf16.msra.mxu1 %v3885_v40  ;;  %v2583_v54 = vrot.slane %v2573_v49, 3  ;;  %v4855_v40 = vrot.slane %v2575_v36, 3  ;;  %v3980_v49 = vld [vmem:[%s5154_s1 + $0x7e4] ss:$8 sps:$4 sm:$0xff]   ;;  %v3975_v36 = vld [vmem:[%s5154_s1 + $0x3e0] ss:$8 sps:$4 sm:$0xff]  }
  0xc4   : > { %2180 = vmatpush1.bf16.msra.mxu0 %v3888_v41  ;;  %1275 = vmatprep.subr.bf16.mxu1 %v3893_v47  ;;  %v2580_v41 = vrot.slane %v2572_v38, 3 }
  0xc5   : > { %2462 = vmatprep.subr.bf16.mxu0 %v3896_v51  ;;  %v3935_v51 = vld [vmem:[%s5154_s1 + $0x374] ss:$8 sps:$4 sm:$0xff]  }
  0xc6   : > { %1019 = vmatmul.mubr.bf16.vlgmr.msra.gmra.mrb[0].mxu1 %v818_v61  ;;  %v4877_v47 = vsel %vm1104_vm4, %v2580_v41, %v4863_v63  ;;  %v3950_v61 = vld [vmem:[%s5154_s1 + $0x794] ss:$8 sps:$4 sm:$0xff]  }
  0xc7   : > { %2182 = vmatmul.mubr.bf16.vlgmr.msra.gmra.mrb[0].mxu0 %v1981_v0  ;;  %1276 = vmatpush1.bf16.msra.mxu1 %v3891_v52  ;;  %v3938_v52 = vld [vmem:[%s5154_s1 + $0x774] ss:$8 sps:$4 sm:$0xff]  }
  0xc8   : > { %2463 = vmatpush1.bf16.msra.mxu0 %v3894_v62  ;;  %1277 = vmatprep.subr.bf16.mxu1 %v3899_v1  ;;  %v2849_v62 = vld [vmem:[%s5156_s3] sm:$0xff]  ;;  %v2851_v0 = vld [vmem:[%s5156_s3 + $0x10] sm:$0xff]  ;;  %v4045_v1 = vmov 0  }
  0xc9   : > { %2464 = vmatprep.subr.bf16.mxu0 %v3902_v2  ;;  %1028 = vmatprep.mubr.bf16.mxu1 %v4586_v33  ;;  %v3911_v33 = vld [vmem:[%s5154_s1 + $0x334] ss:$8 sps:$4 sm:$0xff]   ;;  %v3945_v2 = vld [vmem:[%s5154_s1 + $0x390] ss:$8 sps:$4 sm:$0xff]  }
  0xca   : > { %2191 = vmatprep.mubr.bf16.mxu0 %v4606_v42  ;;  %v3914_v42 = vld [vmem:[%s5154_s1 + $0x734] ss:$8 sps:$4 sm:$0xff]   ;;  %3601 = vset.pattern.permute.xlu0 %v4045_v1 }
  0xcb   : > { %1278 = vmatpush1.bf16.msra.mxu1 %v3897_v4  ;;  %3602 = vset.pattern.permute.xlu1 %v4045_v1  ;;  %v3948_v4 = vld [vmem:[%s5154_s1 + $0x790] ss:$8 sps:$4 sm:$0xff]   ;;  %v3999_v1 = vld [vmem:[%s5154_s1 + $0x840] ss:$8 sps:$4 sm:$0xff]  }
  0xcc   : > { %2465 = vmatpush1.bf16.msra.mxu0 %v3900_v5  ;;  %1279 = vmatprep.subr.bf16.mxu1 %v3905_v12  ;;  %v2850_v5 = vld [vmem:[%s5156_s3 + $0x8] sm:$0xff]  ;;  %v3957_v12 = vld [vmem:[%s5154_s1 + $0x3b0] ss:$8 sps:$4 sm:$0xff]  }
  0xcd   : > { %2466 = vmatprep.subr.bf16.mxu0 %v3908_v13  ;;  %2854 = vperm.xlu0 %3601, %v2849_v62   ;;  %v3960_v13 = vld [vmem:[%s5154_s1 + $0x7b0] ss:$8 sps:$4 sm:$0xff]   ;;  %v3993_v62 = vld [vmem:[%s5154_s1 + $0x820] ss:$8 sps:$4 sm:$0xff]  }
  0xce   : > { %1029 = vmatmul.mubr.bf16.gmra.mrb[12].mxu1 %v817_v46  ;;  %v4873_v46 = vsel %vm1104_vm4, %v2583_v54, %v4855_v40  ;;  %2864 = vperm.xlu1 %3602, %v2851_v0   ;;  %v3998_v0 = vld [vmem:[%s5154_s1 + $0x834] ss:$8 sps:$4 sm:$0xff]  }
  0xcf   : > { %2192 = vmatmul.mubr.bf16.gmra.mrb[12].mxu0 %v1980_v50  ;;  %1280 = vmatpush1.bf16.msra.mxu1 %v3903_v14  ;;  %v3930_v50 = vld [vmem:[%s5154_s1 + $0x760] ss:$8 sps:$4 sm:$0xff]   ;;  %v3965_v14 = vld [vmem:[%s5154_s1 + $0x3c4] ss:$8 sps:$4 sm:$0xff]  }
  0xd0   : > { %2467 = vmatpush1.bf16.msra.mxu0 %v3906_v3  ;;  %1281 = vmatprep.subr.bf16.mxu1 %v3911_v33  ;;  %v3968_v3 = vld [vmem:[%s5154_s1 + $0x7c4] ss:$8 sps:$4 sm:$0xff]   ;;  %v3963_v33 = vld [vmem:[%s5154_s1 + $0x3c0] ss:$8 sps:$4 sm:$0xff]  }
  0xd1   : > { %2468 = vmatprep.subr.bf16.mxu0 %v3914_v42  ;;  %1307 = vmatprep.mubr.bf16.mxu1 %v1110_v22  ;;  %v3966_v42 = vld [vmem:[%s5154_s1 + $0x7c0] ss:$8 sps:$4 sm:$0xff]   ;;  %v3971_v22 = vld [vmem:[%s5154_s1 + $0x3d4] ss:$8 sps:$4 sm:$0xff]  }
  0xd2   : > { %2494 = vmatprep.mubr.bf16.mxu0 %v2297_v23  ;;  %2859 = vperm.xlu0 %3601, %v2850_v5   ;;  %v3974_v23 = vld [vmem:[%s5154_s1 + $0x7d4] ss:$8 sps:$4 sm:$0xff]  }
  0xd3   : > { %1282 = vmatpush1.bf16.msra.mxu1 %v3909_v20  ;;  %v2259_v20 = vpack.c.bf16 %v4839_v28, %v2251_v15  ;;  %v4010_v5 = vld [vmem:[%s5154_s1 + $0x874] ss:$8 sps:$4 sm:$0xff]  }
  0xd4   : > { %2469 = vmatpush1.bf16.msra.mxu0 %v3912_v21  ;;  %1283 = vmatprep.subr.bf16.mxu1 %v3917_v24  ;;  %v2261_v21 = vpack.c.bf16 %v2257_v17, %v4560_v19  ;;  %v3969_v24 = vld [vmem:[%s5154_s1 + $0x3d0] ss:$8 sps:$4 sm:$0xff]  }
  0xd5   : > { %2470 = vmatprep.subr.bf16.mxu0 %v3920_v25  ;;  %v3972_v25 = vld [vmem:[%s5154_s1 + $0x7d0] ss:$8 sps:$4 sm:$0xff]   ;;  %v2265_v29 = vshrl.u32 %v2259_v20, 16  ;;  %v2268_v30 = vshll.u32 %v2259_v20, 16  ;;  %v4017_v20 = vld [vmem:[%s5154_s1 + $0x8a0] ss:$8 sps:$4 sm:$0xff]  }
  0xd6   : > { %v1090_v19 = vld [vmem:[%s4227_s12 + $0x10] sm:$0xff]  ;;  %v2273_v31 = vshrl.u32 %v2261_v21, 16 }
  0xd7   : > { %1284 = vmatpush1.bf16.msra.mxu1 %v3915_v26  ;;  %v1088_v26 = vld [vmem:[%s4227_s12] sm:$0xc0]  ;;  %v2267_v54 = vrot.slane %v2265_v29, 2  ;;  %v2270_v41 = vrot.slane %v2268_v30, 3  ;;  %v4034_v29 = vld [vmem:[%s5154_s1 + $0x8f4] ss:$8 sps:$4 sm:$0xff]  }
  0xd8   : > { %2471 = vmatpush1.bf16.msra.mxu0 %v3918_v27  ;;  %1285 = vmatprep.subr.bf16.mxu1 %v3923_v34  ;;  %v1094_v27 = vld [vmem:[%s4227_s12 + $0x30] sm:$0x3f]  ;;  %v2276_v34 = vshll.u32 %v2261_v21, 16  ;;  %v1096_v37 = vpack.c.bf16 %v1090_v19, %v1088_v26  ;;  %v4031_v19 = vld [vmem:[%s5154_s1 + $0x8e4] ss:$8 sps:$4 sm:$0xff]  }
  0xd9   : > { %2472 = vmatprep.subr.bf16.mxu0 %v3926_v35  ;;  %v3977_v35 = vld [vmem:[%s5154_s1 + $0x3e4] ss:$8 sps:$4 sm:$0xff]   ;;  %v1098_v38 = vpack.c.bf16 %v1094_v27, %v4839_v28  ;;  %v3986_v28 = vld [vmem:[%s5154_s1 + $0x7f4] ss:$8 sps:$4 sm:$0xff]   ;;  %v4026_v26 = vld [vmem:[%s5154_s1 + $0x8d0] ss:$8 sps:$4 sm:$0xff]  }
  0xda   : > { %v4022_v21 = vld [vmem:[%s5154_s1 + $0x8b4] ss:$8 sps:$4 sm:$0xff]   ;;  %v4029_v27 = vld [vmem:[%s5154_s1 + $0x8e0] ss:$8 sps:$4 sm:$0xff]   ;;  %v4032_v30 = vld [vmem:[%s5154_s1 + $0x8f0] ss:$8 sps:$4 sm:$0xff]  }
  0xdb   : > { %1286 = vmatpush1.bf16.msra.mxu1 %v3921_v43  ;;  %v2275_v43 = vrot.slane %v2273_v31, 2 }
  0xdc   : > { %2473 = vmatpush1.bf16.msra.mxu0 %v3924_v32  ;;  %1287 = vmatprep.subr.bf16.mxu1 %v3929_v44  ;;  %v2278_v32 = vrot.slane %v2276_v34, 3  ;;  %v3983_v44 = vld [vmem:[%s5154_s1 + $0x3f4] ss:$8 sps:$4 sm:$0xff]  }
  0xdd   : > { %2474 = vmatprep.subr.bf16.mxu0 %v3932_v45  ;;  %v3981_v45 = vld [vmem:[%s5154_s1 + $0x3f0] ss:$8 sps:$4 sm:$0xff]  }
  0xdf   : > { %1288 = vmatpush1.bf16.msra.mxu1 %v3927_v48  ;;  %v3984_v48 = vld [vmem:[%s5154_s1 + $0x7f0] ss:$8 sps:$4 sm:$0xff]  }
  0xe0   : > { %2475 = vmatpush1.bf16.msra.mxu0 %v3930_v50  ;;  %1289 = vmatprep.subr.bf16.mxu1 %v3935_v51  ;;  %v1105_v50 = vrot.slane %v1096_v37, 3  ;;  %v1106_v51 = vrot.slane %v1098_v38, 3 }
  0xe1   : > { %2476 = vmatprep.subr.bf16.mxu0 %v3938_v52  ;;  %v2271_v52 = vor.u32 %v2270_v41, %v2267_v54 }
  0xe3   : > { %1290 = vmatpush1.bf16.msra.mxu1 %v3933_v53  ;;  %v2279_v53 = vor.u32 %v2278_v32, %v2275_v43 }
  0xe4   : > { %2477 = vmatpush1.bf16.msra.mxu0 %v3936_v55  ;;  %1291 = vmatprep.subr.bf16.mxu1 %v3941_v56  ;;  %v3989_v55 = vld [vmem:[%s5154_s1 + $0x804] ss:$8 sps:$4 sm:$0xff]   ;;  %v1107_v56 = vsel %vm1104_vm4, %v1105_v50, %v1106_v51 }
  0xe5   : > { %2478 = vmatprep.subr.bf16.mxu0 %v3944_v57  ;;  %v3987_v57 = vld [vmem:[%s5154_s1 + $0x800] ss:$8 sps:$4 sm:$0xff]  }
  0xe7   : > { %1292 = vmatpush1.bf16.msra.mxu1 %v3939_v58  ;;  %v2280_v58 = vsel %vm2263_vm5, %v2271_v52, %v2279_v53 }
  0xe8   : > { %2479 = vmatpush1.bf16.msra.mxu0 %v3942_v59  ;;  %1293 = vmatprep.subr.bf16.mxu1 %v3947_v60  ;;  %v3992_v59 = vld [vmem:[%s5154_s1 + $0x814] ss:$8 sps:$4 sm:$0xff]   ;;  %v3990_v60 = vld [vmem:[%s5154_s1 + $0x810] ss:$8 sps:$4 sm:$0xff]  }
  0xe9   : > { %2480 = vmatprep.subr.bf16.mxu0 %v3950_v61  ;;  %v3995_v61 = vld [vmem:[%s5154_s1 + $0x824] ss:$8 sps:$4 sm:$0xff]  }
  0xeb   : > { %1294 = vmatpush1.bf16.msra.mxu1 %v3945_v2  ;;  %v4004_v2 = vld [vmem:[%s5154_s1 + $0x854] ss:$8 sps:$4 sm:$0xff]  }
  0xec   : > { %2481 = vmatpush1.bf16.msra.mxu0 %v3948_v4  ;;  %1295 = vmatprep.subr.bf16.mxu1 %v3953_v6  ;;  %v4005_v4 = vld [vmem:[%s5154_s1 + $0x860] ss:$8 sps:$4 sm:$0xff]   ;;  %v4008_v6 = vld [vmem:[%s5154_s1 + $0x870] ss:$8 sps:$4 sm:$0xff]  }
  0xed   : > { %2482 = vmatprep.subr.bf16.mxu0 %v3956_v7  ;;  %v4013_v7 = vld [vmem:[%s5154_s1 + $0x884] ss:$8 sps:$4 sm:$0xff]  }
  0xef   : > { %1296 = vmatpush1.bf16.msra.mxu1 %v3951_v8 }
  0xf0   : > { %2483 = vmatpush1.bf16.msra.mxu0 %v3954_v9  ;;  %1297 = vmatprep.subr.bf16.mxu1 %v3959_v10 }
  0xf1   : > { %2484 = vmatprep.subr.bf16.mxu0 %v3962_v11 }
  0xf3   : > { %1298 = vmatpush1.bf16.msra.mxu1 %v3957_v12  ;;  %v4011_v12 = vld [vmem:[%s5154_s1 + $0x880] ss:$8 sps:$4 sm:$0xff]  }
  0xf4   : > { %2485 = vmatpush1.bf16.msra.mxu0 %v3960_v13  ;;  %1299 = vmatprep.subr.bf16.mxu1 %v3965_v14 }
  0xf5   : > { %2486 = vmatprep.subr.bf16.mxu0 %v3968_v3  ;;  %v4016_v3 = vld [vmem:[%s5154_s1 + $0x894] ss:$8 sps:$4 sm:$0xff]  }
  0xf7   : > { %1300 = vmatpush1.bf16.msra.mxu1 %v3963_v33  ;;  %v4014_v33 = vld [vmem:[%s5154_s1 + $0x890] ss:$8 sps:$4 sm:$0xff]  }
  0xf8   : > { %2487 = vmatpush1.bf16.msra.mxu0 %v3966_v42  ;;  %1301 = vmatprep.subr.bf16.mxu1 %v3971_v22  ;;  %v4019_v42 = vld [vmem:[%s5154_s1 + $0x8a4] ss:$8 sps:$4 sm:$0xff]   ;;  %v4020_v22 = vld [vmem:[%s5154_s1 + $0x8b0] ss:$8 sps:$4 sm:$0xff]  }
  0xf9   : > { %2488 = vmatprep.subr.bf16.mxu0 %v3974_v23  ;;  %v4025_v23 = vld [vmem:[%s5154_s1 + $0x8c4] ss:$8 sps:$4 sm:$0xff]  }
  0xfb   : > { %1302 = vmatpush1.bf16.msra.mxu1 %v3969_v24  ;;  %v4023_v24 = vld [vmem:[%s5154_s1 + $0x8c0] ss:$8 sps:$4 sm:$0xff]  }
  0xfc   : > { %2489 = vmatpush1.bf16.msra.mxu0 %v3972_v25  ;;  %1303 = vmatprep.subr.bf16.mxu1 %v3977_v35  ;;  %v4028_v25 = vld [vmem:[%s5154_s1 + $0x8d4] ss:$8 sps:$4 sm:$0xff]  }
  0xfd   : > { %2490 = vmatprep.subr.bf16.mxu0 %v3980_v49 }
  0xff   : > { %1304 = vmatpush1.bf16.msra.mxu1 %v3975_v36 }
 0x100   : > { %2491 = vmatpush1.bf16.msra.mxu0 %v3978_v39  ;;  %1305 = vmatprep.subr.bf16.mxu1 %v3983_v44 }
 0x101   : > { %2492 = vmatprep.subr.bf16.mxu0 %v3986_v28 }
 0x103   : > { %1306 = vmatpush1.bf16.msra.mxu1 %v3981_v45 }
 0x104   : > { %2493 = vmatpush1.bf16.msra.mxu0 %v3984_v48  ;;  %3526 = vmatprep.subr.bf16.mxu1 %v3989_v55 }
 0x105   : > { %2750 = vmatprep.subr.bf16.mxu0 %v3989_v55 }
 0x106   : > { %1308 = vmatmul.mubr.bf16.vlgmr.msra.gmra.mrb[0].mxu1 %v1107_v56 }
 0x107   : > { %2495 = vmatmul.mubr.bf16.vlgmr.msra.gmra.mrb[0].mxu0 %v2280_v58  ;;  %3542 = vmatpush1.bf16.msra.mxu1 %v3987_v57 }
 0x108   : > { %2751 = vmatpush1.bf16.msra.mxu0 %v3987_v57  ;;  %3527 = vmatprep.subr.bf16.mxu1 %v3992_v59 }
 0x109   : > { %2752 = vmatprep.subr.bf16.mxu0 %v3992_v59  ;;  %1317 = vmatprep.mubr.bf16.mxu1 %v4806_v16  ;;  %v3996_v16 = vld [vmem:[%s5154_s1 + $0x830] ss:$8 sps:$4 sm:$0xff]  }
 0x10a   : > { %2504 = vmatprep.mubr.bf16.mxu0 %v4808_v18  ;;  %v4001_v18 = vld [vmem:[%s5154_s1 + $0x844] ss:$8 sps:$4 sm:$0xff]  }
 0x10b   : > { %3543 = vmatpush1.bf16.msra.mxu1 %v3990_v60 }
 0x10c   : > { %2753 = vmatpush1.bf16.msra.mxu0 %v3990_v60  ;;  %3528 = vmatprep.subr.bf16.mxu1 %v3995_v61 }
 0x10d   : > { %2754 = vmatprep.subr.bf16.mxu0 %v3995_v61 }
 0x10e   : > { %1318 = vmatmul.mubr.bf16.gmra.mrb[16].mxu1 %v1106_v51 }
 0x10f   : > { %2505 = vmatmul.mubr.bf16.gmra.mrb[16].mxu0 %v2279_v53  ;;  %3544 = vmatpush1.bf16.msra.mxu1 %v3993_v62 }
 0x110   : > { %2755 = vmatpush1.bf16.msra.mxu0 %v3993_v62  ;;  %3529 = vmatprep.subr.bf16.mxu1 %v3998_v0 }
 0x111   : > { %2756 = vmatprep.subr.bf16.mxu0 %v3998_v0  ;;  %2782 = vmatprep.mubr.bf16.mxu0 %v4873_v46  ;;  %v4002_v46 = vld [vmem:[%s5154_s1 + $0x850] ss:$8 sps:$4 sm:$0xff]  }
 0x112   : > { %2792 = vmatprep.mubr.bf16.mxu1 %v4855_v40  ;;  %v4007_v40 = vld [vmem:[%s5154_s1 + $0x864] ss:$8 sps:$4 sm:$0xff]  }
 0x113   : > { %3545 = vmatpush1.bf16.msra.mxu1 %v3996_v16 }
 0x114   : > { %2757 = vmatpush1.bf16.msra.mxu0 %v3996_v16  ;;  %3530 = vmatprep.subr.bf16.mxu1 %v4001_v18 }
 0x115   : > { %2758 = vmatprep.subr.bf16.mxu0 %v4001_v18 }
 0x117   : > { %3546 = vmatpush1.bf16.msra.mxu1 %v3999_v1 }
 0x118   : > { %2759 = vmatpush1.bf16.msra.mxu0 %v3999_v1  ;;  %3531 = vmatprep.subr.bf16.mxu1 %v4004_v2 }
 0x119   : > { %2760 = vmatprep.subr.bf16.mxu0 %v4004_v2 }
 0x11b   : > { %3547 = vmatpush1.bf16.msra.mxu1 %v4002_v46 }
 0x11c   : > { %2761 = vmatpush1.bf16.msra.mxu0 %v4002_v46  ;;  %3532 = vmatprep.subr.bf16.mxu1 %v4007_v40 }
 0x11d   : > { %2762 = vmatprep.subr.bf16.mxu0 %v4007_v40 }
 0x11f   : > { %3548 = vmatpush1.bf16.msra.mxu1 %v4005_v4 }
 0x120   : > { %2763 = vmatpush1.bf16.msra.mxu0 %v4005_v4  ;;  %3533 = vmatprep.subr.bf16.mxu1 %v4010_v5 }
 0x121   : > { %2764 = vmatprep.subr.bf16.mxu0 %v4010_v5  ;;  %v444_v9 = vpop.f32.mrb[4].mxu1 }
 0x122   : > { %v5067_v8 = vpop.f32.mrb[4].mxu0  ;;  %v446_v11 = vpop.f32.mrb[5].mxu1 }
 0x123   : > { %v5069_v10 = vpop.f32.mrb[5].mxu0  ;;  %3549 = vmatpush1.bf16.msra.mxu1 %v4008_v6  ;;  %v448_v14 = vpop.f32.mrb[6].mxu1 }
 0x124   : > { %2765 = vmatpush1.bf16.msra.mxu0 %v4008_v6  ;;  %v1636_v13 = vpop.f32.mrb[6].mxu0  ;;  %3534 = vmatprep.subr.bf16.mxu1 %v4013_v7  ;;  %v449_v17 = vpop.f32.mrb[7].mxu1 }
 0x125   : > { %2766 = vmatprep.subr.bf16.mxu0 %v4013_v7  ;;  %v1637_v15 = vpop.f32.mrb[7].mxu0 }
 0x127   : > { %3550 = vmatpush1.bf16.msra.mxu1 %v4011_v12 }
 0x128   : > { %2767 = vmatpush1.bf16.msra.mxu0 %v4011_v12  ;;  %3535 = vmatprep.subr.bf16.mxu1 %v4016_v3  ;;  %v2827_v12 = vlaneseq }
 0x129   : > { %2768 = vmatprep.subr.bf16.mxu0 %v4016_v3  ;;  %v2825_v3 = vld [vmem:[%s5155_s2] sm:$0x3] }
 0x12a   : > { %v2828_v13 = vshrl.u32 %v2827_v12, 7 }
 0x12b   : > { %3551 = vmatpush1.bf16.msra.mxu1 %v4014_v33 }
 0x12c   : > { %2769 = vmatpush1.bf16.msra.mxu0 %v4014_v33  ;;  %3536 = vmatprep.subr.bf16.mxu1 %v4019_v42  ;;  %v2829_v14 = vsub.s32 0, %v2828_v13  ;;  %v2833_v15 = vsub.s32 1, %v2828_v13 }
 0x12d   : > { %2770 = vmatprep.subr.bf16.mxu0 %v4019_v42 }
 0x12e   : > { %v2830_v17 = vrot.slane %v2825_v3, %v2829_v14 }
 0x12f   : > { %3552 = vmatpush1.bf16.msra.mxu1 %v4017_v20 }
 0x130   : > { %2771 = vmatpush1.bf16.msra.mxu0 %v4017_v20  ;;  %3537 = vmatprep.subr.bf16.mxu1 %v4022_v21  ;;  %v2834_v20 = vrot.slane %v2825_v3, %v2833_v15 }
 0x131   : > { %2772 = vmatprep.subr.bf16.mxu0 %v4022_v21 }
 0x133   : > { %3553 = vmatpush1.bf16.msra.mxu1 %v4020_v22 }
 0x134   : > { %2773 = vmatpush1.bf16.msra.mxu0 %v4020_v22  ;;  %3538 = vmatprep.subr.bf16.mxu1 %v4025_v23 }
 0x135   : > { %2774 = vmatprep.subr.bf16.mxu0 %v4025_v23 }
 0x137   : > { %3554 = vmatpush1.bf16.msra.mxu1 %v4023_v24 }
 0x138   : > { %2775 = vmatpush1.bf16.msra.mxu0 %v4023_v24  ;;  %3539 = vmatprep.subr.bf16.mxu1 %v4028_v25 }
 0x139   : > { %2776 = vmatprep.subr.bf16.mxu0 %v4028_v25 }
 0x13b   : > { %3555 = vmatpush1.bf16.msra.mxu1 %v4026_v26 }
 0x13c   : > { %2777 = vmatpush1.bf16.msra.mxu0 %v4026_v26  ;;  %3540 = vmatprep.subr.bf16.mxu1 %v4031_v19 }
 0x13d   : > { %2778 = vmatprep.subr.bf16.mxu0 %v4031_v19 }
 0x13f   : > { %3556 = vmatpush1.bf16.msra.mxu1 %v4029_v27 }
 0x140   : > { %2779 = vmatpush1.bf16.msra.mxu0 %v4029_v27  ;;  %3541 = vmatprep.subr.bf16.mxu1 %v4034_v29 }
 0x141   : > { %2780 = vmatprep.subr.bf16.mxu0 %v4034_v29 }
 0x143   : > { %3557 = vmatpush1.bf16.msra.mxu1 %v4032_v30 }
 0x144   : > { %2781 = vmatpush1.bf16.msra.mxu0 %v4032_v30 }
 0x146   : > { %2793 = vmatmul.mubr.bf16.vlgmr.msra.gmra.mrb[20].mxu1 %v4863_v63  ;;  %v4046_v63 = vmov 0.0  }
 0x147   : > { %2783 = vmatmul.mubr.bf16.vlgmr.msra.gmra.mrb[0].mxu0 %v4877_v47  ;;  %2873 = vst [vmem:[%s5123_s21] sm:$0xff] %v4046_v63  ;;  %2881 = vst [vmem:[%s5123_s21 + $0x40] sm:$0xff] %v4046_v63 }
 0x148   : > { %2882 = vst [vmem:[%s5123_s21 + $0x48] sm:$0xff] %v4046_v63  ;;  %2883 = vst [vmem:[%s5123_s21 + $0x50] sm:$0x3] %v4046_v63 }
 0x149   : > { %2884 = vst [vmem:[%s5123_s21 + $0x58] sm:$0x3] %v4046_v63  ;;  %2874 = vst [vmem:[%s5123_s21 + $0x8] sm:$0xff] %v4046_v63 }
 0x14a   : > { %2879 = vst [vmem:[%s5123_s21 + $0x30] sm:$0xff] %v4046_v63  ;;  %2880 = vst [vmem:[%s5123_s21 + $0x38] sm:$0xff] %v4046_v63 }
 0x161   : > { %v741_v31 = vpop.f32.mrb[8].mxu1 }
 0x162   : > { %v1904_v34 = vpop.f32.mrb[8].mxu0  ;;  %v758_v35 = vadd.f32 %v741_v31, %v444_v9  ;;  %v743_v49 = vpop.f32.mrb[9].mxu1 }
 0x163   : > { %v1906_v36 = vpop.f32.mrb[9].mxu0  ;;  %v759_v37 = vadd.f32 %v743_v49, %v446_v11  ;;  %v745_v39 = vpop.f32.mrb[10].mxu1 }
 0x164   : > { %v1908_v38 = vpop.f32.mrb[10].mxu0  ;;  %v746_v41 = vpop.f32.mrb[11].mxu1 }
 0x165   : > { %v1909_v54 = vpop.f32.mrb[11].mxu0 }
 0x1a1   : > { %v1030_v47 = vpop.f32.mrb[12].mxu1 }
 0x1a2   : > { %v2193_v43 = vpop.f32.mrb[12].mxu0  ;;  %v1047_v32 = vadd.f32 %v1030_v47, %v758_v35  ;;  %v1032_v44 = vpop.f32.mrb[13].mxu1 }
 0x1a3   : > { %v2195_v28 = vpop.f32.mrb[13].mxu0  ;;  %v1048_v45 = vadd.f32 %v1032_v44, %v759_v37  ;;  %v1034_v50 = vpop.f32.mrb[14].mxu1 }
 0x1a4   : > { %v2197_v48 = vpop.f32.mrb[14].mxu0  ;;  %v1035_v52 = vpop.f32.mrb[15].mxu1 }
 0x1a5   : > { %v2198_v51 = vpop.f32.mrb[15].mxu0  ;;  %v2865_v37 = vpop.permute.xlu1 %2864 }
 0x1d9   : > { %v1309_v53 = vpop.f32.mrb[0].mxu1 }
 0x1da   : > { %v1311_v55 = vpop.f32.mrb[1].mxu1 }
 0x1db   : > { %v1313_v56 = vpop.f32.mrb[2].mxu1 }
 0x1dc   : > { %v1315_v57 = vpop.f32.mrb[3].mxu1 }
 0x1e1   : > { %v1319_v58 = vpop.f32.mrb[16].mxu1 }
 0x1e2   : > { %v2506_v59 = vpop.f32.mrb[16].mxu0  ;;  %v1336_v60 = vadd.f32 %v1319_v58, %v1047_v32  ;;  %v1321_v61 = vpop.f32.mrb[17].mxu1 }
 0x1e3   : > { %v2508_v62 = vpop.f32.mrb[17].mxu0  ;;  %v1337_v0 = vadd.f32 %v1321_v61, %v1048_v45  ;;  %v1323_v16 = vpop.f32.mrb[18].mxu1 }
 0x1e4   : > { %v2510_v18 = vpop.f32.mrb[18].mxu0  ;;  %v1649_v1 = vadd.f32 %v5067_v8, %v1336_v60  ;;  %v1324_v2 = vpop.f32.mrb[19].mxu1 }
 0x1e5   : > { %v2511_v46 = vpop.f32.mrb[19].mxu0  ;;  %v1650_v40 = vadd.f32 %v5069_v10, %v1337_v0  ;;  %v2855_v8 = vpop.permute.xlu0 %2854 }
 0x1e6   : > { %v1921_v4 = vadd.f32 %v1904_v34, %v1649_v1 }
 0x1e7   : > { %v1922_v5 = vadd.f32 %v1906_v36, %v1650_v40 }
 0x1e8   : > { %v2210_v6 = vadd.f32 %v2193_v43, %v1921_v4 }
 0x1e9   : > { %v2211_v7 = vadd.f32 %v2195_v28, %v1922_v5  ;;  %v2860_v45 = vpop.permute.xlu0 %2859 }
 0x1ea   : > { %v2523_v9 = vadd.f32 %v2506_v59, %v2210_v6 }
 0x1eb   : > { %v2524_v11 = vadd.f32 %v2508_v62, %v2211_v7 }
 0x219   : > { %v2794_v42 = vpop.f32.mrb[20].mxu1 }
 0x21a   : > { %v2784_v33 = vpop.f32.mrb[0].mxu0  ;;  %v2811_v21 = vadd.f32 %v2794_v42, %v2523_v9  ;;  %v2796_v23 = vpop.f32.mrb[21].mxu1 }
 0x21b   : > { %v3558_v10 = vadd.f32 %v2784_v33, %v1309_v53  ;;  %v2786_v22 = vpop.f32.mrb[1].mxu0  ;;  %v2812_v25 = vadd.f32 %v2796_v23, %v2524_v11  ;;  %v2798_v19 = vpop.f32.mrb[22].mxu1 }
 0x21c   : > { %v3559_v24 = vadd.f32 %v2786_v22, %v1311_v55  ;;  %v2788_v26 = vpop.f32.mrb[2].mxu0  ;;  %v2841_v29 = vadd.f32 %v2830_v17, %v2811_v21  ;;  %v2799_v34 = vpop.f32.mrb[23].mxu1 }
 0x21d   : > { %v2837_v27 = vadd.f32 %v3558_v10, %v2830_v17  ;;  %v3560_v30 = vadd.f32 %v2788_v26, %v1313_v56  ;;  %v2790_v31 = vpop.f32.mrb[3].mxu0  ;;  %v2842_v49 = vadd.f32 %v2834_v20, %v2812_v25 }
 0x21e   : > { %v2838_v35 = vadd.f32 %v3559_v24, %v2834_v20  ;;  %v3561_v36 = vadd.f32 %v2790_v31, %v1315_v57  ;;  %v2847_v54 = vmax.f32 %v2841_v29, 0.0 }
 0x21f   : > { %v2843_v38 = vmax.f32 %v2837_v27, 0.0  ;;  %v2839_v39 = vadd.f32 %v3560_v30, %v2830_v17  ;;  %v2848_v47 = vmax.f32 %v2842_v49, 0.0 }
 0x220   : > { %v2844_v41 = vmax.f32 %v2838_v35, 0.0  ;;  %v2840_v63 = vadd.f32 %v3561_v36, %v2834_v20  ;;  %v2871_v44 = vmul.f32 %v2865_v37, %v2847_v54 }
 0x221   : > { %v2867_v43 = vmul.f32 %v2855_v8, %v2843_v38  ;;  %v2845_v32 = vmax.f32 %v2839_v39, 0.0  ;;  %v2872_v50 = vmul.f32 %v2865_v37, %v2848_v47 }
 0x222   : > { %v2868_v28 = vmul.f32 %v2855_v8, %v2844_v41  ;;  %v2846_v48 = vmax.f32 %v2840_v63, 0.0  ;;  %v2898_v53 = vrot.slane %v2871_v44, 1 }
 0x223   : > { %v2892_v51 = vrot.slane %v2867_v43, 1  ;;  %v2869_v52 = vmul.f32 %v2860_v45, %v2845_v32  ;;  %v2900_v57 = vrot.slane %v2872_v50, 1 }
 0x224   : > { %v2893_v55 = vrot.slane %v2868_v28, 1  ;;  %v2870_v56 = vmul.f32 %v2860_v45, %v2846_v48  ;;  %2916 = vst [vmem:[%s5123_s21 + $0x30] sm:$0x7f] %v2898_v53 }
 0x225   : > { %2910 = vst [vmem:[%s5123_s21] sm:$0x80] %v2892_v51  ;;  %v2894_v58 = vrot.slane %v2869_v52, 1  ;;  %2917 = vst [vmem:[%s5123_s21 + $0x38] sm:$0x7f] %v2900_v57 }
 0x226   : > { %2911 = vst [vmem:[%s5123_s21 + $0x8] sm:$0x80] %v2893_v55  ;;  %v2896_v59 = vrot.slane %v2870_v56, 1 }
 0x227   : > { %v2895_v60 = vsel %vm815_vm2, %v2892_v51, %v2894_v58  ;;  %v2899_v61 = vsel %vm815_vm2, %v2894_v58, %v2898_v53 }
 0x228   : > { %v2897_v62 = vsel %vm815_vm2, %v2893_v55, %v2896_v59  ;;  %2912 = vst [vmem:[%s5123_s21 + $0x10] sm:$0xff] %v2895_v60  ;;  %v2901_v0 = vsel %vm815_vm2, %v2896_v59, %v2900_v57  ;;  %2914 = vst [vmem:[%s5123_s21 + $0x20] sm:$0xff] %v2899_v61 }
 0x229   : > { %2913 = vst [vmem:[%s5123_s21 + $0x18] sm:$0xff] %v2897_v62  ;;  %2915 = vst [vmem:[%s5123_s21 + $0x28] sm:$0xff] %v2901_v0 }
 0x22a PF: > { %s14_s15 = sadd.s32 1, %s4043_s15  }
 0x22b   : > { %p11_p4 = scmp.ge.s32.totalorder %s14_s15, 4  }
 0x22d   :  { %13 = sbr.rel (!%p11_p4) target bundleno = 1 (0x1), region = 74 }

</bundles_post_ra>
